<compile_context>
chip_gen: v5e
topology: v5e:2x2
jax: 0.10.0
libtpu: 0.0.40
codegen_flags: <defaults>
</compile_context>

<pallas_src>
import functools

import jax
import jax.numpy as jnp
from jax.experimental import pallas as pl
from jax.experimental.pallas import tpu as pltpu


def _round_up(x, m):
    return ((x + m - 1) // m) * m


def _bilstm_kernel(x_ref,
                   wih_f_ref, whh_f_ref, b_f_ref,
                   wih_b_ref, whh_b_ref, b_b_ref,
                   h0f_ref, c0f_ref, h0b_ref, c0b_ref,
                   wlab_f_ref, wlab_b_ref, blab_ref,
                   out_ref,
                   hf, cf, xw,
                   *, t_total, t_chunk, last_row):
    c = pl.program_id(0)
    nc = pl.num_programs(0)
    Bp, Hp = hf.shape
    wdt = wih_f_ref.dtype

    # Initialize forward recurrent state (persists in VMEM scratch across grid).
    @pl.when(c == 0)
    def _():
        hf[...] = h0f_ref[...]
        cf[...] = c0f_ref[...]

    # (1) One big MXU matmul: input projection (+ bias) for the whole chunk.
    xw[...] = (jnp.dot(x_ref[...], wih_f_ref[...],
                       preferred_element_type=jnp.float32)
               + b_f_ref[...])

    # (2) Serial recurrence over the chunk: static trip count, fully unrolled.
    #     Tail steps of a partially-filled chunk are masked (the padded x rows
    #     are zeros -> finite, defined values, but never reach the state).
    valid = jnp.minimum(t_chunk, t_total - c * t_chunk)

    def step(t, carry):
        h, cs = carry
        row = pl.multiple_of(t * Bp, Bp)
        gates = (xw[pl.ds(row, Bp), :]
                 + jnp.dot(h.astype(wdt), whh_f_ref[...],
                           preferred_element_type=jnp.float32))
        # PyTorch gate order i, f, g, o — slices are 128-lane aligned (Hp%128==0)
        i = jax.nn.sigmoid(gates[:, 0 * Hp:1 * Hp])
        f = jax.nn.sigmoid(gates[:, 1 * Hp:2 * Hp])
        g = jnp.tanh(gates[:, 2 * Hp:3 * Hp])
        o = jax.nn.sigmoid(gates[:, 3 * Hp:4 * Hp])
        c_new = f * cs + i * g
        h_new = o * jnp.tanh(c_new)
        keep = t < valid
        return jnp.where(keep, h_new, h), jnp.where(keep, c_new, cs)

    h_fin, c_fin = jax.lax.fori_loop(0, t_chunk, step, (hf[...], cf[...]),
                                     unroll=True)
    hf[...] = h_fin
    cf[...] = c_fin

    # (3) Epilogue (exactly once, on the last chunk): single backward-direction
    #     step on x[T-1] (PyTorch lstm_out[-1] semantics) + classifier +
    #     log-softmax.  x[T-1] is sliced from the resident chunk (no extra input).
    @pl.when(c == nc - 1)
    def _():
        x_last = x_ref[pl.ds(last_row * Bp, Bp), :]
        gates_b = (jnp.dot(x_last, wih_b_ref[...],
                           preferred_element_type=jnp.float32)
                   + jnp.dot(h0b_ref[...].astype(wdt), whh_b_ref[...],
                             preferred_element_type=jnp.float32)
                   + b_b_ref[...])
        ib = jax.nn.sigmoid(gates_b[:, 0 * Hp:1 * Hp])
        fb = jax.nn.sigmoid(gates_b[:, 1 * Hp:2 * Hp])
        gb = jnp.tanh(gates_b[:, 2 * Hp:3 * Hp])
        ob = jax.nn.sigmoid(gates_b[:, 3 * Hp:4 * Hp])
        cb = fb * c0b_ref[...] + ib * gb
        hb = ob * jnp.tanh(cb)

        # Classifier via pre-split weights (no XLU lane-concat of [hf, hb]).
        y = (jnp.dot(h_fin.astype(wdt), wlab_f_ref[...],
                     preferred_element_type=jnp.float32)
             + jnp.dot(hb.astype(wdt), wlab_b_ref[...],
                       preferred_element_type=jnp.float32)
             + blab_ref[...])
        # Padded label lanes carry bias -1e30 -> exp underflows to exactly 0,
        # so the log-softmax over the padded width is exact for real columns.
        m = jnp.max(y, axis=-1, keepdims=True)
        lse = jnp.log(jnp.sum(jnp.exp(y - m), axis=-1, keepdims=True)) + m
        out_ref[...] = y - lse


def bilstm_forward(sentence, params, hidden, *, t_chunk=32,
                   weight_dtype=jnp.float32, single_buffer_invariants=True):
    T, B = sentence.shape
    emb_tbl = params["emb"]
    E = emb_tbl.shape[1]
    H = params["whh_f"].shape[0]
    L = params["wlab"].shape[1]

    Bp = _round_up(B, 8)        # f32 sublane width
    Ep = _round_up(E, 128)      # lane width
    Hp = _round_up(H, 128)
    Lp = _round_up(L, 128)
    Tc = min(t_chunk, T)
    n_chunks = -(-T // Tc)
    T_pad = n_chunks * Tc
    last_row = (T - 1) - (n_chunks - 1) * Tc   # row of x[T-1] inside last chunk

    h0, c0 = hidden             # each (2, B, H)

    # ---- XLA-side glue: embedding gather + padding to TPU-friendly shapes ----
    x = jnp.take(emb_tbl, sentence, axis=0)                     # (T, B, E)
    x = jnp.pad(x, ((0, T_pad - T), (0, Bp - B), (0, Ep - E)))  # zero-padded
    x2d = x.reshape(T_pad * Bp, Ep).astype(weight_dtype)        # seq-major rows

    def pad_gate_w(w, rows_to):
        # (rows, 4H) -> (rows_to, 4*Hp): each gate block placed at k*Hp
        rows = w.shape[0]
        out = jnp.zeros((rows_to, 4 * Hp), jnp.float32)
        for k in range(4):
            out = out.at[:rows, k * Hp:k * Hp + H].set(w[:, k * H:(k + 1) * H])
        return out.astype(weight_dtype)

    def pad_gate_b(b):
        out = jnp.zeros((1, 4 * Hp), jnp.float32)
        for k in range(4):
            out = out.at[:, k * Hp:k * Hp + H].set(b[:, k * H:(k + 1) * H])
        return out

    def pad_state(s):
        return jnp.pad(s, ((0, Bp - B), (0, Hp - H)))

    wih_f = pad_gate_w(params["wih_f"], Ep)
    whh_f = pad_gate_w(params["whh_f"], Hp)
    b_f = pad_gate_b(params["b_f"])
    wih_b = pad_gate_w(params["wih_b"], Ep)
    whh_b = pad_gate_w(params["whh_b"], Hp)
    b_b = pad_gate_b(params["b_b"])

    wlab_f = jnp.pad(params["wlab"][:H],
                     ((0, Hp - H), (0, Lp - L))).astype(weight_dtype)
    wlab_b = jnp.pad(params["wlab"][H:],
                     ((0, Hp - H), (0, Lp - L))).astype(weight_dtype)
    blab = jnp.full((1, Lp), -1e30, jnp.float32).at[:, :L].set(params["blab"][0])

    h0f, h0b = pad_state(h0[0]), pad_state(h0[1])
    c0f, c0b = pad_state(c0[0]), pad_state(c0[1])

    def invariant(shape):
        # Constant index map across the grid -> single-buffer it (the default
        # second pipeline buffer is pure waste for loop-invariant operands).
        if single_buffer_invariants:
            return pl.BlockSpec(shape, lambda c: (0, 0),
                                pipeline_mode=pl.Buffered(buffer_count=1))
        return pl.BlockSpec(shape, lambda c: (0, 0))

    grid_spec = pltpu.PrefetchScalarGridSpec(
        num_scalar_prefetch=0,
        grid=(n_chunks,),
        in_specs=[
            pl.BlockSpec((Tc * Bp, Ep), lambda c: (c, 0)),   # x chunk (streamed)
            invariant((Ep, 4 * Hp)), invariant((Hp, 4 * Hp)), invariant((1, 4 * Hp)),
            invariant((Ep, 4 * Hp)), invariant((Hp, 4 * Hp)), invariant((1, 4 * Hp)),
            invariant((Bp, Hp)), invariant((Bp, Hp)),
            invariant((Bp, Hp)), invariant((Bp, Hp)),
            invariant((Hp, Lp)), invariant((Hp, Lp)), invariant((1, Lp)),
        ],
        out_specs=pl.BlockSpec((Bp, Lp), lambda c: (0, 0)),
        scratch_shapes=[
            pltpu.VMEM((Bp, Hp), jnp.float32),               # h (forward)
            pltpu.VMEM((Bp, Hp), jnp.float32),               # c (forward)
            pltpu.VMEM((Tc * Bp, 4 * Hp), jnp.float32),      # chunk x-projection
        ],
    )

    # ---- VMEM budget drives the limit (no hard-coded 32 MiB) ----------------
    wbytes = jnp.dtype(weight_dtype).itemsize
    w_mult = 1 if single_buffer_invariants else 2
    vmem_bytes = (
        2 * Tc * Bp * Ep * wbytes                          # x chunk (dbl-buffered)
        + w_mult * 2 * (Ep + Hp) * 4 * Hp * wbytes         # gate weights (f/b)
        + w_mult * 2 * 4 * Hp * 4                          # gate biases (f32)
        + w_mult * 4 * Bp * Hp * 4                         # h0/c0 (f32)
        + w_mult * (2 * Hp * Lp * wbytes + Lp * 4)         # classifier
        + 2 * Bp * Lp * 4                                  # output
        + (Tc * Bp * 4 * Hp + 2 * Bp * Hp) * 4             # scratch
    )
    vmem_limit = int(min(max(2 * vmem_bytes, 16 * 1024 * 1024),
                         64 * 1024 * 1024))

    flops = (2 * T_pad * Bp * Ep * 4 * Hp          # chunk input projections
             + 2 * T_pad * Bp * Hp * 4 * Hp        # recurrent matmuls
             + 2 * Bp * (Ep + Hp) * 4 * Hp         # single backward step
             + 2 * Bp * 2 * Hp * Lp)               # classifier
    transcendentals = 5 * Bp * Hp * (T_pad + 1) + 2 * Bp * Lp
    bytes_accessed = (T_pad * Bp * Ep * wbytes
                      + 2 * (Ep + Hp) * 4 * Hp * wbytes
                      + 2 * 4 * Hp * 4
                      + 4 * Bp * Hp * 4
                      + 2 * Hp * Lp * wbytes + Lp * 4
                      + Bp * Lp * 4)

    out = pl.pallas_call(
        functools.partial(_bilstm_kernel, t_total=T, t_chunk=Tc,
                          last_row=last_row),
        out_shape=jax.ShapeDtypeStruct((Bp, Lp), jnp.float32),
        grid_spec=grid_spec,
        compiler_params=pltpu.CompilerParams(
            dimension_semantics=("arbitrary",),   # time axis is serial
            vmem_limit_bytes=vmem_limit,
        ),
        cost_estimate=pl.CostEstimate(
            flops=int(flops),
            transcendentals=int(transcendentals),
            bytes_accessed=int(bytes_accessed)),
    )(x2d,
      wih_f, whh_f, b_f,
      wih_b, whh_b, b_b,
      h0f, c0f, h0b, c0b,
      wlab_f, wlab_b, blab)

    return out[:B, :L]


def init_params(key, vocab_size, E, H, L):
    ks = jax.random.split(key, 11)
    s = 1.0 / float(jnp.sqrt(jnp.float32(H)))

    def u(k, shape):
        return jax.random.uniform(k, shape, jnp.float32, -s, s)

    return dict(
        emb=jax.random.normal(ks[0], (vocab_size, E), jnp.float32),
        # weights stored pre-transposed (E,4H)/(H,4H)/(2H,L) for x @ W layout
        wih_f=u(ks[1], (E, 4 * H)),
        whh_f=u(ks[2], (H, 4 * H)),
        b_f=u(ks[3], (1, 4 * H)) + u(ks[4], (1, 4 * H)),    # b_ih + b_hh
        wih_b=u(ks[5], (E, 4 * H)),
        whh_b=u(ks[6], (H, 4 * H)),
        b_b=u(ks[7], (1, 4 * H)) + u(ks[8], (1, 4 * H)),
        wlab=u(ks[9], (2 * H, L)),
        blab=u(ks[10], (1, L)),
    )


def ref_forward(sentence, params, hidden):
    """Pure-JAX reference matching the PyTorch module's forward."""
    emb = params["emb"][sentence]          # (T, B, E)
    T = emb.shape[0]
    h0, c0 = hidden

    def cell(x, h, c, wih, whh, b):
        gates = x @ wih + h @ whh + b
        i, f, g, o = jnp.split(gates, 4, axis=-1)
        c = jax.nn.sigmoid(f) * c + jax.nn.sigmoid(i) * jnp.tanh(g)
        h = jax.nn.sigmoid(o) * jnp.tanh(c)
        return h, c

    h, c = h0[0], c0[0]
    for t in range(T):
        h, c = cell(emb[t], h, c, params["wih_f"], params["whh_f"], params["b_f"])
    # backward direction contributes exactly one step at lstm_out[-1]
    hb, _ = cell(emb[T - 1], h0[1], c0[1],
                 params["wih_b"], params["whh_b"], params["b_b"])
    feat = jnp.concatenate([h, hb], axis=-1)
    y = feat @ params["wlab"] + params["blab"]
    return jax.nn.log_softmax(y, axis=-1)


if __name__ == "__main__":
    T, B, E, H, V, L = 8, 2, 32, 32, 50, 5
    key = jax.random.PRNGKey(0)
    kp, ks, kh, kc = jax.random.split(key, 4)

    params = init_params(kp, V, E, H, L)
    sentence = jax.random.randint(ks, (T, B), 0, V, dtype=jnp.int32)
    # deterministic stand-in for self.hidden = init_hidden() (torch.randn)
    h0 = jax.random.normal(kh, (2, B, H), jnp.float32)
    c0 = jax.random.normal(kc, (2, B, H), jnp.float32)

    run = functools.partial(bilstm_forward, sentence, params, (h0, c0))
    try:
        out = jax.block_until_ready(run(single_buffer_invariants=True))
    except Exception:
        # pl.Buffered(1) unsupported on this jax/libtpu build -> fall back to
        # default double-buffering (identical results, just more resident VMEM).
        out = jax.block_until_ready(run(single_buffer_invariants=False))

    with jax.default_matmul_precision("highest"):
        ref = jax.block_until_ready(ref_forward(sentence, params, (h0, c0)))

    assert out.shape == (B, L)
    max_err = float(jnp.max(jnp.abs(out - ref)))
    assert jnp.allclose(out, ref, atol=2e-3, rtol=2e-3), max_err
    print("KERNEL_OK")
</pallas_src>

<mosaic_0001>
module attributes {stable_mosaic.version = 11 : i64} {
  func.func @_bilstm_kernel(%arg0: i32, %arg1: memref<64x128xf32, #tpu.memory_space<vmem>>, %arg2: memref<128x512xf32, #tpu.memory_space<vmem>>, %arg3: memref<128x512xf32, #tpu.memory_space<vmem>>, %arg4: memref<1x512xf32, #tpu.memory_space<vmem>>, %arg5: memref<128x512xf32, #tpu.memory_space<vmem>>, %arg6: memref<128x512xf32, #tpu.memory_space<vmem>>, %arg7: memref<1x512xf32, #tpu.memory_space<vmem>>, %arg8: memref<8x128xf32, #tpu.memory_space<vmem>>, %arg9: memref<8x128xf32, #tpu.memory_space<vmem>>, %arg10: memref<8x128xf32, #tpu.memory_space<vmem>>, %arg11: memref<8x128xf32, #tpu.memory_space<vmem>>, %arg12: memref<128x128xf32, #tpu.memory_space<vmem>>, %arg13: memref<128x128xf32, #tpu.memory_space<vmem>>, %arg14: memref<1x128xf32, #tpu.memory_space<vmem>>, %arg15: memref<8x128xf32, #tpu.memory_space<vmem>>, %arg16: memref<8x128xf32, #tpu.memory_space<vmem>>, %arg17: memref<8x128xf32, #tpu.memory_space<vmem>>, %arg18: memref<64x512xf32, #tpu.memory_space<vmem>>) attributes {dimension_semantics = [#tpu.dimension_semantics<arbitrary>], iteration_bounds = array<i64: 1>, scalar_prefetch = 0 : i64, scratch_operands = 3 : i64, tpu.core_type = #tpu.core_type<tc>, window_params = [{transform_indices = @transform_0, window_bounds = array<i64: 64, 128>}, {pipeline_mode = #tpu.pipeline_mode<synchronous>, transform_indices = @transform_1, window_bounds = array<i64: 128, 512>}, {pipeline_mode = #tpu.pipeline_mode<synchronous>, transform_indices = @transform_2, window_bounds = array<i64: 128, 512>}, {pipeline_mode = #tpu.pipeline_mode<synchronous>, transform_indices = @transform_3, window_bounds = array<i64: 1, 512>}, {pipeline_mode = #tpu.pipeline_mode<synchronous>, transform_indices = @transform_4, window_bounds = array<i64: 128, 512>}, {pipeline_mode = #tpu.pipeline_mode<synchronous>, transform_indices = @transform_5, window_bounds = array<i64: 128, 512>}, {pipeline_mode = #tpu.pipeline_mode<synchronous>, transform_indices = @transform_6, window_bounds = array<i64: 1, 512>}, {pipeline_mode = #tpu.pipeline_mode<synchronous>, transform_indices = @transform_7, window_bounds = array<i64: 8, 128>}, {pipeline_mode = #tpu.pipeline_mode<synchronous>, transform_indices = @transform_8, window_bounds = array<i64: 8, 128>}, {pipeline_mode = #tpu.pipeline_mode<synchronous>, transform_indices = @transform_9, window_bounds = array<i64: 8, 128>}, {pipeline_mode = #tpu.pipeline_mode<synchronous>, transform_indices = @transform_10, window_bounds = array<i64: 8, 128>}, {pipeline_mode = #tpu.pipeline_mode<synchronous>, transform_indices = @transform_11, window_bounds = array<i64: 128, 128>}, {pipeline_mode = #tpu.pipeline_mode<synchronous>, transform_indices = @transform_12, window_bounds = array<i64: 128, 128>}, {pipeline_mode = #tpu.pipeline_mode<synchronous>, transform_indices = @transform_13, window_bounds = array<i64: 1, 128>}, {pipeline_mode = #tpu.pipeline_mode<synchronous>, transform_indices = @transform_14, window_bounds = array<i64: 8, 128>}]} {
    %c0_i32 = arith.constant 0 : i32
    %0 = arith.cmpi eq, %arg0, %c0_i32 : i32
    %1 = arith.extui %0 : i1 to i32
    %c0_i32_0 = arith.constant 0 : i32
    %2 = arith.cmpi ne, %1, %c0_i32_0 : i32
    scf.if %2 {
      %c0_86 = arith.constant 0 : index
      %c0_87 = arith.constant 0 : index
      %300 = vector.load %arg8[%c0_86, %c0_87] : memref<8x128xf32, #tpu.memory_space<vmem>>, vector<8x128xf32>
      %c0_88 = arith.constant 0 : index
      %c0_89 = arith.constant 0 : index
      %301 = vector.load %arg16[%c0_88, %c0_89] : memref<8x128xf32, #tpu.memory_space<vmem>>, vector<8x128xf32>
      tpu.vector_store %arg16[%c0_88, %c0_89], %300 {strides = array<i32>} : memref<8x128xf32, #tpu.memory_space<vmem>>, vector<8x128xf32>,
      %c0_90 = arith.constant 0 : index
      %c0_91 = arith.constant 0 : index
      %302 = vector.load %arg9[%c0_90, %c0_91] : memref<8x128xf32, #tpu.memory_space<vmem>>, vector<8x128xf32>
      %c0_92 = arith.constant 0 : index
      %c0_93 = arith.constant 0 : index
      %303 = vector.load %arg17[%c0_92, %c0_93] : memref<8x128xf32, #tpu.memory_space<vmem>>, vector<8x128xf32>
      tpu.vector_store %arg17[%c0_92, %c0_93], %302 {strides = array<i32>} : memref<8x128xf32, #tpu.memory_space<vmem>>, vector<8x128xf32>,
    } else {
    }
    %c0 = arith.constant 0 : index
    %c0_1 = arith.constant 0 : index
    %3 = vector.load %arg1[%c0, %c0_1] : memref<64x128xf32, #tpu.memory_space<vmem>>, vector<64x128xf32>
    %c0_2 = arith.constant 0 : index
    %c0_3 = arith.constant 0 : index
    %4 = vector.load %arg2[%c0_2, %c0_3] : memref<128x512xf32, #tpu.memory_space<vmem>>, vector<128x512xf32>
    %cst = arith.constant dense<0.000000e+00> : vector<64x512xf32>
    %5 = tpu.matmul %3, %4, %cst {dimension_numbers = #tpu.dot_dimension_numbers<[1], [0], [0], [1], [0, 0, 1, 1], [], []>} : vector<64x128xf32>, vector<128x512xf32>, vector<64x512xf32> -> vector<64x512xf32>
    %c0_4 = arith.constant 0 : index
    %c0_5 = arith.constant 0 : index
    %6 = vector.load %arg4[%c0_4, %c0_5] : memref<1x512xf32, #tpu.memory_space<vmem>>, vector<1x512xf32>
    %7 = vector.broadcast %6 : vector<1x512xf32> to vector<64x512xf32>
    %8 = arith.addf %5, %7 : vector<64x512xf32>
    %c0_6 = arith.constant 0 : index
    %c0_7 = arith.constant 0 : index
    %9 = vector.load %arg18[%c0_6, %c0_7] : memref<64x512xf32, #tpu.memory_space<vmem>>, vector<64x512xf32>
    tpu.vector_store %arg18[%c0_6, %c0_7], %8 {strides = array<i32>} : memref<64x512xf32, #tpu.memory_space<vmem>>, vector<64x512xf32>,
    %c8_i32 = arith.constant 8 : i32
    %10 = arith.muli %arg0, %c8_i32 : i32
    %c8_i32_8 = arith.constant 8 : i32
    %11 = arith.subi %c8_i32_8, %10 : i32
    %c8_i32_9 = arith.constant 8 : i32
    %12 = arith.minsi %c8_i32_9, %11 : i32
    %c0_10 = arith.constant 0 : index
    %c0_11 = arith.constant 0 : index
    %13 = vector.load %arg16[%c0_10, %c0_11] : memref<8x128xf32, #tpu.memory_space<vmem>>, vector<8x128xf32>
    %c0_12 = arith.constant 0 : index
    %c0_13 = arith.constant 0 : index
    %14 = vector.load %arg17[%c0_12, %c0_13] : memref<8x128xf32, #tpu.memory_space<vmem>>, vector<8x128xf32>
    %c0_i32_14 = arith.constant 0 : i32
    %c8_i32_15 = arith.constant 8 : i32
    %15 = arith.muli %c0_i32_14, %c8_i32_15 : i32
    %16 = tpu.assume_multiple %15, 8 : i32
    %17 = arith.index_cast %16 : i32 to index
    %c0_16 = arith.constant 0 : index
    %18 = vector.load %arg18[%17, %c0_16] : memref<64x512xf32, #tpu.memory_space<vmem>>, vector<8x512xf32>
    %c0_17 = arith.constant 0 : index
    %c0_18 = arith.constant 0 : index
    %19 = vector.load %arg3[%c0_17, %c0_18] : memref<128x512xf32, #tpu.memory_space<vmem>>, vector<128x512xf32>
    %cst_19 = arith.constant dense<0.000000e+00> : vector<8x512xf32>
    %20 = tpu.matmul %13, %19, %cst_19 {dimension_numbers = #tpu.dot_dimension_numbers<[1], [0], [0], [1], [0, 0, 1, 1], [], []>} : vector<8x128xf32>, vector<128x512xf32>, vector<8x512xf32> -> vector<8x512xf32>
    %21 = arith.addf %18, %20 : vector<8x512xf32>
    %22 = vector.extract_strided_slice %21 {offsets = [0, 0], sizes = [8, 128], strides = [1, 1]} : vector<8x512xf32> to vector<8x128xf32>
    %23 = arith.negf %22 : vector<8x128xf32>
    %24 = math.exp %23 : vector<8x128xf32>
    %cst_20 = arith.constant 1.000000e+00 : f32
    %25 = vector.broadcast %cst_20 : f32 to vector<8x128xf32>
    %26 = arith.addf %25, %24 : vector<8x128xf32>
    %27 = arith.divf %25, %26 : vector<8x128xf32>
    %28 = vector.extract_strided_slice %21 {offsets = [0, 128], sizes = [8, 128], strides = [1, 1]} : vector<8x512xf32> to vector<8x128xf32>
    %29 = arith.negf %28 : vector<8x128xf32>
    %30 = math.exp %29 : vector<8x128xf32>
    %cst_21 = arith.constant 1.000000e+00 : f32
    %31 = vector.broadcast %cst_21 : f32 to vector<8x128xf32>
    %32 = arith.addf %31, %30 : vector<8x128xf32>
    %33 = arith.divf %31, %32 : vector<8x128xf32>
    %34 = vector.extract_strided_slice %21 {offsets = [0, 256], sizes = [8, 128], strides = [1, 1]} : vector<8x512xf32> to vector<8x128xf32>
    %35 = math.tanh %34 : vector<8x128xf32>
    %36 = vector.extract_strided_slice %21 {offsets = [0, 384], sizes = [8, 128], strides = [1, 1]} : vector<8x512xf32> to vector<8x128xf32>
    %37 = arith.negf %36 : vector<8x128xf32>
    %38 = math.exp %37 : vector<8x128xf32>
    %cst_22 = arith.constant 1.000000e+00 : f32
    %39 = vector.broadcast %cst_22 : f32 to vector<8x128xf32>
    %40 = arith.addf %39, %38 : vector<8x128xf32>
    %41 = arith.divf %39, %40 : vector<8x128xf32>
    %42 = arith.mulf %33, %14 : vector<8x128xf32>
    %43 = arith.mulf %27, %35 : vector<8x128xf32>
    %44 = arith.addf %42, %43 : vector<8x128xf32>
    %45 = math.tanh %44 : vector<8x128xf32>
    %46 = arith.mulf %41, %45 : vector<8x128xf32>
    %47 = arith.cmpi slt, %c0_i32_14, %12 : i32
    %48 = arith.select %47, %46, %13 : vector<8x128xf32>
    %49 = arith.select %47, %44, %14 : vector<8x128xf32>
    %c1_i32 = arith.constant 1 : i32
    %c8_i32_23 = arith.constant 8 : i32
    %50 = arith.muli %c1_i32, %c8_i32_23 : i32
    %51 = tpu.assume_multiple %50, 8 : i32
    %52 = arith.index_cast %51 : i32 to index
    %c0_24 = arith.constant 0 : index
    %53 = vector.load %arg18[%52, %c0_24] : memref<64x512xf32, #tpu.memory_space<vmem>>, vector<8x512xf32>
    %c0_25 = arith.constant 0 : index
    %c0_26 = arith.constant 0 : index
    %54 = vector.load %arg3[%c0_25, %c0_26] : memref<128x512xf32, #tpu.memory_space<vmem>>, vector<128x512xf32>
    %cst_27 = arith.constant dense<0.000000e+00> : vector<8x512xf32>
    %55 = tpu.matmul %48, %54, %cst_27 {dimension_numbers = #tpu.dot_dimension_numbers<[1], [0], [0], [1], [0, 0, 1, 1], [], []>} : vector<8x128xf32>, vector<128x512xf32>, vector<8x512xf32> -> vector<8x512xf32>
    %56 = arith.addf %53, %55 : vector<8x512xf32>
    %57 = vector.extract_strided_slice %56 {offsets = [0, 0], sizes = [8, 128], strides = [1, 1]} : vector<8x512xf32> to vector<8x128xf32>
    %58 = arith.negf %57 : vector<8x128xf32>
    %59 = math.exp %58 : vector<8x128xf32>
    %cst_28 = arith.constant 1.000000e+00 : f32
    %60 = vector.broadcast %cst_28 : f32 to vector<8x128xf32>
    %61 = arith.addf %60, %59 : vector<8x128xf32>
    %62 = arith.divf %60, %61 : vector<8x128xf32>
    %63 = vector.extract_strided_slice %56 {offsets = [0, 128], sizes = [8, 128], strides = [1, 1]} : vector<8x512xf32> to vector<8x128xf32>
    %64 = arith.negf %63 : vector<8x128xf32>
    %65 = math.exp %64 : vector<8x128xf32>
    %cst_29 = arith.constant 1.000000e+00 : f32
    %66 = vector.broadcast %cst_29 : f32 to vector<8x128xf32>
    %67 = arith.addf %66, %65 : vector<8x128xf32>
    %68 = arith.divf %66, %67 : vector<8x128xf32>
    %69 = vector.extract_strided_slice %56 {offsets = [0, 256], sizes = [8, 128], strides = [1, 1]} : vector<8x512xf32> to vector<8x128xf32>
    %70 = math.tanh %69 : vector<8x128xf32>
    %71 = vector.extract_strided_slice %56 {offsets = [0, 384], sizes = [8, 128], strides = [1, 1]} : vector<8x512xf32> to vector<8x128xf32>
    %72 = arith.negf %71 : vector<8x128xf32>
    %73 = math.exp %72 : vector<8x128xf32>
    %cst_30 = arith.constant 1.000000e+00 : f32
    %74 = vector.broadcast %cst_30 : f32 to vector<8x128xf32>
    %75 = arith.addf %74, %73 : vector<8x128xf32>
    %76 = arith.divf %74, %75 : vector<8x128xf32>
    %77 = arith.mulf %68, %49 : vector<8x128xf32>
    %78 = arith.mulf %62, %70 : vector<8x128xf32>
    %79 = arith.addf %77, %78 : vector<8x128xf32>
    %80 = math.tanh %79 : vector<8x128xf32>
    %81 = arith.mulf %76, %80 : vector<8x128xf32>
    %82 = arith.cmpi slt, %c1_i32, %12 : i32
    %83 = arith.select %82, %81, %48 : vector<8x128xf32>
    %84 = arith.select %82, %79, %49 : vector<8x128xf32>
    %c2_i32 = arith.constant 2 : i32
    %c8_i32_31 = arith.constant 8 : i32
    %85 = arith.muli %c2_i32, %c8_i32_31 : i32
    %86 = tpu.assume_multiple %85, 8 : i32
    %87 = arith.index_cast %86 : i32 to index
    %c0_32 = arith.constant 0 : index
    %88 = vector.load %arg18[%87, %c0_32] : memref<64x512xf32, #tpu.memory_space<vmem>>, vector<8x512xf32>
    %c0_33 = arith.constant 0 : index
    %c0_34 = arith.constant 0 : index
    %89 = vector.load %arg3[%c0_33, %c0_34] : memref<128x512xf32, #tpu.memory_space<vmem>>, vector<128x512xf32>
    %cst_35 = arith.constant dense<0.000000e+00> : vector<8x512xf32>
    %90 = tpu.matmul %83, %89, %cst_35 {dimension_numbers = #tpu.dot_dimension_numbers<[1], [0], [0], [1], [0, 0, 1, 1], [], []>} : vector<8x128xf32>, vector<128x512xf32>, vector<8x512xf32> -> vector<8x512xf32>
    %91 = arith.addf %88, %90 : vector<8x512xf32>
    %92 = vector.extract_strided_slice %91 {offsets = [0, 0], sizes = [8, 128], strides = [1, 1]} : vector<8x512xf32> to vector<8x128xf32>
    %93 = arith.negf %92 : vector<8x128xf32>
    %94 = math.exp %93 : vector<8x128xf32>
    %cst_36 = arith.constant 1.000000e+00 : f32
    %95 = vector.broadcast %cst_36 : f32 to vector<8x128xf32>
    %96 = arith.addf %95, %94 : vector<8x128xf32>
    %97 = arith.divf %95, %96 : vector<8x128xf32>
    %98 = vector.extract_strided_slice %91 {offsets = [0, 128], sizes = [8, 128], strides = [1, 1]} : vector<8x512xf32> to vector<8x128xf32>
    %99 = arith.negf %98 : vector<8x128xf32>
    %100 = math.exp %99 : vector<8x128xf32>
    %cst_37 = arith.constant 1.000000e+00 : f32
    %101 = vector.broadcast %cst_37 : f32 to vector<8x128xf32>
    %102 = arith.addf %101, %100 : vector<8x128xf32>
    %103 = arith.divf %101, %102 : vector<8x128xf32>
    %104 = vector.extract_strided_slice %91 {offsets = [0, 256], sizes = [8, 128], strides = [1, 1]} : vector<8x512xf32> to vector<8x128xf32>
    %105 = math.tanh %104 : vector<8x128xf32>
    %106 = vector.extract_strided_slice %91 {offsets = [0, 384], sizes = [8, 128], strides = [1, 1]} : vector<8x512xf32> to vector<8x128xf32>
    %107 = arith.negf %106 : vector<8x128xf32>
    %108 = math.exp %107 : vector<8x128xf32>
    %cst_38 = arith.constant 1.000000e+00 : f32
    %109 = vector.broadcast %cst_38 : f32 to vector<8x128xf32>
    %110 = arith.addf %109, %108 : vector<8x128xf32>
    %111 = arith.divf %109, %110 : vector<8x128xf32>
    %112 = arith.mulf %103, %84 : vector<8x128xf32>
    %113 = arith.mulf %97, %105 : vector<8x128xf32>
    %114 = arith.addf %112, %113 : vector<8x128xf32>
    %115 = math.tanh %114 : vector<8x128xf32>
    %116 = arith.mulf %111, %115 : vector<8x128xf32>
    %117 = arith.cmpi slt, %c2_i32, %12 : i32
    %118 = arith.select %117, %116, %83 : vector<8x128xf32>
    %119 = arith.select %117, %114, %84 : vector<8x128xf32>
    %c3_i32 = arith.constant 3 : i32
    %c8_i32_39 = arith.constant 8 : i32
    %120 = arith.muli %c3_i32, %c8_i32_39 : i32
    %121 = tpu.assume_multiple %120, 8 : i32
    %122 = arith.index_cast %121 : i32 to index
    %c0_40 = arith.constant 0 : index
    %123 = vector.load %arg18[%122, %c0_40] : memref<64x512xf32, #tpu.memory_space<vmem>>, vector<8x512xf32>
    %c0_41 = arith.constant 0 : index
    %c0_42 = arith.constant 0 : index
    %124 = vector.load %arg3[%c0_41, %c0_42] : memref<128x512xf32, #tpu.memory_space<vmem>>, vector<128x512xf32>
    %cst_43 = arith.constant dense<0.000000e+00> : vector<8x512xf32>
    %125 = tpu.matmul %118, %124, %cst_43 {dimension_numbers = #tpu.dot_dimension_numbers<[1], [0], [0], [1], [0, 0, 1, 1], [], []>} : vector<8x128xf32>, vector<128x512xf32>, vector<8x512xf32> -> vector<8x512xf32>
    %126 = arith.addf %123, %125 : vector<8x512xf32>
    %127 = vector.extract_strided_slice %126 {offsets = [0, 0], sizes = [8, 128], strides = [1, 1]} : vector<8x512xf32> to vector<8x128xf32>
    %128 = arith.negf %127 : vector<8x128xf32>
    %129 = math.exp %128 : vector<8x128xf32>
    %cst_44 = arith.constant 1.000000e+00 : f32
    %130 = vector.broadcast %cst_44 : f32 to vector<8x128xf32>
    %131 = arith.addf %130, %129 : vector<8x128xf32>
    %132 = arith.divf %130, %131 : vector<8x128xf32>
    %133 = vector.extract_strided_slice %126 {offsets = [0, 128], sizes = [8, 128], strides = [1, 1]} : vector<8x512xf32> to vector<8x128xf32>
    %134 = arith.negf %133 : vector<8x128xf32>
    %135 = math.exp %134 : vector<8x128xf32>
    %cst_45 = arith.constant 1.000000e+00 : f32
    %136 = vector.broadcast %cst_45 : f32 to vector<8x128xf32>
    %137 = arith.addf %136, %135 : vector<8x128xf32>
    %138 = arith.divf %136, %137 : vector<8x128xf32>
    %139 = vector.extract_strided_slice %126 {offsets = [0, 256], sizes = [8, 128], strides = [1, 1]} : vector<8x512xf32> to vector<8x128xf32>
    %140 = math.tanh %139 : vector<8x128xf32>
    %141 = vector.extract_strided_slice %126 {offsets = [0, 384], sizes = [8, 128], strides = [1, 1]} : vector<8x512xf32> to vector<8x128xf32>
    %142 = arith.negf %141 : vector<8x128xf32>
    %143 = math.exp %142 : vector<8x128xf32>
    %cst_46 = arith.constant 1.000000e+00 : f32
    %144 = vector.broadcast %cst_46 : f32 to vector<8x128xf32>
    %145 = arith.addf %144, %143 : vector<8x128xf32>
    %146 = arith.divf %144, %145 : vector<8x128xf32>
    %147 = arith.mulf %138, %119 : vector<8x128xf32>
    %148 = arith.mulf %132, %140 : vector<8x128xf32>
    %149 = arith.addf %147, %148 : vector<8x128xf32>
    %150 = math.tanh %149 : vector<8x128xf32>
    %151 = arith.mulf %146, %150 : vector<8x128xf32>
    %152 = arith.cmpi slt, %c3_i32, %12 : i32
    %153 = arith.select %152, %151, %118 : vector<8x128xf32>
    %154 = arith.select %152, %149, %119 : vector<8x128xf32>
    %c4_i32 = arith.constant 4 : i32
    %c8_i32_47 = arith.constant 8 : i32
    %155 = arith.muli %c4_i32, %c8_i32_47 : i32
    %156 = tpu.assume_multiple %155, 8 : i32
    %157 = arith.index_cast %156 : i32 to index
    %c0_48 = arith.constant 0 : index
    %158 = vector.load %arg18[%157, %c0_48] : memref<64x512xf32, #tpu.memory_space<vmem>>, vector<8x512xf32>
    %c0_49 = arith.constant 0 : index
    %c0_50 = arith.constant 0 : index
    %159 = vector.load %arg3[%c0_49, %c0_50] : memref<128x512xf32, #tpu.memory_space<vmem>>, vector<128x512xf32>
    %cst_51 = arith.constant dense<0.000000e+00> : vector<8x512xf32>
    %160 = tpu.matmul %153, %159, %cst_51 {dimension_numbers = #tpu.dot_dimension_numbers<[1], [0], [0], [1], [0, 0, 1, 1], [], []>} : vector<8x128xf32>, vector<128x512xf32>, vector<8x512xf32> -> vector<8x512xf32>
    %161 = arith.addf %158, %160 : vector<8x512xf32>
    %162 = vector.extract_strided_slice %161 {offsets = [0, 0], sizes = [8, 128], strides = [1, 1]} : vector<8x512xf32> to vector<8x128xf32>
    %163 = arith.negf %162 : vector<8x128xf32>
    %164 = math.exp %163 : vector<8x128xf32>
    %cst_52 = arith.constant 1.000000e+00 : f32
    %165 = vector.broadcast %cst_52 : f32 to vector<8x128xf32>
    %166 = arith.addf %165, %164 : vector<8x128xf32>
    %167 = arith.divf %165, %166 : vector<8x128xf32>
    %168 = vector.extract_strided_slice %161 {offsets = [0, 128], sizes = [8, 128], strides = [1, 1]} : vector<8x512xf32> to vector<8x128xf32>
    %169 = arith.negf %168 : vector<8x128xf32>
    %170 = math.exp %169 : vector<8x128xf32>
    %cst_53 = arith.constant 1.000000e+00 : f32
    %171 = vector.broadcast %cst_53 : f32 to vector<8x128xf32>
    %172 = arith.addf %171, %170 : vector<8x128xf32>
    %173 = arith.divf %171, %172 : vector<8x128xf32>
    %174 = vector.extract_strided_slice %161 {offsets = [0, 256], sizes = [8, 128], strides = [1, 1]} : vector<8x512xf32> to vector<8x128xf32>
    %175 = math.tanh %174 : vector<8x128xf32>
    %176 = vector.extract_strided_slice %161 {offsets = [0, 384], sizes = [8, 128], strides = [1, 1]} : vector<8x512xf32> to vector<8x128xf32>
    %177 = arith.negf %176 : vector<8x128xf32>
    %178 = math.exp %177 : vector<8x128xf32>
    %cst_54 = arith.constant 1.000000e+00 : f32
    %179 = vector.broadcast %cst_54 : f32 to vector<8x128xf32>
    %180 = arith.addf %179, %178 : vector<8x128xf32>
    %181 = arith.divf %179, %180 : vector<8x128xf32>
    %182 = arith.mulf %173, %154 : vector<8x128xf32>
    %183 = arith.mulf %167, %175 : vector<8x128xf32>
    %184 = arith.addf %182, %183 : vector<8x128xf32>
    %185 = math.tanh %184 : vector<8x128xf32>
    %186 = arith.mulf %181, %185 : vector<8x128xf32>
    %187 = arith.cmpi slt, %c4_i32, %12 : i32
    %188 = arith.select %187, %186, %153 : vector<8x128xf32>
    %189 = arith.select %187, %184, %154 : vector<8x128xf32>
    %c5_i32 = arith.constant 5 : i32
    %c8_i32_55 = arith.constant 8 : i32
    %190 = arith.muli %c5_i32, %c8_i32_55 : i32
    %191 = tpu.assume_multiple %190, 8 : i32
    %192 = arith.index_cast %191 : i32 to index
    %c0_56 = arith.constant 0 : index
    %193 = vector.load %arg18[%192, %c0_56] : memref<64x512xf32, #tpu.memory_space<vmem>>, vector<8x512xf32>
    %c0_57 = arith.constant 0 : index
    %c0_58 = arith.constant 0 : index
    %194 = vector.load %arg3[%c0_57, %c0_58] : memref<128x512xf32, #tpu.memory_space<vmem>>, vector<128x512xf32>
    %cst_59 = arith.constant dense<0.000000e+00> : vector<8x512xf32>
    %195 = tpu.matmul %188, %194, %cst_59 {dimension_numbers = #tpu.dot_dimension_numbers<[1], [0], [0], [1], [0, 0, 1, 1], [], []>} : vector<8x128xf32>, vector<128x512xf32>, vector<8x512xf32> -> vector<8x512xf32>
    %196 = arith.addf %193, %195 : vector<8x512xf32>
    %197 = vector.extract_strided_slice %196 {offsets = [0, 0], sizes = [8, 128], strides = [1, 1]} : vector<8x512xf32> to vector<8x128xf32>
    %198 = arith.negf %197 : vector<8x128xf32>
    %199 = math.exp %198 : vector<8x128xf32>
    %cst_60 = arith.constant 1.000000e+00 : f32
    %200 = vector.broadcast %cst_60 : f32 to vector<8x128xf32>
    %201 = arith.addf %200, %199 : vector<8x128xf32>
    %202 = arith.divf %200, %201 : vector<8x128xf32>
    %203 = vector.extract_strided_slice %196 {offsets = [0, 128], sizes = [8, 128], strides = [1, 1]} : vector<8x512xf32> to vector<8x128xf32>
    %204 = arith.negf %203 : vector<8x128xf32>
    %205 = math.exp %204 : vector<8x128xf32>
    %cst_61 = arith.constant 1.000000e+00 : f32
    %206 = vector.broadcast %cst_61 : f32 to vector<8x128xf32>
    %207 = arith.addf %206, %205 : vector<8x128xf32>
    %208 = arith.divf %206, %207 : vector<8x128xf32>
    %209 = vector.extract_strided_slice %196 {offsets = [0, 256], sizes = [8, 128], strides = [1, 1]} : vector<8x512xf32> to vector<8x128xf32>
    %210 = math.tanh %209 : vector<8x128xf32>
    %211 = vector.extract_strided_slice %196 {offsets = [0, 384], sizes = [8, 128], strides = [1, 1]} : vector<8x512xf32> to vector<8x128xf32>
    %212 = arith.negf %211 : vector<8x128xf32>
    %213 = math.exp %212 : vector<8x128xf32>
    %cst_62 = arith.constant 1.000000e+00 : f32
    %214 = vector.broadcast %cst_62 : f32 to vector<8x128xf32>
    %215 = arith.addf %214, %213 : vector<8x128xf32>
    %216 = arith.divf %214, %215 : vector<8x128xf32>
    %217 = arith.mulf %208, %189 : vector<8x128xf32>
    %218 = arith.mulf %202, %210 : vector<8x128xf32>
    %219 = arith.addf %217, %218 : vector<8x128xf32>
    %220 = math.tanh %219 : vector<8x128xf32>
    %221 = arith.mulf %216, %220 : vector<8x128xf32>
    %222 = arith.cmpi slt, %c5_i32, %12 : i32
    %223 = arith.select %222, %221, %188 : vector<8x128xf32>
    %224 = arith.select %222, %219, %189 : vector<8x128xf32>
    %c6_i32 = arith.constant 6 : i32
    %c8_i32_63 = arith.constant 8 : i32
    %225 = arith.muli %c6_i32, %c8_i32_63 : i32
    %226 = tpu.assume_multiple %225, 8 : i32
    %227 = arith.index_cast %226 : i32 to index
    %c0_64 = arith.constant 0 : index
    %228 = vector.load %arg18[%227, %c0_64] : memref<64x512xf32, #tpu.memory_space<vmem>>, vector<8x512xf32>
    %c0_65 = arith.constant 0 : index
    %c0_66 = arith.constant 0 : index
    %229 = vector.load %arg3[%c0_65, %c0_66] : memref<128x512xf32, #tpu.memory_space<vmem>>, vector<128x512xf32>
    %cst_67 = arith.constant dense<0.000000e+00> : vector<8x512xf32>
    %230 = tpu.matmul %223, %229, %cst_67 {dimension_numbers = #tpu.dot_dimension_numbers<[1], [0], [0], [1], [0, 0, 1, 1], [], []>} : vector<8x128xf32>, vector<128x512xf32>, vector<8x512xf32> -> vector<8x512xf32>
    %231 = arith.addf %228, %230 : vector<8x512xf32>
    %232 = vector.extract_strided_slice %231 {offsets = [0, 0], sizes = [8, 128], strides = [1, 1]} : vector<8x512xf32> to vector<8x128xf32>
    %233 = arith.negf %232 : vector<8x128xf32>
    %234 = math.exp %233 : vector<8x128xf32>
    %cst_68 = arith.constant 1.000000e+00 : f32
    %235 = vector.broadcast %cst_68 : f32 to vector<8x128xf32>
    %236 = arith.addf %235, %234 : vector<8x128xf32>
    %237 = arith.divf %235, %236 : vector<8x128xf32>
    %238 = vector.extract_strided_slice %231 {offsets = [0, 128], sizes = [8, 128], strides = [1, 1]} : vector<8x512xf32> to vector<8x128xf32>
    %239 = arith.negf %238 : vector<8x128xf32>
    %240 = math.exp %239 : vector<8x128xf32>
    %cst_69 = arith.constant 1.000000e+00 : f32
    %241 = vector.broadcast %cst_69 : f32 to vector<8x128xf32>
    %242 = arith.addf %241, %240 : vector<8x128xf32>
    %243 = arith.divf %241, %242 : vector<8x128xf32>
    %244 = vector.extract_strided_slice %231 {offsets = [0, 256], sizes = [8, 128], strides = [1, 1]} : vector<8x512xf32> to vector<8x128xf32>
    %245 = math.tanh %244 : vector<8x128xf32>
    %246 = vector.extract_strided_slice %231 {offsets = [0, 384], sizes = [8, 128], strides = [1, 1]} : vector<8x512xf32> to vector<8x128xf32>
    %247 = arith.negf %246 : vector<8x128xf32>
    %248 = math.exp %247 : vector<8x128xf32>
    %cst_70 = arith.constant 1.000000e+00 : f32
    %249 = vector.broadcast %cst_70 : f32 to vector<8x128xf32>
    %250 = arith.addf %249, %248 : vector<8x128xf32>
    %251 = arith.divf %249, %250 : vector<8x128xf32>
    %252 = arith.mulf %243, %224 : vector<8x128xf32>
    %253 = arith.mulf %237, %245 : vector<8x128xf32>
    %254 = arith.addf %252, %253 : vector<8x128xf32>
    %255 = math.tanh %254 : vector<8x128xf32>
    %256 = arith.mulf %251, %255 : vector<8x128xf32>
    %257 = arith.cmpi slt, %c6_i32, %12 : i32
    %258 = arith.select %257, %256, %223 : vector<8x128xf32>
    %259 = arith.select %257, %254, %224 : vector<8x128xf32>
    %c7_i32 = arith.constant 7 : i32
    %c8_i32_71 = arith.constant 8 : i32
    %260 = arith.muli %c7_i32, %c8_i32_71 : i32
    %261 = tpu.assume_multiple %260, 8 : i32
    %262 = arith.index_cast %261 : i32 to index
    %c0_72 = arith.constant 0 : index
    %263 = vector.load %arg18[%262, %c0_72] : memref<64x512xf32, #tpu.memory_space<vmem>>, vector<8x512xf32>
    %c0_73 = arith.constant 0 : index
    %c0_74 = arith.constant 0 : index
    %264 = vector.load %arg3[%c0_73, %c0_74] : memref<128x512xf32, #tpu.memory_space<vmem>>, vector<128x512xf32>
    %cst_75 = arith.constant dense<0.000000e+00> : vector<8x512xf32>
    %265 = tpu.matmul %258, %264, %cst_75 {dimension_numbers = #tpu.dot_dimension_numbers<[1], [0], [0], [1], [0, 0, 1, 1], [], []>} : vector<8x128xf32>, vector<128x512xf32>, vector<8x512xf32> -> vector<8x512xf32>
    %266 = arith.addf %263, %265 : vector<8x512xf32>
    %267 = vector.extract_strided_slice %266 {offsets = [0, 0], sizes = [8, 128], strides = [1, 1]} : vector<8x512xf32> to vector<8x128xf32>
    %268 = arith.negf %267 : vector<8x128xf32>
    %269 = math.exp %268 : vector<8x128xf32>
    %cst_76 = arith.constant 1.000000e+00 : f32
    %270 = vector.broadcast %cst_76 : f32 to vector<8x128xf32>
    %271 = arith.addf %270, %269 : vector<8x128xf32>
    %272 = arith.divf %270, %271 : vector<8x128xf32>
    %273 = vector.extract_strided_slice %266 {offsets = [0, 128], sizes = [8, 128], strides = [1, 1]} : vector<8x512xf32> to vector<8x128xf32>
    %274 = arith.negf %273 : vector<8x128xf32>
    %275 = math.exp %274 : vector<8x128xf32>
    %cst_77 = arith.constant 1.000000e+00 : f32
    %276 = vector.broadcast %cst_77 : f32 to vector<8x128xf32>
    %277 = arith.addf %276, %275 : vector<8x128xf32>
    %278 = arith.divf %276, %277 : vector<8x128xf32>
    %279 = vector.extract_strided_slice %266 {offsets = [0, 256], sizes = [8, 128], strides = [1, 1]} : vector<8x512xf32> to vector<8x128xf32>
    %280 = math.tanh %279 : vector<8x128xf32>
    %281 = vector.extract_strided_slice %266 {offsets = [0, 384], sizes = [8, 128], strides = [1, 1]} : vector<8x512xf32> to vector<8x128xf32>
    %282 = arith.negf %281 : vector<8x128xf32>
    %283 = math.exp %282 : vector<8x128xf32>
    %cst_78 = arith.constant 1.000000e+00 : f32
    %284 = vector.broadcast %cst_78 : f32 to vector<8x128xf32>
    %285 = arith.addf %284, %283 : vector<8x128xf32>
    %286 = arith.divf %284, %285 : vector<8x128xf32>
    %287 = arith.mulf %278, %259 : vector<8x128xf32>
    %288 = arith.mulf %272, %280 : vector<8x128xf32>
    %289 = arith.addf %287, %288 : vector<8x128xf32>
    %290 = math.tanh %289 : vector<8x128xf32>
    %291 = arith.mulf %286, %290 : vector<8x128xf32>
    %292 = arith.cmpi slt, %c7_i32, %12 : i32
    %293 = arith.select %292, %291, %258 : vector<8x128xf32>
    %294 = arith.select %292, %289, %259 : vector<8x128xf32>
    %c8_i32_79 = arith.constant 8 : i32
    %c0_80 = arith.constant 0 : index
    %c0_81 = arith.constant 0 : index
    %295 = vector.load %arg16[%c0_80, %c0_81] : memref<8x128xf32, #tpu.memory_space<vmem>>, vector<8x128xf32>
    tpu.vector_store %arg16[%c0_80, %c0_81], %293 {strides = array<i32>} : memref<8x128xf32, #tpu.memory_space<vmem>>, vector<8x128xf32>,
    %c0_82 = arith.constant 0 : index
    %c0_83 = arith.constant 0 : index
    %296 = vector.load %arg17[%c0_82, %c0_83] : memref<8x128xf32, #tpu.memory_space<vmem>>, vector<8x128xf32>
    tpu.vector_store %arg17[%c0_82, %c0_83], %294 {strides = array<i32>} : memref<8x128xf32, #tpu.memory_space<vmem>>, vector<8x128xf32>,
    %c0_i32_84 = arith.constant 0 : i32
    %297 = arith.cmpi eq, %arg0, %c0_i32_84 : i32
    %298 = arith.extui %297 : i1 to i32
    %c0_i32_85 = arith.constant 0 : i32
    %299 = arith.cmpi ne, %298, %c0_i32_85 : i32
    scf.if %299 {
      %c56 = arith.constant 56 : index
      %c0_86 = arith.constant 0 : index
      %300 = vector.load %arg1[%c56, %c0_86] : memref<64x128xf32, #tpu.memory_space<vmem>>, vector<8x128xf32>
      %c0_87 = arith.constant 0 : index
      %c0_88 = arith.constant 0 : index
      %301 = vector.load %arg5[%c0_87, %c0_88] : memref<128x512xf32, #tpu.memory_space<vmem>>, vector<128x512xf32>
      %cst_89 = arith.constant dense<0.000000e+00> : vector<8x512xf32>
      %302 = tpu.matmul %300, %301, %cst_89 {dimension_numbers = #tpu.dot_dimension_numbers<[1], [0], [0], [1], [0, 0, 1, 1], [], []>} : vector<8x128xf32>, vector<128x512xf32>, vector<8x512xf32> -> vector<8x512xf32>
      %c0_90 = arith.constant 0 : index
      %c0_91 = arith.constant 0 : index
      %303 = vector.load %arg10[%c0_90, %c0_91] : memref<8x128xf32, #tpu.memory_space<vmem>>, vector<8x128xf32>
      %c0_92 = arith.constant 0 : index
      %c0_93 = arith.constant 0 : index
      %304 = vector.load %arg6[%c0_92, %c0_93] : memref<128x512xf32, #tpu.memory_space<vmem>>, vector<128x512xf32>
      %cst_94 = arith.constant dense<0.000000e+00> : vector<8x512xf32>
      %305 = tpu.matmul %303, %304, %cst_94 {dimension_numbers = #tpu.dot_dimension_numbers<[1], [0], [0], [1], [0, 0, 1, 1], [], []>} : vector<8x128xf32>, vector<128x512xf32>, vector<8x512xf32> -> vector<8x512xf32>
      %306 = arith.addf %302, %305 : vector<8x512xf32>
      %c0_95 = arith.constant 0 : index
      %c0_96 = arith.constant 0 : index
      %307 = vector.load %arg7[%c0_95, %c0_96] : memref<1x512xf32, #tpu.memory_space<vmem>>, vector<1x512xf32>
      %308 = vector.broadcast %307 : vector<1x512xf32> to vector<8x512xf32>
      %309 = arith.addf %306, %308 : vector<8x512xf32>
      %310 = vector.extract_strided_slice %309 {offsets = [0, 0], sizes = [8, 128], strides = [1, 1]} : vector<8x512xf32> to vector<8x128xf32>
      %311 = arith.negf %310 : vector<8x128xf32>
      %312 = math.exp %311 : vector<8x128xf32>
      %cst_97 = arith.constant 1.000000e+00 : f32
      %313 = vector.broadcast %cst_97 : f32 to vector<8x128xf32>
      %314 = arith.addf %313, %312 : vector<8x128xf32>
      %315 = arith.divf %313, %314 : vector<8x128xf32>
      %316 = vector.extract_strided_slice %309 {offsets = [0, 128], sizes = [8, 128], strides = [1, 1]} : vector<8x512xf32> to vector<8x128xf32>
      %317 = arith.negf %316 : vector<8x128xf32>
      %318 = math.exp %317 : vector<8x128xf32>
      %cst_98 = arith.constant 1.000000e+00 : f32
      %319 = vector.broadcast %cst_98 : f32 to vector<8x128xf32>
      %320 = arith.addf %319, %318 : vector<8x128xf32>
      %321 = arith.divf %319, %320 : vector<8x128xf32>
      %322 = vector.extract_strided_slice %309 {offsets = [0, 256], sizes = [8, 128], strides = [1, 1]} : vector<8x512xf32> to vector<8x128xf32>
      %323 = math.tanh %322 : vector<8x128xf32>
      %324 = vector.extract_strided_slice %309 {offsets = [0, 384], sizes = [8, 128], strides = [1, 1]} : vector<8x512xf32> to vector<8x128xf32>
      %325 = arith.negf %324 : vector<8x128xf32>
      %326 = math.exp %325 : vector<8x128xf32>
      %cst_99 = arith.constant 1.000000e+00 : f32
      %327 = vector.broadcast %cst_99 : f32 to vector<8x128xf32>
      %328 = arith.addf %327, %326 : vector<8x128xf32>
      %329 = arith.divf %327, %328 : vector<8x128xf32>
      %c0_100 = arith.constant 0 : index
      %c0_101 = arith.constant 0 : index
      %330 = vector.load %arg11[%c0_100, %c0_101] : memref<8x128xf32, #tpu.memory_space<vmem>>, vector<8x128xf32>
      %331 = arith.mulf %321, %330 : vector<8x128xf32>
      %332 = arith.mulf %315, %323 : vector<8x128xf32>
      %333 = arith.addf %331, %332 : vector<8x128xf32>
      %334 = math.tanh %333 : vector<8x128xf32>
      %335 = arith.mulf %329, %334 : vector<8x128xf32>
      %c0_102 = arith.constant 0 : index
      %c0_103 = arith.constant 0 : index
      %336 = vector.load %arg12[%c0_102, %c0_103] : memref<128x128xf32, #tpu.memory_space<vmem>>, vector<128x128xf32>
      %cst_104 = arith.constant dense<0.000000e+00> : vector<8x128xf32>
      %337 = tpu.matmul %293, %336, %cst_104 {dimension_numbers = #tpu.dot_dimension_numbers<[1], [0], [0], [1], [0, 0, 1, 1], [], []>} : vector<8x128xf32>, vector<128x128xf32>, vector<8x128xf32> -> vector<8x128xf32>
      %c0_105 = arith.constant 0 : index
      %c0_106 = arith.constant 0 : index
      %338 = vector.load %arg13[%c0_105, %c0_106] : memref<128x128xf32, #tpu.memory_space<vmem>>, vector<128x128xf32>
      %cst_107 = arith.constant dense<0.000000e+00> : vector<8x128xf32>
      %339 = tpu.matmul %335, %338, %cst_107 {dimension_numbers = #tpu.dot_dimension_numbers<[1], [0], [0], [1], [0, 0, 1, 1], [], []>} : vector<8x128xf32>, vector<128x128xf32>, vector<8x128xf32> -> vector<8x128xf32>
      %340 = arith.addf %337, %339 : vector<8x128xf32>
      %c0_108 = arith.constant 0 : index
      %c0_109 = arith.constant 0 : index
      %341 = vector.load %arg14[%c0_108, %c0_109] : memref<1x128xf32, #tpu.memory_space<vmem>>, vector<1x128xf32>
      %342 = vector.broadcast %341 : vector<1x128xf32> to vector<8x128xf32>
      %343 = arith.addf %340, %342 : vector<8x128xf32>
      %cst_110 = arith.constant dense<0xFF800000> : vector<8xf32>
      %344 = vector.multi_reduction <maximumf>, %343, %cst_110 [1] : vector<8x128xf32> to vector<8xf32>
      %345 = vector.shape_cast %344 : vector<8xf32> to vector<8x1xf32>
      %346 = vector.broadcast %345 : vector<8x1xf32> to vector<8x128xf32>
      %347 = arith.subf %343, %346 : vector<8x128xf32>
      %348 = math.exp %347 : vector<8x128xf32>
      %cst_111 = arith.constant dense<0.000000e+00> : vector<8xf32>
      %349 = vector.multi_reduction <add>, %348, %cst_111 [1] : vector<8x128xf32> to vector<8xf32>
      %350 = vector.shape_cast %349 : vector<8xf32> to vector<8x1xf32>
      %351 = math.log %350 : vector<8x1xf32>
      %352 = arith.addf %351, %345 : vector<8x1xf32>
      %353 = vector.broadcast %352 : vector<8x1xf32> to vector<8x128xf32>
      %354 = arith.subf %343, %353 : vector<8x128xf32>
      %c0_112 = arith.constant 0 : index
      %c0_113 = arith.constant 0 : index
      %355 = vector.load %arg15[%c0_112, %c0_113] : memref<8x128xf32, #tpu.memory_space<vmem>>, vector<8x128xf32>
      tpu.vector_store %arg15[%c0_112, %c0_113], %354 {strides = array<i32>} : memref<8x128xf32, #tpu.memory_space<vmem>>, vector<8x128xf32>,
    } else {
    }
    return
  }
  func.func @transform_0(%arg0: i32) -> (i32, i32) {
    %c0_i32 = arith.constant 0 : i32
    %c0_i32_0 = arith.constant 0 : i32
    return %arg0, %c0_i32 : i32, i32
  }
  func.func @transform_1(%arg0: i32) -> (i32, i32) {
    %c0_i32 = arith.constant 0 : i32
    %c0_i32_0 = arith.constant 0 : i32
    %c0_i32_1 = arith.constant 0 : i32
    return %c0_i32, %c0_i32_0 : i32, i32
  }
  func.func @transform_2(%arg0: i32) -> (i32, i32) {
    %c0_i32 = arith.constant 0 : i32
    %c0_i32_0 = arith.constant 0 : i32
    %c0_i32_1 = arith.constant 0 : i32
    return %c0_i32, %c0_i32_0 : i32, i32
  }
  func.func @transform_3(%arg0: i32) -> (i32, i32) {
    %c0_i32 = arith.constant 0 : i32
    %c0_i32_0 = arith.constant 0 : i32
    %c0_i32_1 = arith.constant 0 : i32
    return %c0_i32, %c0_i32_0 : i32, i32
  }
  func.func @transform_4(%arg0: i32) -> (i32, i32) {
    %c0_i32 = arith.constant 0 : i32
    %c0_i32_0 = arith.constant 0 : i32
    %c0_i32_1 = arith.constant 0 : i32
    return %c0_i32, %c0_i32_0 : i32, i32
  }
  func.func @transform_5(%arg0: i32) -> (i32, i32) {
    %c0_i32 = arith.constant 0 : i32
    %c0_i32_0 = arith.constant 0 : i32
    %c0_i32_1 = arith.constant 0 : i32
    return %c0_i32, %c0_i32_0 : i32, i32
  }
  func.func @transform_6(%arg0: i32) -> (i32, i32) {
    %c0_i32 = arith.constant 0 : i32
    %c0_i32_0 = arith.constant 0 : i32
    %c0_i32_1 = arith.constant 0 : i32
    return %c0_i32, %c0_i32_0 : i32, i32
  }
  func.func @transform_7(%arg0: i32) -> (i32, i32) {
    %c0_i32 = arith.constant 0 : i32
    %c0_i32_0 = arith.constant 0 : i32
    %c0_i32_1 = arith.constant 0 : i32
    return %c0_i32, %c0_i32_0 : i32, i32
  }
  func.func @transform_8(%arg0: i32) -> (i32, i32) {
    %c0_i32 = arith.constant 0 : i32
    %c0_i32_0 = arith.constant 0 : i32
    %c0_i32_1 = arith.constant 0 : i32
    return %c0_i32, %c0_i32_0 : i32, i32
  }
  func.func @transform_9(%arg0: i32) -> (i32, i32) {
    %c0_i32 = arith.constant 0 : i32
    %c0_i32_0 = arith.constant 0 : i32
    %c0_i32_1 = arith.constant 0 : i32
    return %c0_i32, %c0_i32_0 : i32, i32
  }
  func.func @transform_10(%arg0: i32) -> (i32, i32) {
    %c0_i32 = arith.constant 0 : i32
    %c0_i32_0 = arith.constant 0 : i32
    %c0_i32_1 = arith.constant 0 : i32
    return %c0_i32, %c0_i32_0 : i32, i32
  }
  func.func @transform_11(%arg0: i32) -> (i32, i32) {
    %c0_i32 = arith.constant 0 : i32
    %c0_i32_0 = arith.constant 0 : i32
    %c0_i32_1 = arith.constant 0 : i32
    return %c0_i32, %c0_i32_0 : i32, i32
  }
  func.func @transform_12(%arg0: i32) -> (i32, i32) {
    %c0_i32 = arith.constant 0 : i32
    %c0_i32_0 = arith.constant 0 : i32
    %c0_i32_1 = arith.constant 0 : i32
    return %c0_i32, %c0_i32_0 : i32, i32
  }
  func.func @transform_13(%arg0: i32) -> (i32, i32) {
    %c0_i32 = arith.constant 0 : i32
    %c0_i32_0 = arith.constant 0 : i32
    %c0_i32_1 = arith.constant 0 : i32
    return %c0_i32, %c0_i32_0 : i32, i32
  }
  func.func @transform_14(%arg0: i32) -> (i32, i32) {
    %c0_i32 = arith.constant 0 : i32
    %c0_i32_0 = arith.constant 0 : i32
    %c0_i32_1 = arith.constant 0 : i32
    return %c0_i32, %c0_i32_0 : i32, i32
  }
}

module attributes {stable_mosaic.version = 11 : i64} {
  func.func @_bilstm_kernel(%arg0: i32, %arg1: memref<64x128xf32, #tpu.memory_space<vmem>>, %arg2: memref<128x512xf32, #tpu.memory_space<vmem>>, %arg3: memref<128x512xf32, #tpu.memory_space<vmem>>, %arg4: memref<1x512xf32, #tpu.memory_space<vmem>>, %arg5: memref<128x512xf32, #tpu.memory_space<vmem>>, %arg6: memref<128x512xf32, #tpu.memory_space<vmem>>, %arg7: memref<1x512xf32, #tpu.memory_space<vmem>>, %arg8: memref<8x128xf32, #tpu.memory_space<vmem>>, %arg9: memref<8x128xf32, #tpu.memory_space<vmem>>, %arg10: memref<8x128xf32, #tpu.memory_space<vmem>>, %arg11: memref<8x128xf32, #tpu.memory_space<vmem>>, %arg12: memref<128x128xf32, #tpu.memory_space<vmem>>, %arg13: memref<128x128xf32, #tpu.memory_space<vmem>>, %arg14: memref<1x128xf32, #tpu.memory_space<vmem>>, %arg15: memref<8x128xf32, #tpu.memory_space<vmem>>, %arg16: memref<8x128xf32, #tpu.memory_space<vmem>>, %arg17: memref<8x128xf32, #tpu.memory_space<vmem>>, %arg18: memref<64x512xf32, #tpu.memory_space<vmem>>) attributes {dimension_semantics = [#tpu.dimension_semantics<arbitrary>], iteration_bounds = array<i64: 1>, scalar_prefetch = 0 : i64, scratch_operands = 3 : i64, tpu.core_type = #tpu.core_type<tc>, window_params = [{transform_indices = @transform_0, window_bounds = array<i64: 64, 128>}, {pipeline_mode = #tpu.pipeline_mode<synchronous>, transform_indices = @transform_1, window_bounds = array<i64: 128, 512>}, {pipeline_mode = #tpu.pipeline_mode<synchronous>, transform_indices = @transform_2, window_bounds = array<i64: 128, 512>}, {pipeline_mode = #tpu.pipeline_mode<synchronous>, transform_indices = @transform_3, window_bounds = array<i64: 1, 512>}, {pipeline_mode = #tpu.pipeline_mode<synchronous>, transform_indices = @transform_4, window_bounds = array<i64: 128, 512>}, {pipeline_mode = #tpu.pipeline_mode<synchronous>, transform_indices = @transform_5, window_bounds = array<i64: 128, 512>}, {pipeline_mode = #tpu.pipeline_mode<synchronous>, transform_indices = @transform_6, window_bounds = array<i64: 1, 512>}, {pipeline_mode = #tpu.pipeline_mode<synchronous>, transform_indices = @transform_7, window_bounds = array<i64: 8, 128>}, {pipeline_mode = #tpu.pipeline_mode<synchronous>, transform_indices = @transform_8, window_bounds = array<i64: 8, 128>}, {pipeline_mode = #tpu.pipeline_mode<synchronous>, transform_indices = @transform_9, window_bounds = array<i64: 8, 128>}, {pipeline_mode = #tpu.pipeline_mode<synchronous>, transform_indices = @transform_10, window_bounds = array<i64: 8, 128>}, {pipeline_mode = #tpu.pipeline_mode<synchronous>, transform_indices = @transform_11, window_bounds = array<i64: 128, 128>}, {pipeline_mode = #tpu.pipeline_mode<synchronous>, transform_indices = @transform_12, window_bounds = array<i64: 128, 128>}, {pipeline_mode = #tpu.pipeline_mode<synchronous>, transform_indices = @transform_13, window_bounds = array<i64: 1, 128>}, {pipeline_mode = #tpu.pipeline_mode<synchronous>, transform_indices = @transform_14, window_bounds = array<i64: 8, 128>}]} {
    %c0_i32 = arith.constant 0 : i32
    %0 = arith.cmpi eq, %arg0, %c0_i32 : i32
    %1 = arith.extui %0 : i1 to i32
    %c0_i32_0 = arith.constant 0 : i32
    %2 = arith.cmpi ne, %1, %c0_i32_0 : i32
    scf.if %2 {
      %c0_86 = arith.constant 0 : index
      %c0_87 = arith.constant 0 : index
      %300 = vector.load %arg8[%c0_86, %c0_87] : memref<8x128xf32, #tpu.memory_space<vmem>>, vector<8x128xf32>
      %c0_88 = arith.constant 0 : index
      %c0_89 = arith.constant 0 : index
      %301 = vector.load %arg16[%c0_88, %c0_89] : memref<8x128xf32, #tpu.memory_space<vmem>>, vector<8x128xf32>
      tpu.vector_store %arg16[%c0_88, %c0_89], %300 {strides = array<i32>} : memref<8x128xf32, #tpu.memory_space<vmem>>, vector<8x128xf32>,
      %c0_90 = arith.constant 0 : index
      %c0_91 = arith.constant 0 : index
      %302 = vector.load %arg9[%c0_90, %c0_91] : memref<8x128xf32, #tpu.memory_space<vmem>>, vector<8x128xf32>
      %c0_92 = arith.constant 0 : index
      %c0_93 = arith.constant 0 : index
      %303 = vector.load %arg17[%c0_92, %c0_93] : memref<8x128xf32, #tpu.memory_space<vmem>>, vector<8x128xf32>
      tpu.vector_store %arg17[%c0_92, %c0_93], %302 {strides = array<i32>} : memref<8x128xf32, #tpu.memory_space<vmem>>, vector<8x128xf32>,
    } else {
    }
    %c0 = arith.constant 0 : index
    %c0_1 = arith.constant 0 : index
    %3 = vector.load %arg1[%c0, %c0_1] : memref<64x128xf32, #tpu.memory_space<vmem>>, vector<64x128xf32>
    %c0_2 = arith.constant 0 : index
    %c0_3 = arith.constant 0 : index
    %4 = vector.load %arg2[%c0_2, %c0_3] : memref<128x512xf32, #tpu.memory_space<vmem>>, vector<128x512xf32>
    %cst = arith.constant dense<0.000000e+00> : vector<64x512xf32>
    %5 = tpu.matmul %3, %4, %cst {dimension_numbers = #tpu.dot_dimension_numbers<[1], [0], [0], [1], [0, 0, 1, 1], [], []>} : vector<64x128xf32>, vector<128x512xf32>, vector<64x512xf32> -> vector<64x512xf32>
    %c0_4 = arith.constant 0 : index
    %c0_5 = arith.constant 0 : index
    %6 = vector.load %arg4[%c0_4, %c0_5] : memref<1x512xf32, #tpu.memory_space<vmem>>, vector<1x512xf32>
    %7 = vector.broadcast %6 : vector<1x512xf32> to vector<64x512xf32>
    %8 = arith.addf %5, %7 : vector<64x512xf32>
    %c0_6 = arith.constant 0 : index
    %c0_7 = arith.constant 0 : index
    %9 = vector.load %arg18[%c0_6, %c0_7] : memref<64x512xf32, #tpu.memory_space<vmem>>, vector<64x512xf32>
    tpu.vector_store %arg18[%c0_6, %c0_7], %8 {strides = array<i32>} : memref<64x512xf32, #tpu.memory_space<vmem>>, vector<64x512xf32>,
    %c8_i32 = arith.constant 8 : i32
    %10 = arith.muli %arg0, %c8_i32 : i32
    %c8_i32_8 = arith.constant 8 : i32
    %11 = arith.subi %c8_i32_8, %10 : i32
    %c8_i32_9 = arith.constant 8 : i32
    %12 = arith.minsi %c8_i32_9, %11 : i32
    %c0_10 = arith.constant 0 : index
    %c0_11 = arith.constant 0 : index
    %13 = vector.load %arg16[%c0_10, %c0_11] : memref<8x128xf32, #tpu.memory_space<vmem>>, vector<8x128xf32>
    %c0_12 = arith.constant 0 : index
    %c0_13 = arith.constant 0 : index
    %14 = vector.load %arg17[%c0_12, %c0_13] : memref<8x128xf32, #tpu.memory_space<vmem>>, vector<8x128xf32>
    %c0_i32_14 = arith.constant 0 : i32
    %c8_i32_15 = arith.constant 8 : i32
    %15 = arith.muli %c0_i32_14, %c8_i32_15 : i32
    %16 = tpu.assume_multiple %15, 8 : i32
    %17 = arith.index_cast %16 : i32 to index
    %c0_16 = arith.constant 0 : index
    %18 = vector.load %arg18[%17, %c0_16] : memref<64x512xf32, #tpu.memory_space<vmem>>, vector<8x512xf32>
    %c0_17 = arith.constant 0 : index
    %c0_18 = arith.constant 0 : index
    %19 = vector.load %arg3[%c0_17, %c0_18] : memref<128x512xf32, #tpu.memory_space<vmem>>, vector<128x512xf32>
    %cst_19 = arith.constant dense<0.000000e+00> : vector<8x512xf32>
    %20 = tpu.matmul %13, %19, %cst_19 {dimension_numbers = #tpu.dot_dimension_numbers<[1], [0], [0], [1], [0, 0, 1, 1], [], []>} : vector<8x128xf32>, vector<128x512xf32>, vector<8x512xf32> -> vector<8x512xf32>
    %21 = arith.addf %18, %20 : vector<8x512xf32>
    %22 = vector.extract_strided_slice %21 {offsets = [0, 0], sizes = [8, 128], strides = [1, 1]} : vector<8x512xf32> to vector<8x128xf32>
    %23 = arith.negf %22 : vector<8x128xf32>
    %24 = math.exp %23 : vector<8x128xf32>
    %cst_20 = arith.constant 1.000000e+00 : f32
    %25 = vector.broadcast %cst_20 : f32 to vector<8x128xf32>
    %26 = arith.addf %25, %24 : vector<8x128xf32>
    %27 = arith.divf %25, %26 : vector<8x128xf32>
    %28 = vector.extract_strided_slice %21 {offsets = [0, 128], sizes = [8, 128], strides = [1, 1]} : vector<8x512xf32> to vector<8x128xf32>
    %29 = arith.negf %28 : vector<8x128xf32>
    %30 = math.exp %29 : vector<8x128xf32>
    %cst_21 = arith.constant 1.000000e+00 : f32
    %31 = vector.broadcast %cst_21 : f32 to vector<8x128xf32>
    %32 = arith.addf %31, %30 : vector<8x128xf32>
    %33 = arith.divf %31, %32 : vector<8x128xf32>
    %34 = vector.extract_strided_slice %21 {offsets = [0, 256], sizes = [8, 128], strides = [1, 1]} : vector<8x512xf32> to vector<8x128xf32>
    %35 = math.tanh %34 : vector<8x128xf32>
    %36 = vector.extract_strided_slice %21 {offsets = [0, 384], sizes = [8, 128], strides = [1, 1]} : vector<8x512xf32> to vector<8x128xf32>
    %37 = arith.negf %36 : vector<8x128xf32>
    %38 = math.exp %37 : vector<8x128xf32>
    %cst_22 = arith.constant 1.000000e+00 : f32
    %39 = vector.broadcast %cst_22 : f32 to vector<8x128xf32>
    %40 = arith.addf %39, %38 : vector<8x128xf32>
    %41 = arith.divf %39, %40 : vector<8x128xf32>
    %42 = arith.mulf %33, %14 : vector<8x128xf32>
    %43 = arith.mulf %27, %35 : vector<8x128xf32>
    %44 = arith.addf %42, %43 : vector<8x128xf32>
    %45 = math.tanh %44 : vector<8x128xf32>
    %46 = arith.mulf %41, %45 : vector<8x128xf32>
    %47 = arith.cmpi slt, %c0_i32_14, %12 : i32
    %48 = arith.select %47, %46, %13 : vector<8x128xf32>
    %49 = arith.select %47, %44, %14 : vector<8x128xf32>
    %c1_i32 = arith.constant 1 : i32
    %c8_i32_23 = arith.constant 8 : i32
    %50 = arith.muli %c1_i32, %c8_i32_23 : i32
    %51 = tpu.assume_multiple %50, 8 : i32
    %52 = arith.index_cast %51 : i32 to index
    %c0_24 = arith.constant 0 : index
    %53 = vector.load %arg18[%52, %c0_24] : memref<64x512xf32, #tpu.memory_space<vmem>>, vector<8x512xf32>
    %c0_25 = arith.constant 0 : index
    %c0_26 = arith.constant 0 : index
    %54 = vector.load %arg3[%c0_25, %c0_26] : memref<128x512xf32, #tpu.memory_space<vmem>>, vector<128x512xf32>
    %cst_27 = arith.constant dense<0.000000e+00> : vector<8x512xf32>
    %55 = tpu.matmul %48, %54, %cst_27 {dimension_numbers = #tpu.dot_dimension_numbers<[1], [0], [0], [1], [0, 0, 1, 1], [], []>} : vector<8x128xf32>, vector<128x512xf32>, vector<8x512xf32> -> vector<8x512xf32>
    %56 = arith.addf %53, %55 : vector<8x512xf32>
    %57 = vector.extract_strided_slice %56 {offsets = [0, 0], sizes = [8, 128], strides = [1, 1]} : vector<8x512xf32> to vector<8x128xf32>
    %58 = arith.negf %57 : vector<8x128xf32>
    %59 = math.exp %58 : vector<8x128xf32>
    %cst_28 = arith.constant 1.000000e+00 : f32
    %60 = vector.broadcast %cst_28 : f32 to vector<8x128xf32>
    %61 = arith.addf %60, %59 : vector<8x128xf32>
    %62 = arith.divf %60, %61 : vector<8x128xf32>
    %63 = vector.extract_strided_slice %56 {offsets = [0, 128], sizes = [8, 128], strides = [1, 1]} : vector<8x512xf32> to vector<8x128xf32>
    %64 = arith.negf %63 : vector<8x128xf32>
    %65 = math.exp %64 : vector<8x128xf32>
    %cst_29 = arith.constant 1.000000e+00 : f32
    %66 = vector.broadcast %cst_29 : f32 to vector<8x128xf32>
    %67 = arith.addf %66, %65 : vector<8x128xf32>
    %68 = arith.divf %66, %67 : vector<8x128xf32>
    %69 = vector.extract_strided_slice %56 {offsets = [0, 256], sizes = [8, 128], strides = [1, 1]} : vector<8x512xf32> to vector<8x128xf32>
    %70 = math.tanh %69 : vector<8x128xf32>
    %71 = vector.extract_strided_slice %56 {offsets = [0, 384], sizes = [8, 128], strides = [1, 1]} : vector<8x512xf32> to vector<8x128xf32>
    %72 = arith.negf %71 : vector<8x128xf32>
    %73 = math.exp %72 : vector<8x128xf32>
    %cst_30 = arith.constant 1.000000e+00 : f32
    %74 = vector.broadcast %cst_30 : f32 to vector<8x128xf32>
    %75 = arith.addf %74, %73 : vector<8x128xf32>
    %76 = arith.divf %74, %75 : vector<8x128xf32>
    %77 = arith.mulf %68, %49 : vector<8x128xf32>
    %78 = arith.mulf %62, %70 : vector<8x128xf32>
    %79 = arith.addf %77, %78 : vector<8x128xf32>
    %80 = math.tanh %79 : vector<8x128xf32>
    %81 = arith.mulf %76, %80 : vector<8x128xf32>
    %82 = arith.cmpi slt, %c1_i32, %12 : i32
    %83 = arith.select %82, %81, %48 : vector<8x128xf32>
    %84 = arith.select %82, %79, %49 : vector<8x128xf32>
    %c2_i32 = arith.constant 2 : i32
    %c8_i32_31 = arith.constant 8 : i32
    %85 = arith.muli %c2_i32, %c8_i32_31 : i32
    %86 = tpu.assume_multiple %85, 8 : i32
    %87 = arith.index_cast %86 : i32 to index
    %c0_32 = arith.constant 0 : index
    %88 = vector.load %arg18[%87, %c0_32] : memref<64x512xf32, #tpu.memory_space<vmem>>, vector<8x512xf32>
    %c0_33 = arith.constant 0 : index
    %c0_34 = arith.constant 0 : index
    %89 = vector.load %arg3[%c0_33, %c0_34] : memref<128x512xf32, #tpu.memory_space<vmem>>, vector<128x512xf32>
    %cst_35 = arith.constant dense<0.000000e+00> : vector<8x512xf32>
    %90 = tpu.matmul %83, %89, %cst_35 {dimension_numbers = #tpu.dot_dimension_numbers<[1], [0], [0], [1], [0, 0, 1, 1], [], []>} : vector<8x128xf32>, vector<128x512xf32>, vector<8x512xf32> -> vector<8x512xf32>
    %91 = arith.addf %88, %90 : vector<8x512xf32>
    %92 = vector.extract_strided_slice %91 {offsets = [0, 0], sizes = [8, 128], strides = [1, 1]} : vector<8x512xf32> to vector<8x128xf32>
    %93 = arith.negf %92 : vector<8x128xf32>
    %94 = math.exp %93 : vector<8x128xf32>
    %cst_36 = arith.constant 1.000000e+00 : f32
    %95 = vector.broadcast %cst_36 : f32 to vector<8x128xf32>
    %96 = arith.addf %95, %94 : vector<8x128xf32>
    %97 = arith.divf %95, %96 : vector<8x128xf32>
    %98 = vector.extract_strided_slice %91 {offsets = [0, 128], sizes = [8, 128], strides = [1, 1]} : vector<8x512xf32> to vector<8x128xf32>
    %99 = arith.negf %98 : vector<8x128xf32>
    %100 = math.exp %99 : vector<8x128xf32>
    %cst_37 = arith.constant 1.000000e+00 : f32
    %101 = vector.broadcast %cst_37 : f32 to vector<8x128xf32>
    %102 = arith.addf %101, %100 : vector<8x128xf32>
    %103 = arith.divf %101, %102 : vector<8x128xf32>
    %104 = vector.extract_strided_slice %91 {offsets = [0, 256], sizes = [8, 128], strides = [1, 1]} : vector<8x512xf32> to vector<8x128xf32>
    %105 = math.tanh %104 : vector<8x128xf32>
    %106 = vector.extract_strided_slice %91 {offsets = [0, 384], sizes = [8, 128], strides = [1, 1]} : vector<8x512xf32> to vector<8x128xf32>
    %107 = arith.negf %106 : vector<8x128xf32>
    %108 = math.exp %107 : vector<8x128xf32>
    %cst_38 = arith.constant 1.000000e+00 : f32
    %109 = vector.broadcast %cst_38 : f32 to vector<8x128xf32>
    %110 = arith.addf %109, %108 : vector<8x128xf32>
    %111 = arith.divf %109, %110 : vector<8x128xf32>
    %112 = arith.mulf %103, %84 : vector<8x128xf32>
    %113 = arith.mulf %97, %105 : vector<8x128xf32>
    %114 = arith.addf %112, %113 : vector<8x128xf32>
    %115 = math.tanh %114 : vector<8x128xf32>
    %116 = arith.mulf %111, %115 : vector<8x128xf32>
    %117 = arith.cmpi slt, %c2_i32, %12 : i32
    %118 = arith.select %117, %116, %83 : vector<8x128xf32>
    %119 = arith.select %117, %114, %84 : vector<8x128xf32>
    %c3_i32 = arith.constant 3 : i32
    %c8_i32_39 = arith.constant 8 : i32
    %120 = arith.muli %c3_i32, %c8_i32_39 : i32
    %121 = tpu.assume_multiple %120, 8 : i32
    %122 = arith.index_cast %121 : i32 to index
    %c0_40 = arith.constant 0 : index
    %123 = vector.load %arg18[%122, %c0_40] : memref<64x512xf32, #tpu.memory_space<vmem>>, vector<8x512xf32>
    %c0_41 = arith.constant 0 : index
    %c0_42 = arith.constant 0 : index
    %124 = vector.load %arg3[%c0_41, %c0_42] : memref<128x512xf32, #tpu.memory_space<vmem>>, vector<128x512xf32>
    %cst_43 = arith.constant dense<0.000000e+00> : vector<8x512xf32>
    %125 = tpu.matmul %118, %124, %cst_43 {dimension_numbers = #tpu.dot_dimension_numbers<[1], [0], [0], [1], [0, 0, 1, 1], [], []>} : vector<8x128xf32>, vector<128x512xf32>, vector<8x512xf32> -> vector<8x512xf32>
    %126 = arith.addf %123, %125 : vector<8x512xf32>
    %127 = vector.extract_strided_slice %126 {offsets = [0, 0], sizes = [8, 128], strides = [1, 1]} : vector<8x512xf32> to vector<8x128xf32>
    %128 = arith.negf %127 : vector<8x128xf32>
    %129 = math.exp %128 : vector<8x128xf32>
    %cst_44 = arith.constant 1.000000e+00 : f32
    %130 = vector.broadcast %cst_44 : f32 to vector<8x128xf32>
    %131 = arith.addf %130, %129 : vector<8x128xf32>
    %132 = arith.divf %130, %131 : vector<8x128xf32>
    %133 = vector.extract_strided_slice %126 {offsets = [0, 128], sizes = [8, 128], strides = [1, 1]} : vector<8x512xf32> to vector<8x128xf32>
    %134 = arith.negf %133 : vector<8x128xf32>
    %135 = math.exp %134 : vector<8x128xf32>
    %cst_45 = arith.constant 1.000000e+00 : f32
    %136 = vector.broadcast %cst_45 : f32 to vector<8x128xf32>
    %137 = arith.addf %136, %135 : vector<8x128xf32>
    %138 = arith.divf %136, %137 : vector<8x128xf32>
    %139 = vector.extract_strided_slice %126 {offsets = [0, 256], sizes = [8, 128], strides = [1, 1]} : vector<8x512xf32> to vector<8x128xf32>
    %140 = math.tanh %139 : vector<8x128xf32>
    %141 = vector.extract_strided_slice %126 {offsets = [0, 384], sizes = [8, 128], strides = [1, 1]} : vector<8x512xf32> to vector<8x128xf32>
    %142 = arith.negf %141 : vector<8x128xf32>
    %143 = math.exp %142 : vector<8x128xf32>
    %cst_46 = arith.constant 1.000000e+00 : f32
    %144 = vector.broadcast %cst_46 : f32 to vector<8x128xf32>
    %145 = arith.addf %144, %143 : vector<8x128xf32>
    %146 = arith.divf %144, %145 : vector<8x128xf32>
    %147 = arith.mulf %138, %119 : vector<8x128xf32>
    %148 = arith.mulf %132, %140 : vector<8x128xf32>
    %149 = arith.addf %147, %148 : vector<8x128xf32>
    %150 = math.tanh %149 : vector<8x128xf32>
    %151 = arith.mulf %146, %150 : vector<8x128xf32>
    %152 = arith.cmpi slt, %c3_i32, %12 : i32
    %153 = arith.select %152, %151, %118 : vector<8x128xf32>
    %154 = arith.select %152, %149, %119 : vector<8x128xf32>
    %c4_i32 = arith.constant 4 : i32
    %c8_i32_47 = arith.constant 8 : i32
    %155 = arith.muli %c4_i32, %c8_i32_47 : i32
    %156 = tpu.assume_multiple %155, 8 : i32
    %157 = arith.index_cast %156 : i32 to index
    %c0_48 = arith.constant 0 : index
    %158 = vector.load %arg18[%157, %c0_48] : memref<64x512xf32, #tpu.memory_space<vmem>>, vector<8x512xf32>
    %c0_49 = arith.constant 0 : index
    %c0_50 = arith.constant 0 : index
    %159 = vector.load %arg3[%c0_49, %c0_50] : memref<128x512xf32, #tpu.memory_space<vmem>>, vector<128x512xf32>
    %cst_51 = arith.constant dense<0.000000e+00> : vector<8x512xf32>
    %160 = tpu.matmul %153, %159, %cst_51 {dimension_numbers = #tpu.dot_dimension_numbers<[1], [0], [0], [1], [0, 0, 1, 1], [], []>} : vector<8x128xf32>, vector<128x512xf32>, vector<8x512xf32> -> vector<8x512xf32>
    %161 = arith.addf %158, %160 : vector<8x512xf32>
    %162 = vector.extract_strided_slice %161 {offsets = [0, 0], sizes = [8, 128], strides = [1, 1]} : vector<8x512xf32> to vector<8x128xf32>
    %163 = arith.negf %162 : vector<8x128xf32>
    %164 = math.exp %163 : vector<8x128xf32>
    %cst_52 = arith.constant 1.000000e+00 : f32
    %165 = vector.broadcast %cst_52 : f32 to vector<8x128xf32>
    %166 = arith.addf %165, %164 : vector<8x128xf32>
    %167 = arith.divf %165, %166 : vector<8x128xf32>
    %168 = vector.extract_strided_slice %161 {offsets = [0, 128], sizes = [8, 128], strides = [1, 1]} : vector<8x512xf32> to vector<8x128xf32>
    %169 = arith.negf %168 : vector<8x128xf32>
    %170 = math.exp %169 : vector<8x128xf32>
    %cst_53 = arith.constant 1.000000e+00 : f32
    %171 = vector.broadcast %cst_53 : f32 to vector<8x128xf32>
    %172 = arith.addf %171, %170 : vector<8x128xf32>
    %173 = arith.divf %171, %172 : vector<8x128xf32>
    %174 = vector.extract_strided_slice %161 {offsets = [0, 256], sizes = [8, 128], strides = [1, 1]} : vector<8x512xf32> to vector<8x128xf32>
    %175 = math.tanh %174 : vector<8x128xf32>
    %176 = vector.extract_strided_slice %161 {offsets = [0, 384], sizes = [8, 128], strides = [1, 1]} : vector<8x512xf32> to vector<8x128xf32>
    %177 = arith.negf %176 : vector<8x128xf32>
    %178 = math.exp %177 : vector<8x128xf32>
    %cst_54 = arith.constant 1.000000e+00 : f32
    %179 = vector.broadcast %cst_54 : f32 to vector<8x128xf32>
    %180 = arith.addf %179, %178 : vector<8x128xf32>
    %181 = arith.divf %179, %180 : vector<8x128xf32>
    %182 = arith.mulf %173, %154 : vector<8x128xf32>
    %183 = arith.mulf %167, %175 : vector<8x128xf32>
    %184 = arith.addf %182, %183 : vector<8x128xf32>
    %185 = math.tanh %184 : vector<8x128xf32>
    %186 = arith.mulf %181, %185 : vector<8x128xf32>
    %187 = arith.cmpi slt, %c4_i32, %12 : i32
    %188 = arith.select %187, %186, %153 : vector<8x128xf32>
    %189 = arith.select %187, %184, %154 : vector<8x128xf32>
    %c5_i32 = arith.constant 5 : i32
    %c8_i32_55 = arith.constant 8 : i32
    %190 = arith.muli %c5_i32, %c8_i32_55 : i32
    %191 = tpu.assume_multiple %190, 8 : i32
    %192 = arith.index_cast %191 : i32 to index
    %c0_56 = arith.constant 0 : index
    %193 = vector.load %arg18[%192, %c0_56] : memref<64x512xf32, #tpu.memory_space<vmem>>, vector<8x512xf32>
    %c0_57 = arith.constant 0 : index
    %c0_58 = arith.constant 0 : index
    %194 = vector.load %arg3[%c0_57, %c0_58] : memref<128x512xf32, #tpu.memory_space<vmem>>, vector<128x512xf32>
    %cst_59 = arith.constant dense<0.000000e+00> : vector<8x512xf32>
    %195 = tpu.matmul %188, %194, %cst_59 {dimension_numbers = #tpu.dot_dimension_numbers<[1], [0], [0], [1], [0, 0, 1, 1], [], []>} : vector<8x128xf32>, vector<128x512xf32>, vector<8x512xf32> -> vector<8x512xf32>
    %196 = arith.addf %193, %195 : vector<8x512xf32>
    %197 = vector.extract_strided_slice %196 {offsets = [0, 0], sizes = [8, 128], strides = [1, 1]} : vector<8x512xf32> to vector<8x128xf32>
    %198 = arith.negf %197 : vector<8x128xf32>
    %199 = math.exp %198 : vector<8x128xf32>
    %cst_60 = arith.constant 1.000000e+00 : f32
    %200 = vector.broadcast %cst_60 : f32 to vector<8x128xf32>
    %201 = arith.addf %200, %199 : vector<8x128xf32>
    %202 = arith.divf %200, %201 : vector<8x128xf32>
    %203 = vector.extract_strided_slice %196 {offsets = [0, 128], sizes = [8, 128], strides = [1, 1]} : vector<8x512xf32> to vector<8x128xf32>
    %204 = arith.negf %203 : vector<8x128xf32>
    %205 = math.exp %204 : vector<8x128xf32>
    %cst_61 = arith.constant 1.000000e+00 : f32
    %206 = vector.broadcast %cst_61 : f32 to vector<8x128xf32>
    %207 = arith.addf %206, %205 : vector<8x128xf32>
    %208 = arith.divf %206, %207 : vector<8x128xf32>
    %209 = vector.extract_strided_slice %196 {offsets = [0, 256], sizes = [8, 128], strides = [1, 1]} : vector<8x512xf32> to vector<8x128xf32>
    %210 = math.tanh %209 : vector<8x128xf32>
    %211 = vector.extract_strided_slice %196 {offsets = [0, 384], sizes = [8, 128], strides = [1, 1]} : vector<8x512xf32> to vector<8x128xf32>
    %212 = arith.negf %211 : vector<8x128xf32>
    %213 = math.exp %212 : vector<8x128xf32>
    %cst_62 = arith.constant 1.000000e+00 : f32
    %214 = vector.broadcast %cst_62 : f32 to vector<8x128xf32>
    %215 = arith.addf %214, %213 : vector<8x128xf32>
    %216 = arith.divf %214, %215 : vector<8x128xf32>
    %217 = arith.mulf %208, %189 : vector<8x128xf32>
    %218 = arith.mulf %202, %210 : vector<8x128xf32>
    %219 = arith.addf %217, %218 : vector<8x128xf32>
    %220 = math.tanh %219 : vector<8x128xf32>
    %221 = arith.mulf %216, %220 : vector<8x128xf32>
    %222 = arith.cmpi slt, %c5_i32, %12 : i32
    %223 = arith.select %222, %221, %188 : vector<8x128xf32>
    %224 = arith.select %222, %219, %189 : vector<8x128xf32>
    %c6_i32 = arith.constant 6 : i32
    %c8_i32_63 = arith.constant 8 : i32
    %225 = arith.muli %c6_i32, %c8_i32_63 : i32
    %226 = tpu.assume_multiple %225, 8 : i32
    %227 = arith.index_cast %226 : i32 to index
    %c0_64 = arith.constant 0 : index
    %228 = vector.load %arg18[%227, %c0_64] : memref<64x512xf32, #tpu.memory_space<vmem>>, vector<8x512xf32>
    %c0_65 = arith.constant 0 : index
    %c0_66 = arith.constant 0 : index
    %229 = vector.load %arg3[%c0_65, %c0_66] : memref<128x512xf32, #tpu.memory_space<vmem>>, vector<128x512xf32>
    %cst_67 = arith.constant dense<0.000000e+00> : vector<8x512xf32>
    %230 = tpu.matmul %223, %229, %cst_67 {dimension_numbers = #tpu.dot_dimension_numbers<[1], [0], [0], [1], [0, 0, 1, 1], [], []>} : vector<8x128xf32>, vector<128x512xf32>, vector<8x512xf32> -> vector<8x512xf32>
    %231 = arith.addf %228, %230 : vector<8x512xf32>
    %232 = vector.extract_strided_slice %231 {offsets = [0, 0], sizes = [8, 128], strides = [1, 1]} : vector<8x512xf32> to vector<8x128xf32>
    %233 = arith.negf %232 : vector<8x128xf32>
    %234 = math.exp %233 : vector<8x128xf32>
    %cst_68 = arith.constant 1.000000e+00 : f32
    %235 = vector.broadcast %cst_68 : f32 to vector<8x128xf32>
    %236 = arith.addf %235, %234 : vector<8x128xf32>
    %237 = arith.divf %235, %236 : vector<8x128xf32>
    %238 = vector.extract_strided_slice %231 {offsets = [0, 128], sizes = [8, 128], strides = [1, 1]} : vector<8x512xf32> to vector<8x128xf32>
    %239 = arith.negf %238 : vector<8x128xf32>
    %240 = math.exp %239 : vector<8x128xf32>
    %cst_69 = arith.constant 1.000000e+00 : f32
    %241 = vector.broadcast %cst_69 : f32 to vector<8x128xf32>
    %242 = arith.addf %241, %240 : vector<8x128xf32>
    %243 = arith.divf %241, %242 : vector<8x128xf32>
    %244 = vector.extract_strided_slice %231 {offsets = [0, 256], sizes = [8, 128], strides = [1, 1]} : vector<8x512xf32> to vector<8x128xf32>
    %245 = math.tanh %244 : vector<8x128xf32>
    %246 = vector.extract_strided_slice %231 {offsets = [0, 384], sizes = [8, 128], strides = [1, 1]} : vector<8x512xf32> to vector<8x128xf32>
    %247 = arith.negf %246 : vector<8x128xf32>
    %248 = math.exp %247 : vector<8x128xf32>
    %cst_70 = arith.constant 1.000000e+00 : f32
    %249 = vector.broadcast %cst_70 : f32 to vector<8x128xf32>
    %250 = arith.addf %249, %248 : vector<8x128xf32>
    %251 = arith.divf %249, %250 : vector<8x128xf32>
    %252 = arith.mulf %243, %224 : vector<8x128xf32>
    %253 = arith.mulf %237, %245 : vector<8x128xf32>
    %254 = arith.addf %252, %253 : vector<8x128xf32>
    %255 = math.tanh %254 : vector<8x128xf32>
    %256 = arith.mulf %251, %255 : vector<8x128xf32>
    %257 = arith.cmpi slt, %c6_i32, %12 : i32
    %258 = arith.select %257, %256, %223 : vector<8x128xf32>
    %259 = arith.select %257, %254, %224 : vector<8x128xf32>
    %c7_i32 = arith.constant 7 : i32
    %c8_i32_71 = arith.constant 8 : i32
    %260 = arith.muli %c7_i32, %c8_i32_71 : i32
    %261 = tpu.assume_multiple %260, 8 : i32
    %262 = arith.index_cast %261 : i32 to index
    %c0_72 = arith.constant 0 : index
    %263 = vector.load %arg18[%262, %c0_72] : memref<64x512xf32, #tpu.memory_space<vmem>>, vector<8x512xf32>
    %c0_73 = arith.constant 0 : index
    %c0_74 = arith.constant 0 : index
    %264 = vector.load %arg3[%c0_73, %c0_74] : memref<128x512xf32, #tpu.memory_space<vmem>>, vector<128x512xf32>
    %cst_75 = arith.constant dense<0.000000e+00> : vector<8x512xf32>
    %265 = tpu.matmul %258, %264, %cst_75 {dimension_numbers = #tpu.dot_dimension_numbers<[1], [0], [0], [1], [0, 0, 1, 1], [], []>} : vector<8x128xf32>, vector<128x512xf32>, vector<8x512xf32> -> vector<8x512xf32>
    %266 = arith.addf %263, %265 : vector<8x512xf32>
    %267 = vector.extract_strided_slice %266 {offsets = [0, 0], sizes = [8, 128], strides = [1, 1]} : vector<8x512xf32> to vector<8x128xf32>
    %268 = arith.negf %267 : vector<8x128xf32>
    %269 = math.exp %268 : vector<8x128xf32>
    %cst_76 = arith.constant 1.000000e+00 : f32
    %270 = vector.broadcast %cst_76 : f32 to vector<8x128xf32>
    %271 = arith.addf %270, %269 : vector<8x128xf32>
    %272 = arith.divf %270, %271 : vector<8x128xf32>
    %273 = vector.extract_strided_slice %266 {offsets = [0, 128], sizes = [8, 128], strides = [1, 1]} : vector<8x512xf32> to vector<8x128xf32>
    %274 = arith.negf %273 : vector<8x128xf32>
    %275 = math.exp %274 : vector<8x128xf32>
    %cst_77 = arith.constant 1.000000e+00 : f32
    %276 = vector.broadcast %cst_77 : f32 to vector<8x128xf32>
    %277 = arith.addf %276, %275 : vector<8x128xf32>
    %278 = arith.divf %276, %277 : vector<8x128xf32>
    %279 = vector.extract_strided_slice %266 {offsets = [0, 256], sizes = [8, 128], strides = [1, 1]} : vector<8x512xf32> to vector<8x128xf32>
    %280 = math.tanh %279 : vector<8x128xf32>
    %281 = vector.extract_strided_slice %266 {offsets = [0, 384], sizes = [8, 128], strides = [1, 1]} : vector<8x512xf32> to vector<8x128xf32>
    %282 = arith.negf %281 : vector<8x128xf32>
    %283 = math.exp %282 : vector<8x128xf32>
    %cst_78 = arith.constant 1.000000e+00 : f32
    %284 = vector.broadcast %cst_78 : f32 to vector<8x128xf32>
    %285 = arith.addf %284, %283 : vector<8x128xf32>
    %286 = arith.divf %284, %285 : vector<8x128xf32>
    %287 = arith.mulf %278, %259 : vector<8x128xf32>
    %288 = arith.mulf %272, %280 : vector<8x128xf32>
    %289 = arith.addf %287, %288 : vector<8x128xf32>
    %290 = math.tanh %289 : vector<8x128xf32>
    %291 = arith.mulf %286, %290 : vector<8x128xf32>
    %292 = arith.cmpi slt, %c7_i32, %12 : i32
    %293 = arith.select %292, %291, %258 : vector<8x128xf32>
    %294 = arith.select %292, %289, %259 : vector<8x128xf32>
    %c8_i32_79 = arith.constant 8 : i32
    %c0_80 = arith.constant 0 : index
    %c0_81 = arith.constant 0 : index
    %295 = vector.load %arg16[%c0_80, %c0_81] : memref<8x128xf32, #tpu.memory_space<vmem>>, vector<8x128xf32>
    tpu.vector_store %arg16[%c0_80, %c0_81], %293 {strides = array<i32>} : memref<8x128xf32, #tpu.memory_space<vmem>>, vector<8x128xf32>,
    %c0_82 = arith.constant 0 : index
    %c0_83 = arith.constant 0 : index
    %296 = vector.load %arg17[%c0_82, %c0_83] : memref<8x128xf32, #tpu.memory_space<vmem>>, vector<8x128xf32>
    tpu.vector_store %arg17[%c0_82, %c0_83], %294 {strides = array<i32>} : memref<8x128xf32, #tpu.memory_space<vmem>>, vector<8x128xf32>,
    %c0_i32_84 = arith.constant 0 : i32
    %297 = arith.cmpi eq, %arg0, %c0_i32_84 : i32
    %298 = arith.extui %297 : i1 to i32
    %c0_i32_85 = arith.constant 0 : i32
    %299 = arith.cmpi ne, %298, %c0_i32_85 : i32
    scf.if %299 {
      %c56 = arith.constant 56 : index
      %c0_86 = arith.constant 0 : index
      %300 = vector.load %arg1[%c56, %c0_86] : memref<64x128xf32, #tpu.memory_space<vmem>>, vector<8x128xf32>
      %c0_87 = arith.constant 0 : index
      %c0_88 = arith.constant 0 : index
      %301 = vector.load %arg5[%c0_87, %c0_88] : memref<128x512xf32, #tpu.memory_space<vmem>>, vector<128x512xf32>
      %cst_89 = arith.constant dense<0.000000e+00> : vector<8x512xf32>
      %302 = tpu.matmul %300, %301, %cst_89 {dimension_numbers = #tpu.dot_dimension_numbers<[1], [0], [0], [1], [0, 0, 1, 1], [], []>} : vector<8x128xf32>, vector<128x512xf32>, vector<8x512xf32> -> vector<8x512xf32>
      %c0_90 = arith.constant 0 : index
      %c0_91 = arith.constant 0 : index
      %303 = vector.load %arg10[%c0_90, %c0_91] : memref<8x128xf32, #tpu.memory_space<vmem>>, vector<8x128xf32>
      %c0_92 = arith.constant 0 : index
      %c0_93 = arith.constant 0 : index
      %304 = vector.load %arg6[%c0_92, %c0_93] : memref<128x512xf32, #tpu.memory_space<vmem>>, vector<128x512xf32>
      %cst_94 = arith.constant dense<0.000000e+00> : vector<8x512xf32>
      %305 = tpu.matmul %303, %304, %cst_94 {dimension_numbers = #tpu.dot_dimension_numbers<[1], [0], [0], [1], [0, 0, 1, 1], [], []>} : vector<8x128xf32>, vector<128x512xf32>, vector<8x512xf32> -> vector<8x512xf32>
      %306 = arith.addf %302, %305 : vector<8x512xf32>
      %c0_95 = arith.constant 0 : index
      %c0_96 = arith.constant 0 : index
      %307 = vector.load %arg7[%c0_95, %c0_96] : memref<1x512xf32, #tpu.memory_space<vmem>>, vector<1x512xf32>
      %308 = vector.broadcast %307 : vector<1x512xf32> to vector<8x512xf32>
      %309 = arith.addf %306, %308 : vector<8x512xf32>
      %310 = vector.extract_strided_slice %309 {offsets = [0, 0], sizes = [8, 128], strides = [1, 1]} : vector<8x512xf32> to vector<8x128xf32>
      %311 = arith.negf %310 : vector<8x128xf32>
      %312 = math.exp %311 : vector<8x128xf32>
      %cst_97 = arith.constant 1.000000e+00 : f32
      %313 = vector.broadcast %cst_97 : f32 to vector<8x128xf32>
      %314 = arith.addf %313, %312 : vector<8x128xf32>
      %315 = arith.divf %313, %314 : vector<8x128xf32>
      %316 = vector.extract_strided_slice %309 {offsets = [0, 128], sizes = [8, 128], strides = [1, 1]} : vector<8x512xf32> to vector<8x128xf32>
      %317 = arith.negf %316 : vector<8x128xf32>
      %318 = math.exp %317 : vector<8x128xf32>
      %cst_98 = arith.constant 1.000000e+00 : f32
      %319 = vector.broadcast %cst_98 : f32 to vector<8x128xf32>
      %320 = arith.addf %319, %318 : vector<8x128xf32>
      %321 = arith.divf %319, %320 : vector<8x128xf32>
      %322 = vector.extract_strided_slice %309 {offsets = [0, 256], sizes = [8, 128], strides = [1, 1]} : vector<8x512xf32> to vector<8x128xf32>
      %323 = math.tanh %322 : vector<8x128xf32>
      %324 = vector.extract_strided_slice %309 {offsets = [0, 384], sizes = [8, 128], strides = [1, 1]} : vector<8x512xf32> to vector<8x128xf32>
      %325 = arith.negf %324 : vector<8x128xf32>
      %326 = math.exp %325 : vector<8x128xf32>
      %cst_99 = arith.constant 1.000000e+00 : f32
      %327 = vector.broadcast %cst_99 : f32 to vector<8x128xf32>
      %328 = arith.addf %327, %326 : vector<8x128xf32>
      %329 = arith.divf %327, %328 : vector<8x128xf32>
      %c0_100 = arith.constant 0 : index
      %c0_101 = arith.constant 0 : index
      %330 = vector.load %arg11[%c0_100, %c0_101] : memref<8x128xf32, #tpu.memory_space<vmem>>, vector<8x128xf32>
      %331 = arith.mulf %321, %330 : vector<8x128xf32>
      %332 = arith.mulf %315, %323 : vector<8x128xf32>
      %333 = arith.addf %331, %332 : vector<8x128xf32>
      %334 = math.tanh %333 : vector<8x128xf32>
      %335 = arith.mulf %329, %334 : vector<8x128xf32>
      %c0_102 = arith.constant 0 : index
      %c0_103 = arith.constant 0 : index
      %336 = vector.load %arg12[%c0_102, %c0_103] : memref<128x128xf32, #tpu.memory_space<vmem>>, vector<128x128xf32>
      %cst_104 = arith.constant dense<0.000000e+00> : vector<8x128xf32>
      %337 = tpu.matmul %293, %336, %cst_104 {dimension_numbers = #tpu.dot_dimension_numbers<[1], [0], [0], [1], [0, 0, 1, 1], [], []>} : vector<8x128xf32>, vector<128x128xf32>, vector<8x128xf32> -> vector<8x128xf32>
      %c0_105 = arith.constant 0 : index
      %c0_106 = arith.constant 0 : index
      %338 = vector.load %arg13[%c0_105, %c0_106] : memref<128x128xf32, #tpu.memory_space<vmem>>, vector<128x128xf32>
      %cst_107 = arith.constant dense<0.000000e+00> : vector<8x128xf32>
      %339 = tpu.matmul %335, %338, %cst_107 {dimension_numbers = #tpu.dot_dimension_numbers<[1], [0], [0], [1], [0, 0, 1, 1], [], []>} : vector<8x128xf32>, vector<128x128xf32>, vector<8x128xf32> -> vector<8x128xf32>
      %340 = arith.addf %337, %339 : vector<8x128xf32>
      %c0_108 = arith.constant 0 : index
      %c0_109 = arith.constant 0 : index
      %341 = vector.load %arg14[%c0_108, %c0_109] : memref<1x128xf32, #tpu.memory_space<vmem>>, vector<1x128xf32>
      %342 = vector.broadcast %341 : vector<1x128xf32> to vector<8x128xf32>
      %343 = arith.addf %340, %342 : vector<8x128xf32>
      %cst_110 = arith.constant dense<0xFF800000> : vector<8xf32>
      %344 = vector.multi_reduction <maximumf>, %343, %cst_110 [1] : vector<8x128xf32> to vector<8xf32>
      %345 = vector.shape_cast %344 : vector<8xf32> to vector<8x1xf32>
      %346 = vector.broadcast %345 : vector<8x1xf32> to vector<8x128xf32>
      %347 = arith.subf %343, %346 : vector<8x128xf32>
      %348 = math.exp %347 : vector<8x128xf32>
      %cst_111 = arith.constant dense<0.000000e+00> : vector<8xf32>
      %349 = vector.multi_reduction <add>, %348, %cst_111 [1] : vector<8x128xf32> to vector<8xf32>
      %350 = vector.shape_cast %349 : vector<8xf32> to vector<8x1xf32>
      %351 = math.log %350 : vector<8x1xf32>
      %352 = arith.addf %351, %345 : vector<8x1xf32>
      %353 = vector.broadcast %352 : vector<8x1xf32> to vector<8x128xf32>
      %354 = arith.subf %343, %353 : vector<8x128xf32>
      %c0_112 = arith.constant 0 : index
      %c0_113 = arith.constant 0 : index
      %355 = vector.load %arg15[%c0_112, %c0_113] : memref<8x128xf32, #tpu.memory_space<vmem>>, vector<8x128xf32>
      tpu.vector_store %arg15[%c0_112, %c0_113], %354 {strides = array<i32>} : memref<8x128xf32, #tpu.memory_space<vmem>>, vector<8x128xf32>,
    } else {
    }
    return
  }
  func.func @transform_0(%arg0: i32) -> (i32, i32) {
    %c0_i32 = arith.constant 0 : i32
    %c0_i32_0 = arith.constant 0 : i32
    return %arg0, %c0_i32 : i32, i32
  }
  func.func @transform_1(%arg0: i32) -> (i32, i32) {
    %c0_i32 = arith.constant 0 : i32
    %c0_i32_0 = arith.constant 0 : i32
    %c0_i32_1 = arith.constant 0 : i32
    return %c0_i32, %c0_i32_0 : i32, i32
  }
  func.func @transform_2(%arg0: i32) -> (i32, i32) {
    %c0_i32 = arith.constant 0 : i32
    %c0_i32_0 = arith.constant 0 : i32
    %c0_i32_1 = arith.constant 0 : i32
    return %c0_i32, %c0_i32_0 : i32, i32
  }
  func.func @transform_3(%arg0: i32) -> (i32, i32) {
    %c0_i32 = arith.constant 0 : i32
    %c0_i32_0 = arith.constant 0 : i32
    %c0_i32_1 = arith.constant 0 : i32
    return %c0_i32, %c0_i32_0 : i32, i32
  }
  func.func @transform_4(%arg0: i32) -> (i32, i32) {
    %c0_i32 = arith.constant 0 : i32
    %c0_i32_0 = arith.constant 0 : i32
    %c0_i32_1 = arith.constant 0 : i32
    return %c0_i32, %c0_i32_0 : i32, i32
  }
  func.func @transform_5(%arg0: i32) -> (i32, i32) {
    %c0_i32 = arith.constant 0 : i32
    %c0_i32_0 = arith.constant 0 : i32
    %c0_i32_1 = arith.constant 0 : i32
    return %c0_i32, %c0_i32_0 : i32, i32
  }
  func.func @transform_6(%arg0: i32) -> (i32, i32) {
    %c0_i32 = arith.constant 0 : i32
    %c0_i32_0 = arith.constant 0 : i32
    %c0_i32_1 = arith.constant 0 : i32
    return %c0_i32, %c0_i32_0 : i32, i32
  }
  func.func @transform_7(%arg0: i32) -> (i32, i32) {
    %c0_i32 = arith.constant 0 : i32
    %c0_i32_0 = arith.constant 0 : i32
    %c0_i32_1 = arith.constant 0 : i32
    return %c0_i32, %c0_i32_0 : i32, i32
  }
  func.func @transform_8(%arg0: i32) -> (i32, i32) {
    %c0_i32 = arith.constant 0 : i32
    %c0_i32_0 = arith.constant 0 : i32
    %c0_i32_1 = arith.constant 0 : i32
    return %c0_i32, %c0_i32_0 : i32, i32
  }
  func.func @transform_9(%arg0: i32) -> (i32, i32) {
    %c0_i32 = arith.constant 0 : i32
    %c0_i32_0 = arith.constant 0 : i32
    %c0_i32_1 = arith.constant 0 : i32
    return %c0_i32, %c0_i32_0 : i32, i32
  }
  func.func @transform_10(%arg0: i32) -> (i32, i32) {
    %c0_i32 = arith.constant 0 : i32
    %c0_i32_0 = arith.constant 0 : i32
    %c0_i32_1 = arith.constant 0 : i32
    return %c0_i32, %c0_i32_0 : i32, i32
  }
  func.func @transform_11(%arg0: i32) -> (i32, i32) {
    %c0_i32 = arith.constant 0 : i32
    %c0_i32_0 = arith.constant 0 : i32
    %c0_i32_1 = arith.constant 0 : i32
    return %c0_i32, %c0_i32_0 : i32, i32
  }
  func.func @transform_12(%arg0: i32) -> (i32, i32) {
    %c0_i32 = arith.constant 0 : i32
    %c0_i32_0 = arith.constant 0 : i32
    %c0_i32_1 = arith.constant 0 : i32
    return %c0_i32, %c0_i32_0 : i32, i32
  }
  func.func @transform_13(%arg0: i32) -> (i32, i32) {
    %c0_i32 = arith.constant 0 : i32
    %c0_i32_0 = arith.constant 0 : i32
    %c0_i32_1 = arith.constant 0 : i32
    return %c0_i32, %c0_i32_0 : i32, i32
  }
  func.func @transform_14(%arg0: i32) -> (i32, i32) {
    %c0_i32 = arith.constant 0 : i32
    %c0_i32_0 = arith.constant 0 : i32
    %c0_i32_1 = arith.constant 0 : i32
    return %c0_i32, %c0_i32_0 : i32, i32
  }
}

</mosaic_0001>

<bundles_post_ra>
// kernel: tpu_custom_call.1
= control target key start
LH: loop header
LB: loop body
LE: loop exit
PB: predicated region body
PF: predicated region fallthrough
CT: control target
= control target key end

     0   :  { %19 = vsyncpa [#allocation6], 0  ;;  %s4018_s0 = inlined_call_operand.hbm [shape: f32[64,128], index: 0, kind: input, shape index: {}]   ;;  %s4019_s1 = inlined_call_operand.hbm [shape: f32[128,512], index: 1, kind: input, shape index: {}]   ;;  %s4020_s2 = inlined_call_operand.hbm [shape: f32[128,512], index: 2, kind: input, shape index: {}]   ;;  %s4021_s3 = inlined_call_operand.hbm [shape: f32[1,512], index: 3, kind: input, shape index: {}]   ;;  %s4022_s4 = inlined_call_operand.hbm [shape: f32[128,512], index: 4, kind: input, shape index: {}]   ;;  %s4023_s5 = inlined_call_operand.hbm [shape: f32[128,512], index: 5, kind: input, shape index: {}]   ;;  %s4024_s6 = inlined_call_operand.hbm [shape: f32[1,512], index: 6, kind: input, shape index: {}]   ;;  %s4025_s7 = inlined_call_operand.hbm [shape: f32[8,128], index: 7, kind: input, shape index: {}]   ;;  %s4026_s8 = inlined_call_operand.hbm [shape: f32[8,128], index: 8, kind: input, shape index: {}]   ;;  %s4027_s9 = inlined_call_operand.vmem [shape: f32[8,128], index: 9, kind: input, shape index: {}]   ;;  %s4028_s10 = inlined_call_operand.hbm [shape: f32[8,128], index: 10, kind: input, shape index: {}]   ;;  %s4029_s11 = inlined_call_operand.hbm [shape: f32[128,128], index: 11, kind: input, shape index: {}]   ;;  %s4030_s12 = inlined_call_operand.hbm [shape: f32[128,128], index: 12, kind: input, shape index: {}]   ;;  %s4031_s13 = inlined_call_operand.vmem [shape: f32[1,128], index: 13, kind: input, shape index: {}]   ;;  %s4032_s14 = inlined_call_operand.hbm [shape: f32[8,128], index: 14, kind: output, shape index: {}]  }
   0x1   :  { %20 = vsyncpa [#allocation9], 0 }
   0x2   :  { %21 = vsyncpa [#allocation12], 0 }
   0x3   :  { %22 = vsyncpa [#allocation15], 0 }
   0x4   :  { %23 = vsyncpa [#allocation18], 0 }
   0x5   :  { %24 = vsyncpa [#allocation21], 0 }
   0x6   :  { %25 = vsyncpa [#allocation24], 0  ;;  %s44_s15 = sshll.u32 %s4019_s1, 4  ;;  %s45_s15 = int_to_ptr.hbm [resolvable:$true] %s44_s15 }
   0x7   :  { %26 = vsyncpa [#allocation7], 0  ;;  %s2938_s16 = smov [#allocation8]   ;;  %s71_s20 = sshll.u32 %s4021_s3, 4  ;;  %s72_s20 = int_to_ptr.hbm [resolvable:$true] %s71_s20 }
   0x8   :  { %s46_s17 = sshll.u32 %s2938_s16, 4  ;;  %s2939_s21 = smov 512   ;;  %s47_s17 = int_to_ptr.vmem [resolvable:$true] %s46_s17 }
   0x9   :  { %s2940_s22 = smov 32   ;;  %s2941_s23 = smov [#allocation11]  }
   0xa   :  { %52 = dma.hbm_to_vmem [thread:$0]  %s45_s15, 8192, %s47_s17, [#allocation9], %s2939_s21, %s2939_s21, %s2940_s22  }
   0xb   :  { %s73_s24 = sshll.u32 %s2941_s23, 4  ;;  %s94_s26 = sshll.u32 %s4023_s5, 4  ;;  %s74_s24 = int_to_ptr.vmem [resolvable:$true] %s73_s24  ;;  %s95_s26 = int_to_ptr.hbm [resolvable:$true] %s94_s26 }
   0xc   :  { %76 = dma.hbm_to_vmem [thread:$0]  %s72_s20, 64, %s74_s24, [#allocation12]  }
   0xd   :  { %s119_s3 = sshll.u32 %s4025_s7, 4  ;;  %s2942_s29 = smov [#allocation14]   ;;  %s120_s3 = int_to_ptr.hbm [resolvable:$true] %s119_s3 }
   0xe   :  { %s96_s30 = sshll.u32 %s2942_s29, 4  ;;  %s2943_s15 = smov [#allocation17]   ;;  %s97_s30 = int_to_ptr.vmem [resolvable:$true] %s96_s30 }
   0xf   :  { %102 = dma.hbm_to_vmem [thread:$0]  %s95_s26, 8192, %s97_s30, [#allocation15], %s2939_s21, %s2939_s21, %s2940_s22  }
  0x10   :  { %s121_s16 = sshll.u32 %s2943_s15, 4  ;;  %s143_s5 = sshll.u32 %s4028_s10, 4  ;;  %s122_s16 = int_to_ptr.vmem [resolvable:$true] %s121_s16  ;;  %s144_s5 = int_to_ptr.hbm [resolvable:$true] %s143_s5 }
  0x11   :  { %124 = dma.hbm_to_vmem [thread:$0]  %s120_s3, 128, %s122_s16, [#allocation18]  }
  0x12   :  { %s31_s7 = sshll.u32 %s4018_s0, 4  ;;  %s2944_s23 = smov [#allocation20]   ;;  %s32_s7 = int_to_ptr.hbm [resolvable:$true] %s31_s7 }
  0x13   :  { %s145_s24 = sshll.u32 %s2944_s23, 4  ;;  %s2945_s25 = smov [#allocation5]   ;;  %s146_s24 = int_to_ptr.vmem [resolvable:$true] %s145_s24 }
  0x14   :  { %148 = dma.hbm_to_vmem [thread:$0]  %s144_s5, 128, %s146_s24, [#allocation21]  }
  0x15   :  { %s33_s1 = sshll.u32 %s2945_s25, 4  ;;  %s2946_s26 = smov 128   ;;  %s34_s1 = int_to_ptr.vmem [resolvable:$true] %s33_s1 }
  0x16   :  { %s2947_s27 = smov 8   ;;  %s57_s3 = sshll.u32 %s4020_s2, 4  ;;  %s58_s3 = int_to_ptr.hbm [resolvable:$true] %s57_s3 }
  0x17   :  { %39 = dma.hbm_to_vmem [thread:$0]  %s32_s7, 1024, %s34_s1, [#allocation6], %s2946_s26, %s2946_s26, %s2947_s27  }
  0x18   :  { %s2948_s0 = smov [#allocation10]   ;;  %s81_s16 = sshll.u32 %s4022_s4, 4  ;;  %s82_s16 = int_to_ptr.hbm [resolvable:$true] %s81_s16 }
  0x19   :  { %s59_s29 = sshll.u32 %s2948_s0, 4  ;;  %s2949_s17 = smov [#allocation13]   ;;  %s60_s29 = int_to_ptr.vmem [resolvable:$true] %s59_s29 }
  0x1a   :  { %65 = dma.hbm_to_vmem [thread:$0]  %s58_s3, 8192, %s60_s29, [#allocation9], %s2939_s21, %s2939_s21, %s2940_s22  }
  0x1b   :  { %s83_s18 = sshll.u32 %s2949_s17, 4  ;;  %s108_s20 = sshll.u32 %s4024_s6, 4  ;;  %s84_s18 = int_to_ptr.vmem [resolvable:$true] %s83_s18  ;;  %s109_s20 = int_to_ptr.hbm [resolvable:$true] %s108_s20 }
  0x1c   :  { %89 = dma.hbm_to_vmem [thread:$0]  %s82_s16, 8192, %s84_s18, [#allocation12], %s2939_s21, %s2939_s21, %s2940_s22  }
  0x1d   :  { %s130_s4 = sshll.u32 %s4026_s8, 4  ;;  %s2950_s23 = smov [#allocation16]   ;;  %s131_s4 = int_to_ptr.hbm [resolvable:$true] %s130_s4 }
  0x1e   :  { %s110_s24 = sshll.u32 %s2950_s23, 4  ;;  %s2951_s25 = smov [#allocation19]   ;;  %s111_s24 = int_to_ptr.vmem [resolvable:$true] %s110_s24 }
  0x1f   :  { %113 = dma.hbm_to_vmem [thread:$0]  %s109_s20, 64, %s111_s24, [#allocation15]  }
  0x20   :  { %s132_s1 = sshll.u32 %s2951_s25, 4  ;;  %s153_s6 = sshll.u32 %s4029_s11, 4  ;;  %s133_s1 = int_to_ptr.vmem [resolvable:$true] %s132_s1  ;;  %s154_s6 = int_to_ptr.hbm [resolvable:$true] %s153_s6 }
  0x21   :  { %135 = dma.hbm_to_vmem [thread:$0]  %s131_s4, 128, %s133_s1, [#allocation18]  }
  0x22   :  { %s166_s22 = sshll.u32 %s4030_s12, 4  ;;  %s2952_s0 = smov [#allocation22]   ;;  %s167_s22 = int_to_ptr.hbm [resolvable:$true] %s166_s22 }
  0x23   :  { %s155_s8 = sshll.u32 %s2952_s0, 4  ;;  %s2953_s29 = smov [#allocation23]   ;;  %s156_s8 = int_to_ptr.vmem [resolvable:$true] %s155_s8 }
  0x24   :  { %161 = dma.hbm_to_vmem [thread:$0]  %s154_s6, 2048, %s156_s8, [#allocation21], %s2946_s26, %s2946_s26, %s2947_s27  }
  0x25   :  { %s168_s30 = sshll.u32 %s2953_s29, 4  ;;  %s169_s30 = int_to_ptr.vmem [resolvable:$true] %s168_s30 }
  0x26   :  { %174 = dma.hbm_to_vmem [thread:$0]  %s167_s22, 2048, %s169_s30, [#allocation24], %s2946_s26, %s2946_s26, %s2947_s27  }
  0x27   :  { %2922 = dma.done.wait [#allocation6], 1024  }
  0x28   :  { %2923 = vsyncadd [#allocation6], 4294966272 }
  0x29   :  { %2924 = dma.done.wait [#allocation9], 16384  }
  0x2a   :  { %2925 = vsyncadd [#allocation9], 4294950912 }
  0x2b   :  { %2926 = dma.done.wait [#allocation12], 8256  }
  0x2c   :  { %2927 = vsyncadd [#allocation12], 4294959040 }
  0x2d   :  { %2928 = dma.done.wait [#allocation15], 8256  }
  0x2e   :  { %2929 = vsyncadd [#allocation15], 4294959040 }
  0x2f   :  { %2930 = dma.done.wait [#allocation18], 256  }
  0x30   :  { %2931 = vsyncadd [#allocation18], 4294967040 }
  0x31   :  { %2932 = dma.done.wait [#allocation21], 2176  }
  0x32   :  { %2933 = vsyncadd [#allocation21], 4294965120 }
  0x33   :  { %2934 = dma.done.wait [#allocation24], 2048  }
  0x34   :  { %2935 = vsyncadd [#allocation24], 4294965248  ;;  %v301_v0 = vld [vmem:[#allocation8 + $0x1e0] sm:$0xff]  ;;  %v302_v1 = vld [vmem:[#allocation8 + $0x1e8] sm:$0xff]  ;;  %s2954_s27 = smov [#allocation25]  }
  0x35   :  { %v303_v2 = vld [vmem:[#allocation8 + $0x1f0] sm:$0xff]  ;;  %315 = vmatpush.msra.mxu0 %v301_v0  ;;  %356 = vmatpush.msra.mxu1 %v302_v1  ;;  %v304_v3 = vld [vmem:[#allocation8 + $0x1f8] sm:$0xff]  ;;  %v297_v4 = vld [vmem:[#allocation8 + $0x1c0] sm:$0xff]  ;;  %s2328_s15 = sshll.u32 %s2954_s27, 4  ;;  %s2329_s15 = int_to_ptr.vmem [resolvable:$true] %s2328_s15 }
  0x36   :  { %v298_v5 = vld [vmem:[#allocation8 + $0x1c8] sm:$0xff]  ;;  %397 = vmatpush.msra.mxu2 %v303_v2  ;;  %438 = vmatpush.msra.mxu3 %v304_v3  ;;  %v299_v6 = vld [vmem:[#allocation8 + $0x1d0] sm:$0xff]  ;;  %v300_v7 = vld [vmem:[#allocation8 + $0x1d8] sm:$0xff] }
  0x37   :  { %v293_v8 = vld [vmem:[#allocation8 + $0x1a0] sm:$0xff]  ;;  %316 = vmatpush.msra.mxu0 %v297_v4  ;;  %357 = vmatpush.msra.mxu1 %v298_v5  ;;  %v294_v9 = vld [vmem:[#allocation8 + $0x1a8] sm:$0xff]  ;;  %v295_v10 = vld [vmem:[#allocation8 + $0x1b0] sm:$0xff] }
  0x38   :  { %v296_v11 = vld [vmem:[#allocation8 + $0x1b8] sm:$0xff]  ;;  %398 = vmatpush.msra.mxu2 %v299_v6  ;;  %439 = vmatpush.msra.mxu3 %v300_v7  ;;  %v289_v12 = vld [vmem:[#allocation8 + $0x180] sm:$0xff]  ;;  %v290_v13 = vld [vmem:[#allocation8 + $0x188] sm:$0xff] }
  0x39   :  { %317 = vmatpush.msra.mxu0 %v293_v8  ;;  %358 = vmatpush.msra.mxu1 %v294_v9  ;;  %v291_v14 = vld [vmem:[#allocation8 + $0x190] sm:$0xff]  ;;  %v292_v15 = vld [vmem:[#allocation8 + $0x198] sm:$0xff]  ;;  %v285_v16 = vld [vmem:[#allocation8 + $0x160] sm:$0xff] }
  0x3a   :  { %399 = vmatpush.msra.mxu2 %v295_v10  ;;  %440 = vmatpush.msra.mxu3 %v296_v11  ;;  %v286_v17 = vld [vmem:[#allocation8 + $0x168] sm:$0xff]  ;;  %v287_v18 = vld [vmem:[#allocation8 + $0x170] sm:$0xff]  ;;  %v288_v19 = vld [vmem:[#allocation8 + $0x178] sm:$0xff] }
  0x3b   :  { %318 = vmatpush.msra.mxu0 %v289_v12  ;;  %359 = vmatpush.msra.mxu1 %v290_v13  ;;  %v281_v20 = vld [vmem:[#allocation8 + $0x140] sm:$0xff]  ;;  %v282_v21 = vld [vmem:[#allocation8 + $0x148] sm:$0xff]  ;;  %v283_v22 = vld [vmem:[#allocation8 + $0x150] sm:$0xff] }
  0x3c   :  { %400 = vmatpush.msra.mxu2 %v291_v14  ;;  %441 = vmatpush.msra.mxu3 %v292_v15  ;;  %v284_v23 = vld [vmem:[#allocation8 + $0x158] sm:$0xff]  ;;  %v277_v24 = vld [vmem:[#allocation8 + $0x120] sm:$0xff]  ;;  %v278_v25 = vld [vmem:[#allocation8 + $0x128] sm:$0xff] }
  0x3d   :  { %319 = vmatpush.msra.mxu0 %v285_v16  ;;  %360 = vmatpush.msra.mxu1 %v286_v17  ;;  %v279_v26 = vld [vmem:[#allocation8 + $0x130] sm:$0xff]  ;;  %v280_v27 = vld [vmem:[#allocation8 + $0x138] sm:$0xff]  ;;  %v273_v28 = vld [vmem:[#allocation8 + $0x100] sm:$0xff] }
  0x3e   :  { %401 = vmatpush.msra.mxu2 %v287_v18  ;;  %442 = vmatpush.msra.mxu3 %v288_v19  ;;  %v274_v29 = vld [vmem:[#allocation8 + $0x108] sm:$0xff]  ;;  %v275_v30 = vld [vmem:[#allocation8 + $0x110] sm:$0xff]  ;;  %v276_v31 = vld [vmem:[#allocation8 + $0x118] sm:$0xff] }
  0x3f   :  { %320 = vmatpush.msra.mxu0 %v281_v20  ;;  %361 = vmatpush.msra.mxu1 %v282_v21  ;;  %v269_v32 = vld [vmem:[#allocation8 + $0xe0] sm:$0xff]  ;;  %v270_v33 = vld [vmem:[#allocation8 + $0xe8] sm:$0xff]  ;;  %v271_v34 = vld [vmem:[#allocation8 + $0xf0] sm:$0xff] }
  0x40   :  { %402 = vmatpush.msra.mxu2 %v283_v22  ;;  %443 = vmatpush.msra.mxu3 %v284_v23  ;;  %v272_v35 = vld [vmem:[#allocation8 + $0xf8] sm:$0xff]  ;;  %v265_v36 = vld [vmem:[#allocation8 + $0xc0] sm:$0xff]  ;;  %v266_v37 = vld [vmem:[#allocation8 + $0xc8] sm:$0xff] }
  0x41   :  { %321 = vmatpush.msra.mxu0 %v277_v24  ;;  %362 = vmatpush.msra.mxu1 %v278_v25  ;;  %v267_v38 = vld [vmem:[#allocation8 + $0xd0] sm:$0xff]  ;;  %v268_v39 = vld [vmem:[#allocation8 + $0xd8] sm:$0xff]  ;;  %v261_v40 = vld [vmem:[#allocation8 + $0xa0] sm:$0xff] }
  0x42   :  { %403 = vmatpush.msra.mxu2 %v279_v26  ;;  %444 = vmatpush.msra.mxu3 %v280_v27  ;;  %v262_v41 = vld [vmem:[#allocation8 + $0xa8] sm:$0xff]  ;;  %v263_v42 = vld [vmem:[#allocation8 + $0xb0] sm:$0xff]  ;;  %v264_v43 = vld [vmem:[#allocation8 + $0xb8] sm:$0xff] }
  0x43   :  { %322 = vmatpush.msra.mxu0 %v273_v28  ;;  %363 = vmatpush.msra.mxu1 %v274_v29  ;;  %v257_v44 = vld [vmem:[#allocation8 + $0x80] sm:$0xff]  ;;  %v258_v45 = vld [vmem:[#allocation8 + $0x88] sm:$0xff]  ;;  %v259_v46 = vld [vmem:[#allocation8 + $0x90] sm:$0xff] }
  0x44   :  { %404 = vmatpush.msra.mxu2 %v275_v30  ;;  %445 = vmatpush.msra.mxu3 %v276_v31  ;;  %v260_v47 = vld [vmem:[#allocation8 + $0x98] sm:$0xff]  ;;  %v253_v48 = vld [vmem:[#allocation8 + $0x60] sm:$0xff]  ;;  %v254_v49 = vld [vmem:[#allocation8 + $0x68] sm:$0xff] }
  0x45   :  { %323 = vmatpush.msra.mxu0 %v269_v32  ;;  %364 = vmatpush.msra.mxu1 %v270_v33  ;;  %v255_v50 = vld [vmem:[#allocation8 + $0x70] sm:$0xff]  ;;  %v256_v51 = vld [vmem:[#allocation8 + $0x78] sm:$0xff]  ;;  %v249_v52 = vld [vmem:[#allocation8 + $0x40] sm:$0xff] }
  0x46   :  { %405 = vmatpush.msra.mxu2 %v271_v34  ;;  %446 = vmatpush.msra.mxu3 %v272_v35  ;;  %v250_v53 = vld [vmem:[#allocation8 + $0x48] sm:$0xff]  ;;  %v251_v54 = vld [vmem:[#allocation8 + $0x50] sm:$0xff]  ;;  %v252_v55 = vld [vmem:[#allocation8 + $0x58] sm:$0xff] }
  0x47   :  { %324 = vmatpush.msra.mxu0 %v265_v36  ;;  %365 = vmatpush.msra.mxu1 %v266_v37  ;;  %v245_v56 = vld [vmem:[#allocation8 + $0x20] sm:$0xff]  ;;  %v246_v57 = vld [vmem:[#allocation8 + $0x28] sm:$0xff]  ;;  %v247_v58 = vld [vmem:[#allocation8 + $0x30] sm:$0xff] }
  0x48   :  { %406 = vmatpush.msra.mxu2 %v267_v38  ;;  %447 = vmatpush.msra.mxu3 %v268_v39  ;;  %v248_v59 = vld [vmem:[#allocation8 + $0x38] sm:$0xff]  ;;  %v241_v60 = vld [vmem:[#allocation8] sm:$0xff]  ;;  %v242_v61 = vld [vmem:[#allocation8 + $0x8] sm:$0xff] }
  0x49   :  { %325 = vmatpush.msra.mxu0 %v261_v40  ;;  %366 = vmatpush.msra.mxu1 %v262_v41  ;;  %v243_v62 = vld [vmem:[#allocation8 + $0x10] sm:$0xff]  ;;  %v244_v63 = vld [vmem:[#allocation8 + $0x18] sm:$0xff]  ;;  %v233_v0 = vld [vmem:[#allocation5] sm:$0xff] }
  0x4a   :  { %407 = vmatpush.msra.mxu2 %v263_v42  ;;  %448 = vmatpush.msra.mxu3 %v264_v43  ;;  %v3087_v1 = vld [vmem:[#allocation10 + $0x1e0] sm:$0xff]  ;;  %v3089_v2 = vld [vmem:[#allocation10 + $0x1e8] sm:$0xff]  ;;  %v3091_v3 = vld [vmem:[#allocation10 + $0x1f8] sm:$0xff] }
  0x4b   :  { %326 = vmatpush.msra.mxu0 %v257_v44  ;;  %367 = vmatpush.msra.mxu1 %v258_v45  ;;  %v3093_v4 = vld [vmem:[#allocation10 + $0x1f0] sm:$0xff]  ;;  %v3095_v5 = vld [vmem:[#allocation10 + $0x1c0] sm:$0xff]  ;;  %v3097_v6 = vld [vmem:[#allocation10 + $0x1c8] sm:$0xff] }
  0x4c   :  { %408 = vmatpush.msra.mxu2 %v259_v46  ;;  %449 = vmatpush.msra.mxu3 %v260_v47  ;;  %v3101_v7 = vld [vmem:[#allocation10 + $0x1d8] sm:$0xff]  ;;  %v3103_v8 = vld [vmem:[#allocation10 + $0x1d0] sm:$0xff]  ;;  %v3106_v9 = vld [vmem:[#allocation10 + $0x1a0] sm:$0xff] }
  0x4d   :  { %327 = vmatpush.msra.mxu0 %v253_v48  ;;  %368 = vmatpush.msra.mxu1 %v254_v49  ;;  %v3108_v10 = vld [vmem:[#allocation10 + $0x1a8] sm:$0xff]  ;;  %v3113_v11 = vld [vmem:[#allocation10 + $0x1b8] sm:$0xff]  ;;  %v3115_v12 = vld [vmem:[#allocation10 + $0x1b0] sm:$0xff] }
  0x4e   :  { %409 = vmatpush.msra.mxu2 %v255_v50  ;;  %450 = vmatpush.msra.mxu3 %v256_v51  ;;  %v234_v13 = vld [vmem:[#allocation5 + $0x8] sm:$0xff]  ;;  %v3121_v14 = vld [vmem:[#allocation10 + $0x180] sm:$0xff]  ;;  %v3127_v16 = vld [vmem:[#allocation10 + $0x198] sm:$0xff] }
  0x4f   :  { %328 = vmatpush.msra.mxu0 %v249_v52  ;;  %369 = vmatpush.msra.mxu1 %v250_v53  ;;  %v3123_v15 = vld [vmem:[#allocation10 + $0x188] sm:$0xff]  ;;  %v3129_v17 = vld [vmem:[#allocation10 + $0x190] sm:$0xff]  ;;  %v3131_v18 = vld [vmem:[#allocation10 + $0x160] sm:$0xff] }
  0x50   :  { %410 = vmatpush.msra.mxu2 %v251_v54  ;;  %451 = vmatpush.msra.mxu3 %v252_v55  ;;  %v3133_v19 = vld [vmem:[#allocation10 + $0x168] sm:$0xff]  ;;  %v3137_v20 = vld [vmem:[#allocation10 + $0x178] sm:$0xff]  ;;  %v3139_v21 = vld [vmem:[#allocation10 + $0x170] sm:$0xff] }
  0x51   :  { %329 = vmatpush.msra.mxu0 %v245_v56  ;;  %370 = vmatpush.msra.mxu1 %v246_v57  ;;  %v3142_v22 = vld [vmem:[#allocation10 + $0x140] sm:$0xff]  ;;  %v3144_v23 = vld [vmem:[#allocation10 + $0x148] sm:$0xff]  ;;  %v3149_v24 = vld [vmem:[#allocation10 + $0x158] sm:$0xff] }
  0x52   :  { %411 = vmatpush.msra.mxu2 %v247_v58  ;;  %452 = vmatpush.msra.mxu3 %v248_v59  ;;  %v3151_v25 = vld [vmem:[#allocation10 + $0x150] sm:$0xff]  ;;  %v3157_v27 = vld [vmem:[#allocation10 + $0x120] sm:$0xff]  ;;  %v3159_v28 = vld [vmem:[#allocation10 + $0x128] sm:$0xff] }
  0x53   :  { %330 = vmatpush.msra.mxu0 %v241_v60  ;;  %371 = vmatpush.msra.mxu1 %v242_v61  ;;  %v235_v26 = vld [vmem:[#allocation5 + $0x10] sm:$0xff]  ;;  %v3163_v29 = vld [vmem:[#allocation10 + $0x138] sm:$0xff]  ;;  %v3167_v31 = vld [vmem:[#allocation10 + $0x100] sm:$0xff] }
  0x54   :  { %412 = vmatpush.msra.mxu2 %v243_v62  ;;  %453 = vmatpush.msra.mxu3 %v244_v63  ;;  %v3165_v30 = vld [vmem:[#allocation10 + $0x130] sm:$0xff]  ;;  %v3169_v32 = vld [vmem:[#allocation10 + $0x108] sm:$0xff]  ;;  %v3173_v33 = vld [vmem:[#allocation10 + $0x118] sm:$0xff] }
  0x55   :  { %331 = vmatmul.f32.vlgmr.msra.gmra.mxu0 %v233_v0  ;;  %372 = vmatmul.f32.vlgmr.msra.gmra.mxu1 %v233_v0  ;;  %v3175_v34 = vld [vmem:[#allocation10 + $0x110] sm:$0xff]  ;;  %v3178_v35 = vld [vmem:[#allocation10 + $0xe0] sm:$0xff]  ;;  %v3180_v36 = vld [vmem:[#allocation10 + $0xe8] sm:$0xff] }
  0x56   :  { %413 = vmatmul.f32.vlgmr.msra.gmra.mxu2 %v233_v0  ;;  %454 = vmatmul.f32.vlgmr.msra.gmra.mxu3 %v233_v0  ;;  %v3185_v37 = vld [vmem:[#allocation10 + $0xf8] sm:$0xff]  ;;  %v3187_v38 = vld [vmem:[#allocation10 + $0xf0] sm:$0xff]  ;;  %v3193_v40 = vld [vmem:[#allocation10 + $0xc0] sm:$0xff] }
  0x57   :  { %588 = vmatpush.msrb.mxu0 %v3087_v1  ;;  %608 = vmatpush.msrb.mxu1 %v3089_v2  ;;  %v236_v39 = vld [vmem:[#allocation5 + $0x18] sm:$0xff]  ;;  %v3195_v41 = vld [vmem:[#allocation10 + $0xc8] sm:$0xff]  ;;  %v3201_v43 = vld [vmem:[#allocation10 + $0xd0] sm:$0xff] }
  0x58   :  { %648 = vmatpush.msrb.mxu3 %v3091_v3  ;;  %628 = vmatpush.msrb.mxu2 %v3093_v4  ;;  %v3199_v42 = vld [vmem:[#allocation10 + $0xd8] sm:$0xff]  ;;  %4121 = vst [vmem:[#allocation35_spill] sm:$0xff] %v3201_v43  ;;  %v3203_v44 = vld [vmem:[#allocation10 + $0xa0] sm:$0xff]  ;;  %v3205_v45 = vld [vmem:[#allocation10 + $0xa8] sm:$0xff] }
  0x59   :  { %589 = vmatpush.msrb.mxu0 %v3095_v5  ;;  %609 = vmatpush.msrb.mxu1 %v3097_v6  ;;  %4120 = vst [vmem:[#allocation34_spill] sm:$0xff] %v3199_v42  ;;  %v3209_v46 = vld [vmem:[#allocation10 + $0xb8] sm:$0xff]  ;;  %v3211_v47 = vld [vmem:[#allocation10 + $0xb0] sm:$0xff]  ;;  %v3214_v48 = vld [vmem:[#allocation10 + $0x80] sm:$0xff] }
  0x5a   :  { %649 = vmatpush.msrb.mxu3 %v3101_v7  ;;  %629 = vmatpush.msrb.mxu2 %v3103_v8  ;;  %4122 = vst [vmem:[#allocation36_spill] sm:$0xff] %v3203_v44  ;;  %v3216_v49 = vld [vmem:[#allocation10 + $0x88] sm:$0xff]  ;;  %v3221_v50 = vld [vmem:[#allocation10 + $0x98] sm:$0xff]  ;;  %v3223_v51 = vld [vmem:[#allocation10 + $0x90] sm:$0xff] }
  0x5b   :  { %590 = vmatpush.msrb.mxu0 %v3106_v9  ;;  %610 = vmatpush.msrb.mxu1 %v3108_v10  ;;  %4123 = vst [vmem:[#allocation37_spill] sm:$0xff] %v3205_v45  ;;  %v237_v52 = vld [vmem:[#allocation5 + $0x20] sm:$0xff]  ;;  %v3231_v54 = vld [vmem:[#allocation10 + $0x68] sm:$0xff]  ;;  %v3235_v55 = vld [vmem:[#allocation10 + $0x78] sm:$0xff] }
  0x5c   :  { %650 = vmatpush.msrb.mxu3 %v3113_v11  ;;  %630 = vmatpush.msrb.mxu2 %v3115_v12  ;;  %4124 = vst [vmem:[#allocation38_spill] sm:$0xff] %v3209_v46  ;;  %v3229_v53 = vld [vmem:[#allocation10 + $0x60] sm:$0xff]  ;;  %v3237_v56 = vld [vmem:[#allocation10 + $0x70] sm:$0xff]  ;;  %v3241_v58 = vld [vmem:[#allocation10 + $0x48] sm:$0xff] }
  0x5d   :  { %334 = vmatmul.f32.gmra.mxu0 %v234_v13  ;;  %375 = vmatmul.f32.gmra.mxu1 %v234_v13  ;;  %4125 = vst [vmem:[#allocation39_spill] sm:$0xff] %v3211_v47  ;;  %v3239_v57 = vld [vmem:[#allocation10 + $0x40] sm:$0xff]  ;;  %v3245_v59 = vld [vmem:[#allocation10 + $0x58] sm:$0xff]  ;;  %v3247_v60 = vld [vmem:[#allocation10 + $0x50] sm:$0xff] }
  0x5e   :  { %416 = vmatmul.f32.gmra.mxu2 %v234_v13  ;;  %457 = vmatmul.f32.gmra.mxu3 %v234_v13  ;;  %4126 = vst [vmem:[#allocation40_spill] sm:$0xff] %v3214_v48  ;;  %v3250_v61 = vld [vmem:[#allocation10 + $0x20] sm:$0xff]  ;;  %v3252_v62 = vld [vmem:[#allocation10 + $0x28] sm:$0xff]  ;;  %v3257_v63 = vld [vmem:[#allocation10 + $0x30] sm:$0xff] }
  0x5f   :  { %591 = vmatpush.msrb.mxu0 %v3121_v14  ;;  %611 = vmatpush.msrb.mxu1 %v3123_v15  ;;  %4127 = vst [vmem:[#allocation41_spill] sm:$0xff] %v3216_v49  ;;  %v3259_v0 = vld [vmem:[#allocation10 + $0x38] sm:$0xff]  ;;  %v238_v13 = vld [vmem:[#allocation5 + $0x28] sm:$0xff] }
  0x60   :  { %651 = vmatpush.msrb.mxu3 %v3127_v16  ;;  %631 = vmatpush.msrb.mxu2 %v3129_v17  ;;  %4128 = vst [vmem:[#allocation42_spill] sm:$0xff] %v3221_v50 }
  0x61   :  { %592 = vmatpush.msrb.mxu0 %v3131_v18  ;;  %612 = vmatpush.msrb.mxu1 %v3133_v19  ;;  %4129 = vst [vmem:[#allocation43_spill] sm:$0xff] %v3223_v51 }
  0x62   :  { %652 = vmatpush.msrb.mxu3 %v3137_v20  ;;  %632 = vmatpush.msrb.mxu2 %v3139_v21  ;;  %4130 = vst [vmem:[#allocation44_spill] sm:$0xff] %v3229_v53 }
  0x63   :  { %593 = vmatpush.msrb.mxu0 %v3142_v22  ;;  %613 = vmatpush.msrb.mxu1 %v3144_v23  ;;  %4131 = vst [vmem:[#allocation45_spill] sm:$0xff] %v3231_v54 }
  0x64   :  { %653 = vmatpush.msrb.mxu3 %v3149_v24  ;;  %633 = vmatpush.msrb.mxu2 %v3151_v25  ;;  %4132 = vst [vmem:[#allocation46_spill] sm:$0xff] %v3235_v55 }
  0x65   :  { %337 = vmatmul.f32.gmra.mxu0 %v235_v26  ;;  %378 = vmatmul.f32.gmra.mxu1 %v235_v26  ;;  %4133 = vst [vmem:[#allocation47_spill] sm:$0xff] %v3237_v56 }
  0x66   :  { %419 = vmatmul.f32.gmra.mxu2 %v235_v26  ;;  %460 = vmatmul.f32.gmra.mxu3 %v235_v26  ;;  %4134 = vst [vmem:[#allocation48_spill] sm:$0xff] %v3239_v57  ;;  %v3265_v26 = vld [vmem:[#allocation10] sm:$0xff] }
  0x67   :  { %594 = vmatpush.msrb.mxu0 %v3157_v27  ;;  %614 = vmatpush.msrb.mxu1 %v3159_v28  ;;  %4135 = vst [vmem:[#allocation49_spill] sm:$0xff] %v3241_v58 }
  0x68   :  { %654 = vmatpush.msrb.mxu3 %v3163_v29  ;;  %634 = vmatpush.msrb.mxu2 %v3165_v30  ;;  %4136 = vst [vmem:[#allocation50_spill] sm:$0xff] %v3245_v59 }
  0x69   :  { %595 = vmatpush.msrb.mxu0 %v3167_v31  ;;  %615 = vmatpush.msrb.mxu1 %v3169_v32  ;;  %4137 = vst [vmem:[#allocation51_spill] sm:$0xff] %v3247_v60 }
  0x6a   :  { %655 = vmatpush.msrb.mxu3 %v3173_v33  ;;  %635 = vmatpush.msrb.mxu2 %v3175_v34  ;;  %4138 = vst [vmem:[#allocation52_spill] sm:$0xff] %v3250_v61 }
  0x6b   :  { %596 = vmatpush.msrb.mxu0 %v3178_v35  ;;  %616 = vmatpush.msrb.mxu1 %v3180_v36  ;;  %4139 = vst [vmem:[#allocation53_spill] sm:$0xff] %v3252_v62 }
  0x6c   :  { %656 = vmatpush.msrb.mxu3 %v3185_v37  ;;  %636 = vmatpush.msrb.mxu2 %v3187_v38  ;;  %4140 = vst [vmem:[#allocation54_spill] sm:$0xff] %v3257_v63 }
  0x6d   :  { %340 = vmatmul.f32.gmra.mxu0 %v236_v39  ;;  %381 = vmatmul.f32.gmra.mxu1 %v236_v39  ;;  %4141 = vst [vmem:[#allocation55_spill] sm:$0xff] %v3259_v0 }
  0x6e   :  { %422 = vmatmul.f32.gmra.mxu2 %v236_v39  ;;  %463 = vmatmul.f32.gmra.mxu3 %v236_v39  ;;  %4142 = vst [vmem:[#allocation56_spill] sm:$0xff] %v3265_v26  ;;  %v3267_v39 = vld [vmem:[#allocation10 + $0x8] sm:$0xff] }
  0x6f   :  { %597 = vmatpush.msrb.mxu0 %v3193_v40  ;;  %617 = vmatpush.msrb.mxu1 %v3195_v41  ;;  %4143 = vst [vmem:[#allocation57_spill] sm:$0xff] %v3267_v39 }
  0x70   :  { %657 = vmatpush.msrb.mxu3 %v3199_v42  ;;  %637 = vmatpush.msrb.mxu2 %v3201_v43 }
  0x71   :  { %598 = vmatpush.msrb.mxu0 %v3203_v44  ;;  %618 = vmatpush.msrb.mxu1 %v3205_v45 }
  0x72   :  { %658 = vmatpush.msrb.mxu3 %v3209_v46  ;;  %638 = vmatpush.msrb.mxu2 %v3211_v47 }
  0x73   :  { %599 = vmatpush.msrb.mxu0 %v3214_v48  ;;  %619 = vmatpush.msrb.mxu1 %v3216_v49 }
  0x74   :  { %659 = vmatpush.msrb.mxu3 %v3221_v50  ;;  %639 = vmatpush.msrb.mxu2 %v3223_v51 }
  0x75   :  { %343 = vmatmul.f32.gmra.mxu0 %v237_v52  ;;  %384 = vmatmul.f32.gmra.mxu1 %v237_v52 }
  0x76   :  { %425 = vmatmul.f32.gmra.mxu2 %v237_v52  ;;  %466 = vmatmul.f32.gmra.mxu3 %v237_v52  ;;  %v3271_v52 = vld [vmem:[#allocation10 + $0x10] sm:$0xff] }
  0x77   :  { %600 = vmatpush.msrb.mxu0 %v3229_v53  ;;  %620 = vmatpush.msrb.mxu1 %v3231_v54  ;;  %4144 = vst [vmem:[#allocation58_spill] sm:$0xff] %v3271_v52 }
  0x78   :  { %660 = vmatpush.msrb.mxu3 %v3235_v55  ;;  %640 = vmatpush.msrb.mxu2 %v3237_v56 }
  0x79   :  { %601 = vmatpush.msrb.mxu0 %v3239_v57  ;;  %621 = vmatpush.msrb.mxu1 %v3241_v58  ;;  %v3273_v58 = vld [vmem:[#allocation10 + $0x18] sm:$0xff] }
  0x7a   :  { %661 = vmatpush.msrb.mxu3 %v3245_v59  ;;  %641 = vmatpush.msrb.mxu2 %v3247_v60  ;;  %4145 = vst [vmem:[#allocation59_spill] sm:$0xff] %v3273_v58 }
  0x7b   :  { %602 = vmatpush.msrb.mxu0 %v3250_v61  ;;  %622 = vmatpush.msrb.mxu1 %v3252_v62 }
  0x7c   :  { %642 = vmatpush.msrb.mxu2 %v3257_v63  ;;  %662 = vmatpush.msrb.mxu3 %v3259_v0  ;;  %v239_v0 = vld [vmem:[#allocation5 + $0x30] sm:$0xff] }
  0x7d   :  { %346 = vmatmul.f32.gmra.mxu0 %v238_v13  ;;  %387 = vmatmul.f32.gmra.mxu1 %v238_v13 }
  0x7e   :  { %428 = vmatmul.f32.gmra.mxu2 %v238_v13  ;;  %469 = vmatmul.f32.gmra.mxu3 %v238_v13  ;;  %v240_v13 = vld [vmem:[#allocation5 + $0x38] sm:$0xff] }
  0x7f   :  { %603 = vmatpush.msrb.mxu0 %v3265_v26  ;;  %623 = vmatpush.msrb.mxu1 %v3267_v39 }
  0x80   :  { %643 = vmatpush.msrb.mxu2 %v3271_v52  ;;  %663 = vmatpush.msrb.mxu3 %v3273_v58 }
  0x81   :  { %748 = vmatpush.msra.mxu0 %v3087_v1  ;;  %768 = vmatpush.msra.mxu1 %v3089_v2 }
  0x82   :  { %788 = vmatpush.msra.mxu2 %v3093_v4  ;;  %808 = vmatpush.msra.mxu3 %v3091_v3 }
  0x83   :  { %749 = vmatpush.msra.mxu0 %v3095_v5  ;;  %769 = vmatpush.msra.mxu1 %v3097_v6 }
  0x84   :  { %789 = vmatpush.msra.mxu2 %v3103_v8  ;;  %809 = vmatpush.msra.mxu3 %v3101_v7 }
  0x85   :  { %349 = vmatmul.f32.gmra.mxu0 %v239_v0  ;;  %390 = vmatmul.f32.gmra.mxu1 %v239_v0 }
  0x86   :  { %431 = vmatmul.f32.gmra.mxu2 %v239_v0  ;;  %472 = vmatmul.f32.gmra.mxu3 %v239_v0  ;;  %v229_v0 = vld [vmem:[#allocation17] sm:$0xff] }
  0x87   :  { %750 = vmatpush.msra.mxu0 %v3106_v9  ;;  %770 = vmatpush.msra.mxu1 %v3108_v10 }
  0x88   :  { %790 = vmatpush.msra.mxu2 %v3115_v12  ;;  %810 = vmatpush.msra.mxu3 %v3113_v11 }
  0x89   :  { %751 = vmatpush.msra.mxu0 %v3121_v14  ;;  %771 = vmatpush.msra.mxu1 %v3123_v15 }
  0x8a   :  { %791 = vmatpush.msra.mxu2 %v3129_v17  ;;  %811 = vmatpush.msra.mxu3 %v3127_v16 }
  0x8b   :  { %752 = vmatpush.msra.mxu0 %v3131_v18  ;;  %772 = vmatpush.msra.mxu1 %v3133_v19 }
  0x8c   :  { %792 = vmatpush.msra.mxu2 %v3139_v21  ;;  %812 = vmatpush.msra.mxu3 %v3137_v20 }
  0x8d   :  { %352 = vmatmul.f32.gmra.mxu0 %v240_v13  ;;  %393 = vmatmul.f32.gmra.mxu1 %v240_v13 }
  0x8e   :  { %434 = vmatmul.f32.gmra.mxu2 %v240_v13  ;;  %475 = vmatmul.f32.gmra.mxu3 %v240_v13  ;;  %v4146_v13 = vld [vmem:[#allocation49_spill] sm:$0xff] }
  0x8f   :  { %753 = vmatpush.msra.mxu0 %v3142_v22  ;;  %773 = vmatpush.msra.mxu1 %v3144_v23 }
  0x90   :  { %793 = vmatpush.msra.mxu2 %v3151_v25  ;;  %813 = vmatpush.msra.mxu3 %v3149_v24 }
  0x91   :  { %754 = vmatpush.msra.mxu0 %v3157_v27  ;;  %774 = vmatpush.msra.mxu1 %v3159_v28 }
  0x92   :  { %794 = vmatpush.msra.mxu2 %v3165_v30  ;;  %814 = vmatpush.msra.mxu3 %v3163_v29 }
  0x93   :  { %755 = vmatpush.msra.mxu0 %v3167_v31  ;;  %775 = vmatpush.msra.mxu1 %v3169_v32 }
  0x94   :  { %795 = vmatpush.msra.mxu2 %v3175_v34  ;;  %815 = vmatpush.msra.mxu3 %v3173_v33 }
  0x95   :  { %604 = vmatmul.f32.vlgmr.msrb.gmra.mxu0 %v229_v0  ;;  %624 = vmatmul.f32.vlgmr.msrb.gmra.mxu1 %v229_v0 }
  0x96   :  { %644 = vmatmul.f32.vlgmr.msrb.gmra.mxu2 %v229_v0  ;;  %664 = vmatmul.f32.vlgmr.msrb.gmra.mxu3 %v229_v0  ;;  %v4147_v0 = vld [vmem:[#allocation55_spill] sm:$0xff] }
  0x97   :  { %756 = vmatpush.msra.mxu0 %v3178_v35  ;;  %776 = vmatpush.msra.mxu1 %v3180_v36 }
  0x98   :  { %796 = vmatpush.msra.mxu2 %v3187_v38  ;;  %816 = vmatpush.msra.mxu3 %v3185_v37 }
  0x99   :  { %757 = vmatpush.msra.mxu0 %v3193_v40  ;;  %777 = vmatpush.msra.mxu1 %v3195_v41 }
  0x9a   :  { %797 = vmatpush.msra.mxu2 %v3201_v43  ;;  %817 = vmatpush.msra.mxu3 %v3199_v42 }
  0x9b   :  { %758 = vmatpush.msra.mxu0 %v3203_v44  ;;  %778 = vmatpush.msra.mxu1 %v3205_v45 }
  0x9c   :  { %798 = vmatpush.msra.mxu2 %v3211_v47  ;;  %818 = vmatpush.msra.mxu3 %v3209_v46 }
  0x9d   :  { %759 = vmatpush.msra.mxu0 %v3214_v48  ;;  %779 = vmatpush.msra.mxu1 %v3216_v49 }
  0x9e   :  { %799 = vmatpush.msra.mxu2 %v3223_v51  ;;  %819 = vmatpush.msra.mxu3 %v3221_v50 }
  0x9f   :  { %760 = vmatpush.msra.mxu0 %v3229_v53  ;;  %780 = vmatpush.msra.mxu1 %v3231_v54 }
  0xa0   :  { %800 = vmatpush.msra.mxu2 %v3237_v56  ;;  %820 = vmatpush.msra.mxu3 %v3235_v55 }
  0xa1   :  { %761 = vmatpush.msra.mxu0 %v3239_v57  ;;  %781 = vmatpush.msra.mxu1 %v4146_v13 }
  0xa2   :  { %801 = vmatpush.msra.mxu2 %v3247_v60  ;;  %821 = vmatpush.msra.mxu3 %v3245_v59 }
  0xa3   :  { %762 = vmatpush.msra.mxu0 %v3250_v61  ;;  %782 = vmatpush.msra.mxu1 %v3252_v62 }
  0xa4   :  { %802 = vmatpush.msra.mxu2 %v3257_v63  ;;  %822 = vmatpush.msra.mxu3 %v4147_v0 }
  0xa5   :  { %763 = vmatpush.msra.mxu0 %v3265_v26  ;;  %783 = vmatpush.msra.mxu1 %v3267_v39 }
  0xa6   :  { %803 = vmatpush.msra.mxu2 %v3271_v52  ;;  %823 = vmatpush.msra.mxu3 %v3273_v58 }
  0xa7   :  { %908 = vmatpush.msrb.mxu0 %v3087_v1  ;;  %928 = vmatpush.msrb.mxu1 %v3089_v2 }
  0xa8   :  { %948 = vmatpush.msrb.mxu2 %v3093_v4  ;;  %968 = vmatpush.msrb.mxu3 %v3091_v3 }
  0xa9   :  { %909 = vmatpush.msrb.mxu0 %v3095_v5  ;;  %929 = vmatpush.msrb.mxu1 %v3097_v6 }
  0xaa   :  { %949 = vmatpush.msrb.mxu2 %v3103_v8  ;;  %969 = vmatpush.msrb.mxu3 %v3101_v7 }
  0xab   :  { %910 = vmatpush.msrb.mxu0 %v3106_v9  ;;  %930 = vmatpush.msrb.mxu1 %v3108_v10 }
  0xac   :  { %950 = vmatpush.msrb.mxu2 %v3115_v12  ;;  %970 = vmatpush.msrb.mxu3 %v3113_v11 }
  0xad   :  { %911 = vmatpush.msrb.mxu0 %v3121_v14  ;;  %931 = vmatpush.msrb.mxu1 %v3123_v15 }
  0xae   :  { %951 = vmatpush.msrb.mxu2 %v3129_v17  ;;  %971 = vmatpush.msrb.mxu3 %v3127_v16 }
  0xaf   :  { %912 = vmatpush.msrb.mxu0 %v3131_v18  ;;  %932 = vmatpush.msrb.mxu1 %v3133_v19 }
  0xb0   :  { %952 = vmatpush.msrb.mxu2 %v3139_v21  ;;  %972 = vmatpush.msrb.mxu3 %v3137_v20 }
  0xb1   :  { %913 = vmatpush.msrb.mxu0 %v3142_v22  ;;  %933 = vmatpush.msrb.mxu1 %v3144_v23 }
  0xb2   :  { %953 = vmatpush.msrb.mxu2 %v3151_v25  ;;  %973 = vmatpush.msrb.mxu3 %v3149_v24 }
  0xb3   :  { %914 = vmatpush.msrb.mxu0 %v3157_v27  ;;  %934 = vmatpush.msrb.mxu1 %v3159_v28 }
  0xb4   :  { %954 = vmatpush.msrb.mxu2 %v3165_v30  ;;  %974 = vmatpush.msrb.mxu3 %v3163_v29 }
  0xb5   :  { %915 = vmatpush.msrb.mxu0 %v3167_v31  ;;  %935 = vmatpush.msrb.mxu1 %v3169_v32 }
  0xb6   :  { %955 = vmatpush.msrb.mxu2 %v3175_v34  ;;  %975 = vmatpush.msrb.mxu3 %v3173_v33 }
  0xb7   :  { %916 = vmatpush.msrb.mxu0 %v3178_v35  ;;  %936 = vmatpush.msrb.mxu1 %v3180_v36 }
  0xb8   :  { %956 = vmatpush.msrb.mxu2 %v3187_v38  ;;  %976 = vmatpush.msrb.mxu3 %v3185_v37 }
  0xb9   :  { %917 = vmatpush.msrb.mxu0 %v3193_v40  ;;  %937 = vmatpush.msrb.mxu1 %v3195_v41 }
  0xba   :  { %957 = vmatpush.msrb.mxu2 %v3201_v43  ;;  %977 = vmatpush.msrb.mxu3 %v3199_v42 }
  0xbb   :  { %918 = vmatpush.msrb.mxu0 %v3203_v44  ;;  %938 = vmatpush.msrb.mxu1 %v3205_v45 }
  0xbc   :  { %958 = vmatpush.msrb.mxu2 %v3211_v47  ;;  %978 = vmatpush.msrb.mxu3 %v3209_v46 }
  0xbd   :  { %919 = vmatpush.msrb.mxu0 %v3214_v48  ;;  %939 = vmatpush.msrb.mxu1 %v3216_v49 }
  0xbe   :  { %959 = vmatpush.msrb.mxu2 %v3223_v51  ;;  %979 = vmatpush.msrb.mxu3 %v3221_v50 }
  0xbf   :  { %920 = vmatpush.msrb.mxu0 %v3229_v53  ;;  %940 = vmatpush.msrb.mxu1 %v3231_v54 }
  0xc0   :  { %960 = vmatpush.msrb.mxu2 %v3237_v56  ;;  %980 = vmatpush.msrb.mxu3 %v3235_v55 }
  0xc1   :  { %921 = vmatpush.msrb.mxu0 %v3239_v57  ;;  %941 = vmatpush.msrb.mxu1 %v4146_v13  ;;  %v305_v57 = vld [vmem:[#allocation11] sm:$0xf] }
  0xc2   :  { %961 = vmatpush.msrb.mxu2 %v3247_v60  ;;  %981 = vmatpush.msrb.mxu3 %v3245_v59  ;;  %v307_v59 = vperm.slane %v305_v57, 0  ;;  %v308_v55 = vperm.slane %v305_v57, 1 }
  0xc3   :  { %922 = vmatpush.msrb.mxu0 %v3250_v61  ;;  %942 = vmatpush.msrb.mxu1 %v3252_v62 }
  0xc4   :  { %962 = vmatpush.msrb.mxu2 %v3257_v63  ;;  %982 = vmatpush.msrb.mxu3 %v4147_v0 }
  0xc5   :  { %923 = vmatpush.msrb.mxu0 %v3265_v26  ;;  %943 = vmatpush.msrb.mxu1 %v3267_v39  ;;  %v3415_v39 = vperm.slane %v305_v57, 2 }
  0xc6   :  { %963 = vmatpush.msrb.mxu2 %v3271_v52  ;;  %983 = vmatpush.msrb.mxu3 %v3273_v58  ;;  %v310_v52 = vperm.slane %v305_v57, 3 }
  0xd2   :  { %v332_v13 = vpop.f32.mrf.mxu0  ;;  %v373_v60 = vpop.f32.mrf.mxu1 }
  0xd9   :  { %v3407_v61 = vpop.f32.mrf.mxu2  ;;  %v3409_v62 = vpop.f32.mrf.mxu3 }
  0xda   :  { %v335_v63 = vpop.f32.mrf.mxu0  ;;  %v376_v56 = vpop.f32.mrf.mxu1 }
  0xdb   :  { %v3411_v0 = vadd.f32 %v335_v63, %v307_v59  ;;  %v3413_v26 = vadd.f32 %v376_v56, %v308_v55 }
  0xdd   :  { %4148 = vst [vmem:[#allocation60_spill] sm:$0xff] %v3411_v0 }
  0xde   :  { %4149 = vst [vmem:[#allocation61_spill] sm:$0xff] %v3413_v26 }
  0xe1   :  { %v417_v54 = vpop.f32.mrf.mxu2  ;;  %v458_v58 = vpop.f32.mrf.mxu3 }
  0xe2   :  { %v3418_v53 = vadd.f32 %v417_v54, %v3415_v39  ;;  %v3420_v50 = vadd.f32 %v458_v58, %v310_v52  ;;  %v338_v51 = vpop.f32.mrf.mxu0  ;;  %v379_v49 = vpop.f32.mrf.mxu1 }
  0xe3   :  { %v3422_v48 = vadd.f32 %v338_v51, %v307_v59  ;;  %v3424_v46 = vadd.f32 %v379_v49, %v308_v55 }
  0xe4   :  { %4150 = vst [vmem:[#allocation62_spill] sm:$0xff] %v3418_v53 }
  0xe5   :  { %4151 = vst [vmem:[#allocation63_spill] sm:$0xff] %v3420_v50 }
  0xe6   :  { %4152 = vst [vmem:[#allocation64_spill] sm:$0xff] %v3422_v48 }
  0xe7   :  { %4153 = vst [vmem:[#allocation65_spill] sm:$0xff] %v3424_v46 }
  0xe9   :  { %v420_v63 = vpop.f32.mrf.mxu2  ;;  %v461_v0 = vpop.f32.mrf.mxu3 }
  0xea   :  { %v3427_v56 = vadd.f32 %v420_v63, %v3415_v39  ;;  %v3429_v26 = vadd.f32 %v461_v0, %v310_v52  ;;  %v341_v57 = vpop.f32.mrf.mxu0  ;;  %v382_v47 = vpop.f32.mrf.mxu1 }
  0xeb   :  { %v3431_v45 = vadd.f32 %v341_v57, %v307_v59  ;;  %v3433_v54 = vadd.f32 %v382_v47, %v308_v55 }
  0xec   :  { %4154 = vst [vmem:[#allocation66_spill] sm:$0xff] %v3427_v56 }
  0xed   :  { %4155 = vst [vmem:[#allocation67_spill] sm:$0xff] %v3429_v26 }
  0xee   :  { %4156 = vst [vmem:[#allocation68_spill] sm:$0xff] %v3431_v45 }
  0xef   :  { %4157 = vst [vmem:[#allocation69_spill] sm:$0xff] %v3433_v54 }
  0xf1   :  { %v423_v58 = vpop.f32.mrf.mxu2  ;;  %v464_v53 = vpop.f32.mrf.mxu3 }
  0xf2   :  { %v3436_v51 = vadd.f32 %v423_v58, %v3415_v39  ;;  %v3438_v49 = vadd.f32 %v464_v53, %v310_v52  ;;  %v344_v46 = vpop.f32.mrf.mxu0  ;;  %v385_v48 = vpop.f32.mrf.mxu1 }
  0xf3   :  { %v3440_v50 = vadd.f32 %v344_v46, %v307_v59  ;;  %v3442_v63 = vadd.f32 %v385_v48, %v308_v55 }
  0xf4   :  { %4158 = vst [vmem:[#allocation70_spill] sm:$0xff] %v3436_v51 }
  0xf5   :  { %4159 = vst [vmem:[#allocation71_spill] sm:$0xff] %v3438_v49 }
  0xf6   :  { %4160 = vst [vmem:[#allocation72_spill] sm:$0xff] %v3440_v50 }
  0xf7   :  { %4161 = vst [vmem:[#allocation73_spill] sm:$0xff] %v3442_v63 }
  0xf9   :  { %v426_v0 = vpop.f32.mrf.mxu2  ;;  %v467_v56 = vpop.f32.mrf.mxu3 }
  0xfa   :  { %v3445_v57 = vadd.f32 %v426_v0, %v3415_v39  ;;  %v3447_v47 = vadd.f32 %v467_v56, %v310_v52  ;;  %v347_v54 = vpop.f32.mrf.mxu0  ;;  %v388_v45 = vpop.f32.mrf.mxu1 }
  0xfb   :  { %v3449_v26 = vadd.f32 %v347_v54, %v307_v59  ;;  %v3451_v58 = vadd.f32 %v388_v45, %v308_v55 }
  0xfc   :  { %4162 = vst [vmem:[#allocation74_spill] sm:$0xff] %v3445_v57 }
  0xfd   :  { %4163 = vst [vmem:[#allocation75_spill] sm:$0xff] %v3447_v47 }
  0xfe   :  { %4164 = vst [vmem:[#allocation76_spill] sm:$0xff] %v3449_v26 }
  0xff   :  { %4165 = vst [vmem:[#allocation77_spill] sm:$0xff] %v3451_v58 }
 0x101   :  { %v429_v53 = vpop.f32.mrf.mxu2  ;;  %v470_v51 = vpop.f32.mrf.mxu3 }
 0x102   :  { %v3454_v46 = vadd.f32 %v429_v53, %v3415_v39  ;;  %v3456_v48 = vadd.f32 %v470_v51, %v310_v52  ;;  %v350_v63 = vpop.f32.mrf.mxu0  ;;  %v391_v50 = vpop.f32.mrf.mxu1  ;;  %v333_v51 = vadd.f32 %v332_v13, %v307_v59 }
 0x103   :  { %v3458_v49 = vadd.f32 %v350_v63, %v307_v59  ;;  %v3460_v0 = vadd.f32 %v391_v50, %v308_v55 }
 0x104   :  { %4166 = vst [vmem:[#allocation78_spill] sm:$0xff] %v3454_v46  ;;  %v374_v46 = vadd.f32 %v373_v60, %v308_v55 }
 0x105   :  { %4167 = vst [vmem:[#allocation79_spill] sm:$0xff] %v3456_v48 }
 0x106   :  { %4168 = vst [vmem:[#allocation80_spill] sm:$0xff] %v3458_v49 }
 0x107   :  { %4169 = vst [vmem:[#allocation81_spill] sm:$0xff] %v3460_v0 }
 0x109   :  { %v432_v56 = vpop.f32.mrf.mxu2  ;;  %v473_v57 = vpop.f32.mrf.mxu3 }
 0x10a   :  { %v3463_v54 = vadd.f32 %v432_v56, %v3415_v39  ;;  %v3465_v45 = vadd.f32 %v473_v57, %v310_v52  ;;  %v353_v58 = vpop.f32.mrf.mxu0  ;;  %v394_v26 = vpop.f32.mrf.mxu1 }
 0x10b   :  { %v3467_v47 = vadd.f32 %v353_v58, %v307_v59  ;;  %v3469_v53 = vadd.f32 %v394_v26, %v308_v55  ;;  %v456_v58 = vadd.f32 %v3409_v62, %v310_v52 }
 0x10c   :  { %4170 = vst [vmem:[#allocation82_spill] sm:$0xff] %v3463_v54 }
 0x10d   :  { %4171 = vst [vmem:[#allocation83_spill] sm:$0xff] %v3465_v45 }
 0x10e   :  { %4172 = vst [vmem:[#allocation84_spill] sm:$0xff] %v3467_v47 }
 0x10f   :  { %4173 = vst [vmem:[#allocation85_spill] sm:$0xff] %v3469_v53 }
 0x111   :  { %v435_v48 = vpop.f32.mrf.mxu2  ;;  %v476_v63 = vpop.f32.mrf.mxu3 }
 0x112   :  { %v3472_v50 = vadd.f32 %v435_v48, %v3415_v39  ;;  %v3474_v0 = vadd.f32 %v476_v63, %v310_v52  ;;  %v605_v49 = vpop.f32.mrf.mxu0  ;;  %v625_v56 = vpop.f32.mrf.mxu1 }
 0x113   :  { %v668_v54 = vadd.f32 %v605_v49, %v333_v51  ;;  %v669_v57 = vadd.f32 %v625_v56, %v374_v46  ;;  %v415_v49 = vadd.f32 %v3407_v61, %v3415_v39 }
 0x114   :  { %4174 = vst [vmem:[#allocation86_spill] sm:$0xff] %v3472_v50 }
 0x115   :  { %4175 = vst [vmem:[#allocation87_spill] sm:$0xff] %v3474_v0  ;;  %v2353_v45 = vmul.f32 -1.442695, %v668_v54  ;;  %v2354_v44 = vmul.f32 -1.442695, %v669_v57 }
 0x117   :  { %2398 = vpow2.f32 %v2353_v45 }
 0x118   :  { %2400 = vpow2.f32 %v2354_v44 }
 0x119   :  { %v665_v26 = vpop.f32.mrf.mxu3  ;;  %v645_v63 = vpop.f32.mrf.mxu2 }
 0x11a   :  { %v671_v59 = vadd.f32 %v665_v26, %v456_v58  ;;  %v670_v45 = vadd.f32 %v645_v63, %v415_v49 }
 0x11c   :  { %v2355_v55 = vmul.f32 -1.442695, %v671_v59 }
 0x11d   :  { %v2399_v60 = vpop.eup %2398 }
 0x11e   :  { %v2401_v13 = vpop.eup %2400  ;;  %v675_v53 = vadd.f32 1.0, %v2399_v60  ;;  %2402 = vpow2.f32 %v2355_v55 }
 0x11f   :  { %v694_v48 = vadd.f32 1.0, %v2401_v13 }
 0x120   :  { %2404 = vrcp.f32 %v675_v53  ;;  %v687_v57 = vand.u32 2147483648, %v675_v53  ;;  %v685_v59 = vand.u32 2147483647, %v675_v53  ;;  %vm681_vm2 = vweird.f32 %v675_v53 }
 0x121   :  { %2406 = vrcp.f32 %v694_v48  ;;  %v706_v58 = vand.u32 2147483648, %v694_v48  ;;  %v704_v60 = vand.u32 2147483647, %v694_v48  ;;  %vm700_vm3 = vweird.f32 %v694_v48 }
 0x122   :  { %v688_v39 = vor.u32 1.1754944e-38, %v687_v57  ;;  %vm686_vm6 = vcmp.eq.f32.partialorder %v685_v59, 8.507059e+37 }
 0x123   :  { %v707_v49 = vor.u32 1.1754944e-38, %v706_v58  ;;  %vm705_vm7 = vcmp.eq.f32.partialorder %v704_v60, 8.507059e+37 }
 0x124   :  { %v2403_v50 = vpop.eup %2402 }
 0x125   :  { %v714_v46 = vadd.f32 1.0, %v2403_v50 }
 0x126   :  { %v2405_v54 = vpop.eup %2404 }
 0x127   :  { %v2407_v62 = vpop.eup %2406  ;;  %v677_v44 = vmul.f32 %v2405_v54, %v675_v53  ;;  %2408 = vrcp.f32 %v714_v46  ;;  %vm682_vm0 = vweird.f32 %v2405_v54  ;;  %v726_v57 = vand.u32 2147483648, %v714_v46 }
 0x128   :  { %v696_v52 = vmul.f32 %v2407_v62, %v694_v48  ;;  %2410 = vtanh.f32 %v670_v45  ;;  %vm701_vm1 = vweird.f32 %v2407_v62  ;;  %vm683_vm4 = vmor %vm681_vm2, %vm682_vm0  ;;  %vm720_vm9 = vweird.f32 %v714_v46 }
 0x129   :  { %v678_v51 = vsub.f32 1.0, %v677_v44  ;;  %vm702_vm5 = vmor %vm700_vm3, %vm701_vm1  ;;  %v231_v44 = vld [vmem:[#allocation19] sm:$0xff]  ;;  %v724_v58 = vand.u32 2147483647, %v714_v46  ;;  %v727_v59 = vor.u32 1.1754944e-38, %v726_v57 }
 0x12a   :  { %v697_v56 = vsub.f32 1.0, %v696_v52 }
 0x12b   :  { %v679_v26 = vmul.f32 %v2405_v54, %v678_v51  ;;  %vm725_vm11 = vcmp.eq.f32.partialorder %v724_v58, 8.507059e+37 }
 0x12c   :  { %v698_v55 = vmul.f32 %v2407_v62, %v697_v56 }
 0x12d   :  { %v2409_v13 = vpop.eup %2408  ;;  %v680_v61 = vadd.f32 %v2405_v54, %v679_v26 }
 0x12e   :  { %v699_v50 = vadd.f32 %v2407_v62, %v698_v55  ;;  %v716_v63 = vmul.f32 %v2409_v13, %v714_v46  ;;  %v2411_v45 = vpop.eup %2410  ;;  %vm721_vm8 = vweird.f32 %v2409_v13 }
 0x12f   :  { %v684_v52 = vsel %vm683_vm4, %v2405_v54, %v680_v61  ;;  %vm722_vm10 = vmor %vm720_vm9, %vm721_vm8 }
 0x130   :  { %v689_v51 = vsel %vm686_vm6, %v688_v39, %v684_v52  ;;  %v703_v0 = vsel %vm702_vm5, %v2407_v62, %v699_v50  ;;  %v717_v56 = vsub.f32 1.0, %v716_v63  ;;  %v4205_v50 = vld [vmem:[#allocation62_spill] sm:$0xff] }
 0x131   :  { %v708_v47 = vsel %vm705_vm7, %v707_v49, %v703_v0  ;;  %v731_v42 = vmul.f32 %v2411_v45, %v689_v51 }
 0x132   :  { %v730_v43 = vmul.f32 %v708_v47, %v231_v44  ;;  %v718_v26 = vmul.f32 %v2409_v13, %v717_v56 }
 0x134   :  { %v3479_v53 = vadd.f32 %v731_v42, %v730_v43  ;;  %v719_v48 = vadd.f32 %v2409_v13, %v718_v26 }
 0x136   :  { %2412 = vtanh.f32 %v3479_v53  ;;  %v723_v54 = vsel %vm722_vm10, %v2409_v13, %v719_v48 }
 0x137   :  { %v728_v55 = vsel %vm725_vm11, %v727_v59, %v723_v54 }
 0x13c   :  { %v2413_v62 = vpop.eup %2412 }
 0x13d   :  { %v734_v60 = vmul.f32 %v2413_v62, %v728_v55 }
 0x13f   :  { %764 = vmatmul.f32.vlgmr.msra.gmra.mxu0 %v734_v60  ;;  %784 = vmatmul.f32.vlgmr.msra.gmra.mxu1 %v734_v60 }
 0x140   :  { %804 = vmatmul.f32.vlgmr.msra.gmra.mxu2 %v734_v60  ;;  %824 = vmatmul.f32.vlgmr.msra.gmra.mxu3 %v734_v60 }
 0x141   :  { %1068 = vmatpush.msra.mxu0 %v3087_v1  ;;  %1088 = vmatpush.msra.mxu1 %v3089_v2  ;;  %v4176_v1 = vld [vmem:[#allocation35_spill] sm:$0xff]  ;;  %v4177_v2 = vld [vmem:[#allocation34_spill] sm:$0xff] }
 0x142   :  { %1108 = vmatpush.msra.mxu2 %v3093_v4  ;;  %1128 = vmatpush.msra.mxu3 %v3091_v3  ;;  %v4178_v3 = vld [vmem:[#allocation36_spill] sm:$0xff]  ;;  %v4179_v4 = vld [vmem:[#allocation37_spill] sm:$0xff] }
 0x143   :  { %1069 = vmatpush.msra.mxu0 %v3095_v5  ;;  %1089 = vmatpush.msra.mxu1 %v3097_v6  ;;  %v4180_v5 = vld [vmem:[#allocation39_spill] sm:$0xff]  ;;  %v4181_v6 = vld [vmem:[#allocation38_spill] sm:$0xff] }
 0x144   :  { %1109 = vmatpush.msra.mxu2 %v3103_v8  ;;  %1129 = vmatpush.msra.mxu3 %v3101_v7  ;;  %v4182_v7 = vld [vmem:[#allocation40_spill] sm:$0xff]  ;;  %v4183_v8 = vld [vmem:[#allocation41_spill] sm:$0xff] }
 0x145   :  { %1070 = vmatpush.msra.mxu0 %v3106_v9  ;;  %1090 = vmatpush.msra.mxu1 %v3108_v10  ;;  %v4184_v9 = vld [vmem:[#allocation43_spill] sm:$0xff]  ;;  %v4185_v10 = vld [vmem:[#allocation42_spill] sm:$0xff] }
 0x146   :  { %1110 = vmatpush.msra.mxu2 %v3115_v12  ;;  %1130 = vmatpush.msra.mxu3 %v3113_v11  ;;  %v4186_v11 = vld [vmem:[#allocation44_spill] sm:$0xff]  ;;  %v4187_v12 = vld [vmem:[#allocation45_spill] sm:$0xff] }
 0x147   :  { %1071 = vmatpush.msra.mxu0 %v3121_v14  ;;  %1091 = vmatpush.msra.mxu1 %v3123_v15  ;;  %v4188_v14 = vld [vmem:[#allocation47_spill] sm:$0xff]  ;;  %v4189_v15 = vld [vmem:[#allocation46_spill] sm:$0xff] }
 0x148   :  { %1111 = vmatpush.msra.mxu2 %v3129_v17  ;;  %1131 = vmatpush.msra.mxu3 %v3127_v16  ;;  %v4190_v16 = vld [vmem:[#allocation48_spill] sm:$0xff]  ;;  %v4191_v17 = vld [vmem:[#allocation49_spill] sm:$0xff] }
 0x149   :  { %1072 = vmatpush.msra.mxu0 %v3131_v18  ;;  %1092 = vmatpush.msra.mxu1 %v3133_v19  ;;  %v4192_v18 = vld [vmem:[#allocation51_spill] sm:$0xff]  ;;  %v4193_v19 = vld [vmem:[#allocation50_spill] sm:$0xff] }
 0x14a   :  { %1112 = vmatpush.msra.mxu2 %v3139_v21  ;;  %1132 = vmatpush.msra.mxu3 %v3137_v20  ;;  %v4194_v20 = vld [vmem:[#allocation52_spill] sm:$0xff]  ;;  %v4195_v21 = vld [vmem:[#allocation53_spill] sm:$0xff] }
 0x14b   :  { %1073 = vmatpush.msra.mxu0 %v3142_v22  ;;  %1093 = vmatpush.msra.mxu1 %v3144_v23  ;;  %v4196_v22 = vld [vmem:[#allocation54_spill] sm:$0xff]  ;;  %v4197_v23 = vld [vmem:[#allocation55_spill] sm:$0xff] }
 0x14c   :  { %1113 = vmatpush.msra.mxu2 %v3151_v25  ;;  %1133 = vmatpush.msra.mxu3 %v3149_v24  ;;  %v4198_v24 = vld [vmem:[#allocation56_spill] sm:$0xff]  ;;  %v4199_v25 = vld [vmem:[#allocation57_spill] sm:$0xff] }
 0x14d   :  { %1074 = vmatpush.msra.mxu0 %v3157_v27  ;;  %1094 = vmatpush.msra.mxu1 %v3159_v28  ;;  %v4200_v27 = vld [vmem:[#allocation58_spill] sm:$0xff]  ;;  %v4201_v28 = vld [vmem:[#allocation59_spill] sm:$0xff] }
 0x14e   :  { %1114 = vmatpush.msra.mxu2 %v3165_v30  ;;  %1134 = vmatpush.msra.mxu3 %v3163_v29 }
 0x14f   :  { %1075 = vmatpush.msra.mxu0 %v3167_v31  ;;  %1095 = vmatpush.msra.mxu1 %v3169_v32  ;;  %v4202_v31 = vld [vmem:[#allocation60_spill] sm:$0xff] }
 0x150   :  { %1115 = vmatpush.msra.mxu2 %v3175_v34  ;;  %1135 = vmatpush.msra.mxu3 %v3173_v33  ;;  %v4203_v33 = vld [vmem:[#allocation61_spill] sm:$0xff] }
 0x151   :  { %1076 = vmatpush.msra.mxu0 %v3178_v35  ;;  %1096 = vmatpush.msra.mxu1 %v3180_v36 }
 0x152   :  { %1116 = vmatpush.msra.mxu2 %v3187_v38  ;;  %1136 = vmatpush.msra.mxu3 %v3185_v37  ;;  %v4204_v38 = vld [vmem:[#allocation63_spill] sm:$0xff] }
 0x153   :  { %1077 = vmatpush.msra.mxu0 %v3193_v40  ;;  %1097 = vmatpush.msra.mxu1 %v3195_v41 }
 0x154   :  { %1117 = vmatpush.msra.mxu2 %v4176_v1  ;;  %1137 = vmatpush.msra.mxu3 %v4177_v2 }
 0x155   :  { %1078 = vmatpush.msra.mxu0 %v4178_v3  ;;  %1098 = vmatpush.msra.mxu1 %v4179_v4 }
 0x156   :  { %1118 = vmatpush.msra.mxu2 %v4180_v5  ;;  %1138 = vmatpush.msra.mxu3 %v4181_v6 }
 0x157   :  { %1079 = vmatpush.msra.mxu0 %v4182_v7  ;;  %1099 = vmatpush.msra.mxu1 %v4183_v8 }
 0x158   :  { %1119 = vmatpush.msra.mxu2 %v4184_v9  ;;  %1139 = vmatpush.msra.mxu3 %v4185_v10 }
 0x159   :  { %1080 = vmatpush.msra.mxu0 %v4186_v11  ;;  %1100 = vmatpush.msra.mxu1 %v4187_v12 }
 0x15a   :  { %1120 = vmatpush.msra.mxu2 %v4188_v14  ;;  %1140 = vmatpush.msra.mxu3 %v4189_v15 }
 0x15b   :  { %1081 = vmatpush.msra.mxu0 %v4190_v16  ;;  %1101 = vmatpush.msra.mxu1 %v4191_v17 }
 0x15c   :  { %1121 = vmatpush.msra.mxu2 %v4192_v18  ;;  %1141 = vmatpush.msra.mxu3 %v4193_v19 }
 0x15d   :  { %1082 = vmatpush.msra.mxu0 %v4194_v20  ;;  %1102 = vmatpush.msra.mxu1 %v4195_v21 }
 0x15e   :  { %1122 = vmatpush.msra.mxu2 %v4196_v22  ;;  %1142 = vmatpush.msra.mxu3 %v4197_v23 }
 0x15f   :  { %1083 = vmatpush.msra.mxu0 %v4198_v24  ;;  %1103 = vmatpush.msra.mxu1 %v4199_v25 }
 0x160   :  { %1123 = vmatpush.msra.mxu2 %v4200_v27  ;;  %1143 = vmatpush.msra.mxu3 %v4201_v28 }
 0x1bc   :  { %v765_v29 = vpop.f32.mrf.mxu0  ;;  %v785_v30 = vpop.f32.mrf.mxu1 }
 0x1bd   :  { %v828_v32 = vadd.f32 %v765_v29, %v4202_v31  ;;  %v829_v34 = vadd.f32 %v785_v30, %v4203_v33  ;;  %v3557_v29 = vld [vmem:[#allocation10 + $0x1e8] sm:$0xff]  ;;  %v3560_v30 = vld [vmem:[#allocation10 + $0x1f0] sm:$0xff]  ;;  %v3563_v31 = vld [vmem:[#allocation10 + $0x1f8] sm:$0xff] }
 0x1be   :  { %v3569_v33 = vld [vmem:[#allocation10 + $0x1c8] sm:$0xff] }
 0x1bf   :  { %v2356_v35 = vmul.f32 -1.442695, %v828_v32  ;;  %v2357_v36 = vmul.f32 -1.442695, %v829_v34  ;;  %v3566_v32 = vld [vmem:[#allocation10 + $0x1c0] sm:$0xff]  ;;  %v3572_v34 = vld [vmem:[#allocation10 + $0x1d0] sm:$0xff] }
 0x1c1   :  { %2414 = vpow2.f32 %v2356_v35  ;;  %v3575_v35 = vld [vmem:[#allocation10 + $0x1d8] sm:$0xff] }
 0x1c2   :  { %2416 = vpow2.f32 %v2357_v36  ;;  %v3578_v36 = vld [vmem:[#allocation10 + $0x1a0] sm:$0xff] }
 0x1c3   :  { %v825_v37 = vpop.f32.mrf.mxu3  ;;  %v805_v46 = vpop.f32.mrf.mxu2 }
 0x1c4   :  { %v831_v40 = vadd.f32 %v825_v37, %v4204_v38  ;;  %v830_v63 = vadd.f32 %v805_v46, %v4205_v50  ;;  %v3581_v37 = vld [vmem:[#allocation10 + $0x1a8] sm:$0xff]  ;;  %v3584_v38 = vld [vmem:[#allocation10 + $0x1b0] sm:$0xff] }
 0x1c5   :  { %v3605_v46 = vld [vmem:[#allocation10 + $0x168] sm:$0xff] }
 0x1c6   :  { %v2358_v41 = vmul.f32 -1.442695, %v831_v40  ;;  %v3587_v40 = vld [vmem:[#allocation10 + $0x1b8] sm:$0xff]  ;;  %v3617_v50 = vld [vmem:[#allocation10 + $0x148] sm:$0xff] }
 0x1c7   :  { %v2415_v42 = vpop.eup %2414 }
 0x1c8   :  { %v2417_v43 = vpop.eup %2416  ;;  %v835_v47 = vadd.f32 1.0, %v2415_v42  ;;  %2418 = vpow2.f32 %v2358_v41  ;;  %v3590_v41 = vld [vmem:[#allocation10 + $0x180] sm:$0xff]  ;;  %v3593_v42 = vld [vmem:[#allocation10 + $0x188] sm:$0xff] }
 0x1c9   :  { %v854_v0 = vadd.f32 1.0, %v2417_v43  ;;  %v3596_v43 = vld [vmem:[#allocation10 + $0x190] sm:$0xff] }
 0x1ca   :  { %2420 = vrcp.f32 %v835_v47  ;;  %v847_v56 = vand.u32 2147483648, %v835_v47  ;;  %v845_v57 = vand.u32 2147483647, %v835_v47  ;;  %vm841_vm14 = vweird.f32 %v835_v47 }
 0x1cb   :  { %2422 = vrcp.f32 %v854_v0  ;;  %v866_v26 = vand.u32 2147483648, %v854_v0  ;;  %v864_v54 = vand.u32 2147483647, %v854_v0  ;;  %vm860_vm15 = vweird.f32 %v854_v0 }
 0x1cc   :  { %v848_v55 = vor.u32 1.1754944e-38, %v847_v56  ;;  %vm846_vm2 = vcmp.eq.f32.partialorder %v845_v57, 8.507059e+37  ;;  %v3638_v56 = vld [vmem:[#allocation10 + $0x100] sm:$0xff]  ;;  %v3647_v57 = vld [vmem:[#allocation10 + $0x118] sm:$0xff] }
 0x1cd   :  { %v867_v2 = vor.u32 1.1754944e-38, %v866_v26  ;;  %vm865_vm3 = vcmp.eq.f32.partialorder %v864_v54, 8.507059e+37  ;;  %v3641_v26 = vld [vmem:[#allocation10 + $0x108] sm:$0xff] }
 0x1ce   :  { %v2419_v13 = vpop.eup %2418  ;;  %v3653_v54 = vld [vmem:[#allocation10 + $0xe8] sm:$0xff] }
 0x1cf   :  { %v874_v61 = vadd.f32 1.0, %v2419_v13  ;;  %v3608_v13 = vld [vmem:[#allocation10 + $0x170] sm:$0xff] }
 0x1d0   :  { %v2421_v39 = vpop.eup %2420 }
 0x1d1   :  { %v2423_v49 = vpop.eup %2422  ;;  %v837_v44 = vmul.f32 %v2421_v39, %v835_v47  ;;  %2424 = vrcp.f32 %v874_v61  ;;  %vm842_vm12 = vweird.f32 %v2421_v39  ;;  %v886_v15 = vand.u32 2147483648, %v874_v61  ;;  %v3599_v47 = vld [vmem:[#allocation10 + $0x198] sm:$0xff] }
 0x1d2   :  { %v856_v52 = vmul.f32 %v2423_v49, %v854_v0  ;;  %2426 = vtanh.f32 %v830_v63  ;;  %vm861_vm13 = vweird.f32 %v2423_v49  ;;  %vm843_vm0 = vmor %vm841_vm14, %vm842_vm12  ;;  %vm880_vm5 = vweird.f32 %v874_v61  ;;  %v3602_v0 = vld [vmem:[#allocation10 + $0x160] sm:$0xff]  ;;  %v3620_v63 = vld [vmem:[#allocation10 + $0x150] sm:$0xff] }
 0x1d3   :  { %v838_v45 = vsub.f32 1.0, %v837_v44  ;;  %vm862_vm1 = vmor %vm860_vm15, %vm861_vm13  ;;  %v884_v16 = vand.u32 2147483647, %v874_v61  ;;  %v887_v18 = vor.u32 1.1754944e-38, %v886_v15  ;;  %v3626_v44 = vld [vmem:[#allocation10 + $0x120] sm:$0xff]  ;;  %v3704_v15 = vld [vmem:[#allocation10 + $0x70] sm:$0xff] }
 0x1d4   :  { %v857_v51 = vsub.f32 1.0, %v856_v52  ;;  %v3629_v52 = vld [vmem:[#allocation10 + $0x128] sm:$0xff]  ;;  %4218 = vst [vmem:[#allocation47_spill] sm:$0xff] %v3704_v15 }
 0x1d5   :  { %v839_v48 = vmul.f32 %v2421_v39, %v838_v45  ;;  %vm885_vm7 = vcmp.eq.f32.partialorder %v884_v16, 8.507059e+37  ;;  %v3632_v45 = vld [vmem:[#allocation10 + $0x130] sm:$0xff]  ;;  %v3707_v16 = vld [vmem:[#allocation10 + $0x78] sm:$0xff] }
 0x1d6   :  { %v858_v58 = vmul.f32 %v2423_v49, %v857_v51  ;;  %v3635_v51 = vld [vmem:[#allocation10 + $0x138] sm:$0xff]  ;;  %4219 = vst [vmem:[#allocation46_spill] sm:$0xff] %v3707_v16 }
 0x1d7   :  { %v2425_v59 = vpop.eup %2424  ;;  %v840_v62 = vadd.f32 %v2421_v39, %v839_v48  ;;  %v3644_v48 = vld [vmem:[#allocation10 + $0x110] sm:$0xff] }
 0x1d8   :  { %v859_v60 = vadd.f32 %v2423_v49, %v858_v58  ;;  %v876_v1 = vmul.f32 %v2425_v59, %v874_v61  ;;  %v2427_v4 = vpop.eup %2426  ;;  %vm881_vm4 = vweird.f32 %v2425_v59  ;;  %v3611_v61 = vld [vmem:[#allocation10 + $0x178] sm:$0xff]  ;;  %v3650_v58 = vld [vmem:[#allocation10 + $0xe0] sm:$0xff] }
 0x1d9   :  { %v844_v3 = vsel %vm843_vm0, %v2421_v39, %v840_v62  ;;  %vm882_vm6 = vmor %vm880_vm5, %vm881_vm4  ;;  %v3614_v39 = vld [vmem:[#allocation10 + $0x140] sm:$0xff]  ;;  %v3659_v62 = vld [vmem:[#allocation10 + $0xf8] sm:$0xff] }
 0x1da   :  { %v849_v5 = vsel %vm846_vm2, %v848_v55, %v844_v3  ;;  %v863_v6 = vsel %vm862_vm1, %v2423_v49, %v859_v60  ;;  %v877_v7 = vsub.f32 1.0, %v876_v1  ;;  %v3623_v49 = vld [vmem:[#allocation10 + $0x158] sm:$0xff]  ;;  %v3662_v55 = vld [vmem:[#allocation10 + $0xc0] sm:$0xff]  ;;  %v3665_v60 = vld [vmem:[#allocation10 + $0xc8] sm:$0xff] }
 0x1db   :  { %v868_v8 = vsel %vm865_vm3, %v867_v2, %v863_v6  ;;  %v891_v9 = vmul.f32 %v2427_v4, %v849_v5  ;;  %v3668_v1 = vld [vmem:[#allocation10 + $0xd0] sm:$0xff]  ;;  %v3671_v2 = vld [vmem:[#allocation10 + $0xd8] sm:$0xff]  ;;  %v3674_v3 = vld [vmem:[#allocation10 + $0xa0] sm:$0xff] }
 0x1dc   :  { %v890_v10 = vmul.f32 %v868_v8, %v3479_v53  ;;  %v878_v11 = vmul.f32 %v2425_v59, %v877_v7  ;;  %v3554_v53 = vld [vmem:[#allocation10 + $0x1e0] sm:$0xff]  ;;  %4206 = vst [vmem:[#allocation35_spill] sm:$0xff] %v3668_v1  ;;  %v3677_v4 = vld [vmem:[#allocation10 + $0xa8] sm:$0xff]  ;;  %v3680_v5 = vld [vmem:[#allocation10 + $0xb0] sm:$0xff] }
 0x1dd   :  { %4207 = vst [vmem:[#allocation34_spill] sm:$0xff] %v3671_v2  ;;  %v3683_v6 = vld [vmem:[#allocation10 + $0xb8] sm:$0xff]  ;;  %v3686_v7 = vld [vmem:[#allocation10 + $0x80] sm:$0xff]  ;;  %v3689_v8 = vld [vmem:[#allocation10 + $0x88] sm:$0xff] }
 0x1de   :  { %v3551_v12 = vadd.f32 %v891_v9, %v890_v10  ;;  %v879_v14 = vadd.f32 %v2425_v59, %v878_v11  ;;  %4208 = vst [vmem:[#allocation36_spill] sm:$0xff] %v3674_v3  ;;  %v3692_v9 = vld [vmem:[#allocation10 + $0x90] sm:$0xff]  ;;  %v3695_v10 = vld [vmem:[#allocation10 + $0x98] sm:$0xff]  ;;  %v3698_v11 = vld [vmem:[#allocation10 + $0x60] sm:$0xff] }
 0x1df   :  { %4209 = vst [vmem:[#allocation37_spill] sm:$0xff] %v3677_v4 }
 0x1e0   :  { %2428 = vtanh.f32 %v3551_v12  ;;  %v883_v17 = vsel %vm882_vm6, %v2425_v59, %v879_v14  ;;  %v3656_v59 = vld [vmem:[#allocation10 + $0xf0] sm:$0xff]  ;;  %4210 = vst [vmem:[#allocation39_spill] sm:$0xff] %v3680_v5  ;;  %v3701_v14 = vld [vmem:[#allocation10 + $0x68] sm:$0xff] }
 0x1e1   :  { %v888_v20 = vsel %vm885_vm7, %v887_v18, %v883_v17  ;;  %4211 = vst [vmem:[#allocation38_spill] sm:$0xff] %v3683_v6  ;;  %v3710_v17 = vld [vmem:[#allocation10 + $0x40] sm:$0xff]  ;;  %v3713_v18 = vld [vmem:[#allocation10 + $0x48] sm:$0xff] }
 0x1e2   :  { %4212 = vst [vmem:[#allocation40_spill] sm:$0xff] %v3686_v7 }
 0x1e3   :  { %4213 = vst [vmem:[#allocation41_spill] sm:$0xff] %v3689_v8 }
 0x1e4   :  { %4214 = vst [vmem:[#allocation43_spill] sm:$0xff] %v3692_v9 }
 0x1e5   :  { %4215 = vst [vmem:[#allocation42_spill] sm:$0xff] %v3695_v10 }
 0x1e6   :  { %v2429_v19 = vpop.eup %2428  ;;  %4216 = vst [vmem:[#allocation44_spill] sm:$0xff] %v3698_v11 }
 0x1e7   :  { %v894_v21 = vmul.f32 %v2429_v19, %v888_v20  ;;  %4217 = vst [vmem:[#allocation45_spill] sm:$0xff] %v3701_v14  ;;  %v3716_v19 = vld [vmem:[#allocation10 + $0x50] sm:$0xff]  ;;  %v3719_v20 = vld [vmem:[#allocation10 + $0x58] sm:$0xff] }
 0x1e8   :  { %4220 = vst [vmem:[#allocation48_spill] sm:$0xff] %v3710_v17 }
 0x1e9   :  { %924 = vmatmul.f32.vlgmr.msrb.gmra.mxu0 %v894_v21  ;;  %944 = vmatmul.f32.vlgmr.msrb.gmra.mxu1 %v894_v21  ;;  %4221 = vst [vmem:[#allocation49_spill] sm:$0xff] %v3713_v18 }
 0x1ea   :  { %964 = vmatmul.f32.vlgmr.msrb.gmra.mxu2 %v894_v21  ;;  %984 = vmatmul.f32.vlgmr.msrb.gmra.mxu3 %v894_v21  ;;  %4222 = vst [vmem:[#allocation51_spill] sm:$0xff] %v3716_v19  ;;  %v3722_v21 = vld [vmem:[#allocation10 + $0x20] sm:$0xff] }
 0x1eb   :  { %1228 = vmatpush.msrb.mxu0 %v3554_v53  ;;  %1248 = vmatpush.msrb.mxu1 %v3557_v29  ;;  %4223 = vst [vmem:[#allocation50_spill] sm:$0xff] %v3719_v20 }
 0x1ec   :  { %1268 = vmatpush.msrb.mxu2 %v3560_v30  ;;  %1288 = vmatpush.msrb.mxu3 %v3563_v31  ;;  %4224 = vst [vmem:[#allocation52_spill] sm:$0xff] %v3722_v21 }
 0x1ed   :  { %1229 = vmatpush.msrb.mxu0 %v3566_v32  ;;  %1249 = vmatpush.msrb.mxu1 %v3569_v33 }
 0x1ee   :  { %1269 = vmatpush.msrb.mxu2 %v3572_v34  ;;  %1289 = vmatpush.msrb.mxu3 %v3575_v35 }
 0x1ef   :  { %1230 = vmatpush.msrb.mxu0 %v3578_v36  ;;  %1250 = vmatpush.msrb.mxu1 %v3581_v37 }
 0x1f0   :  { %1270 = vmatpush.msrb.mxu2 %v3584_v38  ;;  %1290 = vmatpush.msrb.mxu3 %v3587_v40 }
 0x1f1   :  { %1231 = vmatpush.msrb.mxu0 %v3590_v41  ;;  %1251 = vmatpush.msrb.mxu1 %v3593_v42 }
 0x1f2   :  { %1271 = vmatpush.msrb.mxu2 %v3596_v43  ;;  %1291 = vmatpush.msrb.mxu3 %v3599_v47 }
 0x1f3   :  { %1232 = vmatpush.msrb.mxu0 %v3602_v0  ;;  %1252 = vmatpush.msrb.mxu1 %v3605_v46 }
 0x1f4   :  { %1272 = vmatpush.msrb.mxu2 %v3608_v13  ;;  %1292 = vmatpush.msrb.mxu3 %v3611_v61 }
 0x1f5   :  { %1233 = vmatpush.msrb.mxu0 %v3614_v39  ;;  %1253 = vmatpush.msrb.mxu1 %v3617_v50 }
 0x1f6   :  { %1273 = vmatpush.msrb.mxu2 %v3620_v63  ;;  %1293 = vmatpush.msrb.mxu3 %v3623_v49 }
 0x1f7   :  { %1234 = vmatpush.msrb.mxu0 %v3626_v44  ;;  %1254 = vmatpush.msrb.mxu1 %v3629_v52 }
 0x1f8   :  { %1274 = vmatpush.msrb.mxu2 %v3632_v45  ;;  %1294 = vmatpush.msrb.mxu3 %v3635_v51 }
 0x1f9   :  { %1235 = vmatpush.msrb.mxu0 %v3638_v56  ;;  %1255 = vmatpush.msrb.mxu1 %v3641_v26 }
 0x1fa   :  { %1275 = vmatpush.msrb.mxu2 %v3644_v48  ;;  %1295 = vmatpush.msrb.mxu3 %v3647_v57 }
 0x1fb   :  { %1236 = vmatpush.msrb.mxu0 %v3650_v58  ;;  %1256 = vmatpush.msrb.mxu1 %v3653_v54 }
 0x1fc   :  { %1276 = vmatpush.msrb.mxu2 %v3656_v59  ;;  %1296 = vmatpush.msrb.mxu3 %v3659_v62 }
 0x1fd   :  { %1237 = vmatpush.msrb.mxu0 %v3662_v55  ;;  %1257 = vmatpush.msrb.mxu1 %v3665_v60 }
 0x1fe   :  { %1277 = vmatpush.msrb.mxu2 %v3668_v1  ;;  %1297 = vmatpush.msrb.mxu3 %v3671_v2 }
 0x1ff   :  { %1238 = vmatpush.msrb.mxu0 %v3674_v3  ;;  %1258 = vmatpush.msrb.mxu1 %v3677_v4 }
 0x200   :  { %1278 = vmatpush.msrb.mxu2 %v3680_v5  ;;  %1298 = vmatpush.msrb.mxu3 %v3683_v6 }
 0x201   :  { %1239 = vmatpush.msrb.mxu0 %v3686_v7  ;;  %1259 = vmatpush.msrb.mxu1 %v3689_v8 }
 0x202   :  { %1279 = vmatpush.msrb.mxu2 %v3692_v9  ;;  %1299 = vmatpush.msrb.mxu3 %v3695_v10 }
 0x203   :  { %1240 = vmatpush.msrb.mxu0 %v3698_v11  ;;  %1260 = vmatpush.msrb.mxu1 %v3701_v14 }
 0x204   :  { %1280 = vmatpush.msrb.mxu2 %v3704_v15  ;;  %1300 = vmatpush.msrb.mxu3 %v3707_v16  ;;  %v3725_v16 = vld [vmem:[#allocation10 + $0x28] sm:$0xff] }
 0x205   :  { %1241 = vmatpush.msrb.mxu0 %v3710_v17  ;;  %1261 = vmatpush.msrb.mxu1 %v3713_v18  ;;  %4225 = vst [vmem:[#allocation53_spill] sm:$0xff] %v3725_v16  ;;  %v4226_v18 = vld [vmem:[#allocation64_spill] sm:$0xff]  ;;  %v4227_v17 = vld [vmem:[#allocation65_spill] sm:$0xff] }
 0x206   :  { %1281 = vmatpush.msrb.mxu2 %v3716_v19  ;;  %1301 = vmatpush.msrb.mxu3 %v3719_v20 }
 0x207   :  { %1242 = vmatpush.msrb.mxu0 %v3722_v21  ;;  %1262 = vmatpush.msrb.mxu1 %v3725_v16 }
 0x208   :  { %1282 = vmatpush.msrb.mxu2 %v4196_v22  ;;  %1302 = vmatpush.msrb.mxu3 %v4197_v23  ;;  %v4228_v23 = vld [vmem:[#allocation67_spill] sm:$0xff] }
 0x209   :  { %1243 = vmatpush.msrb.mxu0 %v4198_v24  ;;  %1263 = vmatpush.msrb.mxu1 %v4199_v25 }
 0x20a   :  { %1283 = vmatpush.msrb.mxu2 %v4200_v27  ;;  %1303 = vmatpush.msrb.mxu3 %v4201_v28 }
 0x266   :  { %v925_v20 = vpop.f32.mrf.mxu0  ;;  %v945_v19 = vpop.f32.mrf.mxu1 }
 0x267   :  { %v988_v21 = vadd.f32 %v925_v20, %v4226_v18  ;;  %v989_v15 = vadd.f32 %v945_v19, %v4227_v17  ;;  %v4229_v17 = vld [vmem:[#allocation66_spill] sm:$0xff] }
 0x269   :  { %v2359_v14 = vmul.f32 -1.442695, %v988_v21  ;;  %v2360_v16 = vmul.f32 -1.442695, %v989_v15 }
 0x26b   :  { %2430 = vpow2.f32 %v2359_v14 }
 0x26c   :  { %2432 = vpow2.f32 %v2360_v16 }
 0x26d   :  { %v985_v22 = vpop.f32.mrf.mxu3  ;;  %v965_v28 = vpop.f32.mrf.mxu2 }
 0x26e   :  { %v991_v11 = vadd.f32 %v985_v22, %v4228_v23  ;;  %v990_v19 = vadd.f32 %v965_v28, %v4229_v17 }
 0x270   :  { %v2361_v24 = vmul.f32 -1.442695, %v991_v11 }
 0x271   :  { %v2431_v10 = vpop.eup %2430 }
 0x272   :  { %v2433_v25 = vpop.eup %2432  ;;  %v995_v9 = vadd.f32 1.0, %v2431_v10  ;;  %2434 = vpow2.f32 %v2361_v24 }
 0x273   :  { %v1014_v27 = vadd.f32 1.0, %v2433_v25 }
 0x274   :  { %2436 = vrcp.f32 %v995_v9  ;;  %v1007_v11 = vand.u32 2147483648, %v995_v9  ;;  %v1005_v24 = vand.u32 2147483647, %v995_v9  ;;  %vm1001_vm10 = vweird.f32 %v995_v9 }
 0x275   :  { %2438 = vrcp.f32 %v1014_v27  ;;  %v1026_v23 = vand.u32 2147483648, %v1014_v27  ;;  %v1024_v7 = vand.u32 2147483647, %v1014_v27  ;;  %vm1020_vm11 = vweird.f32 %v1014_v27 }
 0x276   :  { %v1008_v28 = vor.u32 1.1754944e-38, %v1007_v11  ;;  %vm1006_vm14 = vcmp.eq.f32.partialorder %v1005_v24, 8.507059e+37 }
 0x277   :  { %vm1025_vm15 = vcmp.eq.f32.partialorder %v1024_v7, 8.507059e+37 }
 0x278   :  { %v2435_v8 = vpop.eup %2434 }
 0x279   :  { %v1034_v18 = vadd.f32 1.0, %v2435_v8 }
 0x27a   :  { %v2437_v20 = vpop.eup %2436 }
 0x27b   :  { %v2439_v15 = vpop.eup %2438  ;;  %v997_v14 = vmul.f32 %v2437_v20, %v995_v9  ;;  %2440 = vrcp.f32 %v1034_v18  ;;  %vm1002_vm8 = vweird.f32 %v2437_v20  ;;  %v1046_v11 = vand.u32 2147483648, %v1034_v18 }
 0x27c   :  { %v1016_v16 = vmul.f32 %v2439_v15, %v1014_v27  ;;  %2442 = vtanh.f32 %v990_v19  ;;  %vm1021_vm9 = vweird.f32 %v2439_v15  ;;  %vm1003_vm12 = vmor %vm1001_vm10, %vm1002_vm8  ;;  %vm1040_vm1 = vweird.f32 %v1034_v18 }
 0x27d   :  { %v998_v21 = vsub.f32 1.0, %v997_v14  ;;  %vm1022_vm13 = vmor %vm1020_vm11, %vm1021_vm9  ;;  %v1027_v14 = vor.u32 1.1754944e-38, %v1026_v23  ;;  %v1047_v24 = vor.u32 1.1754944e-38, %v1046_v11  ;;  %v4248_v11 = vld [vmem:[#allocation52_spill] sm:$0xff] }
 0x27e   :  { %v1017_v22 = vsub.f32 1.0, %v1016_v16 }
 0x27f   :  { %v999_v10 = vmul.f32 %v2437_v20, %v998_v21 }
 0x280   :  { %v1018_v25 = vmul.f32 %v2439_v15, %v1017_v22 }
 0x281   :  { %v2441_v6 = vpop.eup %2440  ;;  %v1000_v8 = vadd.f32 %v2437_v20, %v999_v10 }
 0x282   :  { %v1019_v17 = vadd.f32 %v2439_v15, %v1018_v25  ;;  %v1036_v5 = vmul.f32 %v2441_v6, %v1034_v18  ;;  %v2443_v19 = vpop.eup %2442  ;;  %vm1041_vm0 = vweird.f32 %v2441_v6  ;;  %v4237_v25 = vld [vmem:[#allocation41_spill] sm:$0xff] }
 0x283   :  { %v1004_v16 = vsel %vm1003_vm12, %v2437_v20, %v1000_v8  ;;  %v1044_v20 = vand.u32 2147483647, %v1034_v18  ;;  %vm1042_vm2 = vmor %vm1040_vm1, %vm1041_vm0  ;;  %v4236_v18 = vld [vmem:[#allocation40_spill] sm:$0xff]  ;;  %v4238_v8 = vld [vmem:[#allocation43_spill] sm:$0xff] }
 0x284   :  { %v1009_v4 = vsel %vm1006_vm14, %v1008_v28, %v1004_v16  ;;  %v1023_v21 = vsel %vm1022_vm13, %v2439_v15, %v1019_v17  ;;  %v1037_v3 = vsub.f32 1.0, %v1036_v5  ;;  %v4239_v28 = vld [vmem:[#allocation42_spill] sm:$0xff]  ;;  %v4240_v17 = vld [vmem:[#allocation44_spill] sm:$0xff]  ;;  %v4242_v16 = vld [vmem:[#allocation47_spill] sm:$0xff] }
 0x285   :  { %v1028_v22 = vsel %vm1025_vm15, %v1027_v14, %v1023_v21  ;;  %v1051_v2 = vmul.f32 %v2443_v19, %v1009_v4  ;;  %vm1045_vm3 = vcmp.eq.f32.partialorder %v1044_v20, 8.507059e+37  ;;  %v4234_v4 = vld [vmem:[#allocation39_spill] sm:$0xff]  ;;  %v4241_v14 = vld [vmem:[#allocation45_spill] sm:$0xff]  ;;  %v4243_v19 = vld [vmem:[#allocation46_spill] sm:$0xff] }
 0x286   :  { %v1050_v1 = vmul.f32 %v1028_v22, %v3551_v12  ;;  %v1038_v10 = vmul.f32 %v2441_v6, %v1037_v3  ;;  %v4230_v12 = vld [vmem:[#allocation35_spill] sm:$0xff]  ;;  %v4233_v3 = vld [vmem:[#allocation37_spill] sm:$0xff]  ;;  %v4244_v21 = vld [vmem:[#allocation48_spill] sm:$0xff] }
 0x287   :  { %v4245_v22 = vld [vmem:[#allocation49_spill] sm:$0xff] }
 0x288   :  { %v3739_v9 = vadd.f32 %v1051_v2, %v1050_v1  ;;  %v1039_v27 = vadd.f32 %v2441_v6, %v1038_v10  ;;  %v4231_v1 = vld [vmem:[#allocation34_spill] sm:$0xff]  ;;  %v4232_v2 = vld [vmem:[#allocation36_spill] sm:$0xff]  ;;  %v4246_v10 = vld [vmem:[#allocation51_spill] sm:$0xff] }
 0x289   :  { %v4249_v20 = vld [vmem:[#allocation53_spill] sm:$0xff] }
 0x28a   :  { %2444 = vtanh.f32 %v3739_v9  ;;  %v1043_v23 = vsel %vm1042_vm2, %v2441_v6, %v1039_v27  ;;  %v4235_v6 = vld [vmem:[#allocation38_spill] sm:$0xff] }
 0x28b   :  { %v1048_v5 = vsel %vm1045_vm3, %v1047_v24, %v1043_v23  ;;  %v4247_v27 = vld [vmem:[#allocation50_spill] sm:$0xff]  ;;  %v3800_v23 = vld [vmem:[#allocation10 + $0x30] sm:$0xff]  ;;  %v3803_v24 = vld [vmem:[#allocation10 + $0x38] sm:$0xff] }
 0x28c   :  { %4250 = vst [vmem:[#allocation54_spill] sm:$0xff] %v3800_v23 }
 0x28d   :  { %4251 = vst [vmem:[#allocation55_spill] sm:$0xff] %v3803_v24 }
 0x290   :  { %v2445_v7 = vpop.eup %2444 }
 0x291   :  { %v1054_v15 = vmul.f32 %v2445_v7, %v1048_v5  ;;  %v3806_v7 = vld [vmem:[#allocation10] sm:$0xff]  ;;  %v3809_v5 = vld [vmem:[#allocation10 + $0x8] sm:$0xff] }
 0x292   :  { %4252 = vst [vmem:[#allocation56_spill] sm:$0xff] %v3806_v7 }
 0x293   :  { %1084 = vmatmul.f32.vlgmr.msra.gmra.mxu0 %v1054_v15  ;;  %1104 = vmatmul.f32.vlgmr.msra.gmra.mxu1 %v1054_v15  ;;  %4253 = vst [vmem:[#allocation57_spill] sm:$0xff] %v3809_v5 }
 0x294   :  { %1124 = vmatmul.f32.vlgmr.msra.gmra.mxu2 %v1054_v15  ;;  %1144 = vmatmul.f32.vlgmr.msra.gmra.mxu3 %v1054_v15  ;;  %v3812_v15 = vld [vmem:[#allocation10 + $0x10] sm:$0xff] }
 0x295   :  { %1388 = vmatpush.msra.mxu0 %v3554_v53  ;;  %1408 = vmatpush.msra.mxu1 %v3557_v29  ;;  %4254 = vst [vmem:[#allocation58_spill] sm:$0xff] %v3812_v15 }
 0x296   :  { %1428 = vmatpush.msra.mxu2 %v3560_v30  ;;  %1448 = vmatpush.msra.mxu3 %v3563_v31 }
 0x297   :  { %1389 = vmatpush.msra.mxu0 %v3566_v32  ;;  %1409 = vmatpush.msra.mxu1 %v3569_v33 }
 0x298   :  { %1429 = vmatpush.msra.mxu2 %v3572_v34  ;;  %1449 = vmatpush.msra.mxu3 %v3575_v35 }
 0x299   :  { %1390 = vmatpush.msra.mxu0 %v3578_v36  ;;  %1410 = vmatpush.msra.mxu1 %v3581_v37 }
 0x29a   :  { %1430 = vmatpush.msra.mxu2 %v3584_v38  ;;  %1450 = vmatpush.msra.mxu3 %v3587_v40 }
 0x29b   :  { %1391 = vmatpush.msra.mxu0 %v3590_v41  ;;  %1411 = vmatpush.msra.mxu1 %v3593_v42 }
 0x29c   :  { %1431 = vmatpush.msra.mxu2 %v3596_v43  ;;  %1451 = vmatpush.msra.mxu3 %v3599_v47 }
 0x29d   :  { %1392 = vmatpush.msra.mxu0 %v3602_v0  ;;  %1412 = vmatpush.msra.mxu1 %v3605_v46 }
 0x29e   :  { %1432 = vmatpush.msra.mxu2 %v3608_v13  ;;  %1452 = vmatpush.msra.mxu3 %v3611_v61 }
 0x29f   :  { %1393 = vmatpush.msra.mxu0 %v3614_v39  ;;  %1413 = vmatpush.msra.mxu1 %v3617_v50 }
 0x2a0   :  { %1433 = vmatpush.msra.mxu2 %v3620_v63  ;;  %1453 = vmatpush.msra.mxu3 %v3623_v49 }
 0x2a1   :  { %1394 = vmatpush.msra.mxu0 %v3626_v44  ;;  %1414 = vmatpush.msra.mxu1 %v3629_v52 }
 0x2a2   :  { %1434 = vmatpush.msra.mxu2 %v3632_v45  ;;  %1454 = vmatpush.msra.mxu3 %v3635_v51 }
 0x2a3   :  { %1395 = vmatpush.msra.mxu0 %v3638_v56  ;;  %1415 = vmatpush.msra.mxu1 %v3641_v26 }
 0x2a4   :  { %1435 = vmatpush.msra.mxu2 %v3644_v48  ;;  %1455 = vmatpush.msra.mxu3 %v3647_v57 }
 0x2a5   :  { %1396 = vmatpush.msra.mxu0 %v3650_v58  ;;  %1416 = vmatpush.msra.mxu1 %v3653_v54 }
 0x2a6   :  { %1436 = vmatpush.msra.mxu2 %v3656_v59  ;;  %1456 = vmatpush.msra.mxu3 %v3659_v62 }
 0x2a7   :  { %1397 = vmatpush.msra.mxu0 %v3662_v55  ;;  %1417 = vmatpush.msra.mxu1 %v3665_v60 }
 0x2a8   :  { %1437 = vmatpush.msra.mxu2 %v4230_v12  ;;  %1457 = vmatpush.msra.mxu3 %v4231_v1 }
 0x2a9   :  { %1398 = vmatpush.msra.mxu0 %v4232_v2  ;;  %1418 = vmatpush.msra.mxu1 %v4233_v3 }
 0x2aa   :  { %1438 = vmatpush.msra.mxu2 %v4234_v4  ;;  %1458 = vmatpush.msra.mxu3 %v4235_v6 }
 0x2ab   :  { %1399 = vmatpush.msra.mxu0 %v4236_v18  ;;  %1419 = vmatpush.msra.mxu1 %v4237_v25 }
 0x2ac   :  { %1439 = vmatpush.msra.mxu2 %v4238_v8  ;;  %1459 = vmatpush.msra.mxu3 %v4239_v28 }
 0x2ad   :  { %1400 = vmatpush.msra.mxu0 %v4240_v17  ;;  %1420 = vmatpush.msra.mxu1 %v4241_v14 }
 0x2ae   :  { %1440 = vmatpush.msra.mxu2 %v4242_v16  ;;  %1460 = vmatpush.msra.mxu3 %v4243_v19 }
 0x2af   :  { %1401 = vmatpush.msra.mxu0 %v4244_v21  ;;  %1421 = vmatpush.msra.mxu1 %v4245_v22 }
 0x2b0   :  { %1441 = vmatpush.msra.mxu2 %v4246_v10  ;;  %1461 = vmatpush.msra.mxu3 %v4247_v27  ;;  %v4256_v27 = vld [vmem:[#allocation68_spill] sm:$0xff]  ;;  %v4257_v10 = vld [vmem:[#allocation69_spill] sm:$0xff] }
 0x2b1   :  { %1402 = vmatpush.msra.mxu0 %v4248_v11  ;;  %1422 = vmatpush.msra.mxu1 %v4249_v20  ;;  %v3815_v20 = vld [vmem:[#allocation10 + $0x18] sm:$0xff] }
 0x2b2   :  { %1442 = vmatpush.msra.mxu2 %v3800_v23  ;;  %1462 = vmatpush.msra.mxu3 %v3803_v24  ;;  %4255 = vst [vmem:[#allocation59_spill] sm:$0xff] %v3815_v20 }
 0x2b3   :  { %1403 = vmatpush.msra.mxu0 %v3806_v7  ;;  %1423 = vmatpush.msra.mxu1 %v3809_v5  ;;  %v4258_v5 = vld [vmem:[#allocation71_spill] sm:$0xff] }
 0x2b4   :  { %1443 = vmatpush.msra.mxu2 %v3812_v15  ;;  %1463 = vmatpush.msra.mxu3 %v3815_v20 }
 0x310   :  { %v1085_v23 = vpop.f32.mrf.mxu0  ;;  %v1105_v11 = vpop.f32.mrf.mxu1 }
 0x311   :  { %v1148_v24 = vadd.f32 %v1085_v23, %v4256_v27  ;;  %v1149_v22 = vadd.f32 %v1105_v11, %v4257_v10  ;;  %v4259_v10 = vld [vmem:[#allocation70_spill] sm:$0xff] }
 0x313   :  { %v2362_v21 = vmul.f32 -1.442695, %v1148_v24  ;;  %v2363_v7 = vmul.f32 -1.442695, %v1149_v22 }
 0x315   :  { %2446 = vpow2.f32 %v2362_v21 }
 0x316   :  { %2448 = vpow2.f32 %v2363_v7 }
 0x317   :  { %v1145_v19 = vpop.f32.mrf.mxu3  ;;  %v1125_v20 = vpop.f32.mrf.mxu2 }
 0x318   :  { %v1151_v16 = vadd.f32 %v1145_v19, %v4258_v5  ;;  %v1150_v11 = vadd.f32 %v1125_v20, %v4259_v10 }
 0x31a   :  { %v2364_v14 = vmul.f32 -1.442695, %v1151_v16 }
 0x31b   :  { %v2447_v17 = vpop.eup %2446 }
 0x31c   :  { %v2449_v15 = vpop.eup %2448  ;;  %v1155_v28 = vadd.f32 1.0, %v2447_v17  ;;  %2450 = vpow2.f32 %v2364_v14 }
 0x31d   :  { %v1174_v8 = vadd.f32 1.0, %v2449_v15 }
 0x31e   :  { %2452 = vrcp.f32 %v1155_v28  ;;  %v1167_v16 = vand.u32 2147483648, %v1155_v28  ;;  %v1165_v14 = vand.u32 2147483647, %v1155_v28  ;;  %vm1161_vm6 = vweird.f32 %v1155_v28 }
 0x31f   :  { %2454 = vrcp.f32 %v1174_v8  ;;  %v1186_v5 = vand.u32 2147483648, %v1174_v8  ;;  %v1184_v18 = vand.u32 2147483647, %v1174_v8  ;;  %vm1180_vm7 = vweird.f32 %v1174_v8 }
 0x320   :  { %v1168_v20 = vor.u32 1.1754944e-38, %v1167_v16  ;;  %vm1166_vm10 = vcmp.eq.f32.partialorder %v1165_v14, 8.507059e+37 }
 0x321   :  { %vm1185_vm11 = vcmp.eq.f32.partialorder %v1184_v18, 8.507059e+37 }
 0x322   :  { %v2451_v25 = vpop.eup %2450 }
 0x323   :  { %v1194_v27 = vadd.f32 1.0, %v2451_v25 }
 0x324   :  { %v2453_v23 = vpop.eup %2452 }
 0x325   :  { %v2455_v22 = vpop.eup %2454  ;;  %v1157_v21 = vmul.f32 %v2453_v23, %v1155_v28  ;;  %2456 = vrcp.f32 %v1194_v27  ;;  %vm1162_vm4 = vweird.f32 %v2453_v23  ;;  %v1206_v16 = vand.u32 2147483648, %v1194_v27 }
 0x326   :  { %v1176_v24 = vmul.f32 %v2455_v22, %v1174_v8  ;;  %2458 = vtanh.f32 %v1150_v11  ;;  %vm1181_vm5 = vweird.f32 %v2455_v22  ;;  %vm1163_vm8 = vmor %vm1161_vm6, %vm1162_vm4  ;;  %vm1200_vm13 = vweird.f32 %v1194_v27 }
 0x327   :  { %v1158_v7 = vsub.f32 1.0, %v1157_v21  ;;  %vm1182_vm9 = vmor %vm1180_vm7, %vm1181_vm5  ;;  %v1187_v21 = vor.u32 1.1754944e-38, %v1186_v5  ;;  %v1207_v14 = vor.u32 1.1754944e-38, %v1206_v16  ;;  %v4278_v16 = vld [vmem:[#allocation52_spill] sm:$0xff] }
 0x328   :  { %v1177_v19 = vsub.f32 1.0, %v1176_v24 }
 0x329   :  { %v1159_v17 = vmul.f32 %v2453_v23, %v1158_v7 }
 0x32a   :  { %v1178_v15 = vmul.f32 %v2455_v22, %v1177_v19 }
 0x32b   :  { %v2457_v6 = vpop.eup %2456  ;;  %v1160_v25 = vadd.f32 %v2453_v23, %v1159_v17 }
 0x32c   :  { %v1179_v10 = vadd.f32 %v2455_v22, %v1178_v15  ;;  %v1196_v4 = vmul.f32 %v2457_v6, %v1194_v27  ;;  %v2459_v11 = vpop.eup %2458  ;;  %vm1201_vm12 = vweird.f32 %v2457_v6  ;;  %v4267_v15 = vld [vmem:[#allocation41_spill] sm:$0xff] }
 0x32d   :  { %v1164_v24 = vsel %vm1163_vm8, %v2453_v23, %v1160_v25  ;;  %v1204_v23 = vand.u32 2147483647, %v1194_v27  ;;  %vm1202_vm14 = vmor %vm1200_vm13, %vm1201_vm12  ;;  %v4266_v27 = vld [vmem:[#allocation40_spill] sm:$0xff]  ;;  %v4268_v25 = vld [vmem:[#allocation43_spill] sm:$0xff] }
 0x32e   :  { %v1169_v3 = vsel %vm1166_vm10, %v1168_v20, %v1164_v24  ;;  %v1183_v7 = vsel %vm1182_vm9, %v2455_v22, %v1179_v10  ;;  %v1197_v2 = vsub.f32 1.0, %v1196_v4  ;;  %v4269_v20 = vld [vmem:[#allocation42_spill] sm:$0xff]  ;;  %v4270_v10 = vld [vmem:[#allocation44_spill] sm:$0xff]  ;;  %v4272_v24 = vld [vmem:[#allocation47_spill] sm:$0xff] }
 0x32f   :  { %v1188_v19 = vsel %vm1185_vm11, %v1187_v21, %v1183_v7  ;;  %v1211_v1 = vmul.f32 %v2459_v11, %v1169_v3  ;;  %vm1205_vm15 = vcmp.eq.f32.partialorder %v1204_v23, 8.507059e+37  ;;  %v4264_v3 = vld [vmem:[#allocation39_spill] sm:$0xff]  ;;  %v4271_v21 = vld [vmem:[#allocation45_spill] sm:$0xff]  ;;  %v4273_v11 = vld [vmem:[#allocation46_spill] sm:$0xff] }
 0x330   :  { %v1210_v12 = vmul.f32 %v1188_v19, %v3739_v9  ;;  %v1198_v17 = vmul.f32 %v2457_v6, %v1197_v2  ;;  %v4260_v9 = vld [vmem:[#allocation35_spill] sm:$0xff]  ;;  %v4263_v2 = vld [vmem:[#allocation37_spill] sm:$0xff]  ;;  %v4274_v7 = vld [vmem:[#allocation48_spill] sm:$0xff] }
 0x331   :  { %v4275_v19 = vld [vmem:[#allocation49_spill] sm:$0xff] }
 0x332   :  { %v3823_v28 = vadd.f32 %v1211_v1, %v1210_v12  ;;  %v1199_v8 = vadd.f32 %v2457_v6, %v1198_v17  ;;  %v4261_v12 = vld [vmem:[#allocation34_spill] sm:$0xff]  ;;  %v4262_v1 = vld [vmem:[#allocation36_spill] sm:$0xff]  ;;  %v4276_v17 = vld [vmem:[#allocation51_spill] sm:$0xff] }
 0x333   :  { %v4279_v23 = vld [vmem:[#allocation53_spill] sm:$0xff] }
 0x334   :  { %2460 = vtanh.f32 %v3823_v28  ;;  %v1203_v5 = vsel %vm1202_vm14, %v2457_v6, %v1199_v8  ;;  %v4265_v6 = vld [vmem:[#allocation38_spill] sm:$0xff] }
 0x335   :  { %v1208_v4 = vsel %vm1205_vm15, %v1207_v14, %v1203_v5  ;;  %v4277_v8 = vld [vmem:[#allocation50_spill] sm:$0xff]  ;;  %v4281_v14 = vld [vmem:[#allocation55_spill] sm:$0xff] }
 0x336   :  { %v4280_v5 = vld [vmem:[#allocation54_spill] sm:$0xff] }
 0x33a   :  { %v2461_v18 = vpop.eup %2460 }
 0x33b   :  { %v1214_v22 = vmul.f32 %v2461_v18, %v1208_v4  ;;  %v4282_v18 = vld [vmem:[#allocation56_spill] sm:$0xff]  ;;  %v4283_v4 = vld [vmem:[#allocation57_spill] sm:$0xff] }
 0x33d   :  { %1244 = vmatmul.f32.vlgmr.msrb.gmra.mxu0 %v1214_v22  ;;  %1264 = vmatmul.f32.vlgmr.msrb.gmra.mxu1 %v1214_v22 }
 0x33e   :  { %1284 = vmatmul.f32.vlgmr.msrb.gmra.mxu2 %v1214_v22  ;;  %1304 = vmatmul.f32.vlgmr.msrb.gmra.mxu3 %v1214_v22  ;;  %v4284_v22 = vld [vmem:[#allocation58_spill] sm:$0xff] }
 0x33f   :  { %1548 = vmatpush.msrb.mxu0 %v3554_v53  ;;  %1568 = vmatpush.msrb.mxu1 %v3557_v29 }
 0x340   :  { %1588 = vmatpush.msrb.mxu2 %v3560_v30  ;;  %1608 = vmatpush.msrb.mxu3 %v3563_v31 }
 0x341   :  { %1549 = vmatpush.msrb.mxu0 %v3566_v32  ;;  %1569 = vmatpush.msrb.mxu1 %v3569_v33 }
 0x342   :  { %1589 = vmatpush.msrb.mxu2 %v3572_v34  ;;  %1609 = vmatpush.msrb.mxu3 %v3575_v35 }
 0x343   :  { %1550 = vmatpush.msrb.mxu0 %v3578_v36  ;;  %1570 = vmatpush.msrb.mxu1 %v3581_v37 }
 0x344   :  { %1590 = vmatpush.msrb.mxu2 %v3584_v38  ;;  %1610 = vmatpush.msrb.mxu3 %v3587_v40 }
 0x345   :  { %1551 = vmatpush.msrb.mxu0 %v3590_v41  ;;  %1571 = vmatpush.msrb.mxu1 %v3593_v42 }
 0x346   :  { %1591 = vmatpush.msrb.mxu2 %v3596_v43  ;;  %1611 = vmatpush.msrb.mxu3 %v3599_v47 }
 0x347   :  { %1552 = vmatpush.msrb.mxu0 %v3602_v0  ;;  %1572 = vmatpush.msrb.mxu1 %v3605_v46 }
 0x348   :  { %1592 = vmatpush.msrb.mxu2 %v3608_v13  ;;  %1612 = vmatpush.msrb.mxu3 %v3611_v61 }
 0x349   :  { %1553 = vmatpush.msrb.mxu0 %v3614_v39  ;;  %1573 = vmatpush.msrb.mxu1 %v3617_v50 }
 0x34a   :  { %1593 = vmatpush.msrb.mxu2 %v3620_v63  ;;  %1613 = vmatpush.msrb.mxu3 %v3623_v49 }
 0x34b   :  { %1554 = vmatpush.msrb.mxu0 %v3626_v44  ;;  %1574 = vmatpush.msrb.mxu1 %v3629_v52 }
 0x34c   :  { %1594 = vmatpush.msrb.mxu2 %v3632_v45  ;;  %1614 = vmatpush.msrb.mxu3 %v3635_v51 }
 0x34d   :  { %1555 = vmatpush.msrb.mxu0 %v3638_v56  ;;  %1575 = vmatpush.msrb.mxu1 %v3641_v26 }
 0x34e   :  { %1595 = vmatpush.msrb.mxu2 %v3644_v48  ;;  %1615 = vmatpush.msrb.mxu3 %v3647_v57 }
 0x34f   :  { %1556 = vmatpush.msrb.mxu0 %v3650_v58  ;;  %1576 = vmatpush.msrb.mxu1 %v3653_v54 }
 0x350   :  { %1596 = vmatpush.msrb.mxu2 %v3656_v59  ;;  %1616 = vmatpush.msrb.mxu3 %v3659_v62 }
 0x351   :  { %1557 = vmatpush.msrb.mxu0 %v3662_v55  ;;  %1577 = vmatpush.msrb.mxu1 %v3665_v60 }
 0x352   :  { %1597 = vmatpush.msrb.mxu2 %v4260_v9  ;;  %1617 = vmatpush.msrb.mxu3 %v4261_v12 }
 0x353   :  { %1558 = vmatpush.msrb.mxu0 %v4262_v1  ;;  %1578 = vmatpush.msrb.mxu1 %v4263_v2 }
 0x354   :  { %1598 = vmatpush.msrb.mxu2 %v4264_v3  ;;  %1618 = vmatpush.msrb.mxu3 %v4265_v6 }
 0x355   :  { %1559 = vmatpush.msrb.mxu0 %v4266_v27  ;;  %1579 = vmatpush.msrb.mxu1 %v4267_v15 }
 0x356   :  { %1599 = vmatpush.msrb.mxu2 %v4268_v25  ;;  %1619 = vmatpush.msrb.mxu3 %v4269_v20 }
 0x357   :  { %1560 = vmatpush.msrb.mxu0 %v4270_v10  ;;  %1580 = vmatpush.msrb.mxu1 %v4271_v21 }
 0x358   :  { %1600 = vmatpush.msrb.mxu2 %v4272_v24  ;;  %1620 = vmatpush.msrb.mxu3 %v4273_v11  ;;  %v4286_v24 = vld [vmem:[#allocation72_spill] sm:$0xff]  ;;  %v4287_v11 = vld [vmem:[#allocation73_spill] sm:$0xff] }
 0x359   :  { %1561 = vmatpush.msrb.mxu0 %v4274_v7  ;;  %1581 = vmatpush.msrb.mxu1 %v4275_v19  ;;  %v4285_v7 = vld [vmem:[#allocation59_spill] sm:$0xff] }
 0x35a   :  { %1601 = vmatpush.msrb.mxu2 %v4276_v17  ;;  %1621 = vmatpush.msrb.mxu3 %v4277_v8 }
 0x35b   :  { %1562 = vmatpush.msrb.mxu0 %v4278_v16  ;;  %1582 = vmatpush.msrb.mxu1 %v4279_v23 }
 0x35c   :  { %1602 = vmatpush.msrb.mxu2 %v4280_v5  ;;  %1622 = vmatpush.msrb.mxu3 %v4281_v14  ;;  %v4288_v14 = vld [vmem:[#allocation75_spill] sm:$0xff] }
 0x35d   :  { %1563 = vmatpush.msrb.mxu0 %v4282_v18  ;;  %1583 = vmatpush.msrb.mxu1 %v4283_v4 }
 0x35e   :  { %1603 = vmatpush.msrb.mxu2 %v4284_v22  ;;  %1623 = vmatpush.msrb.mxu3 %v4285_v7 }
 0x3ba   :  { %v1245_v19 = vpop.f32.mrf.mxu0  ;;  %v1265_v17 = vpop.f32.mrf.mxu1 }
 0x3bb   :  { %v1308_v8 = vadd.f32 %v1245_v19, %v4286_v24  ;;  %v1309_v16 = vadd.f32 %v1265_v17, %v4287_v11  ;;  %v4289_v11 = vld [vmem:[#allocation74_spill] sm:$0xff] }
 0x3bd   :  { %v2365_v21 = vmul.f32 -1.442695, %v1308_v8  ;;  %v2366_v23 = vmul.f32 -1.442695, %v1309_v16 }
 0x3bf   :  { %2462 = vpow2.f32 %v2365_v21 }
 0x3c0   :  { %2464 = vpow2.f32 %v2366_v23 }
 0x3c1   :  { %v1305_v5 = vpop.f32.mrf.mxu3  ;;  %v1285_v7 = vpop.f32.mrf.mxu2 }
 0x3c2   :  { %v1311_v10 = vadd.f32 %v1305_v5, %v4288_v14  ;;  %v1310_v17 = vadd.f32 %v1285_v7, %v4289_v11 }
 0x3c4   :  { %v2367_v18 = vmul.f32 -1.442695, %v1311_v10 }
 0x3c5   :  { %v2463_v25 = vpop.eup %2462 }
 0x3c6   :  { %v2465_v4 = vpop.eup %2464  ;;  %v1315_v20 = vadd.f32 1.0, %v2463_v25  ;;  %2466 = vpow2.f32 %v2367_v18 }
 0x3c7   :  { %v1334_v22 = vadd.f32 1.0, %v2465_v4 }
 0x3c8   :  { %2468 = vrcp.f32 %v1315_v20  ;;  %v1327_v10 = vand.u32 2147483648, %v1315_v20  ;;  %v1325_v18 = vand.u32 2147483647, %v1315_v20  ;;  %vm1321_vm2 = vweird.f32 %v1315_v20 }
 0x3c9   :  { %2470 = vrcp.f32 %v1334_v22  ;;  %v1346_v14 = vand.u32 2147483648, %v1334_v22  ;;  %v1344_v27 = vand.u32 2147483647, %v1334_v22  ;;  %vm1340_vm3 = vweird.f32 %v1334_v22 }
 0x3ca   :  { %v1328_v7 = vor.u32 1.1754944e-38, %v1327_v10  ;;  %vm1326_vm6 = vcmp.eq.f32.partialorder %v1325_v18, 8.507059e+37 }
 0x3cb   :  { %vm1345_vm7 = vcmp.eq.f32.partialorder %v1344_v27, 8.507059e+37 }
 0x3cc   :  { %v2467_v15 = vpop.eup %2466 }
 0x3cd   :  { %v1354_v24 = vadd.f32 1.0, %v2467_v15 }
 0x3ce   :  { %v2469_v19 = vpop.eup %2468 }
 0x3cf   :  { %v2471_v8 = vpop.eup %2470  ;;  %v1317_v21 = vmul.f32 %v2469_v19, %v1315_v20  ;;  %2472 = vrcp.f32 %v1354_v24  ;;  %vm1322_vm0 = vweird.f32 %v2469_v19  ;;  %v1366_v10 = vand.u32 2147483648, %v1354_v24 }
 0x3d0   :  { %v1336_v16 = vmul.f32 %v2471_v8, %v1334_v22  ;;  %2474 = vtanh.f32 %v1310_v17  ;;  %vm1341_vm1 = vweird.f32 %v2471_v8  ;;  %vm1323_vm4 = vmor %vm1321_vm2, %vm1322_vm0  ;;  %vm1360_vm9 = vweird.f32 %v1354_v24 }
 0x3d1   :  { %v1318_v23 = vsub.f32 1.0, %v1317_v21  ;;  %vm1342_vm5 = vmor %vm1340_vm3, %vm1341_vm1  ;;  %v1347_v21 = vor.u32 1.1754944e-38, %v1346_v14  ;;  %v1367_v18 = vor.u32 1.1754944e-38, %v1366_v10 }
 0x3d2   :  { %v1337_v5 = vsub.f32 1.0, %v1336_v16 }
 0x3d3   :  { %v1319_v25 = vmul.f32 %v2469_v19, %v1318_v23 }
 0x3d4   :  { %v1338_v4 = vmul.f32 %v2471_v8, %v1337_v5 }
 0x3d5   :  { %v2473_v3 = vpop.eup %2472  ;;  %v1320_v15 = vadd.f32 %v2469_v19, %v1319_v25 }
 0x3d6   :  { %v1339_v11 = vadd.f32 %v2471_v8, %v1338_v4  ;;  %v1356_v6 = vmul.f32 %v2473_v3, %v1354_v24  ;;  %v2475_v17 = vpop.eup %2474  ;;  %vm1361_vm8 = vweird.f32 %v2473_v3 }
 0x3d7   :  { %v1324_v16 = vsel %vm1323_vm4, %v2469_v19, %v1320_v15  ;;  %v1364_v19 = vand.u32 2147483647, %v1354_v24  ;;  %vm1362_vm10 = vmor %vm1360_vm9, %vm1361_vm8  ;;  %v4319_v15 = vld [vmem:[#allocation78_spill] sm:$0xff] }
 0x3d8   :  { %v1329_v2 = vsel %vm1326_vm6, %v1328_v7, %v1324_v16  ;;  %v1343_v23 = vsel %vm1342_vm5, %v2471_v8, %v1339_v11  ;;  %v1357_v1 = vsub.f32 1.0, %v1356_v6 }
 0x3d9   :  { %v1348_v5 = vsel %vm1345_vm7, %v1347_v21, %v1343_v23  ;;  %v1371_v9 = vmul.f32 %v2475_v17, %v1329_v2  ;;  %vm1365_vm11 = vcmp.eq.f32.partialorder %v1364_v19, 8.507059e+37 }
 0x3da   :  { %v1370_v12 = vmul.f32 %v1348_v5, %v3823_v28  ;;  %v1358_v25 = vmul.f32 %v2473_v3, %v1357_v1 }
 0x3dc   :  { %v3895_v20 = vadd.f32 %v1371_v9, %v1370_v12  ;;  %v1359_v22 = vadd.f32 %v2473_v3, %v1358_v25 }
 0x3de   :  { %2476 = vtanh.f32 %v3895_v20  ;;  %v1363_v14 = vsel %vm1362_vm10, %v2473_v3, %v1359_v22 }
 0x3df   :  { %v1368_v6 = vsel %vm1365_vm11, %v1367_v18, %v1363_v14 }
 0x3e4   :  { %v2477_v27 = vpop.eup %2476 }
 0x3e5   :  { %v1374_v8 = vmul.f32 %v2477_v27, %v1368_v6 }
 0x3e7   :  { %1404 = vmatmul.f32.vlgmr.msra.gmra.mxu0 %v1374_v8  ;;  %1424 = vmatmul.f32.vlgmr.msra.gmra.mxu1 %v1374_v8 }
 0x3e8   :  { %1444 = vmatmul.f32.vlgmr.msra.gmra.mxu2 %v1374_v8  ;;  %1464 = vmatmul.f32.vlgmr.msra.gmra.mxu3 %v1374_v8 }
 0x3e9   :  { %1708 = vmatpush.msra.mxu0 %v3554_v53  ;;  %1728 = vmatpush.msra.mxu1 %v3557_v29  ;;  %v4290_v53 = vld [vmem:[#allocation34_spill] sm:$0xff]  ;;  %v4291_v29 = vld [vmem:[#allocation35_spill] sm:$0xff] }
 0x3ea   :  { %1768 = vmatpush.msra.mxu3 %v3563_v31  ;;  %1748 = vmatpush.msra.mxu2 %v3560_v30  ;;  %v4292_v30 = vld [vmem:[#allocation36_spill] sm:$0xff]  ;;  %v4293_v31 = vld [vmem:[#allocation37_spill] sm:$0xff] }
 0x3eb   :  { %1709 = vmatpush.msra.mxu0 %v3566_v32  ;;  %1729 = vmatpush.msra.mxu1 %v3569_v33  ;;  %v4294_v32 = vld [vmem:[#allocation38_spill] sm:$0xff]  ;;  %v4295_v33 = vld [vmem:[#allocation39_spill] sm:$0xff] }
 0x3ec   :  { %1769 = vmatpush.msra.mxu3 %v3575_v35  ;;  %1749 = vmatpush.msra.mxu2 %v3572_v34  ;;  %v4296_v34 = vld [vmem:[#allocation40_spill] sm:$0xff]  ;;  %v4297_v35 = vld [vmem:[#allocation41_spill] sm:$0xff] }
 0x3ed   :  { %1710 = vmatpush.msra.mxu0 %v3578_v36  ;;  %1730 = vmatpush.msra.mxu1 %v3581_v37  ;;  %v4298_v36 = vld [vmem:[#allocation42_spill] sm:$0xff]  ;;  %v4299_v37 = vld [vmem:[#allocation43_spill] sm:$0xff] }
 0x3ee   :  { %1770 = vmatpush.msra.mxu3 %v3587_v40  ;;  %1750 = vmatpush.msra.mxu2 %v3584_v38  ;;  %v4300_v38 = vld [vmem:[#allocation44_spill] sm:$0xff]  ;;  %v4301_v40 = vld [vmem:[#allocation45_spill] sm:$0xff] }
 0x3ef   :  { %1711 = vmatpush.msra.mxu0 %v3590_v41  ;;  %1731 = vmatpush.msra.mxu1 %v3593_v42  ;;  %v4302_v41 = vld [vmem:[#allocation46_spill] sm:$0xff]  ;;  %v4303_v42 = vld [vmem:[#allocation47_spill] sm:$0xff] }
 0x3f0   :  { %1771 = vmatpush.msra.mxu3 %v3599_v47  ;;  %1751 = vmatpush.msra.mxu2 %v3596_v43  ;;  %v4304_v43 = vld [vmem:[#allocation48_spill] sm:$0xff]  ;;  %v4305_v47 = vld [vmem:[#allocation49_spill] sm:$0xff] }
 0x3f1   :  { %1712 = vmatpush.msra.mxu0 %v3602_v0  ;;  %1732 = vmatpush.msra.mxu1 %v3605_v46  ;;  %v4306_v0 = vld [vmem:[#allocation50_spill] sm:$0xff]  ;;  %v4307_v46 = vld [vmem:[#allocation51_spill] sm:$0xff] }
 0x3f2   :  { %1772 = vmatpush.msra.mxu3 %v3611_v61  ;;  %1752 = vmatpush.msra.mxu2 %v3608_v13  ;;  %v4308_v13 = vld [vmem:[#allocation52_spill] sm:$0xff]  ;;  %v4309_v61 = vld [vmem:[#allocation53_spill] sm:$0xff] }
 0x3f3   :  { %1713 = vmatpush.msra.mxu0 %v3614_v39  ;;  %1733 = vmatpush.msra.mxu1 %v3617_v50  ;;  %v4310_v39 = vld [vmem:[#allocation55_spill] sm:$0xff]  ;;  %v4311_v50 = vld [vmem:[#allocation54_spill] sm:$0xff] }
 0x3f4   :  { %1773 = vmatpush.msra.mxu3 %v3623_v49  ;;  %1753 = vmatpush.msra.mxu2 %v3620_v63  ;;  %v4312_v63 = vld [vmem:[#allocation56_spill] sm:$0xff]  ;;  %v4313_v49 = vld [vmem:[#allocation57_spill] sm:$0xff] }
 0x3f5   :  { %1714 = vmatpush.msra.mxu0 %v3626_v44  ;;  %1734 = vmatpush.msra.mxu1 %v3629_v52  ;;  %v4314_v44 = vld [vmem:[#allocation59_spill] sm:$0xff]  ;;  %v4315_v52 = vld [vmem:[#allocation58_spill] sm:$0xff] }
 0x3f6   :  { %1774 = vmatpush.msra.mxu3 %v3635_v51  ;;  %1754 = vmatpush.msra.mxu2 %v3632_v45 }
 0x3f7   :  { %1715 = vmatpush.msra.mxu0 %v3638_v56  ;;  %1735 = vmatpush.msra.mxu1 %v3641_v26  ;;  %v4316_v56 = vld [vmem:[#allocation76_spill] sm:$0xff] }
 0x3f8   :  { %1775 = vmatpush.msra.mxu3 %v3647_v57  ;;  %1755 = vmatpush.msra.mxu2 %v3644_v48  ;;  %v4317_v48 = vld [vmem:[#allocation77_spill] sm:$0xff] }
 0x3f9   :  { %1716 = vmatpush.msra.mxu0 %v3650_v58  ;;  %1736 = vmatpush.msra.mxu1 %v3653_v54 }
 0x3fa   :  { %1776 = vmatpush.msra.mxu3 %v3659_v62  ;;  %1756 = vmatpush.msra.mxu2 %v3656_v59  ;;  %v4318_v62 = vld [vmem:[#allocation79_spill] sm:$0xff] }
 0x3fb   :  { %1717 = vmatpush.msra.mxu0 %v3662_v55  ;;  %1737 = vmatpush.msra.mxu1 %v3665_v60 }
 0x3fc   :  { %1777 = vmatpush.msra.mxu3 %v4290_v53  ;;  %1757 = vmatpush.msra.mxu2 %v4291_v29 }
 0x3fd   :  { %1718 = vmatpush.msra.mxu0 %v4292_v30  ;;  %1738 = vmatpush.msra.mxu1 %v4293_v31 }
 0x3fe   :  { %1778 = vmatpush.msra.mxu3 %v4294_v32  ;;  %1758 = vmatpush.msra.mxu2 %v4295_v33 }
 0x3ff   :  { %1719 = vmatpush.msra.mxu0 %v4296_v34  ;;  %1739 = vmatpush.msra.mxu1 %v4297_v35 }
 0x400   :  { %1779 = vmatpush.msra.mxu3 %v4298_v36  ;;  %1759 = vmatpush.msra.mxu2 %v4299_v37 }
 0x401   :  { %1720 = vmatpush.msra.mxu0 %v4300_v38  ;;  %1740 = vmatpush.msra.mxu1 %v4301_v40 }
 0x402   :  { %1780 = vmatpush.msra.mxu3 %v4302_v41  ;;  %1760 = vmatpush.msra.mxu2 %v4303_v42 }
 0x403   :  { %1721 = vmatpush.msra.mxu0 %v4304_v43  ;;  %1741 = vmatpush.msra.mxu1 %v4305_v47 }
 0x404   :  { %1781 = vmatpush.msra.mxu3 %v4306_v0  ;;  %1761 = vmatpush.msra.mxu2 %v4307_v46 }
 0x405   :  { %1722 = vmatpush.msra.mxu0 %v4308_v13  ;;  %1742 = vmatpush.msra.mxu1 %v4309_v61 }
 0x406   :  { %1782 = vmatpush.msra.mxu3 %v4310_v39  ;;  %1762 = vmatpush.msra.mxu2 %v4311_v50  ;;  %v1993_v39 = vld [vmem:[#allocation14 + $0x1e8] sm:$0xff]  ;;  %v1995_v50 = vld [vmem:[#allocation14 + $0x1f8] sm:$0xff] }
 0x407   :  { %1723 = vmatpush.msra.mxu0 %v4312_v63  ;;  %1743 = vmatpush.msra.mxu1 %v4313_v49  ;;  %v1988_v63 = vld [vmem:[#allocation14 + $0x1c0] sm:$0xff]  ;;  %v1989_v49 = vld [vmem:[#allocation14 + $0x1c8] sm:$0xff] }
 0x408   :  { %1783 = vmatpush.msra.mxu3 %v4314_v44  ;;  %1763 = vmatpush.msra.mxu2 %v4315_v52  ;;  %v1991_v44 = vld [vmem:[#allocation14 + $0x1d8] sm:$0xff]  ;;  %v1984_v52 = vld [vmem:[#allocation14 + $0x1a0] sm:$0xff] }
 0x464   :  { %v1405_v45 = vpop.f32.mrf.mxu0  ;;  %v1425_v51 = vpop.f32.mrf.mxu1 }
 0x465   :  { %v1468_v26 = vadd.f32 %v1405_v45, %v4316_v56  ;;  %v1469_v57 = vadd.f32 %v1425_v51, %v4317_v48  ;;  %v1985_v45 = vld [vmem:[#allocation14 + $0x1a8] sm:$0xff]  ;;  %v1987_v51 = vld [vmem:[#allocation14 + $0x1b8] sm:$0xff]  ;;  %v1980_v56 = vld [vmem:[#allocation14 + $0x180] sm:$0xff] }
 0x466   :  { %v1983_v48 = vld [vmem:[#allocation14 + $0x198] sm:$0xff] }
 0x467   :  { %v2368_v58 = vmul.f32 -1.442695, %v1468_v26  ;;  %v2369_v54 = vmul.f32 -1.442695, %v1469_v57  ;;  %v1981_v26 = vld [vmem:[#allocation14 + $0x188] sm:$0xff]  ;;  %v1994_v57 = vld [vmem:[#allocation14 + $0x1f0] sm:$0xff] }
 0x469   :  { %2478 = vpow2.f32 %v2368_v58  ;;  %v1976_v58 = vld [vmem:[#allocation14 + $0x160] sm:$0xff] }
 0x46a   :  { %2480 = vpow2.f32 %v2369_v54  ;;  %v1977_v54 = vld [vmem:[#allocation14 + $0x168] sm:$0xff] }
 0x46b   :  { %v1465_v59 = vpop.f32.mrf.mxu3  ;;  %v1445_v2 = vpop.f32.mrf.mxu2 }
 0x46c   :  { %v1471_v55 = vadd.f32 %v1465_v59, %v4318_v62  ;;  %v1470_v7 = vadd.f32 %v1445_v2, %v4319_v15  ;;  %v1979_v59 = vld [vmem:[#allocation14 + $0x178] sm:$0xff]  ;;  %v1990_v62 = vld [vmem:[#allocation14 + $0x1d0] sm:$0xff] }
 0x46d   :  { %v1971_v2 = vld [vmem:[#allocation14 + $0x138] sm:$0xff] }
 0x46e   :  { %v2370_v60 = vmul.f32 -1.442695, %v1471_v55  ;;  %v1972_v55 = vld [vmem:[#allocation14 + $0x140] sm:$0xff]  ;;  %v1967_v15 = vld [vmem:[#allocation14 + $0x118] sm:$0xff] }
 0x46f   :  { %v2479_v28 = vpop.eup %2478 }
 0x470   :  { %v2481_v9 = vpop.eup %2480  ;;  %v1475_v12 = vadd.f32 1.0, %v2479_v28  ;;  %2482 = vpow2.f32 %v2370_v60  ;;  %v1973_v60 = vld [vmem:[#allocation14 + $0x148] sm:$0xff]  ;;  %v1975_v28 = vld [vmem:[#allocation14 + $0x158] sm:$0xff] }
 0x471   :  { %v1494_v1 = vadd.f32 1.0, %v2481_v9  ;;  %v1986_v9 = vld [vmem:[#allocation14 + $0x1b0] sm:$0xff] }
 0x472   :  { %2484 = vrcp.f32 %v1475_v12  ;;  %v1487_v5 = vand.u32 2147483648, %v1475_v12  ;;  %v1485_v10 = vand.u32 2147483647, %v1475_v12  ;;  %vm1481_vm14 = vweird.f32 %v1475_v12 }
 0x473   :  { %2486 = vrcp.f32 %v1494_v1  ;;  %v1506_v25 = vand.u32 2147483648, %v1494_v1  ;;  %v1504_v14 = vand.u32 2147483647, %v1494_v1  ;;  %vm1500_vm15 = vweird.f32 %v1494_v1 }
 0x474   :  { %v1488_v6 = vor.u32 1.1754944e-38, %v1487_v5  ;;  %vm1486_vm2 = vcmp.eq.f32.partialorder %v1485_v10, 8.507059e+37  ;;  %v1957_v5 = vld [vmem:[#allocation14 + $0xc8] sm:$0xff] }
 0x475   :  { %v1507_v29 = vor.u32 1.1754944e-38, %v1506_v25  ;;  %vm1505_vm3 = vcmp.eq.f32.partialorder %v1504_v14, 8.507059e+37  ;;  %v1959_v25 = vld [vmem:[#allocation14 + $0xd8] sm:$0xff] }
 0x476   :  { %v2483_v3 = vpop.eup %2482  ;;  %v4320_v14 = vld [vmem:[#allocation80_spill] sm:$0xff] }
 0x477   :  { %v1514_v24 = vadd.f32 1.0, %v2483_v3  ;;  %v1982_v3 = vld [vmem:[#allocation14 + $0x190] sm:$0xff] }
 0x478   :  { %v2485_v4 = vpop.eup %2484 }
 0x479   :  { %v2487_v11 = vpop.eup %2486  ;;  %v1477_v21 = vmul.f32 %v2485_v4, %v1475_v12  ;;  %2488 = vrcp.f32 %v1514_v24  ;;  %vm1482_vm12 = vweird.f32 %v2485_v4  ;;  %v1526_v42 = vand.u32 2147483648, %v1514_v24  ;;  %v1968_v12 = vld [vmem:[#allocation14 + $0x120] sm:$0xff] }
 0x47a   :  { %v1496_v16 = vmul.f32 %v2487_v11, %v1494_v1  ;;  %2490 = vtanh.f32 %v1470_v7  ;;  %vm1501_vm13 = vweird.f32 %v2487_v11  ;;  %vm1483_vm0 = vmor %vm1481_vm14, %vm1482_vm12  ;;  %vm1520_vm5 = vweird.f32 %v1514_v24  ;;  %v1969_v1 = vld [vmem:[#allocation14 + $0x128] sm:$0xff]  ;;  %v1978_v7 = vld [vmem:[#allocation14 + $0x170] sm:$0xff] }
 0x47b   :  { %v1478_v17 = vsub.f32 1.0, %v1477_v21  ;;  %vm1502_vm1 = vmor %vm1500_vm15, %vm1501_vm13  ;;  %v1524_v43 = vand.u32 2147483647, %v1514_v24  ;;  %v1527_v0 = vor.u32 1.1754944e-38, %v1526_v42  ;;  %v1961_v21 = vld [vmem:[#allocation14 + $0xe8] sm:$0xff]  ;;  %v1958_v42 = vld [vmem:[#allocation14 + $0xd0] sm:$0xff] }
 0x47c   :  { %v1497_v23 = vsub.f32 1.0, %v1496_v16  ;;  %v1963_v16 = vld [vmem:[#allocation14 + $0xf8] sm:$0xff] }
 0x47d   :  { %v1479_v22 = vmul.f32 %v2485_v4, %v1478_v17  ;;  %vm1525_vm7 = vcmp.eq.f32.partialorder %v1524_v43, 8.507059e+37  ;;  %v1974_v17 = vld [vmem:[#allocation14 + $0x150] sm:$0xff]  ;;  %v1940_v43 = vld [vmem:[#allocation14 + $0x40] sm:$0xff] }
 0x47e   :  { %v1498_v19 = vmul.f32 %v2487_v11, %v1497_v23  ;;  %v1956_v23 = vld [vmem:[#allocation14 + $0xc0] sm:$0xff] }
 0x47f   :  { %v2489_v18 = vpop.eup %2488  ;;  %v1480_v27 = vadd.f32 %v2485_v4, %v1479_v22 }
 0x480   :  { %v1499_v8 = vadd.f32 %v2487_v11, %v1498_v19  ;;  %v1516_v53 = vmul.f32 %v2489_v18, %v1514_v24  ;;  %v2491_v31 = vpop.eup %2490  ;;  %vm1521_vm4 = vweird.f32 %v2489_v18  ;;  %v1964_v24 = vld [vmem:[#allocation14 + $0x100] sm:$0xff]  ;;  %v1970_v19 = vld [vmem:[#allocation14 + $0x130] sm:$0xff] }
 0x481   :  { %v1484_v30 = vsel %vm1483_vm0, %v2485_v4, %v1480_v27  ;;  %vm1522_vm6 = vmor %vm1520_vm5, %vm1521_vm4  ;;  %v1965_v4 = vld [vmem:[#allocation14 + $0x108] sm:$0xff]  ;;  %v4321_v27 = vld [vmem:[#allocation81_spill] sm:$0xff] }
 0x482   :  { %v1489_v32 = vsel %vm1486_vm2, %v1488_v6, %v1484_v30  ;;  %v1503_v33 = vsel %vm1502_vm1, %v2487_v11, %v1499_v8  ;;  %v1517_v34 = vsub.f32 1.0, %v1516_v53  ;;  %v1960_v11 = vld [vmem:[#allocation14 + $0xe0] sm:$0xff]  ;;  %v1953_v53 = vld [vmem:[#allocation14 + $0xa8] sm:$0xff]  ;;  %v1966_v30 = vld [vmem:[#allocation14 + $0x110] sm:$0xff] }
 0x483   :  { %v1508_v35 = vsel %vm1505_vm3, %v1507_v29, %v1503_v33  ;;  %v1531_v36 = vmul.f32 %v2491_v31, %v1489_v32  ;;  %v1952_v8 = vld [vmem:[#allocation14 + $0xa0] sm:$0xff]  ;;  %v1955_v29 = vld [vmem:[#allocation14 + $0xb8] sm:$0xff] }
 0x484   :  { %v1530_v37 = vmul.f32 %v1508_v35, %v3895_v20  ;;  %v1518_v38 = vmul.f32 %v2489_v18, %v1517_v34  ;;  %v1992_v20 = vld [vmem:[#allocation14 + $0x1e0] sm:$0xff]  ;;  %v1949_v34 = vld [vmem:[#allocation14 + $0x88] sm:$0xff]  ;;  %v1951_v35 = vld [vmem:[#allocation14 + $0x98] sm:$0xff] }
 0x485   :  { %v1948_v33 = vld [vmem:[#allocation14 + $0x80] sm:$0xff] }
 0x486   :  { %v3967_v40 = vadd.f32 %v1531_v36, %v1530_v37  ;;  %v1519_v41 = vadd.f32 %v2489_v18, %v1518_v38  ;;  %v1962_v36 = vld [vmem:[#allocation14 + $0xf0] sm:$0xff]  ;;  %v1944_v37 = vld [vmem:[#allocation14 + $0x60] sm:$0xff]  ;;  %v1945_v38 = vld [vmem:[#allocation14 + $0x68] sm:$0xff] }
 0x488   :  { %2492 = vtanh.f32 %v3967_v40  ;;  %v1523_v47 = vsel %vm1522_vm6, %v2489_v18, %v1519_v41  ;;  %v1947_v41 = vld [vmem:[#allocation14 + $0x78] sm:$0xff] }
 0x489   :  { %v1528_v13 = vsel %vm1525_vm7, %v1527_v0, %v1523_v47  ;;  %v1941_v47 = vld [vmem:[#allocation14 + $0x48] sm:$0xff]  ;;  %v1943_v0 = vld [vmem:[#allocation14 + $0x58] sm:$0xff] }
 0x48e   :  { %v2493_v46 = vpop.eup %2492 }
 0x48f   :  { %v1534_v61 = vmul.f32 %v2493_v46, %v1528_v13  ;;  %v1954_v13 = vld [vmem:[#allocation14 + $0xb0] sm:$0xff] }
 0x491   :  { %1564 = vmatmul.f32.vlgmr.msrb.gmra.mxu0 %v1534_v61  ;;  %1584 = vmatmul.f32.vlgmr.msrb.gmra.mxu1 %v1534_v61 }
 0x492   :  { %1604 = vmatmul.f32.vlgmr.msrb.gmra.mxu2 %v1534_v61  ;;  %1624 = vmatmul.f32.vlgmr.msrb.gmra.mxu3 %v1534_v61  ;;  %v1936_v61 = vld [vmem:[#allocation14 + $0x20] sm:$0xff] }
 0x493   :  { %1996 = vmatpush.msrb.mxu0 %v1992_v20  ;;  %2016 = vmatpush.msrb.mxu1 %v1993_v39  ;;  %v1937_v20 = vld [vmem:[#allocation14 + $0x28] sm:$0xff] }
 0x494   :  { %2056 = vmatpush.msrb.mxu3 %v1995_v50  ;;  %2036 = vmatpush.msrb.mxu2 %v1994_v57  ;;  %v4322_v39 = vld [vmem:[#allocation83_spill] sm:$0xff] }
 0x495   :  { %1997 = vmatpush.msrb.mxu0 %v1988_v63  ;;  %2017 = vmatpush.msrb.mxu1 %v1989_v49  ;;  %v1939_v63 = vld [vmem:[#allocation14 + $0x38] sm:$0xff]  ;;  %v1950_v49 = vld [vmem:[#allocation14 + $0x90] sm:$0xff] }
 0x496   :  { %2057 = vmatpush.msrb.mxu3 %v1991_v44  ;;  %2037 = vmatpush.msrb.mxu2 %v1990_v62  ;;  %v1932_v44 = vld [vmem:[#allocation14] sm:$0xff] }
 0x497   :  { %1998 = vmatpush.msrb.mxu0 %v1984_v52  ;;  %2018 = vmatpush.msrb.mxu1 %v1985_v45  ;;  %v1933_v52 = vld [vmem:[#allocation14 + $0x8] sm:$0xff] }
 0x498   :  { %2058 = vmatpush.msrb.mxu3 %v1987_v51  ;;  %2038 = vmatpush.msrb.mxu2 %v1986_v9  ;;  %v1935_v51 = vld [vmem:[#allocation14 + $0x18] sm:$0xff]  ;;  %v4323_v9 = vld [vmem:[#allocation82_spill] sm:$0xff] }
 0x499   :  { %1999 = vmatpush.msrb.mxu0 %v1980_v56  ;;  %2019 = vmatpush.msrb.mxu1 %v1981_v26 }
 0x49a   :  { %2059 = vmatpush.msrb.mxu3 %v1983_v48  ;;  %2039 = vmatpush.msrb.mxu2 %v1982_v3 }
 0x49b   :  { %2000 = vmatpush.msrb.mxu0 %v1976_v58  ;;  %2020 = vmatpush.msrb.mxu1 %v1977_v54  ;;  %v1946_v58 = vld [vmem:[#allocation14 + $0x70] sm:$0xff] }
 0x49c   :  { %2060 = vmatpush.msrb.mxu3 %v1979_v59  ;;  %2040 = vmatpush.msrb.mxu2 %v1978_v7  ;;  %v1942_v54 = vld [vmem:[#allocation14 + $0x50] sm:$0xff] }
 0x49d   :  { %2001 = vmatpush.msrb.mxu0 %v1972_v55  ;;  %2021 = vmatpush.msrb.mxu1 %v1973_v60  ;;  %v1938_v55 = vld [vmem:[#allocation14 + $0x30] sm:$0xff] }
 0x49e   :  { %2061 = vmatpush.msrb.mxu3 %v1975_v28  ;;  %2041 = vmatpush.msrb.mxu2 %v1974_v17 }
 0x49f   :  { %2002 = vmatpush.msrb.mxu0 %v1968_v12  ;;  %2022 = vmatpush.msrb.mxu1 %v1969_v1  ;;  %v1934_v1 = vld [vmem:[#allocation14 + $0x10] sm:$0xff] }
 0x4a0   :  { %2062 = vmatpush.msrb.mxu3 %v1971_v2  ;;  %2042 = vmatpush.msrb.mxu2 %v1970_v19 }
 0x4a1   :  { %2003 = vmatpush.msrb.mxu0 %v1964_v24  ;;  %2023 = vmatpush.msrb.mxu1 %v1965_v4 }
 0x4a2   :  { %2063 = vmatpush.msrb.mxu3 %v1967_v15  ;;  %2043 = vmatpush.msrb.mxu2 %v1966_v30 }
 0x4a3   :  { %2004 = vmatpush.msrb.mxu0 %v1960_v11  ;;  %2024 = vmatpush.msrb.mxu1 %v1961_v21 }
 0x4a4   :  { %2064 = vmatpush.msrb.mxu3 %v1963_v16  ;;  %2044 = vmatpush.msrb.mxu2 %v1962_v36 }
 0x4a5   :  { %2005 = vmatpush.msrb.mxu0 %v1956_v23  ;;  %2025 = vmatpush.msrb.mxu1 %v1957_v5 }
 0x4a6   :  { %2065 = vmatpush.msrb.mxu3 %v1959_v25  ;;  %2045 = vmatpush.msrb.mxu2 %v1958_v42 }
 0x4a7   :  { %2006 = vmatpush.msrb.mxu0 %v1952_v8  ;;  %2026 = vmatpush.msrb.mxu1 %v1953_v53 }
 0x4a8   :  { %2066 = vmatpush.msrb.mxu3 %v1955_v29  ;;  %2046 = vmatpush.msrb.mxu2 %v1954_v13  ;;  %v1923_v13 = vld [vmem:[#allocation13 + $0x1c0] sm:$0xff] }
 0x4a9   :  { %2007 = vmatpush.msrb.mxu0 %v1948_v33  ;;  %2027 = vmatpush.msrb.mxu1 %v1949_v34 }
 0x4aa   :  { %2067 = vmatpush.msrb.mxu3 %v1951_v35  ;;  %2047 = vmatpush.msrb.mxu2 %v1950_v49  ;;  %v1922_v49 = vld [vmem:[#allocation13 + $0x1b8] sm:$0xff] }
 0x4ab   :  { %2008 = vmatpush.msrb.mxu0 %v1944_v37  ;;  %2028 = vmatpush.msrb.mxu1 %v1945_v38 }
 0x4ac   :  { %2068 = vmatpush.msrb.mxu3 %v1947_v41  ;;  %2048 = vmatpush.msrb.mxu2 %v1946_v58  ;;  %v1913_v58 = vld [vmem:[#allocation13 + $0x170] sm:$0xff] }
 0x4ad   :  { %2009 = vmatpush.msrb.mxu0 %v1940_v43  ;;  %2029 = vmatpush.msrb.mxu1 %v1941_v47  ;;  %v1927_v47 = vld [vmem:[#allocation13 + $0x1e0] sm:$0xff] }
 0x4ae   :  { %2069 = vmatpush.msrb.mxu3 %v1943_v0  ;;  %2049 = vmatpush.msrb.mxu2 %v1942_v54  ;;  %v1928_v0 = vld [vmem:[#allocation13 + $0x1e8] sm:$0xff]  ;;  %v1907_v54 = vld [vmem:[#allocation13 + $0x140] sm:$0xff] }
 0x4af   :  { %2010 = vmatpush.msrb.mxu0 %v1936_v61  ;;  %2030 = vmatpush.msrb.mxu1 %v1937_v20  ;;  %v1924_v61 = vld [vmem:[#allocation13 + $0x1c8] sm:$0xff]  ;;  %v1926_v20 = vld [vmem:[#allocation13 + $0x1d8] sm:$0xff] }
 0x4b0   :  { %2070 = vmatpush.msrb.mxu3 %v1939_v63  ;;  %2050 = vmatpush.msrb.mxu2 %v1938_v55  ;;  %v1920_v63 = vld [vmem:[#allocation13 + $0x1a8] sm:$0xff]  ;;  %v1909_v55 = vld [vmem:[#allocation13 + $0x150] sm:$0xff] }
 0x4b1   :  { %2011 = vmatpush.msrb.mxu0 %v1932_v44  ;;  %2031 = vmatpush.msrb.mxu1 %v1933_v52  ;;  %v1921_v44 = vld [vmem:[#allocation13 + $0x1b0] sm:$0xff]  ;;  %v1915_v52 = vld [vmem:[#allocation13 + $0x180] sm:$0xff] }
 0x4b2   :  { %2071 = vmatpush.msrb.mxu3 %v1935_v51  ;;  %2051 = vmatpush.msrb.mxu2 %v1934_v1  ;;  %v1918_v51 = vld [vmem:[#allocation13 + $0x198] sm:$0xff]  ;;  %v1899_v1 = vld [vmem:[#allocation13 + $0x100] sm:$0xff] }
 0x50e   :  { %v1565_v22 = vpop.f32.mrf.mxu0  ;;  %v1585_v10 = vpop.f32.mrf.mxu1 }
 0x50f   :  { %v1628_v18 = vadd.f32 %v1565_v22, %v4320_v14  ;;  %v1629_v6 = vadd.f32 %v1585_v10, %v4321_v27 }
 0x511   :  { %v2371_v31 = vmul.f32 -1.442695, %v1628_v18  ;;  %v2372_v32 = vmul.f32 -1.442695, %v1629_v6 }
 0x513   :  { %2494 = vpow2.f32 %v2371_v31 }
 0x514   :  { %2496 = vpow2.f32 %v2372_v32 }
 0x515   :  { %v1625_v46 = vpop.f32.mrf.mxu3  ;;  %v1605_v59 = vpop.f32.mrf.mxu2 }
 0x516   :  { %v1631_v50 = vadd.f32 %v1625_v46, %v4322_v39  ;;  %v1630_v12 = vadd.f32 %v1605_v59, %v4323_v9  ;;  %v1929_v46 = vld [vmem:[#allocation13 + $0x1f0] sm:$0xff]  ;;  %v1908_v59 = vld [vmem:[#allocation13 + $0x148] sm:$0xff]  ;;  %v1906_v9 = vld [vmem:[#allocation13 + $0x138] sm:$0xff] }
 0x517   :  { %v1925_v39 = vld [vmem:[#allocation13 + $0x1d0] sm:$0xff] }
 0x518   :  { %v2373_v45 = vmul.f32 -1.442695, %v1631_v50  ;;  %v1919_v50 = vld [vmem:[#allocation13 + $0x1a0] sm:$0xff] }
 0x519   :  { %v2495_v56 = vpop.eup %2494 }
 0x51a   :  { %v2497_v26 = vpop.eup %2496  ;;  %v1635_v48 = vadd.f32 1.0, %v2495_v56  ;;  %2498 = vpow2.f32 %v2373_v45  ;;  %v1916_v45 = vld [vmem:[#allocation13 + $0x188] sm:$0xff]  ;;  %v1917_v56 = vld [vmem:[#allocation13 + $0x190] sm:$0xff] }
 0x51b   :  { %v1654_v57 = vadd.f32 1.0, %v2497_v26  ;;  %v1911_v26 = vld [vmem:[#allocation13 + $0x160] sm:$0xff] }
 0x51c   :  { %2500 = vrcp.f32 %v1635_v48  ;;  %v1647_v7 = vand.u32 2147483648, %v1635_v48  ;;  %v1645_v16 = vand.u32 2147483647, %v1635_v48  ;;  %vm1641_vm10 = vweird.f32 %v1635_v48 }
 0x51d   :  { %2502 = vrcp.f32 %v1654_v57  ;;  %v1666_v11 = vand.u32 2147483648, %v1654_v57  ;;  %v1664_v23 = vand.u32 2147483647, %v1654_v57  ;;  %vm1660_vm11 = vweird.f32 %v1654_v57 }
 0x51e   :  { %v1648_v22 = vor.u32 1.1754944e-38, %v1647_v7  ;;  %vm1646_vm14 = vcmp.eq.f32.partialorder %v1645_v16, 8.507059e+37  ;;  %v1898_v7 = vld [vmem:[#allocation13 + $0xf8] sm:$0xff]  ;;  %v1892_v16 = vld [vmem:[#allocation13 + $0xc8] sm:$0xff] }
 0x51f   :  { %v1667_v14 = vor.u32 1.1754944e-38, %v1666_v11  ;;  %vm1665_vm15 = vcmp.eq.f32.partialorder %v1664_v23, 8.507059e+37  ;;  %v1931_v11 = vld [vmem:[%s4027_s9] sm:$0xff] }
 0x520   :  { %v2499_v62 = vpop.eup %2498  ;;  %v1887_v23 = vld [vmem:[#allocation13 + $0xa0] sm:$0xff] }
 0x521   :  { %v1674_v60 = vadd.f32 1.0, %v2499_v62  ;;  %v1910_v62 = vld [vmem:[#allocation13 + $0x158] sm:$0xff] }
 0x522   :  { %v2501_v28 = vpop.eup %2500 }
 0x523   :  { %v2503_v2 = vpop.eup %2502  ;;  %v1637_v3 = vmul.f32 %v2501_v28, %v1635_v48  ;;  %2504 = vrcp.f32 %v1674_v60  ;;  %vm1642_vm8 = vweird.f32 %v2501_v28  ;;  %v1686_v35 = vand.u32 2147483648, %v1674_v60  ;;  %v1912_v48 = vld [vmem:[#allocation13 + $0x168] sm:$0xff] }
 0x524   :  { %v1656_v24 = vmul.f32 %v2503_v2, %v1654_v57  ;;  %2506 = vtanh.f32 %v1630_v12  ;;  %vm1661_vm9 = vweird.f32 %v2503_v2  ;;  %vm1643_vm12 = vmor %vm1641_vm10, %vm1642_vm8  ;;  %vm1680_vm1 = vweird.f32 %v1674_v60  ;;  %v1914_v57 = vld [vmem:[#allocation13 + $0x178] sm:$0xff]  ;;  %v1905_v12 = vld [vmem:[#allocation13 + $0x130] sm:$0xff] }
 0x525   :  { %v1638_v4 = vsub.f32 1.0, %v1637_v3  ;;  %vm1662_vm13 = vmor %vm1660_vm11, %vm1661_vm9  ;;  %v1684_v36 = vand.u32 2147483647, %v1674_v60  ;;  %v1687_v38 = vor.u32 1.1754944e-38, %v1686_v35  ;;  %v1902_v3 = vld [vmem:[#allocation13 + $0x118] sm:$0xff]  ;;  %v1872_v35 = vld [vmem:[#allocation13 + $0x28] sm:$0xff] }
 0x526   :  { %v1657_v15 = vsub.f32 1.0, %v1656_v24  ;;  %v1901_v24 = vld [vmem:[#allocation13 + $0x110] sm:$0xff] }
 0x527   :  { %v1639_v21 = vmul.f32 %v2501_v28, %v1638_v4  ;;  %vm1685_vm3 = vcmp.eq.f32.partialorder %v1684_v36, 8.507059e+37  ;;  %v1895_v4 = vld [vmem:[#allocation13 + $0xe0] sm:$0xff]  ;;  %v1874_v36 = vld [vmem:[#allocation13 + $0x38] sm:$0xff] }
 0x528   :  { %v1658_v17 = vmul.f32 %v2503_v2, %v1657_v15  ;;  %v1896_v15 = vld [vmem:[#allocation13 + $0xe8] sm:$0xff] }
 0x529   :  { %v2505_v5 = vpop.eup %2504  ;;  %v1640_v25 = vadd.f32 %v2501_v28, %v1639_v21  ;;  %v1891_v21 = vld [vmem:[#allocation13 + $0xc0] sm:$0xff] }
 0x52a   :  { %v1659_v10 = vadd.f32 %v2503_v2, %v1658_v17  ;;  %v1676_v19 = vmul.f32 %v2505_v5, %v1674_v60  ;;  %v2507_v27 = vpop.eup %2506  ;;  %vm1681_vm0 = vweird.f32 %v2505_v5  ;;  %v1903_v60 = vld [vmem:[#allocation13 + $0x120] sm:$0xff]  ;;  %v1894_v17 = vld [vmem:[#allocation13 + $0xd8] sm:$0xff] }
 0x52b   :  { %v1644_v18 = vsel %vm1643_vm12, %v2501_v28, %v1640_v25  ;;  %vm1682_vm2 = vmor %vm1680_vm1, %vm1681_vm0  ;;  %v1904_v28 = vld [vmem:[#allocation13 + $0x128] sm:$0xff]  ;;  %v1890_v25 = vld [vmem:[#allocation13 + $0xb8] sm:$0xff] }
 0x52c   :  { %v1649_v6 = vsel %vm1646_vm14, %v1648_v22, %v1644_v18  ;;  %v1663_v8 = vsel %vm1662_vm13, %v2503_v2, %v1659_v10  ;;  %v1677_v53 = vsub.f32 1.0, %v1676_v19  ;;  %v1900_v2 = vld [vmem:[#allocation13 + $0x108] sm:$0xff]  ;;  %v1897_v22 = vld [vmem:[#allocation13 + $0xf0] sm:$0xff]  ;;  %v1883_v10 = vld [vmem:[#allocation13 + $0x80] sm:$0xff] }
 0x52d   :  { %v1668_v29 = vsel %vm1665_vm15, %v1667_v14, %v1663_v8  ;;  %v1691_v30 = vmul.f32 %v2507_v27, %v1649_v6  ;;  %v1884_v19 = vld [vmem:[#allocation13 + $0x88] sm:$0xff]  ;;  %v1886_v14 = vld [vmem:[#allocation13 + $0x98] sm:$0xff]  ;;  %v1893_v18 = vld [vmem:[#allocation13 + $0xd0] sm:$0xff] }
 0x52e   :  { %v1690_v31 = vmul.f32 %v1668_v29, %v3967_v40  ;;  %v1678_v32 = vmul.f32 %v2505_v5, %v1677_v53  ;;  %v1930_v40 = vld [vmem:[#allocation13 + $0x1f8] sm:$0xff]  ;;  %v1879_v27 = vld [vmem:[#allocation13 + $0x60] sm:$0xff]  ;;  %v1880_v6 = vld [vmem:[#allocation13 + $0x68] sm:$0xff] }
 0x52f   :  { %v1882_v8 = vld [vmem:[#allocation13 + $0x78] sm:$0xff]  ;;  %v1875_v53 = vld [vmem:[#allocation13 + $0x40] sm:$0xff]  ;;  %v1889_v29 = vld [vmem:[#allocation13 + $0xb0] sm:$0xff] }
 0x530   :  { %v3975_v33 = vadd.f32 %v1691_v30, %v1690_v31  ;;  %v1679_v34 = vadd.f32 %v2505_v5, %v1678_v32  ;;  %v1876_v30 = vld [vmem:[#allocation13 + $0x48] sm:$0xff]  ;;  %v1878_v31 = vld [vmem:[#allocation13 + $0x58] sm:$0xff]  ;;  %v1871_v32 = vld [vmem:[#allocation13 + $0x20] sm:$0xff] }
 0x532   :  { %2508 = vtanh.f32 %v3975_v33  ;;  %v1683_v37 = vsel %vm1682_vm2, %v2505_v5, %v1679_v34  ;;  %v1888_v5 = vld [vmem:[#allocation13 + $0xa8] sm:$0xff]  ;;  %v1885_v34 = vld [vmem:[#allocation13 + $0x90] sm:$0xff] }
 0x533   :  { %v1688_v42 = vsel %vm1685_vm3, %v1687_v38, %v1683_v37  ;;  %v1867_v37 = vld [vmem:[#allocation13] sm:$0xff]  ;;  %v1868_v38 = vld [vmem:[#allocation13 + $0x8] sm:$0xff] }
 0x538   :  { %v2509_v41 = vpop.eup %2508 }
 0x539   :  { %v1694_v43 = vmul.f32 %v2509_v41, %v1688_v42  ;;  %v1870_v41 = vld [vmem:[#allocation13 + $0x18] sm:$0xff] }
 0x53a   :  { %v1866_v42 = vld [vmem:[#allocation5 + $0x38] sm:$0xff] }
 0x53b   :  { %1724 = vmatmul.f32.vlgmr.msra.gmra.mxu0 %v1694_v43  ;;  %1744 = vmatmul.f32.vlgmr.msra.gmra.mxu1 %v1694_v43 }
 0x53c   :  { %1764 = vmatmul.f32.vlgmr.msra.gmra.mxu2 %v1694_v43  ;;  %1784 = vmatmul.f32.vlgmr.msra.gmra.mxu3 %v1694_v43  ;;  %v1881_v43 = vld [vmem:[#allocation13 + $0x70] sm:$0xff] }
 0x53d   :  { %2076 = vmatpush.msra.mxu0 %v1927_v47  ;;  %2096 = vmatpush.msra.mxu1 %v1928_v0  ;;  %v1877_v47 = vld [vmem:[#allocation13 + $0x50] sm:$0xff] }
 0x53e   :  { %2136 = vmatpush.msra.mxu3 %v1930_v40  ;;  %2116 = vmatpush.msra.mxu2 %v1929_v46  ;;  %v1873_v0 = vld [vmem:[#allocation13 + $0x30] sm:$0xff] }
 0x53f   :  { %2077 = vmatpush.msra.mxu0 %v1923_v13  ;;  %2097 = vmatpush.msra.mxu1 %v1924_v61  ;;  %v1869_v40 = vld [vmem:[#allocation13 + $0x10] sm:$0xff]  ;;  %v2247_v61 = vld [vmem:[#allocation22 + $0x68] sm:$0xff] }
 0x540   :  { %2137 = vmatpush.msra.mxu3 %v1926_v20  ;;  %2117 = vmatpush.msra.mxu2 %v1925_v39  ;;  %v2249_v46 = vld [vmem:[#allocation22 + $0x78] sm:$0xff]  ;;  %v2248_v13 = vld [vmem:[#allocation22 + $0x70] sm:$0xff]  ;;  %v2246_v20 = vld [vmem:[#allocation22 + $0x60] sm:$0xff] }
 0x541   :  { %2078 = vmatpush.msra.mxu0 %v1919_v50  ;;  %2098 = vmatpush.msra.mxu1 %v1920_v63  ;;  %v2245_v39 = vld [vmem:[#allocation22 + $0x58] sm:$0xff]  ;;  %v2244_v50 = vld [vmem:[#allocation22 + $0x50] sm:$0xff]  ;;  %v2243_v63 = vld [vmem:[#allocation22 + $0x48] sm:$0xff] }
 0x542   :  { %2138 = vmatpush.msra.mxu3 %v1922_v49  ;;  %2118 = vmatpush.msra.mxu2 %v1921_v44  ;;  %v2242_v49 = vld [vmem:[#allocation22 + $0x40] sm:$0xff] }
 0x543   :  { %2079 = vmatpush.msra.mxu0 %v1915_v52  ;;  %2099 = vmatpush.msra.mxu1 %v1916_v45  ;;  %v2241_v45 = vld [vmem:[#allocation22 + $0x38] sm:$0xff] }
 0x544   :  { %2139 = vmatpush.msra.mxu3 %v1918_v51  ;;  %2119 = vmatpush.msra.mxu2 %v1917_v56  ;;  %v4324_v51 = vld [vmem:[#allocation84_spill] sm:$0xff] }
 0x545   :  { %2080 = vmatpush.msra.mxu0 %v1911_v26  ;;  %2100 = vmatpush.msra.mxu1 %v1912_v48  ;;  %v4325_v26 = vld [vmem:[#allocation85_spill] sm:$0xff] }
 0x546   :  { %2140 = vmatpush.msra.mxu3 %v1914_v57  ;;  %2120 = vmatpush.msra.mxu2 %v1913_v58  ;;  %v2240_v57 = vld [vmem:[#allocation22 + $0x30] sm:$0xff] }
 0x547   :  { %2081 = vmatpush.msra.mxu0 %v1907_v54  ;;  %2101 = vmatpush.msra.mxu1 %v1908_v59  ;;  %v2239_v59 = vld [vmem:[#allocation22 + $0x28] sm:$0xff] }
 0x548   :  { %2141 = vmatpush.msra.mxu3 %v1910_v62  ;;  %2121 = vmatpush.msra.mxu2 %v1909_v55  ;;  %v2238_v62 = vld [vmem:[#allocation22 + $0x20] sm:$0xff] }
 0x549   :  { %2082 = vmatpush.msra.mxu0 %v1903_v60  ;;  %2102 = vmatpush.msra.mxu1 %v1904_v28  ;;  %v4326_v60 = vld [vmem:[#allocation87_spill] sm:$0xff] }
 0x54a   :  { %2142 = vmatpush.msra.mxu3 %v1906_v9  ;;  %2122 = vmatpush.msra.mxu2 %v1905_v12  ;;  %v2237_v9 = vld [vmem:[#allocation22 + $0x18] sm:$0xff] }
 0x54b   :  { %2083 = vmatpush.msra.mxu0 %v1899_v1  ;;  %2103 = vmatpush.msra.mxu1 %v1900_v2  ;;  %v2236_v1 = vld [vmem:[#allocation22 + $0x10] sm:$0xff] }
 0x54c   :  { %2143 = vmatpush.msra.mxu3 %v1902_v3  ;;  %2123 = vmatpush.msra.mxu2 %v1901_v24 }
 0x54d   :  { %2084 = vmatpush.msra.mxu0 %v1895_v4  ;;  %2104 = vmatpush.msra.mxu1 %v1896_v15  ;;  %v2235_v4 = vld [vmem:[#allocation22 + $0x8] sm:$0xff] }
 0x54e   :  { %2144 = vmatpush.msra.mxu3 %v1898_v7  ;;  %2012 = vmatmul.f32.vlgmr.msrb.gmra.mxu0 %v1931_v11  ;;  %v2234_v7 = vld [vmem:[#allocation22] sm:$0xff] }
 0x54f   :  { %2085 = vmatpush.msra.mxu0 %v1891_v21  ;;  %2105 = vmatpush.msra.mxu1 %v1892_v16  ;;  %v2265_v16 = vld [vmem:[#allocation23 + $0x78] sm:$0xff] }
 0x550   :  { %2145 = vmatpush.msra.mxu3 %v1894_v17  ;;  %2032 = vmatmul.f32.vlgmr.msrb.gmra.mxu1 %v1931_v11 }
 0x551   :  { %2086 = vmatpush.msra.mxu0 %v1887_v23  ;;  %2106 = vmatpush.msra.mxu1 %v1888_v5  ;;  %v4327_v5 = vld [vmem:[#allocation86_spill] sm:$0xff] }
 0x552   :  { %2146 = vmatpush.msra.mxu3 %v1890_v25  ;;  %2124 = vmatpush.msra.mxu2 %v1897_v22  ;;  %v2264_v22 = vld [vmem:[#allocation23 + $0x70] sm:$0xff] }
 0x553   :  { %2087 = vmatpush.msra.mxu0 %v1883_v10  ;;  %2107 = vmatpush.msra.mxu1 %v1884_v19 }
 0x554   :  { %2147 = vmatpush.msra.mxu3 %v1886_v14  ;;  %2125 = vmatpush.msra.mxu2 %v1893_v18  ;;  %v2263_v18 = vld [vmem:[#allocation23 + $0x68] sm:$0xff] }
 0x555   :  { %2072 = vmatmul.f32.vlgmr.msrb.gmra.mxu3 %v1931_v11  ;;  %2088 = vmatpush.msra.mxu0 %v1879_v27 }
 0x556   :  { %2108 = vmatpush.msra.mxu1 %v1880_v6  ;;  %2148 = vmatpush.msra.mxu3 %v1882_v8 }
 0x557   :  { %2089 = vmatpush.msra.mxu0 %v1875_v53  ;;  %2126 = vmatpush.msra.mxu2 %v1889_v29 }
 0x558   :  { %2109 = vmatpush.msra.mxu1 %v1876_v30  ;;  %2149 = vmatpush.msra.mxu3 %v1878_v31  ;;  %v2262_v30 = vld [vmem:[#allocation23 + $0x60] sm:$0xff] }
 0x559   :  { %2090 = vmatpush.msra.mxu0 %v1871_v32  ;;  %2127 = vmatpush.msra.mxu2 %v1885_v34 }
 0x55a   :  { %2110 = vmatpush.msra.mxu1 %v1872_v35  ;;  %2150 = vmatpush.msra.mxu3 %v1874_v36 }
 0x55b   :  { %2052 = vmatmul.f32.vlgmr.msrb.gmra.mxu2 %v1931_v11  ;;  %2091 = vmatpush.msra.mxu0 %v1867_v37  ;;  %v2261_v37 = vld [vmem:[#allocation23 + $0x58] sm:$0xff] }
 0x55c   :  { %2111 = vmatpush.msra.mxu1 %v1868_v38  ;;  %2151 = vmatpush.msra.mxu3 %v1870_v41 }
 0x55d   :  { %2092 = vmatmul.f32.vlgmr.msra.gmra.mxu0 %v1866_v42  ;;  %2112 = vmatmul.f32.vlgmr.msra.gmra.mxu1 %v1866_v42 }
 0x55e   :  { %2128 = vmatpush.msra.mxu2 %v1881_v43  ;;  %2152 = vmatmul.f32.vlgmr.msra.gmra.mxu3 %v1866_v42 }
 0x55f   :  { %2286 = vmatpush.msrb.mxu1 %v2249_v46  ;;  %2266 = vmatpush.msrb.mxu0 %v2265_v16  ;;  %v2254_v16 = vld [vmem:[#allocation23 + $0x20] sm:$0xff] }
 0x560   :  { %2129 = vmatpush.msra.mxu2 %v1877_v47 }
 0x561   :  { %2287 = vmatpush.msrb.mxu1 %v2248_v13  ;;  %2267 = vmatpush.msrb.mxu0 %v2264_v22 }
 0x562   :  { %2130 = vmatpush.msra.mxu2 %v1873_v0  ;;  %v2260_v0 = vld [vmem:[#allocation23 + $0x50] sm:$0xff] }
 0x563   :  { %2288 = vmatpush.msrb.mxu1 %v2247_v61  ;;  %2268 = vmatpush.msrb.mxu0 %v2263_v18  ;;  %v2251_v18 = vld [vmem:[#allocation23 + $0x8] sm:$0xff] }
 0x564   :  { %2131 = vmatpush.msra.mxu2 %v1869_v40 }
 0x565   :  { %2132 = vmatmul.f32.vlgmr.msra.gmra.mxu2 %v1866_v42  ;;  %2289 = vmatpush.msrb.mxu1 %v2246_v20 }
 0x566   :  { %2269 = vmatpush.msrb.mxu0 %v2262_v30 }
 0x567   :  { %2290 = vmatpush.msrb.mxu1 %v2245_v39 }
 0x568   :  { %2270 = vmatpush.msrb.mxu0 %v2261_v37 }
 0x569   :  { %2291 = vmatpush.msrb.mxu1 %v2244_v50  ;;  %v3992_v50 = vld [vmem:[#allocation16] sm:$0xf] }
 0x56a   :  { %2271 = vmatpush.msrb.mxu0 %v2260_v0 }
 0x56b   :  { %2292 = vmatpush.msrb.mxu1 %v2243_v63  ;;  %v2259_v63 = vld [vmem:[#allocation23 + $0x48] sm:$0xff] }
 0x56c   :  { %2272 = vmatpush.msrb.mxu0 %v2259_v63 }
 0x56d   :  { %2293 = vmatpush.msrb.mxu1 %v2242_v49 }
 0x56f   :  { %2294 = vmatpush.msrb.mxu1 %v2241_v45 }
 0x571   :  { %2295 = vmatpush.msrb.mxu1 %v2240_v57 }
 0x573   :  { %2296 = vmatpush.msrb.mxu1 %v2239_v59  ;;  %v2257_v59 = vld [vmem:[#allocation23 + $0x38] sm:$0xff] }
 0x575   :  { %2297 = vmatpush.msrb.mxu1 %v2238_v62 }
 0x577   :  { %2298 = vmatpush.msrb.mxu1 %v2237_v9 }
 0x579   :  { %2299 = vmatpush.msrb.mxu1 %v2236_v1 }
 0x57b   :  { %2300 = vmatpush.msrb.mxu1 %v2235_v4 }
 0x57d   :  { %2301 = vmatpush.msrb.mxu1 %v2234_v7 }
 0x5b8   :  { %v1725_v44 = vpop.f32.mrf.mxu0  ;;  %v1745_v52 = vpop.f32.mrf.mxu1 }
 0x5b9   :  { %v1788_v56 = vadd.f32 %v1725_v44, %v4324_v51  ;;  %v1789_v48 = vadd.f32 %v1745_v52, %v4325_v26  ;;  %v2158_v26 = vperm.slane %v3992_v50, 0 }
 0x5bb   :  { %v2374_v58 = vmul.f32 -1.442695, %v1788_v56  ;;  %v2375_v54 = vmul.f32 -1.442695, %v1789_v48  ;;  %v2258_v56 = vld [vmem:[#allocation23 + $0x40] sm:$0xff]  ;;  %v2159_v48 = vperm.slane %v3992_v50, 1 }
 0x5bc   :  { %2273 = vmatpush.msrb.mxu0 %v2258_v56  ;;  %v2228_v56 = vld [vmem:[#allocation20] sm:$0xff] }
 0x5bd   :  { %2510 = vpow2.f32 %v2374_v58 }
 0x5be   :  { %2512 = vpow2.f32 %v2375_v54  ;;  %2274 = vmatpush.msrb.mxu0 %v2257_v59 }
 0x5bf   :  { %v1785_v55 = vpop.f32.mrf.mxu3  ;;  %v1765_v11 = vpop.f32.mrf.mxu2 }
 0x5c0   :  { %v1791_v28 = vadd.f32 %v1785_v55, %v4326_v60  ;;  %v1790_v25 = vadd.f32 %v1765_v11, %v4327_v5  ;;  %v2161_v11 = vperm.slane %v3992_v50, 3 }
 0x5c2   :  { %v2376_v12 = vmul.f32 -1.442695, %v1791_v28  ;;  %v2256_v28 = vld [vmem:[#allocation23 + $0x30] sm:$0xff] }
 0x5c3   :  { %v2511_v2 = vpop.eup %2510  ;;  %2275 = vmatpush.msrb.mxu0 %v2256_v28 }
 0x5c4   :  { %v2513_v3 = vpop.eup %2512  ;;  %v1795_v24 = vadd.f32 1.0, %v2511_v2  ;;  %2514 = vpow2.f32 %v2376_v12 }
 0x5c5   :  { %v1814_v15 = vadd.f32 1.0, %v2513_v3  ;;  %v2255_v3 = vld [vmem:[#allocation23 + $0x28] sm:$0xff] }
 0x5c6   :  { %2516 = vrcp.f32 %v1795_v24  ;;  %v1807_v8 = vand.u32 2147483648, %v1795_v24  ;;  %v1805_v34 = vand.u32 2147483647, %v1795_v24  ;;  %vm1801_vm6 = vweird.f32 %v1795_v24  ;;  %2276 = vmatpush.msrb.mxu0 %v2255_v3 }
 0x5c7   :  { %2518 = vrcp.f32 %v1814_v15  ;;  %v1826_v31 = vand.u32 2147483648, %v1814_v15  ;;  %v1824_v36 = vand.u32 2147483647, %v1814_v15  ;;  %vm1820_vm7 = vweird.f32 %v1814_v15 }
 0x5c8   :  { %v1808_v42 = vor.u32 1.1754944e-38, %v1807_v8  ;;  %vm1806_vm10 = vcmp.eq.f32.partialorder %v1805_v34, 8.507059e+37  ;;  %2277 = vmatpush.msrb.mxu0 %v2254_v16  ;;  %v2160_v34 = vperm.slane %v3992_v50, 2 }
 0x5c9   :  { %v1827_v40 = vor.u32 1.1754944e-38, %v1826_v31  ;;  %vm1825_vm11 = vcmp.eq.f32.partialorder %v1824_v36, 8.507059e+37 }
 0x5ca   :  { %v2515_v21 = vpop.eup %2514 }
 0x5cb   :  { %v3984_v17 = vadd.f32 1.0, %v2515_v21  ;;  %v2013_v53 = vpop.f32.mrf.mxu0 }
 0x5cc   :  { %v2517_v23 = vpop.eup %2516 }
 0x5cd   :  { %v2519_v10 = vpop.eup %2518  ;;  %v1797_v19 = vmul.f32 %v2517_v23, %v1795_v24  ;;  %2520 = vrcp.f32 %v3984_v17  ;;  %v2033_v29 = vpop.f32.mrf.mxu1  ;;  %vm1802_vm4 = vweird.f32 %v2517_v23  ;;  %vm1840_vm13 = vweird.f32 %v3984_v17 }
 0x5ce   :  { %v1816_v14 = vmul.f32 %v2519_v10, %v1814_v15  ;;  %2522 = vtanh.f32 %v1790_v25  ;;  %vm1821_vm5 = vweird.f32 %v2519_v10  ;;  %vm1803_vm8 = vmor %vm1801_vm6, %vm1802_vm4  ;;  %v1844_v1 = vand.u32 2147483647, %v3984_v17 }
 0x5cf   :  { %v1798_v27 = vsub.f32 1.0, %v1797_v19  ;;  %vm1822_vm9 = vmor %vm1820_vm7, %vm1821_vm5 }
 0x5d0   :  { %v1817_v6 = vsub.f32 1.0, %v1816_v14  ;;  %vm1845_vm15 = vcmp.eq.f32.partialorder %v1844_v1, 8.507059e+37 }
 0x5d1   :  { %v1799_v32 = vmul.f32 %v2517_v23, %v1798_v27 }
 0x5d2   :  { %v1818_v35 = vmul.f32 %v2519_v10, %v1817_v6  ;;  %v2250_v6 = vld [vmem:[#allocation23] sm:$0xff] }
 0x5d3   :  { %v3988_v38 = vpop.eup %2520  ;;  %v1800_v41 = vadd.f32 %v2517_v23, %v1799_v32 }
 0x5d4   :  { %v1819_v43 = vadd.f32 %v2519_v10, %v1818_v35  ;;  %v1836_v47 = vmul.f32 %v3988_v38, %v3984_v17  ;;  %v2523_v13 = vpop.eup %2522  ;;  %vm1841_vm12 = vweird.f32 %v3988_v38 }
 0x5d5   :  { %v1804_v46 = vsel %vm1803_vm8, %v2517_v23, %v1800_v41  ;;  %vm4003_vm14 = vmor %vm1840_vm13, %vm1841_vm12  ;;  %v2253_v23 = vld [vmem:[#allocation23 + $0x18] sm:$0xff] }
 0x5d6   :  { %v1809_v61 = vsel %vm1806_vm10, %v1808_v42, %v1804_v46  ;;  %v1823_v20 = vsel %vm1822_vm9, %v2519_v10, %v1819_v43  ;;  %v1837_v39 = vsub.f32 1.0, %v1836_v47  ;;  %v2252_v10 = vld [vmem:[#allocation23 + $0x10] sm:$0xff]  ;;  %2278 = vmatpush.msrb.mxu0 %v2253_v23 }
 0x5d7   :  { %v1828_v49 = vsel %vm1825_vm11, %v1827_v40, %v1823_v20  ;;  %v1851_v44 = vmul.f32 %v2523_v13, %v1809_v61 }
 0x5d8   :  { %v1850_v52 = vmul.f32 %v1828_v49, %v3975_v33  ;;  %v2073_v45 = vpop.f32.mrf.mxu3  ;;  %v1838_v51 = vmul.f32 %v3988_v38, %v1837_v39  ;;  %v1846_v33 = vand.u32 2147483648, %v3984_v17  ;;  %2279 = vmatpush.msrb.mxu0 %v2252_v10 }
 0x5da   :  { %v1852_v57 = vadd.f32 %v1851_v44, %v1850_v52  ;;  %v2093_v58 = vpop.f32.mrf.mxu0  ;;  %v2113_v54 = vpop.f32.mrf.mxu1  ;;  %v1839_v60 = vadd.f32 %v3988_v38, %v1838_v51  ;;  %v1847_v21 = vor.u32 1.1754944e-38, %v1846_v33  ;;  %2280 = vmatpush.msrb.mxu0 %v2251_v18 }
 0x5db   :  { %v2094_v62 = vadd.f32 %v2093_v58, %v2013_v53  ;;  %v2114_v55 = vadd.f32 %v2113_v54, %v2033_v29 }
 0x5dc   :  { %2524 = vtanh.f32 %v1852_v57  ;;  %v1843_v7 = vsel %vm4003_vm14, %v3988_v38, %v1839_v60  ;;  %2281 = vmatpush.msrb.mxu0 %v2250_v6 }
 0x5dd   :  { %v2166_v9 = vadd.f32 %v2158_v26, %v2094_v62  ;;  %v2167_v12 = vadd.f32 %v2159_v48, %v2114_v55  ;;  %v1848_v22 = vsel %vm1845_vm15, %v1847_v21, %v1843_v7 }
 0x5de   :  { %v2053_v15 = vpop.f32.mrf.mxu2 }
 0x5df   :  { %v2377_v24 = vmul.f32 -1.442695, %v2166_v9  ;;  %v2378_v4 = vmul.f32 -1.442695, %v2167_v12 }
 0x5e1   :  { %2526 = vpow2.f32 %v2377_v24  ;;  %v2153_v17 = vpop.f32.mrf.mxu3 }
 0x5e2   :  { %v2525_v5 = vpop.eup %2524  ;;  %2528 = vpow2.f32 %v2378_v4  ;;  %v2154_v25 = vadd.f32 %v2153_v17, %v2073_v45  ;;  %v2397_v4 = vld [vmem:[%s4031_s13] ss:$0 sm:$0xff]  ;;  %s2330_s13 = sshll.u32 %s4032_s14, 4  ;;  %s2331_s13 = int_to_ptr.hbm [resolvable:$true] %s2330_s13 }
 0x5e3   :  { %v1854_v19 = vmul.f32 %v2525_v5, %v1848_v22 }
 0x5e4   :  { %v2169_v14 = vadd.f32 %v2161_v11, %v2154_v25 }
 0x5e5   :  { %2302 = vmatmul.f32.vlgmr.msrb.gmra.mxu1 %v1854_v19 }
 0x5e6   :  { %v2379_v27 = vmul.f32 -1.442695, %v2169_v14 }
 0x5e7   :  { %v2527_v8 = vpop.eup %2526 }
 0x5e8   :  { %v2529_v53 = vpop.eup %2528  ;;  %v2173_v29 = vadd.f32 1.0, %v2527_v8  ;;  %2530 = vpow2.f32 %v2379_v27  ;;  %v2133_v31 = vpop.f32.mrf.mxu2 }
 0x5e9   :  { %v2192_v30 = vadd.f32 1.0, %v2529_v53  ;;  %v2134_v32 = vadd.f32 %v2133_v31, %v2053_v15 }
 0x5ea   :  { %2532 = vrcp.f32 %v2173_v29  ;;  %v2185_v40 = vand.u32 2147483648, %v2173_v29  ;;  %v2183_v61 = vand.u32 2147483647, %v2173_v29  ;;  %vm2179_vm2 = vweird.f32 %v2173_v29 }
 0x5eb   :  { %2534 = vrcp.f32 %v2192_v30  ;;  %v2168_v38 = vadd.f32 %v2160_v34, %v2134_v32  ;;  %v2204_v46 = vand.u32 2147483648, %v2192_v30  ;;  %v2202_v39 = vand.u32 2147483647, %v2192_v30 }
 0x5ec   :  { %vm2198_vm3 = vweird.f32 %v2192_v30  ;;  %v2186_v44 = vor.u32 1.1754944e-38, %v2185_v40  ;;  %vm2184_vm6 = vcmp.eq.f32.partialorder %v2183_v61, 8.507059e+37 }
 0x5ed   :  { %v2205_v45 = vor.u32 1.1754944e-38, %v2204_v46  ;;  %vm2203_vm7 = vcmp.eq.f32.partialorder %v2202_v39, 8.507059e+37 }
 0x5ee   :  { %v2531_v35 = vpop.eup %2530 }
 0x5ef   :  { %v2212_v36 = vadd.f32 1.0, %v2531_v35 }
 0x5f0   :  { %v2533_v37 = vpop.eup %2532 }
 0x5f1   :  { %v2535_v41 = vpop.eup %2534  ;;  %v2175_v42 = vmul.f32 %v2533_v37, %v2173_v29  ;;  %2536 = vrcp.f32 %v2212_v36  ;;  %vm2180_vm0 = vweird.f32 %v2533_v37  ;;  %v2224_v28 = vand.u32 2147483648, %v2212_v36 }
 0x5f2   :  { %v2194_v43 = vmul.f32 %v2535_v41, %v2192_v30  ;;  %2538 = vtanh.f32 %v2168_v38  ;;  %vm2199_vm1 = vweird.f32 %v2535_v41  ;;  %vm2181_vm4 = vmor %vm2179_vm2, %vm2180_vm0  ;;  %vm2218_vm9 = vweird.f32 %v2212_v36 }
 0x5f3   :  { %v2176_v47 = vsub.f32 1.0, %v2175_v42  ;;  %vm2200_vm5 = vmor %vm2198_vm3, %vm2199_vm1  ;;  %v2222_v9 = vand.u32 2147483647, %v2212_v36  ;;  %v2225_v1 = vor.u32 1.1754944e-38, %v2224_v28 }
 0x5f4   :  { %v2195_v0 = vsub.f32 1.0, %v2194_v43 }
 0x5f5   :  { %v2177_v13 = vmul.f32 %v2533_v37, %v2176_v47  ;;  %vm2223_vm11 = vcmp.eq.f32.partialorder %v2222_v9, 8.507059e+37 }
 0x5f6   :  { %v2196_v20 = vmul.f32 %v2535_v41, %v2195_v0 }
 0x5f7   :  { %v2537_v50 = vpop.eup %2536  ;;  %v2178_v63 = vadd.f32 %v2533_v37, %v2177_v13 }
 0x5f8   :  { %v2214_v49 = vmul.f32 %v2537_v50, %v2212_v36  ;;  %v2197_v52 = vadd.f32 %v2535_v41, %v2196_v20  ;;  %v2539_v26 = vpop.eup %2538  ;;  %vm2219_vm8 = vweird.f32 %v2537_v50 }
 0x5f9   :  { %v2182_v51 = vsel %vm2181_vm4, %v2533_v37, %v2178_v63  ;;  %vm2220_vm10 = vmor %vm2218_vm9, %vm2219_vm8 }
 0x5fa   :  { %v2215_v48 = vsub.f32 1.0, %v2214_v49  ;;  %v2187_v57 = vsel %vm2184_vm6, %v2186_v44, %v2182_v51  ;;  %v2201_v58 = vsel %vm2200_vm5, %v2535_v41, %v2197_v52 }
 0x5fb   :  { %v2206_v54 = vsel %vm2203_vm7, %v2205_v45, %v2201_v58  ;;  %v2230_v59 = vmul.f32 %v2539_v26, %v2187_v57 }
 0x5fc   :  { %v2229_v62 = vmul.f32 %v2228_v56, %v2206_v54  ;;  %v2216_v55 = vmul.f32 %v2537_v50, %v2215_v48 }
 0x5fe   :  { %v2231_v60 = vadd.f32 %v2230_v59, %v2229_v62  ;;  %v2217_v33 = vadd.f32 %v2537_v50, %v2216_v55 }
 0x600   :  { %2540 = vtanh.f32 %v2231_v60  ;;  %v2221_v12 = vsel %vm2220_vm10, %v2537_v50, %v2217_v33 }
 0x601   :  { %v2226_v3 = vsel %vm2223_vm11, %v2225_v1, %v2221_v12 }
 0x606   :  { %v2541_v2 = vpop.eup %2540 }
 0x607   :  { %v2233_v24 = vmul.f32 %v2541_v2, %v2226_v3 }
 0x609   :  { %2282 = vmatmul.f32.vlgmr.msrb.gmra.mxu0 %v2233_v24 }
 0x662   :  { %v2303_v15 = vpop.f32.mrf.mxu1 }
 0x686   :  { %v2283_v7 = vpop.f32.mrf.mxu0 }
 0x687   :  { %v2304_v11 = vadd.f32 %v2303_v15, %v2283_v7 }
 0x689   :  { %v2310_v21 = vadd.f32 %v2397_v4, %v2304_v11 }
 0x68b   :  { %2311 = vmax.xlane.f32.xlu0 %v2310_v21 }
 0x6fe   :  { %v2312_v16 = vpop.xlane.xlu0 %2311 }
 0x6ff   :  { %v2313_v23 = vsub.f32 %v2310_v21, %v2312_v16 }
 0x701   :  { %v2314_v17 = vmul.f32 1.442695, %v2313_v23 }
 0x703   :  { %2542 = vpow2.f32 %v2314_v17 }
 0x709   :  { %v2543_v5 = vpop.eup %2542 }
 0x70a   :  { %2316 = vadd.xlane.f32.xlu0 %v2543_v5 }
 0x77d   :  { %v2317_v25 = vpop.xlane.xlu0 %2316 }
 0x77e   :  { %2544 = vlog2.f32 %v2317_v25 }
 0x784   :  { %v2545_v22 = vpop.eup %2544 }
 0x785   :  { %v2319_v10 = vmul.f32 0.6931472, %v2545_v22 }
 0x787   :  { %v2320_v19 = vadd.f32 %v2319_v10, %v2312_v16 }
 0x789   :  { %v2321_v14 = vsub.f32 %v2310_v21, %v2320_v19 }
 0x78b   :  { %2322 = vst [vmem:[#allocation25] sm:$0xff] %v2321_v14 }
 0x78c   :  { %2333 = dma.vmem_to_hbm [thread:$0]  %s2329_s15, 128, %s2331_s13, [#allocation7]  }
 0x78d   :  { %2936 = dma.done.wait [#allocation7], 128  }
 0x78e   :  { %2937 = vsyncadd [#allocation7], 4294967168 }
 0x78f   :  { %2338 = vsyncpa [#allocation6], 1 }
 0x790   :  { %2339 = vsyncpa [#allocation9], 1 }
 0x791   :  { %2340 = vsyncpa [#allocation12], 1 }
 0x792   :  { %2341 = vsyncpa [#allocation15], 1 }
 0x793   :  { %2342 = vsyncpa [#allocation18], 1 }
 0x794   :  { %2343 = vsyncpa [#allocation21], 1 }
 0x795   :  { %2344 = vsyncpa [#allocation24], 1 }
 0x796   :  { %2345 = vsyncpa [#allocation7], 1 }

// kernel: tpu_custom_call.1
= control target key start
LH: loop header
LB: loop body
LE: loop exit
PB: predicated region body
PF: predicated region fallthrough
CT: control target
= control target key end

     0   :  { %19 = vsyncpa [#allocation6], 0  ;;  %s4018_s0 = inlined_call_operand.hbm [shape: f32[64,128], index: 0, kind: input, shape index: {}]   ;;  %s4019_s1 = inlined_call_operand.hbm [shape: f32[128,512], index: 1, kind: input, shape index: {}]   ;;  %s4020_s2 = inlined_call_operand.hbm [shape: f32[128,512], index: 2, kind: input, shape index: {}]   ;;  %s4021_s3 = inlined_call_operand.hbm [shape: f32[1,512], index: 3, kind: input, shape index: {}]   ;;  %s4022_s4 = inlined_call_operand.hbm [shape: f32[128,512], index: 4, kind: input, shape index: {}]   ;;  %s4023_s5 = inlined_call_operand.hbm [shape: f32[128,512], index: 5, kind: input, shape index: {}]   ;;  %s4024_s6 = inlined_call_operand.hbm [shape: f32[1,512], index: 6, kind: input, shape index: {}]   ;;  %s4025_s7 = inlined_call_operand.hbm [shape: f32[8,128], index: 7, kind: input, shape index: {}]   ;;  %s4026_s8 = inlined_call_operand.hbm [shape: f32[8,128], index: 8, kind: input, shape index: {}]   ;;  %s4027_s9 = inlined_call_operand.vmem [shape: f32[8,128], index: 9, kind: input, shape index: {}]   ;;  %s4028_s10 = inlined_call_operand.hbm [shape: f32[8,128], index: 10, kind: input, shape index: {}]   ;;  %s4029_s11 = inlined_call_operand.hbm [shape: f32[128,128], index: 11, kind: input, shape index: {}]   ;;  %s4030_s12 = inlined_call_operand.hbm [shape: f32[128,128], index: 12, kind: input, shape index: {}]   ;;  %s4031_s13 = inlined_call_operand.vmem [shape: f32[1,128], index: 13, kind: input, shape index: {}]   ;;  %s4032_s14 = inlined_call_operand.hbm [shape: f32[8,128], index: 14, kind: output, shape index: {}]  }
   0x1   :  { %20 = vsyncpa [#allocation9], 0 }
   0x2   :  { %21 = vsyncpa [#allocation12], 0 }
   0x3   :  { %22 = vsyncpa [#allocation15], 0 }
   0x4   :  { %23 = vsyncpa [#allocation18], 0 }
   0x5   :  { %24 = vsyncpa [#allocation21], 0 }
   0x6   :  { %25 = vsyncpa [#allocation24], 0  ;;  %s44_s15 = sshll.u32 %s4019_s1, 4  ;;  %s45_s15 = int_to_ptr.hbm [resolvable:$true] %s44_s15 }
   0x7   :  { %26 = vsyncpa [#allocation7], 0  ;;  %s2938_s16 = smov [#allocation8]   ;;  %s71_s20 = sshll.u32 %s4021_s3, 4  ;;  %s72_s20 = int_to_ptr.hbm [resolvable:$true] %s71_s20 }
   0x8   :  { %s46_s17 = sshll.u32 %s2938_s16, 4  ;;  %s2939_s21 = smov 512   ;;  %s47_s17 = int_to_ptr.vmem [resolvable:$true] %s46_s17 }
   0x9   :  { %s2940_s22 = smov 32   ;;  %s2941_s23 = smov [#allocation11]  }
   0xa   :  { %52 = dma.hbm_to_vmem [thread:$0]  %s45_s15, 8192, %s47_s17, [#allocation9], %s2939_s21, %s2939_s21, %s2940_s22  }
   0xb   :  { %s73_s24 = sshll.u32 %s2941_s23, 4  ;;  %s94_s26 = sshll.u32 %s4023_s5, 4  ;;  %s74_s24 = int_to_ptr.vmem [resolvable:$true] %s73_s24  ;;  %s95_s26 = int_to_ptr.hbm [resolvable:$true] %s94_s26 }
   0xc   :  { %76 = dma.hbm_to_vmem [thread:$0]  %s72_s20, 64, %s74_s24, [#allocation12]  }
   0xd   :  { %s119_s3 = sshll.u32 %s4025_s7, 4  ;;  %s2942_s29 = smov [#allocation14]   ;;  %s120_s3 = int_to_ptr.hbm [resolvable:$true] %s119_s3 }
   0xe   :  { %s96_s30 = sshll.u32 %s2942_s29, 4  ;;  %s2943_s15 = smov [#allocation17]   ;;  %s97_s30 = int_to_ptr.vmem [resolvable:$true] %s96_s30 }
   0xf   :  { %102 = dma.hbm_to_vmem [thread:$0]  %s95_s26, 8192, %s97_s30, [#allocation15], %s2939_s21, %s2939_s21, %s2940_s22  }
  0x10   :  { %s121_s16 = sshll.u32 %s2943_s15, 4  ;;  %s143_s5 = sshll.u32 %s4028_s10, 4  ;;  %s122_s16 = int_to_ptr.vmem [resolvable:$true] %s121_s16  ;;  %s144_s5 = int_to_ptr.hbm [resolvable:$true] %s143_s5 }
  0x11   :  { %124 = dma.hbm_to_vmem [thread:$0]  %s120_s3, 128, %s122_s16, [#allocation18]  }
  0x12   :  { %s31_s7 = sshll.u32 %s4018_s0, 4  ;;  %s2944_s23 = smov [#allocation20]   ;;  %s32_s7 = int_to_ptr.hbm [resolvable:$true] %s31_s7 }
  0x13   :  { %s145_s24 = sshll.u32 %s2944_s23, 4  ;;  %s2945_s25 = smov [#allocation5]   ;;  %s146_s24 = int_to_ptr.vmem [resolvable:$true] %s145_s24 }
  0x14   :  { %148 = dma.hbm_to_vmem [thread:$0]  %s144_s5, 128, %s146_s24, [#allocation21]  }
  0x15   :  { %s33_s1 = sshll.u32 %s2945_s25, 4  ;;  %s2946_s26 = smov 128   ;;  %s34_s1 = int_to_ptr.vmem [resolvable:$true] %s33_s1 }
  0x16   :  { %s2947_s27 = smov 8   ;;  %s57_s3 = sshll.u32 %s4020_s2, 4  ;;  %s58_s3 = int_to_ptr.hbm [resolvable:$true] %s57_s3 }
  0x17   :  { %39 = dma.hbm_to_vmem [thread:$0]  %s32_s7, 1024, %s34_s1, [#allocation6], %s2946_s26, %s2946_s26, %s2947_s27  }
  0x18   :  { %s2948_s0 = smov [#allocation10]   ;;  %s81_s16 = sshll.u32 %s4022_s4, 4  ;;  %s82_s16 = int_to_ptr.hbm [resolvable:$true] %s81_s16 }
  0x19   :  { %s59_s29 = sshll.u32 %s2948_s0, 4  ;;  %s2949_s17 = smov [#allocation13]   ;;  %s60_s29 = int_to_ptr.vmem [resolvable:$true] %s59_s29 }
  0x1a   :  { %65 = dma.hbm_to_vmem [thread:$0]  %s58_s3, 8192, %s60_s29, [#allocation9], %s2939_s21, %s2939_s21, %s2940_s22  }
  0x1b   :  { %s83_s18 = sshll.u32 %s2949_s17, 4  ;;  %s108_s20 = sshll.u32 %s4024_s6, 4  ;;  %s84_s18 = int_to_ptr.vmem [resolvable:$true] %s83_s18  ;;  %s109_s20 = int_to_ptr.hbm [resolvable:$true] %s108_s20 }
  0x1c   :  { %89 = dma.hbm_to_vmem [thread:$0]  %s82_s16, 8192, %s84_s18, [#allocation12], %s2939_s21, %s2939_s21, %s2940_s22  }
  0x1d   :  { %s130_s4 = sshll.u32 %s4026_s8, 4  ;;  %s2950_s23 = smov [#allocation16]   ;;  %s131_s4 = int_to_ptr.hbm [resolvable:$true] %s130_s4 }
  0x1e   :  { %s110_s24 = sshll.u32 %s2950_s23, 4  ;;  %s2951_s25 = smov [#allocation19]   ;;  %s111_s24 = int_to_ptr.vmem [resolvable:$true] %s110_s24 }
  0x1f   :  { %113 = dma.hbm_to_vmem [thread:$0]  %s109_s20, 64, %s111_s24, [#allocation15]  }
  0x20   :  { %s132_s1 = sshll.u32 %s2951_s25, 4  ;;  %s153_s6 = sshll.u32 %s4029_s11, 4  ;;  %s133_s1 = int_to_ptr.vmem [resolvable:$true] %s132_s1  ;;  %s154_s6 = int_to_ptr.hbm [resolvable:$true] %s153_s6 }
  0x21   :  { %135 = dma.hbm_to_vmem [thread:$0]  %s131_s4, 128, %s133_s1, [#allocation18]  }
  0x22   :  { %s166_s22 = sshll.u32 %s4030_s12, 4  ;;  %s2952_s0 = smov [#allocation22]   ;;  %s167_s22 = int_to_ptr.hbm [resolvable:$true] %s166_s22 }
  0x23   :  { %s155_s8 = sshll.u32 %s2952_s0, 4  ;;  %s2953_s29 = smov [#allocation23]   ;;  %s156_s8 = int_to_ptr.vmem [resolvable:$true] %s155_s8 }
  0x24   :  { %161 = dma.hbm_to_vmem [thread:$0]  %s154_s6, 2048, %s156_s8, [#allocation21], %s2946_s26, %s2946_s26, %s2947_s27  }
  0x25   :  { %s168_s30 = sshll.u32 %s2953_s29, 4  ;;  %s169_s30 = int_to_ptr.vmem [resolvable:$true] %s168_s30 }
  0x26   :  { %174 = dma.hbm_to_vmem [thread:$0]  %s167_s22, 2048, %s169_s30, [#allocation24], %s2946_s26, %s2946_s26, %s2947_s27  }
  0x27   :  { %2922 = dma.done.wait [#allocation6], 1024  }
  0x28   :  { %2923 = vsyncadd [#allocation6], 4294966272 }
  0x29   :  { %2924 = dma.done.wait [#allocation9], 16384  }
  0x2a   :  { %2925 = vsyncadd [#allocation9], 4294950912 }
  0x2b   :  { %2926 = dma.done.wait [#allocation12], 8256  }
  0x2c   :  { %2927 = vsyncadd [#allocation12], 4294959040 }
  0x2d   :  { %2928 = dma.done.wait [#allocation15], 8256  }
  0x2e   :  { %2929 = vsyncadd [#allocation15], 4294959040 }
  0x2f   :  { %2930 = dma.done.wait [#allocation18], 256  }
  0x30   :  { %2931 = vsyncadd [#allocation18], 4294967040 }
  0x31   :  { %2932 = dma.done.wait [#allocation21], 2176  }
  0x32   :  { %2933 = vsyncadd [#allocation21], 4294965120 }
  0x33   :  { %2934 = dma.done.wait [#allocation24], 2048  }
  0x34   :  { %2935 = vsyncadd [#allocation24], 4294965248  ;;  %v301_v0 = vld [vmem:[#allocation8 + $0x1e0] sm:$0xff]  ;;  %v302_v1 = vld [vmem:[#allocation8 + $0x1e8] sm:$0xff]  ;;  %s2954_s27 = smov [#allocation25]  }
  0x35   :  { %v303_v2 = vld [vmem:[#allocation8 + $0x1f0] sm:$0xff]  ;;  %315 = vmatpush.msra.mxu0 %v301_v0  ;;  %356 = vmatpush.msra.mxu1 %v302_v1  ;;  %v304_v3 = vld [vmem:[#allocation8 + $0x1f8] sm:$0xff]  ;;  %v297_v4 = vld [vmem:[#allocation8 + $0x1c0] sm:$0xff]  ;;  %s2328_s15 = sshll.u32 %s2954_s27, 4  ;;  %s2329_s15 = int_to_ptr.vmem [resolvable:$true] %s2328_s15 }
  0x36   :  { %v298_v5 = vld [vmem:[#allocation8 + $0x1c8] sm:$0xff]  ;;  %397 = vmatpush.msra.mxu2 %v303_v2  ;;  %438 = vmatpush.msra.mxu3 %v304_v3  ;;  %v299_v6 = vld [vmem:[#allocation8 + $0x1d0] sm:$0xff]  ;;  %v300_v7 = vld [vmem:[#allocation8 + $0x1d8] sm:$0xff] }
  0x37   :  { %v293_v8 = vld [vmem:[#allocation8 + $0x1a0] sm:$0xff]  ;;  %316 = vmatpush.msra.mxu0 %v297_v4  ;;  %357 = vmatpush.msra.mxu1 %v298_v5  ;;  %v294_v9 = vld [vmem:[#allocation8 + $0x1a8] sm:$0xff]  ;;  %v295_v10 = vld [vmem:[#allocation8 + $0x1b0] sm:$0xff] }
  0x38   :  { %v296_v11 = vld [vmem:[#allocation8 + $0x1b8] sm:$0xff]  ;;  %398 = vmatpush.msra.mxu2 %v299_v6  ;;  %439 = vmatpush.msra.mxu3 %v300_v7  ;;  %v289_v12 = vld [vmem:[#allocation8 + $0x180] sm:$0xff]  ;;  %v290_v13 = vld [vmem:[#allocation8 + $0x188] sm:$0xff] }
  0x39   :  { %317 = vmatpush.msra.mxu0 %v293_v8  ;;  %358 = vmatpush.msra.mxu1 %v294_v9  ;;  %v291_v14 = vld [vmem:[#allocation8 + $0x190] sm:$0xff]  ;;  %v292_v15 = vld [vmem:[#allocation8 + $0x198] sm:$0xff]  ;;  %v285_v16 = vld [vmem:[#allocation8 + $0x160] sm:$0xff] }
  0x3a   :  { %399 = vmatpush.msra.mxu2 %v295_v10  ;;  %440 = vmatpush.msra.mxu3 %v296_v11  ;;  %v286_v17 = vld [vmem:[#allocation8 + $0x168] sm:$0xff]  ;;  %v287_v18 = vld [vmem:[#allocation8 + $0x170] sm:$0xff]  ;;  %v288_v19 = vld [vmem:[#allocation8 + $0x178] sm:$0xff] }
  0x3b   :  { %318 = vmatpush.msra.mxu0 %v289_v12  ;;  %359 = vmatpush.msra.mxu1 %v290_v13  ;;  %v281_v20 = vld [vmem:[#allocation8 + $0x140] sm:$0xff]  ;;  %v282_v21 = vld [vmem:[#allocation8 + $0x148] sm:$0xff]  ;;  %v283_v22 = vld [vmem:[#allocation8 + $0x150] sm:$0xff] }
  0x3c   :  { %400 = vmatpush.msra.mxu2 %v291_v14  ;;  %441 = vmatpush.msra.mxu3 %v292_v15  ;;  %v284_v23 = vld [vmem:[#allocation8 + $0x158] sm:$0xff]  ;;  %v277_v24 = vld [vmem:[#allocation8 + $0x120] sm:$0xff]  ;;  %v278_v25 = vld [vmem:[#allocation8 + $0x128] sm:$0xff] }
  0x3d   :  { %319 = vmatpush.msra.mxu0 %v285_v16  ;;  %360 = vmatpush.msra.mxu1 %v286_v17  ;;  %v279_v26 = vld [vmem:[#allocation8 + $0x130] sm:$0xff]  ;;  %v280_v27 = vld [vmem:[#allocation8 + $0x138] sm:$0xff]  ;;  %v273_v28 = vld [vmem:[#allocation8 + $0x100] sm:$0xff] }
  0x3e   :  { %401 = vmatpush.msra.mxu2 %v287_v18  ;;  %442 = vmatpush.msra.mxu3 %v288_v19  ;;  %v274_v29 = vld [vmem:[#allocation8 + $0x108] sm:$0xff]  ;;  %v275_v30 = vld [vmem:[#allocation8 + $0x110] sm:$0xff]  ;;  %v276_v31 = vld [vmem:[#allocation8 + $0x118] sm:$0xff] }
  0x3f   :  { %320 = vmatpush.msra.mxu0 %v281_v20  ;;  %361 = vmatpush.msra.mxu1 %v282_v21  ;;  %v269_v32 = vld [vmem:[#allocation8 + $0xe0] sm:$0xff]  ;;  %v270_v33 = vld [vmem:[#allocation8 + $0xe8] sm:$0xff]  ;;  %v271_v34 = vld [vmem:[#allocation8 + $0xf0] sm:$0xff] }
  0x40   :  { %402 = vmatpush.msra.mxu2 %v283_v22  ;;  %443 = vmatpush.msra.mxu3 %v284_v23  ;;  %v272_v35 = vld [vmem:[#allocation8 + $0xf8] sm:$0xff]  ;;  %v265_v36 = vld [vmem:[#allocation8 + $0xc0] sm:$0xff]  ;;  %v266_v37 = vld [vmem:[#allocation8 + $0xc8] sm:$0xff] }
  0x41   :  { %321 = vmatpush.msra.mxu0 %v277_v24  ;;  %362 = vmatpush.msra.mxu1 %v278_v25  ;;  %v267_v38 = vld [vmem:[#allocation8 + $0xd0] sm:$0xff]  ;;  %v268_v39 = vld [vmem:[#allocation8 + $0xd8] sm:$0xff]  ;;  %v261_v40 = vld [vmem:[#allocation8 + $0xa0] sm:$0xff] }
  0x42   :  { %403 = vmatpush.msra.mxu2 %v279_v26  ;;  %444 = vmatpush.msra.mxu3 %v280_v27  ;;  %v262_v41 = vld [vmem:[#allocation8 + $0xa8] sm:$0xff]  ;;  %v263_v42 = vld [vmem:[#allocation8 + $0xb0] sm:$0xff]  ;;  %v264_v43 = vld [vmem:[#allocation8 + $0xb8] sm:$0xff] }
  0x43   :  { %322 = vmatpush.msra.mxu0 %v273_v28  ;;  %363 = vmatpush.msra.mxu1 %v274_v29  ;;  %v257_v44 = vld [vmem:[#allocation8 + $0x80] sm:$0xff]  ;;  %v258_v45 = vld [vmem:[#allocation8 + $0x88] sm:$0xff]  ;;  %v259_v46 = vld [vmem:[#allocation8 + $0x90] sm:$0xff] }
  0x44   :  { %404 = vmatpush.msra.mxu2 %v275_v30  ;;  %445 = vmatpush.msra.mxu3 %v276_v31  ;;  %v260_v47 = vld [vmem:[#allocation8 + $0x98] sm:$0xff]  ;;  %v253_v48 = vld [vmem:[#allocation8 + $0x60] sm:$0xff]  ;;  %v254_v49 = vld [vmem:[#allocation8 + $0x68] sm:$0xff] }
  0x45   :  { %323 = vmatpush.msra.mxu0 %v269_v32  ;;  %364 = vmatpush.msra.mxu1 %v270_v33  ;;  %v255_v50 = vld [vmem:[#allocation8 + $0x70] sm:$0xff]  ;;  %v256_v51 = vld [vmem:[#allocation8 + $0x78] sm:$0xff]  ;;  %v249_v52 = vld [vmem:[#allocation8 + $0x40] sm:$0xff] }
  0x46   :  { %405 = vmatpush.msra.mxu2 %v271_v34  ;;  %446 = vmatpush.msra.mxu3 %v272_v35  ;;  %v250_v53 = vld [vmem:[#allocation8 + $0x48] sm:$0xff]  ;;  %v251_v54 = vld [vmem:[#allocation8 + $0x50] sm:$0xff]  ;;  %v252_v55 = vld [vmem:[#allocation8 + $0x58] sm:$0xff] }
  0x47   :  { %324 = vmatpush.msra.mxu0 %v265_v36  ;;  %365 = vmatpush.msra.mxu1 %v266_v37  ;;  %v245_v56 = vld [vmem:[#allocation8 + $0x20] sm:$0xff]  ;;  %v246_v57 = vld [vmem:[#allocation8 + $0x28] sm:$0xff]  ;;  %v247_v58 = vld [vmem:[#allocation8 + $0x30] sm:$0xff] }
  0x48   :  { %406 = vmatpush.msra.mxu2 %v267_v38  ;;  %447 = vmatpush.msra.mxu3 %v268_v39  ;;  %v248_v59 = vld [vmem:[#allocation8 + $0x38] sm:$0xff]  ;;  %v241_v60 = vld [vmem:[#allocation8] sm:$0xff]  ;;  %v242_v61 = vld [vmem:[#allocation8 + $0x8] sm:$0xff] }
  0x49   :  { %325 = vmatpush.msra.mxu0 %v261_v40  ;;  %366 = vmatpush.msra.mxu1 %v262_v41  ;;  %v243_v62 = vld [vmem:[#allocation8 + $0x10] sm:$0xff]  ;;  %v244_v63 = vld [vmem:[#allocation8 + $0x18] sm:$0xff]  ;;  %v233_v0 = vld [vmem:[#allocation5] sm:$0xff] }
  0x4a   :  { %407 = vmatpush.msra.mxu2 %v263_v42  ;;  %448 = vmatpush.msra.mxu3 %v264_v43  ;;  %v3087_v1 = vld [vmem:[#allocation10 + $0x1e0] sm:$0xff]  ;;  %v3089_v2 = vld [vmem:[#allocation10 + $0x1e8] sm:$0xff]  ;;  %v3091_v3 = vld [vmem:[#allocation10 + $0x1f8] sm:$0xff] }
  0x4b   :  { %326 = vmatpush.msra.mxu0 %v257_v44  ;;  %367 = vmatpush.msra.mxu1 %v258_v45  ;;  %v3093_v4 = vld [vmem:[#allocation10 + $0x1f0] sm:$0xff]  ;;  %v3095_v5 = vld [vmem:[#allocation10 + $0x1c0] sm:$0xff]  ;;  %v3097_v6 = vld [vmem:[#allocation10 + $0x1c8] sm:$0xff] }
  0x4c   :  { %408 = vmatpush.msra.mxu2 %v259_v46  ;;  %449 = vmatpush.msra.mxu3 %v260_v47  ;;  %v3101_v7 = vld [vmem:[#allocation10 + $0x1d8] sm:$0xff]  ;;  %v3103_v8 = vld [vmem:[#allocation10 + $0x1d0] sm:$0xff]  ;;  %v3106_v9 = vld [vmem:[#allocation10 + $0x1a0] sm:$0xff] }
  0x4d   :  { %327 = vmatpush.msra.mxu0 %v253_v48  ;;  %368 = vmatpush.msra.mxu1 %v254_v49  ;;  %v3108_v10 = vld [vmem:[#allocation10 + $0x1a8] sm:$0xff]  ;;  %v3113_v11 = vld [vmem:[#allocation10 + $0x1b8] sm:$0xff]  ;;  %v3115_v12 = vld [vmem:[#allocation10 + $0x1b0] sm:$0xff] }
  0x4e   :  { %409 = vmatpush.msra.mxu2 %v255_v50  ;;  %450 = vmatpush.msra.mxu3 %v256_v51  ;;  %v234_v13 = vld [vmem:[#allocation5 + $0x8] sm:$0xff]  ;;  %v3121_v14 = vld [vmem:[#allocation10 + $0x180] sm:$0xff]  ;;  %v3127_v16 = vld [vmem:[#allocation10 + $0x198] sm:$0xff] }
  0x4f   :  { %328 = vmatpush.msra.mxu0 %v249_v52  ;;  %369 = vmatpush.msra.mxu1 %v250_v53  ;;  %v3123_v15 = vld [vmem:[#allocation10 + $0x188] sm:$0xff]  ;;  %v3129_v17 = vld [vmem:[#allocation10 + $0x190] sm:$0xff]  ;;  %v3131_v18 = vld [vmem:[#allocation10 + $0x160] sm:$0xff] }
  0x50   :  { %410 = vmatpush.msra.mxu2 %v251_v54  ;;  %451 = vmatpush.msra.mxu3 %v252_v55  ;;  %v3133_v19 = vld [vmem:[#allocation10 + $0x168] sm:$0xff]  ;;  %v3137_v20 = vld [vmem:[#allocation10 + $0x178] sm:$0xff]  ;;  %v3139_v21 = vld [vmem:[#allocation10 + $0x170] sm:$0xff] }
  0x51   :  { %329 = vmatpush.msra.mxu0 %v245_v56  ;;  %370 = vmatpush.msra.mxu1 %v246_v57  ;;  %v3142_v22 = vld [vmem:[#allocation10 + $0x140] sm:$0xff]  ;;  %v3144_v23 = vld [vmem:[#allocation10 + $0x148] sm:$0xff]  ;;  %v3149_v24 = vld [vmem:[#allocation10 + $0x158] sm:$0xff] }
  0x52   :  { %411 = vmatpush.msra.mxu2 %v247_v58  ;;  %452 = vmatpush.msra.mxu3 %v248_v59  ;;  %v3151_v25 = vld [vmem:[#allocation10 + $0x150] sm:$0xff]  ;;  %v3157_v27 = vld [vmem:[#allocation10 + $0x120] sm:$0xff]  ;;  %v3159_v28 = vld [vmem:[#allocation10 + $0x128] sm:$0xff] }
  0x53   :  { %330 = vmatpush.msra.mxu0 %v241_v60  ;;  %371 = vmatpush.msra.mxu1 %v242_v61  ;;  %v235_v26 = vld [vmem:[#allocation5 + $0x10] sm:$0xff]  ;;  %v3163_v29 = vld [vmem:[#allocation10 + $0x138] sm:$0xff]  ;;  %v3167_v31 = vld [vmem:[#allocation10 + $0x100] sm:$0xff] }
  0x54   :  { %412 = vmatpush.msra.mxu2 %v243_v62  ;;  %453 = vmatpush.msra.mxu3 %v244_v63  ;;  %v3165_v30 = vld [vmem:[#allocation10 + $0x130] sm:$0xff]  ;;  %v3169_v32 = vld [vmem:[#allocation10 + $0x108] sm:$0xff]  ;;  %v3173_v33 = vld [vmem:[#allocation10 + $0x118] sm:$0xff] }
  0x55   :  { %331 = vmatmul.f32.vlgmr.msra.gmra.mxu0 %v233_v0  ;;  %372 = vmatmul.f32.vlgmr.msra.gmra.mxu1 %v233_v0  ;;  %v3175_v34 = vld [vmem:[#allocation10 + $0x110] sm:$0xff]  ;;  %v3178_v35 = vld [vmem:[#allocation10 + $0xe0] sm:$0xff]  ;;  %v3180_v36 = vld [vmem:[#allocation10 + $0xe8] sm:$0xff] }
  0x56   :  { %413 = vmatmul.f32.vlgmr.msra.gmra.mxu2 %v233_v0  ;;  %454 = vmatmul.f32.vlgmr.msra.gmra.mxu3 %v233_v0  ;;  %v3185_v37 = vld [vmem:[#allocation10 + $0xf8] sm:$0xff]  ;;  %v3187_v38 = vld [vmem:[#allocation10 + $0xf0] sm:$0xff]  ;;  %v3193_v40 = vld [vmem:[#allocation10 + $0xc0] sm:$0xff] }
  0x57   :  { %588 = vmatpush.msrb.mxu0 %v3087_v1  ;;  %608 = vmatpush.msrb.mxu1 %v3089_v2  ;;  %v236_v39 = vld [vmem:[#allocation5 + $0x18] sm:$0xff]  ;;  %v3195_v41 = vld [vmem:[#allocation10 + $0xc8] sm:$0xff]  ;;  %v3201_v43 = vld [vmem:[#allocation10 + $0xd0] sm:$0xff] }
  0x58   :  { %648 = vmatpush.msrb.mxu3 %v3091_v3  ;;  %628 = vmatpush.msrb.mxu2 %v3093_v4  ;;  %v3199_v42 = vld [vmem:[#allocation10 + $0xd8] sm:$0xff]  ;;  %4121 = vst [vmem:[#allocation35_spill] sm:$0xff] %v3201_v43  ;;  %v3203_v44 = vld [vmem:[#allocation10 + $0xa0] sm:$0xff]  ;;  %v3205_v45 = vld [vmem:[#allocation10 + $0xa8] sm:$0xff] }
  0x59   :  { %589 = vmatpush.msrb.mxu0 %v3095_v5  ;;  %609 = vmatpush.msrb.mxu1 %v3097_v6  ;;  %4120 = vst [vmem:[#allocation34_spill] sm:$0xff] %v3199_v42  ;;  %v3209_v46 = vld [vmem:[#allocation10 + $0xb8] sm:$0xff]  ;;  %v3211_v47 = vld [vmem:[#allocation10 + $0xb0] sm:$0xff]  ;;  %v3214_v48 = vld [vmem:[#allocation10 + $0x80] sm:$0xff] }
  0x5a   :  { %649 = vmatpush.msrb.mxu3 %v3101_v7  ;;  %629 = vmatpush.msrb.mxu2 %v3103_v8  ;;  %4122 = vst [vmem:[#allocation36_spill] sm:$0xff] %v3203_v44  ;;  %v3216_v49 = vld [vmem:[#allocation10 + $0x88] sm:$0xff]  ;;  %v3221_v50 = vld [vmem:[#allocation10 + $0x98] sm:$0xff]  ;;  %v3223_v51 = vld [vmem:[#allocation10 + $0x90] sm:$0xff] }
  0x5b   :  { %590 = vmatpush.msrb.mxu0 %v3106_v9  ;;  %610 = vmatpush.msrb.mxu1 %v3108_v10  ;;  %4123 = vst [vmem:[#allocation37_spill] sm:$0xff] %v3205_v45  ;;  %v237_v52 = vld [vmem:[#allocation5 + $0x20] sm:$0xff]  ;;  %v3231_v54 = vld [vmem:[#allocation10 + $0x68] sm:$0xff]  ;;  %v3235_v55 = vld [vmem:[#allocation10 + $0x78] sm:$0xff] }
  0x5c   :  { %650 = vmatpush.msrb.mxu3 %v3113_v11  ;;  %630 = vmatpush.msrb.mxu2 %v3115_v12  ;;  %4124 = vst [vmem:[#allocation38_spill] sm:$0xff] %v3209_v46  ;;  %v3229_v53 = vld [vmem:[#allocation10 + $0x60] sm:$0xff]  ;;  %v3237_v56 = vld [vmem:[#allocation10 + $0x70] sm:$0xff]  ;;  %v3241_v58 = vld [vmem:[#allocation10 + $0x48] sm:$0xff] }
  0x5d   :  { %334 = vmatmul.f32.gmra.mxu0 %v234_v13  ;;  %375 = vmatmul.f32.gmra.mxu1 %v234_v13  ;;  %4125 = vst [vmem:[#allocation39_spill] sm:$0xff] %v3211_v47  ;;  %v3239_v57 = vld [vmem:[#allocation10 + $0x40] sm:$0xff]  ;;  %v3245_v59 = vld [vmem:[#allocation10 + $0x58] sm:$0xff]  ;;  %v3247_v60 = vld [vmem:[#allocation10 + $0x50] sm:$0xff] }
  0x5e   :  { %416 = vmatmul.f32.gmra.mxu2 %v234_v13  ;;  %457 = vmatmul.f32.gmra.mxu3 %v234_v13  ;;  %4126 = vst [vmem:[#allocation40_spill] sm:$0xff] %v3214_v48  ;;  %v3250_v61 = vld [vmem:[#allocation10 + $0x20] sm:$0xff]  ;;  %v3252_v62 = vld [vmem:[#allocation10 + $0x28] sm:$0xff]  ;;  %v3257_v63 = vld [vmem:[#allocation10 + $0x30] sm:$0xff] }
  0x5f   :  { %591 = vmatpush.msrb.mxu0 %v3121_v14  ;;  %611 = vmatpush.msrb.mxu1 %v3123_v15  ;;  %4127 = vst [vmem:[#allocation41_spill] sm:$0xff] %v3216_v49  ;;  %v3259_v0 = vld [vmem:[#allocation10 + $0x38] sm:$0xff]  ;;  %v238_v13 = vld [vmem:[#allocation5 + $0x28] sm:$0xff] }
  0x60   :  { %651 = vmatpush.msrb.mxu3 %v3127_v16  ;;  %631 = vmatpush.msrb.mxu2 %v3129_v17  ;;  %4128 = vst [vmem:[#allocation42_spill] sm:$0xff] %v3221_v50 }
  0x61   :  { %592 = vmatpush.msrb.mxu0 %v3131_v18  ;;  %612 = vmatpush.msrb.mxu1 %v3133_v19  ;;  %4129 = vst [vmem:[#allocation43_spill] sm:$0xff] %v3223_v51 }
  0x62   :  { %652 = vmatpush.msrb.mxu3 %v3137_v20  ;;  %632 = vmatpush.msrb.mxu2 %v3139_v21  ;;  %4130 = vst [vmem:[#allocation44_spill] sm:$0xff] %v3229_v53 }
  0x63   :  { %593 = vmatpush.msrb.mxu0 %v3142_v22  ;;  %613 = vmatpush.msrb.mxu1 %v3144_v23  ;;  %4131 = vst [vmem:[#allocation45_spill] sm:$0xff] %v3231_v54 }
  0x64   :  { %653 = vmatpush.msrb.mxu3 %v3149_v24  ;;  %633 = vmatpush.msrb.mxu2 %v3151_v25  ;;  %4132 = vst [vmem:[#allocation46_spill] sm:$0xff] %v3235_v55 }
  0x65   :  { %337 = vmatmul.f32.gmra.mxu0 %v235_v26  ;;  %378 = vmatmul.f32.gmra.mxu1 %v235_v26  ;;  %4133 = vst [vmem:[#allocation47_spill] sm:$0xff] %v3237_v56 }
  0x66   :  { %419 = vmatmul.f32.gmra.mxu2 %v235_v26  ;;  %460 = vmatmul.f32.gmra.mxu3 %v235_v26  ;;  %4134 = vst [vmem:[#allocation48_spill] sm:$0xff] %v3239_v57  ;;  %v3265_v26 = vld [vmem:[#allocation10] sm:$0xff] }
  0x67   :  { %594 = vmatpush.msrb.mxu0 %v3157_v27  ;;  %614 = vmatpush.msrb.mxu1 %v3159_v28  ;;  %4135 = vst [vmem:[#allocation49_spill] sm:$0xff] %v3241_v58 }
  0x68   :  { %654 = vmatpush.msrb.mxu3 %v3163_v29  ;;  %634 = vmatpush.msrb.mxu2 %v3165_v30  ;;  %4136 = vst [vmem:[#allocation50_spill] sm:$0xff] %v3245_v59 }
  0x69   :  { %595 = vmatpush.msrb.mxu0 %v3167_v31  ;;  %615 = vmatpush.msrb.mxu1 %v3169_v32  ;;  %4137 = vst [vmem:[#allocation51_spill] sm:$0xff] %v3247_v60 }
  0x6a   :  { %655 = vmatpush.msrb.mxu3 %v3173_v33  ;;  %635 = vmatpush.msrb.mxu2 %v3175_v34  ;;  %4138 = vst [vmem:[#allocation52_spill] sm:$0xff] %v3250_v61 }
  0x6b   :  { %596 = vmatpush.msrb.mxu0 %v3178_v35  ;;  %616 = vmatpush.msrb.mxu1 %v3180_v36  ;;  %4139 = vst [vmem:[#allocation53_spill] sm:$0xff] %v3252_v62 }
  0x6c   :  { %656 = vmatpush.msrb.mxu3 %v3185_v37  ;;  %636 = vmatpush.msrb.mxu2 %v3187_v38  ;;  %4140 = vst [vmem:[#allocation54_spill] sm:$0xff] %v3257_v63 }
  0x6d   :  { %340 = vmatmul.f32.gmra.mxu0 %v236_v39  ;;  %381 = vmatmul.f32.gmra.mxu1 %v236_v39  ;;  %4141 = vst [vmem:[#allocation55_spill] sm:$0xff] %v3259_v0 }
  0x6e   :  { %422 = vmatmul.f32.gmra.mxu2 %v236_v39  ;;  %463 = vmatmul.f32.gmra.mxu3 %v236_v39  ;;  %4142 = vst [vmem:[#allocation56_spill] sm:$0xff] %v3265_v26  ;;  %v3267_v39 = vld [vmem:[#allocation10 + $0x8] sm:$0xff] }
  0x6f   :  { %597 = vmatpush.msrb.mxu0 %v3193_v40  ;;  %617 = vmatpush.msrb.mxu1 %v3195_v41  ;;  %4143 = vst [vmem:[#allocation57_spill] sm:$0xff] %v3267_v39 }
  0x70   :  { %657 = vmatpush.msrb.mxu3 %v3199_v42  ;;  %637 = vmatpush.msrb.mxu2 %v3201_v43 }
  0x71   :  { %598 = vmatpush.msrb.mxu0 %v3203_v44  ;;  %618 = vmatpush.msrb.mxu1 %v3205_v45 }
  0x72   :  { %658 = vmatpush.msrb.mxu3 %v3209_v46  ;;  %638 = vmatpush.msrb.mxu2 %v3211_v47 }
  0x73   :  { %599 = vmatpush.msrb.mxu0 %v3214_v48  ;;  %619 = vmatpush.msrb.mxu1 %v3216_v49 }
  0x74   :  { %659 = vmatpush.msrb.mxu3 %v3221_v50  ;;  %639 = vmatpush.msrb.mxu2 %v3223_v51 }
  0x75   :  { %343 = vmatmul.f32.gmra.mxu0 %v237_v52  ;;  %384 = vmatmul.f32.gmra.mxu1 %v237_v52 }
  0x76   :  { %425 = vmatmul.f32.gmra.mxu2 %v237_v52  ;;  %466 = vmatmul.f32.gmra.mxu3 %v237_v52  ;;  %v3271_v52 = vld [vmem:[#allocation10 + $0x10] sm:$0xff] }
  0x77   :  { %600 = vmatpush.msrb.mxu0 %v3229_v53  ;;  %620 = vmatpush.msrb.mxu1 %v3231_v54  ;;  %4144 = vst [vmem:[#allocation58_spill] sm:$0xff] %v3271_v52 }
  0x78   :  { %660 = vmatpush.msrb.mxu3 %v3235_v55  ;;  %640 = vmatpush.msrb.mxu2 %v3237_v56 }
  0x79   :  { %601 = vmatpush.msrb.mxu0 %v3239_v57  ;;  %621 = vmatpush.msrb.mxu1 %v3241_v58  ;;  %v3273_v58 = vld [vmem:[#allocation10 + $0x18] sm:$0xff] }
  0x7a   :  { %661 = vmatpush.msrb.mxu3 %v3245_v59  ;;  %641 = vmatpush.msrb.mxu2 %v3247_v60  ;;  %4145 = vst [vmem:[#allocation59_spill] sm:$0xff] %v3273_v58 }
  0x7b   :  { %602 = vmatpush.msrb.mxu0 %v3250_v61  ;;  %622 = vmatpush.msrb.mxu1 %v3252_v62 }
  0x7c   :  { %642 = vmatpush.msrb.mxu2 %v3257_v63  ;;  %662 = vmatpush.msrb.mxu3 %v3259_v0  ;;  %v239_v0 = vld [vmem:[#allocation5 + $0x30] sm:$0xff] }
  0x7d   :  { %346 = vmatmul.f32.gmra.mxu0 %v238_v13  ;;  %387 = vmatmul.f32.gmra.mxu1 %v238_v13 }
  0x7e   :  { %428 = vmatmul.f32.gmra.mxu2 %v238_v13  ;;  %469 = vmatmul.f32.gmra.mxu3 %v238_v13  ;;  %v240_v13 = vld [vmem:[#allocation5 + $0x38] sm:$0xff] }
  0x7f   :  { %603 = vmatpush.msrb.mxu0 %v3265_v26  ;;  %623 = vmatpush.msrb.mxu1 %v3267_v39 }
  0x80   :  { %643 = vmatpush.msrb.mxu2 %v3271_v52  ;;  %663 = vmatpush.msrb.mxu3 %v3273_v58 }
  0x81   :  { %748 = vmatpush.msra.mxu0 %v3087_v1  ;;  %768 = vmatpush.msra.mxu1 %v3089_v2 }
  0x82   :  { %788 = vmatpush.msra.mxu2 %v3093_v4  ;;  %808 = vmatpush.msra.mxu3 %v3091_v3 }
  0x83   :  { %749 = vmatpush.msra.mxu0 %v3095_v5  ;;  %769 = vmatpush.msra.mxu1 %v3097_v6 }
  0x84   :  { %789 = vmatpush.msra.mxu2 %v3103_v8  ;;  %809 = vmatpush.msra.mxu3 %v3101_v7 }
  0x85   :  { %349 = vmatmul.f32.gmra.mxu0 %v239_v0  ;;  %390 = vmatmul.f32.gmra.mxu1 %v239_v0 }
  0x86   :  { %431 = vmatmul.f32.gmra.mxu2 %v239_v0  ;;  %472 = vmatmul.f32.gmra.mxu3 %v239_v0  ;;  %v229_v0 = vld [vmem:[#allocation17] sm:$0xff] }
  0x87   :  { %750 = vmatpush.msra.mxu0 %v3106_v9  ;;  %770 = vmatpush.msra.mxu1 %v3108_v10 }
  0x88   :  { %790 = vmatpush.msra.mxu2 %v3115_v12  ;;  %810 = vmatpush.msra.mxu3 %v3113_v11 }
  0x89   :  { %751 = vmatpush.msra.mxu0 %v3121_v14  ;;  %771 = vmatpush.msra.mxu1 %v3123_v15 }
  0x8a   :  { %791 = vmatpush.msra.mxu2 %v3129_v17  ;;  %811 = vmatpush.msra.mxu3 %v3127_v16 }
  0x8b   :  { %752 = vmatpush.msra.mxu0 %v3131_v18  ;;  %772 = vmatpush.msra.mxu1 %v3133_v19 }
  0x8c   :  { %792 = vmatpush.msra.mxu2 %v3139_v21  ;;  %812 = vmatpush.msra.mxu3 %v3137_v20 }
  0x8d   :  { %352 = vmatmul.f32.gmra.mxu0 %v240_v13  ;;  %393 = vmatmul.f32.gmra.mxu1 %v240_v13 }
  0x8e   :  { %434 = vmatmul.f32.gmra.mxu2 %v240_v13  ;;  %475 = vmatmul.f32.gmra.mxu3 %v240_v13  ;;  %v4146_v13 = vld [vmem:[#allocation49_spill] sm:$0xff] }
  0x8f   :  { %753 = vmatpush.msra.mxu0 %v3142_v22  ;;  %773 = vmatpush.msra.mxu1 %v3144_v23 }
  0x90   :  { %793 = vmatpush.msra.mxu2 %v3151_v25  ;;  %813 = vmatpush.msra.mxu3 %v3149_v24 }
  0x91   :  { %754 = vmatpush.msra.mxu0 %v3157_v27  ;;  %774 = vmatpush.msra.mxu1 %v3159_v28 }
  0x92   :  { %794 = vmatpush.msra.mxu2 %v3165_v30  ;;  %814 = vmatpush.msra.mxu3 %v3163_v29 }
  0x93   :  { %755 = vmatpush.msra.mxu0 %v3167_v31  ;;  %775 = vmatpush.msra.mxu1 %v3169_v32 }
  0x94   :  { %795 = vmatpush.msra.mxu2 %v3175_v34  ;;  %815 = vmatpush.msra.mxu3 %v3173_v33 }
  0x95   :  { %604 = vmatmul.f32.vlgmr.msrb.gmra.mxu0 %v229_v0  ;;  %624 = vmatmul.f32.vlgmr.msrb.gmra.mxu1 %v229_v0 }
  0x96   :  { %644 = vmatmul.f32.vlgmr.msrb.gmra.mxu2 %v229_v0  ;;  %664 = vmatmul.f32.vlgmr.msrb.gmra.mxu3 %v229_v0  ;;  %v4147_v0 = vld [vmem:[#allocation55_spill] sm:$0xff] }
  0x97   :  { %756 = vmatpush.msra.mxu0 %v3178_v35  ;;  %776 = vmatpush.msra.mxu1 %v3180_v36 }
  0x98   :  { %796 = vmatpush.msra.mxu2 %v3187_v38  ;;  %816 = vmatpush.msra.mxu3 %v3185_v37 }
  0x99   :  { %757 = vmatpush.msra.mxu0 %v3193_v40  ;;  %777 = vmatpush.msra.mxu1 %v3195_v41 }
  0x9a   :  { %797 = vmatpush.msra.mxu2 %v3201_v43  ;;  %817 = vmatpush.msra.mxu3 %v3199_v42 }
  0x9b   :  { %758 = vmatpush.msra.mxu0 %v3203_v44  ;;  %778 = vmatpush.msra.mxu1 %v3205_v45 }
  0x9c   :  { %798 = vmatpush.msra.mxu2 %v3211_v47  ;;  %818 = vmatpush.msra.mxu3 %v3209_v46 }
  0x9d   :  { %759 = vmatpush.msra.mxu0 %v3214_v48  ;;  %779 = vmatpush.msra.mxu1 %v3216_v49 }
  0x9e   :  { %799 = vmatpush.msra.mxu2 %v3223_v51  ;;  %819 = vmatpush.msra.mxu3 %v3221_v50 }
  0x9f   :  { %760 = vmatpush.msra.mxu0 %v3229_v53  ;;  %780 = vmatpush.msra.mxu1 %v3231_v54 }
  0xa0   :  { %800 = vmatpush.msra.mxu2 %v3237_v56  ;;  %820 = vmatpush.msra.mxu3 %v3235_v55 }
  0xa1   :  { %761 = vmatpush.msra.mxu0 %v3239_v57  ;;  %781 = vmatpush.msra.mxu1 %v4146_v13 }
  0xa2   :  { %801 = vmatpush.msra.mxu2 %v3247_v60  ;;  %821 = vmatpush.msra.mxu3 %v3245_v59 }
  0xa3   :  { %762 = vmatpush.msra.mxu0 %v3250_v61  ;;  %782 = vmatpush.msra.mxu1 %v3252_v62 }
  0xa4   :  { %802 = vmatpush.msra.mxu2 %v3257_v63  ;;  %822 = vmatpush.msra.mxu3 %v4147_v0 }
  0xa5   :  { %763 = vmatpush.msra.mxu0 %v3265_v26  ;;  %783 = vmatpush.msra.mxu1 %v3267_v39 }
  0xa6   :  { %803 = vmatpush.msra.mxu2 %v3271_v52  ;;  %823 = vmatpush.msra.mxu3 %v3273_v58 }
  0xa7   :  { %908 = vmatpush.msrb.mxu0 %v3087_v1  ;;  %928 = vmatpush.msrb.mxu1 %v3089_v2 }
  0xa8   :  { %948 = vmatpush.msrb.mxu2 %v3093_v4  ;;  %968 = vmatpush.msrb.mxu3 %v3091_v3 }
  0xa9   :  { %909 = vmatpush.msrb.mxu0 %v3095_v5  ;;  %929 = vmatpush.msrb.mxu1 %v3097_v6 }
  0xaa   :  { %949 = vmatpush.msrb.mxu2 %v3103_v8  ;;  %969 = vmatpush.msrb.mxu3 %v3101_v7 }
  0xab   :  { %910 = vmatpush.msrb.mxu0 %v3106_v9  ;;  %930 = vmatpush.msrb.mxu1 %v3108_v10 }
  0xac   :  { %950 = vmatpush.msrb.mxu2 %v3115_v12  ;;  %970 = vmatpush.msrb.mxu3 %v3113_v11 }
  0xad   :  { %911 = vmatpush.msrb.mxu0 %v3121_v14  ;;  %931 = vmatpush.msrb.mxu1 %v3123_v15 }
  0xae   :  { %951 = vmatpush.msrb.mxu2 %v3129_v17  ;;  %971 = vmatpush.msrb.mxu3 %v3127_v16 }
  0xaf   :  { %912 = vmatpush.msrb.mxu0 %v3131_v18  ;;  %932 = vmatpush.msrb.mxu1 %v3133_v19 }
  0xb0   :  { %952 = vmatpush.msrb.mxu2 %v3139_v21  ;;  %972 = vmatpush.msrb.mxu3 %v3137_v20 }
  0xb1   :  { %913 = vmatpush.msrb.mxu0 %v3142_v22  ;;  %933 = vmatpush.msrb.mxu1 %v3144_v23 }
  0xb2   :  { %953 = vmatpush.msrb.mxu2 %v3151_v25  ;;  %973 = vmatpush.msrb.mxu3 %v3149_v24 }
  0xb3   :  { %914 = vmatpush.msrb.mxu0 %v3157_v27  ;;  %934 = vmatpush.msrb.mxu1 %v3159_v28 }
  0xb4   :  { %954 = vmatpush.msrb.mxu2 %v3165_v30  ;;  %974 = vmatpush.msrb.mxu3 %v3163_v29 }
  0xb5   :  { %915 = vmatpush.msrb.mxu0 %v3167_v31  ;;  %935 = vmatpush.msrb.mxu1 %v3169_v32 }
  0xb6   :  { %955 = vmatpush.msrb.mxu2 %v3175_v34  ;;  %975 = vmatpush.msrb.mxu3 %v3173_v33 }
  0xb7   :  { %916 = vmatpush.msrb.mxu0 %v3178_v35  ;;  %936 = vmatpush.msrb.mxu1 %v3180_v36 }
  0xb8   :  { %956 = vmatpush.msrb.mxu2 %v3187_v38  ;;  %976 = vmatpush.msrb.mxu3 %v3185_v37 }
  0xb9   :  { %917 = vmatpush.msrb.mxu0 %v3193_v40  ;;  %937 = vmatpush.msrb.mxu1 %v3195_v41 }
  0xba   :  { %957 = vmatpush.msrb.mxu2 %v3201_v43  ;;  %977 = vmatpush.msrb.mxu3 %v3199_v42 }
  0xbb   :  { %918 = vmatpush.msrb.mxu0 %v3203_v44  ;;  %938 = vmatpush.msrb.mxu1 %v3205_v45 }
  0xbc   :  { %958 = vmatpush.msrb.mxu2 %v3211_v47  ;;  %978 = vmatpush.msrb.mxu3 %v3209_v46 }
  0xbd   :  { %919 = vmatpush.msrb.mxu0 %v3214_v48  ;;  %939 = vmatpush.msrb.mxu1 %v3216_v49 }
  0xbe   :  { %959 = vmatpush.msrb.mxu2 %v3223_v51  ;;  %979 = vmatpush.msrb.mxu3 %v3221_v50 }
  0xbf   :  { %920 = vmatpush.msrb.mxu0 %v3229_v53  ;;  %940 = vmatpush.msrb.mxu1 %v3231_v54 }
  0xc0   :  { %960 = vmatpush.msrb.mxu2 %v3237_v56  ;;  %980 = vmatpush.msrb.mxu3 %v3235_v55 }
  0xc1   :  { %921 = vmatpush.msrb.mxu0 %v3239_v57  ;;  %941 = vmatpush.msrb.mxu1 %v4146_v13  ;;  %v305_v57 = vld [vmem:[#allocation11] sm:$0xf] }
  0xc2   :  { %961 = vmatpush.msrb.mxu2 %v3247_v60  ;;  %981 = vmatpush.msrb.mxu3 %v3245_v59  ;;  %v307_v59 = vperm.slane %v305_v57, 0  ;;  %v308_v55 = vperm.slane %v305_v57, 1 }
  0xc3   :  { %922 = vmatpush.msrb.mxu0 %v3250_v61  ;;  %942 = vmatpush.msrb.mxu1 %v3252_v62 }
  0xc4   :  { %962 = vmatpush.msrb.mxu2 %v3257_v63  ;;  %982 = vmatpush.msrb.mxu3 %v4147_v0 }
  0xc5   :  { %923 = vmatpush.msrb.mxu0 %v3265_v26  ;;  %943 = vmatpush.msrb.mxu1 %v3267_v39  ;;  %v3415_v39 = vperm.slane %v305_v57, 2 }
  0xc6   :  { %963 = vmatpush.msrb.mxu2 %v3271_v52  ;;  %983 = vmatpush.msrb.mxu3 %v3273_v58  ;;  %v310_v52 = vperm.slane %v305_v57, 3 }
  0xd2   :  { %v332_v13 = vpop.f32.mrf.mxu0  ;;  %v373_v60 = vpop.f32.mrf.mxu1 }
  0xd9   :  { %v3407_v61 = vpop.f32.mrf.mxu2  ;;  %v3409_v62 = vpop.f32.mrf.mxu3 }
  0xda   :  { %v335_v63 = vpop.f32.mrf.mxu0  ;;  %v376_v56 = vpop.f32.mrf.mxu1 }
  0xdb   :  { %v3411_v0 = vadd.f32 %v335_v63, %v307_v59  ;;  %v3413_v26 = vadd.f32 %v376_v56, %v308_v55 }
  0xdd   :  { %4148 = vst [vmem:[#allocation60_spill] sm:$0xff] %v3411_v0 }
  0xde   :  { %4149 = vst [vmem:[#allocation61_spill] sm:$0xff] %v3413_v26 }
  0xe1   :  { %v417_v54 = vpop.f32.mrf.mxu2  ;;  %v458_v58 = vpop.f32.mrf.mxu3 }
  0xe2   :  { %v3418_v53 = vadd.f32 %v417_v54, %v3415_v39  ;;  %v3420_v50 = vadd.f32 %v458_v58, %v310_v52  ;;  %v338_v51 = vpop.f32.mrf.mxu0  ;;  %v379_v49 = vpop.f32.mrf.mxu1 }
  0xe3   :  { %v3422_v48 = vadd.f32 %v338_v51, %v307_v59  ;;  %v3424_v46 = vadd.f32 %v379_v49, %v308_v55 }
  0xe4   :  { %4150 = vst [vmem:[#allocation62_spill] sm:$0xff] %v3418_v53 }
  0xe5   :  { %4151 = vst [vmem:[#allocation63_spill] sm:$0xff] %v3420_v50 }
  0xe6   :  { %4152 = vst [vmem:[#allocation64_spill] sm:$0xff] %v3422_v48 }
  0xe7   :  { %4153 = vst [vmem:[#allocation65_spill] sm:$0xff] %v3424_v46 }
  0xe9   :  { %v420_v63 = vpop.f32.mrf.mxu2  ;;  %v461_v0 = vpop.f32.mrf.mxu3 }
  0xea   :  { %v3427_v56 = vadd.f32 %v420_v63, %v3415_v39  ;;  %v3429_v26 = vadd.f32 %v461_v0, %v310_v52  ;;  %v341_v57 = vpop.f32.mrf.mxu0  ;;  %v382_v47 = vpop.f32.mrf.mxu1 }
  0xeb   :  { %v3431_v45 = vadd.f32 %v341_v57, %v307_v59  ;;  %v3433_v54 = vadd.f32 %v382_v47, %v308_v55 }
  0xec   :  { %4154 = vst [vmem:[#allocation66_spill] sm:$0xff] %v3427_v56 }
  0xed   :  { %4155 = vst [vmem:[#allocation67_spill] sm:$0xff] %v3429_v26 }
  0xee   :  { %4156 = vst [vmem:[#allocation68_spill] sm:$0xff] %v3431_v45 }
  0xef   :  { %4157 = vst [vmem:[#allocation69_spill] sm:$0xff] %v3433_v54 }
  0xf1   :  { %v423_v58 = vpop.f32.mrf.mxu2  ;;  %v464_v53 = vpop.f32.mrf.mxu3 }
  0xf2   :  { %v3436_v51 = vadd.f32 %v423_v58, %v3415_v39  ;;  %v3438_v49 = vadd.f32 %v464_v53, %v310_v52  ;;  %v344_v46 = vpop.f32.mrf.mxu0  ;;  %v385_v48 = vpop.f32.mrf.mxu1 }
  0xf3   :  { %v3440_v50 = vadd.f32 %v344_v46, %v307_v59  ;;  %v3442_v63 = vadd.f32 %v385_v48, %v308_v55 }
  0xf4   :  { %4158 = vst [vmem:[#allocation70_spill] sm:$0xff] %v3436_v51 }
  0xf5   :  { %4159 = vst [vmem:[#allocation71_spill] sm:$0xff] %v3438_v49 }
  0xf6   :  { %4160 = vst [vmem:[#allocation72_spill] sm:$0xff] %v3440_v50 }
  0xf7   :  { %4161 = vst [vmem:[#allocation73_spill] sm:$0xff] %v3442_v63 }
  0xf9   :  { %v426_v0 = vpop.f32.mrf.mxu2  ;;  %v467_v56 = vpop.f32.mrf.mxu3 }
  0xfa   :  { %v3445_v57 = vadd.f32 %v426_v0, %v3415_v39  ;;  %v3447_v47 = vadd.f32 %v467_v56, %v310_v52  ;;  %v347_v54 = vpop.f32.mrf.mxu0  ;;  %v388_v45 = vpop.f32.mrf.mxu1 }
  0xfb   :  { %v3449_v26 = vadd.f32 %v347_v54, %v307_v59  ;;  %v3451_v58 = vadd.f32 %v388_v45, %v308_v55 }
  0xfc   :  { %4162 = vst [vmem:[#allocation74_spill] sm:$0xff] %v3445_v57 }
  0xfd   :  { %4163 = vst [vmem:[#allocation75_spill] sm:$0xff] %v3447_v47 }
  0xfe   :  { %4164 = vst [vmem:[#allocation76_spill] sm:$0xff] %v3449_v26 }
  0xff   :  { %4165 = vst [vmem:[#allocation77_spill] sm:$0xff] %v3451_v58 }
 0x101   :  { %v429_v53 = vpop.f32.mrf.mxu2  ;;  %v470_v51 = vpop.f32.mrf.mxu3 }
 0x102   :  { %v3454_v46 = vadd.f32 %v429_v53, %v3415_v39  ;;  %v3456_v48 = vadd.f32 %v470_v51, %v310_v52  ;;  %v350_v63 = vpop.f32.mrf.mxu0  ;;  %v391_v50 = vpop.f32.mrf.mxu1  ;;  %v333_v51 = vadd.f32 %v332_v13, %v307_v59 }
 0x103   :  { %v3458_v49 = vadd.f32 %v350_v63, %v307_v59  ;;  %v3460_v0 = vadd.f32 %v391_v50, %v308_v55 }
 0x104   :  { %4166 = vst [vmem:[#allocation78_spill] sm:$0xff] %v3454_v46  ;;  %v374_v46 = vadd.f32 %v373_v60, %v308_v55 }
 0x105   :  { %4167 = vst [vmem:[#allocation79_spill] sm:$0xff] %v3456_v48 }
 0x106   :  { %4168 = vst [vmem:[#allocation80_spill] sm:$0xff] %v3458_v49 }
 0x107   :  { %4169 = vst [vmem:[#allocation81_spill] sm:$0xff] %v3460_v0 }
 0x109   :  { %v432_v56 = vpop.f32.mrf.mxu2  ;;  %v473_v57 = vpop.f32.mrf.mxu3 }
 0x10a   :  { %v3463_v54 = vadd.f32 %v432_v56, %v3415_v39  ;;  %v3465_v45 = vadd.f32 %v473_v57, %v310_v52  ;;  %v353_v58 = vpop.f32.mrf.mxu0  ;;  %v394_v26 = vpop.f32.mrf.mxu1 }
 0x10b   :  { %v3467_v47 = vadd.f32 %v353_v58, %v307_v59  ;;  %v3469_v53 = vadd.f32 %v394_v26, %v308_v55  ;;  %v456_v58 = vadd.f32 %v3409_v62, %v310_v52 }
 0x10c   :  { %4170 = vst [vmem:[#allocation82_spill] sm:$0xff] %v3463_v54 }
 0x10d   :  { %4171 = vst [vmem:[#allocation83_spill] sm:$0xff] %v3465_v45 }
 0x10e   :  { %4172 = vst [vmem:[#allocation84_spill] sm:$0xff] %v3467_v47 }
 0x10f   :  { %4173 = vst [vmem:[#allocation85_spill] sm:$0xff] %v3469_v53 }
 0x111   :  { %v435_v48 = vpop.f32.mrf.mxu2  ;;  %v476_v63 = vpop.f32.mrf.mxu3 }
 0x112   :  { %v3472_v50 = vadd.f32 %v435_v48, %v3415_v39  ;;  %v3474_v0 = vadd.f32 %v476_v63, %v310_v52  ;;  %v605_v49 = vpop.f32.mrf.mxu0  ;;  %v625_v56 = vpop.f32.mrf.mxu1 }
 0x113   :  { %v668_v54 = vadd.f32 %v605_v49, %v333_v51  ;;  %v669_v57 = vadd.f32 %v625_v56, %v374_v46  ;;  %v415_v49 = vadd.f32 %v3407_v61, %v3415_v39 }
 0x114   :  { %4174 = vst [vmem:[#allocation86_spill] sm:$0xff] %v3472_v50 }
 0x115   :  { %4175 = vst [vmem:[#allocation87_spill] sm:$0xff] %v3474_v0  ;;  %v2353_v45 = vmul.f32 -1.442695, %v668_v54  ;;  %v2354_v44 = vmul.f32 -1.442695, %v669_v57 }
 0x117   :  { %2398 = vpow2.f32 %v2353_v45 }
 0x118   :  { %2400 = vpow2.f32 %v2354_v44 }
 0x119   :  { %v665_v26 = vpop.f32.mrf.mxu3  ;;  %v645_v63 = vpop.f32.mrf.mxu2 }
 0x11a   :  { %v671_v59 = vadd.f32 %v665_v26, %v456_v58  ;;  %v670_v45 = vadd.f32 %v645_v63, %v415_v49 }
 0x11c   :  { %v2355_v55 = vmul.f32 -1.442695, %v671_v59 }
 0x11d   :  { %v2399_v60 = vpop.eup %2398 }
 0x11e   :  { %v2401_v13 = vpop.eup %2400  ;;  %v675_v53 = vadd.f32 1.0, %v2399_v60  ;;  %2402 = vpow2.f32 %v2355_v55 }
 0x11f   :  { %v694_v48 = vadd.f32 1.0, %v2401_v13 }
 0x120   :  { %2404 = vrcp.f32 %v675_v53  ;;  %v687_v57 = vand.u32 2147483648, %v675_v53  ;;  %v685_v59 = vand.u32 2147483647, %v675_v53  ;;  %vm681_vm2 = vweird.f32 %v675_v53 }
 0x121   :  { %2406 = vrcp.f32 %v694_v48  ;;  %v706_v58 = vand.u32 2147483648, %v694_v48  ;;  %v704_v60 = vand.u32 2147483647, %v694_v48  ;;  %vm700_vm3 = vweird.f32 %v694_v48 }
 0x122   :  { %v688_v39 = vor.u32 1.1754944e-38, %v687_v57  ;;  %vm686_vm6 = vcmp.eq.f32.partialorder %v685_v59, 8.507059e+37 }
 0x123   :  { %v707_v49 = vor.u32 1.1754944e-38, %v706_v58  ;;  %vm705_vm7 = vcmp.eq.f32.partialorder %v704_v60, 8.507059e+37 }
 0x124   :  { %v2403_v50 = vpop.eup %2402 }
 0x125   :  { %v714_v46 = vadd.f32 1.0, %v2403_v50 }
 0x126   :  { %v2405_v54 = vpop.eup %2404 }
 0x127   :  { %v2407_v62 = vpop.eup %2406  ;;  %v677_v44 = vmul.f32 %v2405_v54, %v675_v53  ;;  %2408 = vrcp.f32 %v714_v46  ;;  %vm682_vm0 = vweird.f32 %v2405_v54  ;;  %v726_v57 = vand.u32 2147483648, %v714_v46 }
 0x128   :  { %v696_v52 = vmul.f32 %v2407_v62, %v694_v48  ;;  %2410 = vtanh.f32 %v670_v45  ;;  %vm701_vm1 = vweird.f32 %v2407_v62  ;;  %vm683_vm4 = vmor %vm681_vm2, %vm682_vm0  ;;  %vm720_vm9 = vweird.f32 %v714_v46 }
 0x129   :  { %v678_v51 = vsub.f32 1.0, %v677_v44  ;;  %vm702_vm5 = vmor %vm700_vm3, %vm701_vm1  ;;  %v231_v44 = vld [vmem:[#allocation19] sm:$0xff]  ;;  %v724_v58 = vand.u32 2147483647, %v714_v46  ;;  %v727_v59 = vor.u32 1.1754944e-38, %v726_v57 }
 0x12a   :  { %v697_v56 = vsub.f32 1.0, %v696_v52 }
 0x12b   :  { %v679_v26 = vmul.f32 %v2405_v54, %v678_v51  ;;  %vm725_vm11 = vcmp.eq.f32.partialorder %v724_v58, 8.507059e+37 }
 0x12c   :  { %v698_v55 = vmul.f32 %v2407_v62, %v697_v56 }
 0x12d   :  { %v2409_v13 = vpop.eup %2408  ;;  %v680_v61 = vadd.f32 %v2405_v54, %v679_v26 }
 0x12e   :  { %v699_v50 = vadd.f32 %v2407_v62, %v698_v55  ;;  %v716_v63 = vmul.f32 %v2409_v13, %v714_v46  ;;  %v2411_v45 = vpop.eup %2410  ;;  %vm721_vm8 = vweird.f32 %v2409_v13 }
 0x12f   :  { %v684_v52 = vsel %vm683_vm4, %v2405_v54, %v680_v61  ;;  %vm722_vm10 = vmor %vm720_vm9, %vm721_vm8 }
 0x130   :  { %v689_v51 = vsel %vm686_vm6, %v688_v39, %v684_v52  ;;  %v703_v0 = vsel %vm702_vm5, %v2407_v62, %v699_v50  ;;  %v717_v56 = vsub.f32 1.0, %v716_v63  ;;  %v4205_v50 = vld [vmem:[#allocation62_spill] sm:$0xff] }
 0x131   :  { %v708_v47 = vsel %vm705_vm7, %v707_v49, %v703_v0  ;;  %v731_v42 = vmul.f32 %v2411_v45, %v689_v51 }
 0x132   :  { %v730_v43 = vmul.f32 %v708_v47, %v231_v44  ;;  %v718_v26 = vmul.f32 %v2409_v13, %v717_v56 }
 0x134   :  { %v3479_v53 = vadd.f32 %v731_v42, %v730_v43  ;;  %v719_v48 = vadd.f32 %v2409_v13, %v718_v26 }
 0x136   :  { %2412 = vtanh.f32 %v3479_v53  ;;  %v723_v54 = vsel %vm722_vm10, %v2409_v13, %v719_v48 }
 0x137   :  { %v728_v55 = vsel %vm725_vm11, %v727_v59, %v723_v54 }
 0x13c   :  { %v2413_v62 = vpop.eup %2412 }
 0x13d   :  { %v734_v60 = vmul.f32 %v2413_v62, %v728_v55 }
 0x13f   :  { %764 = vmatmul.f32.vlgmr.msra.gmra.mxu0 %v734_v60  ;;  %784 = vmatmul.f32.vlgmr.msra.gmra.mxu1 %v734_v60 }
 0x140   :  { %804 = vmatmul.f32.vlgmr.msra.gmra.mxu2 %v734_v60  ;;  %824 = vmatmul.f32.vlgmr.msra.gmra.mxu3 %v734_v60 }
 0x141   :  { %1068 = vmatpush.msra.mxu0 %v3087_v1  ;;  %1088 = vmatpush.msra.mxu1 %v3089_v2  ;;  %v4176_v1 = vld [vmem:[#allocation35_spill] sm:$0xff]  ;;  %v4177_v2 = vld [vmem:[#allocation34_spill] sm:$0xff] }
 0x142   :  { %1108 = vmatpush.msra.mxu2 %v3093_v4  ;;  %1128 = vmatpush.msra.mxu3 %v3091_v3  ;;  %v4178_v3 = vld [vmem:[#allocation36_spill] sm:$0xff]  ;;  %v4179_v4 = vld [vmem:[#allocation37_spill] sm:$0xff] }
 0x143   :  { %1069 = vmatpush.msra.mxu0 %v3095_v5  ;;  %1089 = vmatpush.msra.mxu1 %v3097_v6  ;;  %v4180_v5 = vld [vmem:[#allocation39_spill] sm:$0xff]  ;;  %v4181_v6 = vld [vmem:[#allocation38_spill] sm:$0xff] }
 0x144   :  { %1109 = vmatpush.msra.mxu2 %v3103_v8  ;;  %1129 = vmatpush.msra.mxu3 %v3101_v7  ;;  %v4182_v7 = vld [vmem:[#allocation40_spill] sm:$0xff]  ;;  %v4183_v8 = vld [vmem:[#allocation41_spill] sm:$0xff] }
 0x145   :  { %1070 = vmatpush.msra.mxu0 %v3106_v9  ;;  %1090 = vmatpush.msra.mxu1 %v3108_v10  ;;  %v4184_v9 = vld [vmem:[#allocation43_spill] sm:$0xff]  ;;  %v4185_v10 = vld [vmem:[#allocation42_spill] sm:$0xff] }
 0x146   :  { %1110 = vmatpush.msra.mxu2 %v3115_v12  ;;  %1130 = vmatpush.msra.mxu3 %v3113_v11  ;;  %v4186_v11 = vld [vmem:[#allocation44_spill] sm:$0xff]  ;;  %v4187_v12 = vld [vmem:[#allocation45_spill] sm:$0xff] }
 0x147   :  { %1071 = vmatpush.msra.mxu0 %v3121_v14  ;;  %1091 = vmatpush.msra.mxu1 %v3123_v15  ;;  %v4188_v14 = vld [vmem:[#allocation47_spill] sm:$0xff]  ;;  %v4189_v15 = vld [vmem:[#allocation46_spill] sm:$0xff] }
 0x148   :  { %1111 = vmatpush.msra.mxu2 %v3129_v17  ;;  %1131 = vmatpush.msra.mxu3 %v3127_v16  ;;  %v4190_v16 = vld [vmem:[#allocation48_spill] sm:$0xff]  ;;  %v4191_v17 = vld [vmem:[#allocation49_spill] sm:$0xff] }
 0x149   :  { %1072 = vmatpush.msra.mxu0 %v3131_v18  ;;  %1092 = vmatpush.msra.mxu1 %v3133_v19  ;;  %v4192_v18 = vld [vmem:[#allocation51_spill] sm:$0xff]  ;;  %v4193_v19 = vld [vmem:[#allocation50_spill] sm:$0xff] }
 0x14a   :  { %1112 = vmatpush.msra.mxu2 %v3139_v21  ;;  %1132 = vmatpush.msra.mxu3 %v3137_v20  ;;  %v4194_v20 = vld [vmem:[#allocation52_spill] sm:$0xff]  ;;  %v4195_v21 = vld [vmem:[#allocation53_spill] sm:$0xff] }
 0x14b   :  { %1073 = vmatpush.msra.mxu0 %v3142_v22  ;;  %1093 = vmatpush.msra.mxu1 %v3144_v23  ;;  %v4196_v22 = vld [vmem:[#allocation54_spill] sm:$0xff]  ;;  %v4197_v23 = vld [vmem:[#allocation55_spill] sm:$0xff] }
 0x14c   :  { %1113 = vmatpush.msra.mxu2 %v3151_v25  ;;  %1133 = vmatpush.msra.mxu3 %v3149_v24  ;;  %v4198_v24 = vld [vmem:[#allocation56_spill] sm:$0xff]  ;;  %v4199_v25 = vld [vmem:[#allocation57_spill] sm:$0xff] }
 0x14d   :  { %1074 = vmatpush.msra.mxu0 %v3157_v27  ;;  %1094 = vmatpush.msra.mxu1 %v3159_v28  ;;  %v4200_v27 = vld [vmem:[#allocation58_spill] sm:$0xff]  ;;  %v4201_v28 = vld [vmem:[#allocation59_spill] sm:$0xff] }
 0x14e   :  { %1114 = vmatpush.msra.mxu2 %v3165_v30  ;;  %1134 = vmatpush.msra.mxu3 %v3163_v29 }
 0x14f   :  { %1075 = vmatpush.msra.mxu0 %v3167_v31  ;;  %1095 = vmatpush.msra.mxu1 %v3169_v32  ;;  %v4202_v31 = vld [vmem:[#allocation60_spill] sm:$0xff] }
 0x150   :  { %1115 = vmatpush.msra.mxu2 %v3175_v34  ;;  %1135 = vmatpush.msra.mxu3 %v3173_v33  ;;  %v4203_v33 = vld [vmem:[#allocation61_spill] sm:$0xff] }
 0x151   :  { %1076 = vmatpush.msra.mxu0 %v3178_v35  ;;  %1096 = vmatpush.msra.mxu1 %v3180_v36 }
 0x152   :  { %1116 = vmatpush.msra.mxu2 %v3187_v38  ;;  %1136 = vmatpush.msra.mxu3 %v3185_v37  ;;  %v4204_v38 = vld [vmem:[#allocation63_spill] sm:$0xff] }
 0x153   :  { %1077 = vmatpush.msra.mxu0 %v3193_v40  ;;  %1097 = vmatpush.msra.mxu1 %v3195_v41 }
 0x154   :  { %1117 = vmatpush.msra.mxu2 %v4176_v1  ;;  %1137 = vmatpush.msra.mxu3 %v4177_v2 }
 0x155   :  { %1078 = vmatpush.msra.mxu0 %v4178_v3  ;;  %1098 = vmatpush.msra.mxu1 %v4179_v4 }
 0x156   :  { %1118 = vmatpush.msra.mxu2 %v4180_v5  ;;  %1138 = vmatpush.msra.mxu3 %v4181_v6 }
 0x157   :  { %1079 = vmatpush.msra.mxu0 %v4182_v7  ;;  %1099 = vmatpush.msra.mxu1 %v4183_v8 }
 0x158   :  { %1119 = vmatpush.msra.mxu2 %v4184_v9  ;;  %1139 = vmatpush.msra.mxu3 %v4185_v10 }
 0x159   :  { %1080 = vmatpush.msra.mxu0 %v4186_v11  ;;  %1100 = vmatpush.msra.mxu1 %v4187_v12 }
 0x15a   :  { %1120 = vmatpush.msra.mxu2 %v4188_v14  ;;  %1140 = vmatpush.msra.mxu3 %v4189_v15 }
 0x15b   :  { %1081 = vmatpush.msra.mxu0 %v4190_v16  ;;  %1101 = vmatpush.msra.mxu1 %v4191_v17 }
 0x15c   :  { %1121 = vmatpush.msra.mxu2 %v4192_v18  ;;  %1141 = vmatpush.msra.mxu3 %v4193_v19 }
 0x15d   :  { %1082 = vmatpush.msra.mxu0 %v4194_v20  ;;  %1102 = vmatpush.msra.mxu1 %v4195_v21 }
 0x15e   :  { %1122 = vmatpush.msra.mxu2 %v4196_v22  ;;  %1142 = vmatpush.msra.mxu3 %v4197_v23 }
 0x15f   :  { %1083 = vmatpush.msra.mxu0 %v4198_v24  ;;  %1103 = vmatpush.msra.mxu1 %v4199_v25 }
 0x160   :  { %1123 = vmatpush.msra.mxu2 %v4200_v27  ;;  %1143 = vmatpush.msra.mxu3 %v4201_v28 }
 0x1bc   :  { %v765_v29 = vpop.f32.mrf.mxu0  ;;  %v785_v30 = vpop.f32.mrf.mxu1 }
 0x1bd   :  { %v828_v32 = vadd.f32 %v765_v29, %v4202_v31  ;;  %v829_v34 = vadd.f32 %v785_v30, %v4203_v33  ;;  %v3557_v29 = vld [vmem:[#allocation10 + $0x1e8] sm:$0xff]  ;;  %v3560_v30 = vld [vmem:[#allocation10 + $0x1f0] sm:$0xff]  ;;  %v3563_v31 = vld [vmem:[#allocation10 + $0x1f8] sm:$0xff] }
 0x1be   :  { %v3569_v33 = vld [vmem:[#allocation10 + $0x1c8] sm:$0xff] }
 0x1bf   :  { %v2356_v35 = vmul.f32 -1.442695, %v828_v32  ;;  %v2357_v36 = vmul.f32 -1.442695, %v829_v34  ;;  %v3566_v32 = vld [vmem:[#allocation10 + $0x1c0] sm:$0xff]  ;;  %v3572_v34 = vld [vmem:[#allocation10 + $0x1d0] sm:$0xff] }
 0x1c1   :  { %2414 = vpow2.f32 %v2356_v35  ;;  %v3575_v35 = vld [vmem:[#allocation10 + $0x1d8] sm:$0xff] }
 0x1c2   :  { %2416 = vpow2.f32 %v2357_v36  ;;  %v3578_v36 = vld [vmem:[#allocation10 + $0x1a0] sm:$0xff] }
 0x1c3   :  { %v825_v37 = vpop.f32.mrf.mxu3  ;;  %v805_v46 = vpop.f32.mrf.mxu2 }
 0x1c4   :  { %v831_v40 = vadd.f32 %v825_v37, %v4204_v38  ;;  %v830_v63 = vadd.f32 %v805_v46, %v4205_v50  ;;  %v3581_v37 = vld [vmem:[#allocation10 + $0x1a8] sm:$0xff]  ;;  %v3584_v38 = vld [vmem:[#allocation10 + $0x1b0] sm:$0xff] }
 0x1c5   :  { %v3605_v46 = vld [vmem:[#allocation10 + $0x168] sm:$0xff] }
 0x1c6   :  { %v2358_v41 = vmul.f32 -1.442695, %v831_v40  ;;  %v3587_v40 = vld [vmem:[#allocation10 + $0x1b8] sm:$0xff]  ;;  %v3617_v50 = vld [vmem:[#allocation10 + $0x148] sm:$0xff] }
 0x1c7   :  { %v2415_v42 = vpop.eup %2414 }
 0x1c8   :  { %v2417_v43 = vpop.eup %2416  ;;  %v835_v47 = vadd.f32 1.0, %v2415_v42  ;;  %2418 = vpow2.f32 %v2358_v41  ;;  %v3590_v41 = vld [vmem:[#allocation10 + $0x180] sm:$0xff]  ;;  %v3593_v42 = vld [vmem:[#allocation10 + $0x188] sm:$0xff] }
 0x1c9   :  { %v854_v0 = vadd.f32 1.0, %v2417_v43  ;;  %v3596_v43 = vld [vmem:[#allocation10 + $0x190] sm:$0xff] }
 0x1ca   :  { %2420 = vrcp.f32 %v835_v47  ;;  %v847_v56 = vand.u32 2147483648, %v835_v47  ;;  %v845_v57 = vand.u32 2147483647, %v835_v47  ;;  %vm841_vm14 = vweird.f32 %v835_v47 }
 0x1cb   :  { %2422 = vrcp.f32 %v854_v0  ;;  %v866_v26 = vand.u32 2147483648, %v854_v0  ;;  %v864_v54 = vand.u32 2147483647, %v854_v0  ;;  %vm860_vm15 = vweird.f32 %v854_v0 }
 0x1cc   :  { %v848_v55 = vor.u32 1.1754944e-38, %v847_v56  ;;  %vm846_vm2 = vcmp.eq.f32.partialorder %v845_v57, 8.507059e+37  ;;  %v3638_v56 = vld [vmem:[#allocation10 + $0x100] sm:$0xff]  ;;  %v3647_v57 = vld [vmem:[#allocation10 + $0x118] sm:$0xff] }
 0x1cd   :  { %v867_v2 = vor.u32 1.1754944e-38, %v866_v26  ;;  %vm865_vm3 = vcmp.eq.f32.partialorder %v864_v54, 8.507059e+37  ;;  %v3641_v26 = vld [vmem:[#allocation10 + $0x108] sm:$0xff] }
 0x1ce   :  { %v2419_v13 = vpop.eup %2418  ;;  %v3653_v54 = vld [vmem:[#allocation10 + $0xe8] sm:$0xff] }
 0x1cf   :  { %v874_v61 = vadd.f32 1.0, %v2419_v13  ;;  %v3608_v13 = vld [vmem:[#allocation10 + $0x170] sm:$0xff] }
 0x1d0   :  { %v2421_v39 = vpop.eup %2420 }
 0x1d1   :  { %v2423_v49 = vpop.eup %2422  ;;  %v837_v44 = vmul.f32 %v2421_v39, %v835_v47  ;;  %2424 = vrcp.f32 %v874_v61  ;;  %vm842_vm12 = vweird.f32 %v2421_v39  ;;  %v886_v15 = vand.u32 2147483648, %v874_v61  ;;  %v3599_v47 = vld [vmem:[#allocation10 + $0x198] sm:$0xff] }
 0x1d2   :  { %v856_v52 = vmul.f32 %v2423_v49, %v854_v0  ;;  %2426 = vtanh.f32 %v830_v63  ;;  %vm861_vm13 = vweird.f32 %v2423_v49  ;;  %vm843_vm0 = vmor %vm841_vm14, %vm842_vm12  ;;  %vm880_vm5 = vweird.f32 %v874_v61  ;;  %v3602_v0 = vld [vmem:[#allocation10 + $0x160] sm:$0xff]  ;;  %v3620_v63 = vld [vmem:[#allocation10 + $0x150] sm:$0xff] }
 0x1d3   :  { %v838_v45 = vsub.f32 1.0, %v837_v44  ;;  %vm862_vm1 = vmor %vm860_vm15, %vm861_vm13  ;;  %v884_v16 = vand.u32 2147483647, %v874_v61  ;;  %v887_v18 = vor.u32 1.1754944e-38, %v886_v15  ;;  %v3626_v44 = vld [vmem:[#allocation10 + $0x120] sm:$0xff]  ;;  %v3704_v15 = vld [vmem:[#allocation10 + $0x70] sm:$0xff] }
 0x1d4   :  { %v857_v51 = vsub.f32 1.0, %v856_v52  ;;  %v3629_v52 = vld [vmem:[#allocation10 + $0x128] sm:$0xff]  ;;  %4218 = vst [vmem:[#allocation47_spill] sm:$0xff] %v3704_v15 }
 0x1d5   :  { %v839_v48 = vmul.f32 %v2421_v39, %v838_v45  ;;  %vm885_vm7 = vcmp.eq.f32.partialorder %v884_v16, 8.507059e+37  ;;  %v3632_v45 = vld [vmem:[#allocation10 + $0x130] sm:$0xff]  ;;  %v3707_v16 = vld [vmem:[#allocation10 + $0x78] sm:$0xff] }
 0x1d6   :  { %v858_v58 = vmul.f32 %v2423_v49, %v857_v51  ;;  %v3635_v51 = vld [vmem:[#allocation10 + $0x138] sm:$0xff]  ;;  %4219 = vst [vmem:[#allocation46_spill] sm:$0xff] %v3707_v16 }
 0x1d7   :  { %v2425_v59 = vpop.eup %2424  ;;  %v840_v62 = vadd.f32 %v2421_v39, %v839_v48  ;;  %v3644_v48 = vld [vmem:[#allocation10 + $0x110] sm:$0xff] }
 0x1d8   :  { %v859_v60 = vadd.f32 %v2423_v49, %v858_v58  ;;  %v876_v1 = vmul.f32 %v2425_v59, %v874_v61  ;;  %v2427_v4 = vpop.eup %2426  ;;  %vm881_vm4 = vweird.f32 %v2425_v59  ;;  %v3611_v61 = vld [vmem:[#allocation10 + $0x178] sm:$0xff]  ;;  %v3650_v58 = vld [vmem:[#allocation10 + $0xe0] sm:$0xff] }
 0x1d9   :  { %v844_v3 = vsel %vm843_vm0, %v2421_v39, %v840_v62  ;;  %vm882_vm6 = vmor %vm880_vm5, %vm881_vm4  ;;  %v3614_v39 = vld [vmem:[#allocation10 + $0x140] sm:$0xff]  ;;  %v3659_v62 = vld [vmem:[#allocation10 + $0xf8] sm:$0xff] }
 0x1da   :  { %v849_v5 = vsel %vm846_vm2, %v848_v55, %v844_v3  ;;  %v863_v6 = vsel %vm862_vm1, %v2423_v49, %v859_v60  ;;  %v877_v7 = vsub.f32 1.0, %v876_v1  ;;  %v3623_v49 = vld [vmem:[#allocation10 + $0x158] sm:$0xff]  ;;  %v3662_v55 = vld [vmem:[#allocation10 + $0xc0] sm:$0xff]  ;;  %v3665_v60 = vld [vmem:[#allocation10 + $0xc8] sm:$0xff] }
 0x1db   :  { %v868_v8 = vsel %vm865_vm3, %v867_v2, %v863_v6  ;;  %v891_v9 = vmul.f32 %v2427_v4, %v849_v5  ;;  %v3668_v1 = vld [vmem:[#allocation10 + $0xd0] sm:$0xff]  ;;  %v3671_v2 = vld [vmem:[#allocation10 + $0xd8] sm:$0xff]  ;;  %v3674_v3 = vld [vmem:[#allocation10 + $0xa0] sm:$0xff] }
 0x1dc   :  { %v890_v10 = vmul.f32 %v868_v8, %v3479_v53  ;;  %v878_v11 = vmul.f32 %v2425_v59, %v877_v7  ;;  %v3554_v53 = vld [vmem:[#allocation10 + $0x1e0] sm:$0xff]  ;;  %4206 = vst [vmem:[#allocation35_spill] sm:$0xff] %v3668_v1  ;;  %v3677_v4 = vld [vmem:[#allocation10 + $0xa8] sm:$0xff]  ;;  %v3680_v5 = vld [vmem:[#allocation10 + $0xb0] sm:$0xff] }
 0x1dd   :  { %4207 = vst [vmem:[#allocation34_spill] sm:$0xff] %v3671_v2  ;;  %v3683_v6 = vld [vmem:[#allocation10 + $0xb8] sm:$0xff]  ;;  %v3686_v7 = vld [vmem:[#allocation10 + $0x80] sm:$0xff]  ;;  %v3689_v8 = vld [vmem:[#allocation10 + $0x88] sm:$0xff] }
 0x1de   :  { %v3551_v12 = vadd.f32 %v891_v9, %v890_v10  ;;  %v879_v14 = vadd.f32 %v2425_v59, %v878_v11  ;;  %4208 = vst [vmem:[#allocation36_spill] sm:$0xff] %v3674_v3  ;;  %v3692_v9 = vld [vmem:[#allocation10 + $0x90] sm:$0xff]  ;;  %v3695_v10 = vld [vmem:[#allocation10 + $0x98] sm:$0xff]  ;;  %v3698_v11 = vld [vmem:[#allocation10 + $0x60] sm:$0xff] }
 0x1df   :  { %4209 = vst [vmem:[#allocation37_spill] sm:$0xff] %v3677_v4 }
 0x1e0   :  { %2428 = vtanh.f32 %v3551_v12  ;;  %v883_v17 = vsel %vm882_vm6, %v2425_v59, %v879_v14  ;;  %v3656_v59 = vld [vmem:[#allocation10 + $0xf0] sm:$0xff]  ;;  %4210 = vst [vmem:[#allocation39_spill] sm:$0xff] %v3680_v5  ;;  %v3701_v14 = vld [vmem:[#allocation10 + $0x68] sm:$0xff] }
 0x1e1   :  { %v888_v20 = vsel %vm885_vm7, %v887_v18, %v883_v17  ;;  %4211 = vst [vmem:[#allocation38_spill] sm:$0xff] %v3683_v6  ;;  %v3710_v17 = vld [vmem:[#allocation10 + $0x40] sm:$0xff]  ;;  %v3713_v18 = vld [vmem:[#allocation10 + $0x48] sm:$0xff] }
 0x1e2   :  { %4212 = vst [vmem:[#allocation40_spill] sm:$0xff] %v3686_v7 }
 0x1e3   :  { %4213 = vst [vmem:[#allocation41_spill] sm:$0xff] %v3689_v8 }
 0x1e4   :  { %4214 = vst [vmem:[#allocation43_spill] sm:$0xff] %v3692_v9 }
 0x1e5   :  { %4215 = vst [vmem:[#allocation42_spill] sm:$0xff] %v3695_v10 }
 0x1e6   :  { %v2429_v19 = vpop.eup %2428  ;;  %4216 = vst [vmem:[#allocation44_spill] sm:$0xff] %v3698_v11 }
 0x1e7   :  { %v894_v21 = vmul.f32 %v2429_v19, %v888_v20  ;;  %4217 = vst [vmem:[#allocation45_spill] sm:$0xff] %v3701_v14  ;;  %v3716_v19 = vld [vmem:[#allocation10 + $0x50] sm:$0xff]  ;;  %v3719_v20 = vld [vmem:[#allocation10 + $0x58] sm:$0xff] }
 0x1e8   :  { %4220 = vst [vmem:[#allocation48_spill] sm:$0xff] %v3710_v17 }
 0x1e9   :  { %924 = vmatmul.f32.vlgmr.msrb.gmra.mxu0 %v894_v21  ;;  %944 = vmatmul.f32.vlgmr.msrb.gmra.mxu1 %v894_v21  ;;  %4221 = vst [vmem:[#allocation49_spill] sm:$0xff] %v3713_v18 }
 0x1ea   :  { %964 = vmatmul.f32.vlgmr.msrb.gmra.mxu2 %v894_v21  ;;  %984 = vmatmul.f32.vlgmr.msrb.gmra.mxu3 %v894_v21  ;;  %4222 = vst [vmem:[#allocation51_spill] sm:$0xff] %v3716_v19  ;;  %v3722_v21 = vld [vmem:[#allocation10 + $0x20] sm:$0xff] }
 0x1eb   :  { %1228 = vmatpush.msrb.mxu0 %v3554_v53  ;;  %1248 = vmatpush.msrb.mxu1 %v3557_v29  ;;  %4223 = vst [vmem:[#allocation50_spill] sm:$0xff] %v3719_v20 }
 0x1ec   :  { %1268 = vmatpush.msrb.mxu2 %v3560_v30  ;;  %1288 = vmatpush.msrb.mxu3 %v3563_v31  ;;  %4224 = vst [vmem:[#allocation52_spill] sm:$0xff] %v3722_v21 }
 0x1ed   :  { %1229 = vmatpush.msrb.mxu0 %v3566_v32  ;;  %1249 = vmatpush.msrb.mxu1 %v3569_v33 }
 0x1ee   :  { %1269 = vmatpush.msrb.mxu2 %v3572_v34  ;;  %1289 = vmatpush.msrb.mxu3 %v3575_v35 }
 0x1ef   :  { %1230 = vmatpush.msrb.mxu0 %v3578_v36  ;;  %1250 = vmatpush.msrb.mxu1 %v3581_v37 }
 0x1f0   :  { %1270 = vmatpush.msrb.mxu2 %v3584_v38  ;;  %1290 = vmatpush.msrb.mxu3 %v3587_v40 }
 0x1f1   :  { %1231 = vmatpush.msrb.mxu0 %v3590_v41  ;;  %1251 = vmatpush.msrb.mxu1 %v3593_v42 }
 0x1f2   :  { %1271 = vmatpush.msrb.mxu2 %v3596_v43  ;;  %1291 = vmatpush.msrb.mxu3 %v3599_v47 }
 0x1f3   :  { %1232 = vmatpush.msrb.mxu0 %v3602_v0  ;;  %1252 = vmatpush.msrb.mxu1 %v3605_v46 }
 0x1f4   :  { %1272 = vmatpush.msrb.mxu2 %v3608_v13  ;;  %1292 = vmatpush.msrb.mxu3 %v3611_v61 }
 0x1f5   :  { %1233 = vmatpush.msrb.mxu0 %v3614_v39  ;;  %1253 = vmatpush.msrb.mxu1 %v3617_v50 }
 0x1f6   :  { %1273 = vmatpush.msrb.mxu2 %v3620_v63  ;;  %1293 = vmatpush.msrb.mxu3 %v3623_v49 }
 0x1f7   :  { %1234 = vmatpush.msrb.mxu0 %v3626_v44  ;;  %1254 = vmatpush.msrb.mxu1 %v3629_v52 }
 0x1f8   :  { %1274 = vmatpush.msrb.mxu2 %v3632_v45  ;;  %1294 = vmatpush.msrb.mxu3 %v3635_v51 }
 0x1f9   :  { %1235 = vmatpush.msrb.mxu0 %v3638_v56  ;;  %1255 = vmatpush.msrb.mxu1 %v3641_v26 }
 0x1fa   :  { %1275 = vmatpush.msrb.mxu2 %v3644_v48  ;;  %1295 = vmatpush.msrb.mxu3 %v3647_v57 }
 0x1fb   :  { %1236 = vmatpush.msrb.mxu0 %v3650_v58  ;;  %1256 = vmatpush.msrb.mxu1 %v3653_v54 }
 0x1fc   :  { %1276 = vmatpush.msrb.mxu2 %v3656_v59  ;;  %1296 = vmatpush.msrb.mxu3 %v3659_v62 }
 0x1fd   :  { %1237 = vmatpush.msrb.mxu0 %v3662_v55  ;;  %1257 = vmatpush.msrb.mxu1 %v3665_v60 }
 0x1fe   :  { %1277 = vmatpush.msrb.mxu2 %v3668_v1  ;;  %1297 = vmatpush.msrb.mxu3 %v3671_v2 }
 0x1ff   :  { %1238 = vmatpush.msrb.mxu0 %v3674_v3  ;;  %1258 = vmatpush.msrb.mxu1 %v3677_v4 }
 0x200   :  { %1278 = vmatpush.msrb.mxu2 %v3680_v5  ;;  %1298 = vmatpush.msrb.mxu3 %v3683_v6 }
 0x201   :  { %1239 = vmatpush.msrb.mxu0 %v3686_v7  ;;  %1259 = vmatpush.msrb.mxu1 %v3689_v8 }
 0x202   :  { %1279 = vmatpush.msrb.mxu2 %v3692_v9  ;;  %1299 = vmatpush.msrb.mxu3 %v3695_v10 }
 0x203   :  { %1240 = vmatpush.msrb.mxu0 %v3698_v11  ;;  %1260 = vmatpush.msrb.mxu1 %v3701_v14 }
 0x204   :  { %1280 = vmatpush.msrb.mxu2 %v3704_v15  ;;  %1300 = vmatpush.msrb.mxu3 %v3707_v16  ;;  %v3725_v16 = vld [vmem:[#allocation10 + $0x28] sm:$0xff] }
 0x205   :  { %1241 = vmatpush.msrb.mxu0 %v3710_v17  ;;  %1261 = vmatpush.msrb.mxu1 %v3713_v18  ;;  %4225 = vst [vmem:[#allocation53_spill] sm:$0xff] %v3725_v16  ;;  %v4226_v18 = vld [vmem:[#allocation64_spill] sm:$0xff]  ;;  %v4227_v17 = vld [vmem:[#allocation65_spill] sm:$0xff] }
 0x206   :  { %1281 = vmatpush.msrb.mxu2 %v3716_v19  ;;  %1301 = vmatpush.msrb.mxu3 %v3719_v20 }
 0x207   :  { %1242 = vmatpush.msrb.mxu0 %v3722_v21  ;;  %1262 = vmatpush.msrb.mxu1 %v3725_v16 }
 0x208   :  { %1282 = vmatpush.msrb.mxu2 %v4196_v22  ;;  %1302 = vmatpush.msrb.mxu3 %v4197_v23  ;;  %v4228_v23 = vld [vmem:[#allocation67_spill] sm:$0xff] }
 0x209   :  { %1243 = vmatpush.msrb.mxu0 %v4198_v24  ;;  %1263 = vmatpush.msrb.mxu1 %v4199_v25 }
 0x20a   :  { %1283 = vmatpush.msrb.mxu2 %v4200_v27  ;;  %1303 = vmatpush.msrb.mxu3 %v4201_v28 }
 0x266   :  { %v925_v20 = vpop.f32.mrf.mxu0  ;;  %v945_v19 = vpop.f32.mrf.mxu1 }
 0x267   :  { %v988_v21 = vadd.f32 %v925_v20, %v4226_v18  ;;  %v989_v15 = vadd.f32 %v945_v19, %v4227_v17  ;;  %v4229_v17 = vld [vmem:[#allocation66_spill] sm:$0xff] }
 0x269   :  { %v2359_v14 = vmul.f32 -1.442695, %v988_v21  ;;  %v2360_v16 = vmul.f32 -1.442695, %v989_v15 }
 0x26b   :  { %2430 = vpow2.f32 %v2359_v14 }
 0x26c   :  { %2432 = vpow2.f32 %v2360_v16 }
 0x26d   :  { %v985_v22 = vpop.f32.mrf.mxu3  ;;  %v965_v28 = vpop.f32.mrf.mxu2 }
 0x26e   :  { %v991_v11 = vadd.f32 %v985_v22, %v4228_v23  ;;  %v990_v19 = vadd.f32 %v965_v28, %v4229_v17 }
 0x270   :  { %v2361_v24 = vmul.f32 -1.442695, %v991_v11 }
 0x271   :  { %v2431_v10 = vpop.eup %2430 }
 0x272   :  { %v2433_v25 = vpop.eup %2432  ;;  %v995_v9 = vadd.f32 1.0, %v2431_v10  ;;  %2434 = vpow2.f32 %v2361_v24 }
 0x273   :  { %v1014_v27 = vadd.f32 1.0, %v2433_v25 }
 0x274   :  { %2436 = vrcp.f32 %v995_v9  ;;  %v1007_v11 = vand.u32 2147483648, %v995_v9  ;;  %v1005_v24 = vand.u32 2147483647, %v995_v9  ;;  %vm1001_vm10 = vweird.f32 %v995_v9 }
 0x275   :  { %2438 = vrcp.f32 %v1014_v27  ;;  %v1026_v23 = vand.u32 2147483648, %v1014_v27  ;;  %v1024_v7 = vand.u32 2147483647, %v1014_v27  ;;  %vm1020_vm11 = vweird.f32 %v1014_v27 }
 0x276   :  { %v1008_v28 = vor.u32 1.1754944e-38, %v1007_v11  ;;  %vm1006_vm14 = vcmp.eq.f32.partialorder %v1005_v24, 8.507059e+37 }
 0x277   :  { %vm1025_vm15 = vcmp.eq.f32.partialorder %v1024_v7, 8.507059e+37 }
 0x278   :  { %v2435_v8 = vpop.eup %2434 }
 0x279   :  { %v1034_v18 = vadd.f32 1.0, %v2435_v8 }
 0x27a   :  { %v2437_v20 = vpop.eup %2436 }
 0x27b   :  { %v2439_v15 = vpop.eup %2438  ;;  %v997_v14 = vmul.f32 %v2437_v20, %v995_v9  ;;  %2440 = vrcp.f32 %v1034_v18  ;;  %vm1002_vm8 = vweird.f32 %v2437_v20  ;;  %v1046_v11 = vand.u32 2147483648, %v1034_v18 }
 0x27c   :  { %v1016_v16 = vmul.f32 %v2439_v15, %v1014_v27  ;;  %2442 = vtanh.f32 %v990_v19  ;;  %vm1021_vm9 = vweird.f32 %v2439_v15  ;;  %vm1003_vm12 = vmor %vm1001_vm10, %vm1002_vm8  ;;  %vm1040_vm1 = vweird.f32 %v1034_v18 }
 0x27d   :  { %v998_v21 = vsub.f32 1.0, %v997_v14  ;;  %vm1022_vm13 = vmor %vm1020_vm11, %vm1021_vm9  ;;  %v1027_v14 = vor.u32 1.1754944e-38, %v1026_v23  ;;  %v1047_v24 = vor.u32 1.1754944e-38, %v1046_v11  ;;  %v4248_v11 = vld [vmem:[#allocation52_spill] sm:$0xff] }
 0x27e   :  { %v1017_v22 = vsub.f32 1.0, %v1016_v16 }
 0x27f   :  { %v999_v10 = vmul.f32 %v2437_v20, %v998_v21 }
 0x280   :  { %v1018_v25 = vmul.f32 %v2439_v15, %v1017_v22 }
 0x281   :  { %v2441_v6 = vpop.eup %2440  ;;  %v1000_v8 = vadd.f32 %v2437_v20, %v999_v10 }
 0x282   :  { %v1019_v17 = vadd.f32 %v2439_v15, %v1018_v25  ;;  %v1036_v5 = vmul.f32 %v2441_v6, %v1034_v18  ;;  %v2443_v19 = vpop.eup %2442  ;;  %vm1041_vm0 = vweird.f32 %v2441_v6  ;;  %v4237_v25 = vld [vmem:[#allocation41_spill] sm:$0xff] }
 0x283   :  { %v1004_v16 = vsel %vm1003_vm12, %v2437_v20, %v1000_v8  ;;  %v1044_v20 = vand.u32 2147483647, %v1034_v18  ;;  %vm1042_vm2 = vmor %vm1040_vm1, %vm1041_vm0  ;;  %v4236_v18 = vld [vmem:[#allocation40_spill] sm:$0xff]  ;;  %v4238_v8 = vld [vmem:[#allocation43_spill] sm:$0xff] }
 0x284   :  { %v1009_v4 = vsel %vm1006_vm14, %v1008_v28, %v1004_v16  ;;  %v1023_v21 = vsel %vm1022_vm13, %v2439_v15, %v1019_v17  ;;  %v1037_v3 = vsub.f32 1.0, %v1036_v5  ;;  %v4239_v28 = vld [vmem:[#allocation42_spill] sm:$0xff]  ;;  %v4240_v17 = vld [vmem:[#allocation44_spill] sm:$0xff]  ;;  %v4242_v16 = vld [vmem:[#allocation47_spill] sm:$0xff] }
 0x285   :  { %v1028_v22 = vsel %vm1025_vm15, %v1027_v14, %v1023_v21  ;;  %v1051_v2 = vmul.f32 %v2443_v19, %v1009_v4  ;;  %vm1045_vm3 = vcmp.eq.f32.partialorder %v1044_v20, 8.507059e+37  ;;  %v4234_v4 = vld [vmem:[#allocation39_spill] sm:$0xff]  ;;  %v4241_v14 = vld [vmem:[#allocation45_spill] sm:$0xff]  ;;  %v4243_v19 = vld [vmem:[#allocation46_spill] sm:$0xff] }
 0x286   :  { %v1050_v1 = vmul.f32 %v1028_v22, %v3551_v12  ;;  %v1038_v10 = vmul.f32 %v2441_v6, %v1037_v3  ;;  %v4230_v12 = vld [vmem:[#allocation35_spill] sm:$0xff]  ;;  %v4233_v3 = vld [vmem:[#allocation37_spill] sm:$0xff]  ;;  %v4244_v21 = vld [vmem:[#allocation48_spill] sm:$0xff] }
 0x287   :  { %v4245_v22 = vld [vmem:[#allocation49_spill] sm:$0xff] }
 0x288   :  { %v3739_v9 = vadd.f32 %v1051_v2, %v1050_v1  ;;  %v1039_v27 = vadd.f32 %v2441_v6, %v1038_v10  ;;  %v4231_v1 = vld [vmem:[#allocation34_spill] sm:$0xff]  ;;  %v4232_v2 = vld [vmem:[#allocation36_spill] sm:$0xff]  ;;  %v4246_v10 = vld [vmem:[#allocation51_spill] sm:$0xff] }
 0x289   :  { %v4249_v20 = vld [vmem:[#allocation53_spill] sm:$0xff] }
 0x28a   :  { %2444 = vtanh.f32 %v3739_v9  ;;  %v1043_v23 = vsel %vm1042_vm2, %v2441_v6, %v1039_v27  ;;  %v4235_v6 = vld [vmem:[#allocation38_spill] sm:$0xff] }
 0x28b   :  { %v1048_v5 = vsel %vm1045_vm3, %v1047_v24, %v1043_v23  ;;  %v4247_v27 = vld [vmem:[#allocation50_spill] sm:$0xff]  ;;  %v3800_v23 = vld [vmem:[#allocation10 + $0x30] sm:$0xff]  ;;  %v3803_v24 = vld [vmem:[#allocation10 + $0x38] sm:$0xff] }
 0x28c   :  { %4250 = vst [vmem:[#allocation54_spill] sm:$0xff] %v3800_v23 }
 0x28d   :  { %4251 = vst [vmem:[#allocation55_spill] sm:$0xff] %v3803_v24 }
 0x290   :  { %v2445_v7 = vpop.eup %2444 }
 0x291   :  { %v1054_v15 = vmul.f32 %v2445_v7, %v1048_v5  ;;  %v3806_v7 = vld [vmem:[#allocation10] sm:$0xff]  ;;  %v3809_v5 = vld [vmem:[#allocation10 + $0x8] sm:$0xff] }
 0x292   :  { %4252 = vst [vmem:[#allocation56_spill] sm:$0xff] %v3806_v7 }
 0x293   :  { %1084 = vmatmul.f32.vlgmr.msra.gmra.mxu0 %v1054_v15  ;;  %1104 = vmatmul.f32.vlgmr.msra.gmra.mxu1 %v1054_v15  ;;  %4253 = vst [vmem:[#allocation57_spill] sm:$0xff] %v3809_v5 }
 0x294   :  { %1124 = vmatmul.f32.vlgmr.msra.gmra.mxu2 %v1054_v15  ;;  %1144 = vmatmul.f32.vlgmr.msra.gmra.mxu3 %v1054_v15  ;;  %v3812_v15 = vld [vmem:[#allocation10 + $0x10] sm:$0xff] }
 0x295   :  { %1388 = vmatpush.msra.mxu0 %v3554_v53  ;;  %1408 = vmatpush.msra.mxu1 %v3557_v29  ;;  %4254 = vst [vmem:[#allocation58_spill] sm:$0xff] %v3812_v15 }
 0x296   :  { %1428 = vmatpush.msra.mxu2 %v3560_v30  ;;  %1448 = vmatpush.msra.mxu3 %v3563_v31 }
 0x297   :  { %1389 = vmatpush.msra.mxu0 %v3566_v32  ;;  %1409 = vmatpush.msra.mxu1 %v3569_v33 }
 0x298   :  { %1429 = vmatpush.msra.mxu2 %v3572_v34  ;;  %1449 = vmatpush.msra.mxu3 %v3575_v35 }
 0x299   :  { %1390 = vmatpush.msra.mxu0 %v3578_v36  ;;  %1410 = vmatpush.msra.mxu1 %v3581_v37 }
 0x29a   :  { %1430 = vmatpush.msra.mxu2 %v3584_v38  ;;  %1450 = vmatpush.msra.mxu3 %v3587_v40 }
 0x29b   :  { %1391 = vmatpush.msra.mxu0 %v3590_v41  ;;  %1411 = vmatpush.msra.mxu1 %v3593_v42 }
 0x29c   :  { %1431 = vmatpush.msra.mxu2 %v3596_v43  ;;  %1451 = vmatpush.msra.mxu3 %v3599_v47 }
 0x29d   :  { %1392 = vmatpush.msra.mxu0 %v3602_v0  ;;  %1412 = vmatpush.msra.mxu1 %v3605_v46 }
 0x29e   :  { %1432 = vmatpush.msra.mxu2 %v3608_v13  ;;  %1452 = vmatpush.msra.mxu3 %v3611_v61 }
 0x29f   :  { %1393 = vmatpush.msra.mxu0 %v3614_v39  ;;  %1413 = vmatpush.msra.mxu1 %v3617_v50 }
 0x2a0   :  { %1433 = vmatpush.msra.mxu2 %v3620_v63  ;;  %1453 = vmatpush.msra.mxu3 %v3623_v49 }
 0x2a1   :  { %1394 = vmatpush.msra.mxu0 %v3626_v44  ;;  %1414 = vmatpush.msra.mxu1 %v3629_v52 }
 0x2a2   :  { %1434 = vmatpush.msra.mxu2 %v3632_v45  ;;  %1454 = vmatpush.msra.mxu3 %v3635_v51 }
 0x2a3   :  { %1395 = vmatpush.msra.mxu0 %v3638_v56  ;;  %1415 = vmatpush.msra.mxu1 %v3641_v26 }
 0x2a4   :  { %1435 = vmatpush.msra.mxu2 %v3644_v48  ;;  %1455 = vmatpush.msra.mxu3 %v3647_v57 }
 0x2a5   :  { %1396 = vmatpush.msra.mxu0 %v3650_v58  ;;  %1416 = vmatpush.msra.mxu1 %v3653_v54 }
 0x2a6   :  { %1436 = vmatpush.msra.mxu2 %v3656_v59  ;;  %1456 = vmatpush.msra.mxu3 %v3659_v62 }
 0x2a7   :  { %1397 = vmatpush.msra.mxu0 %v3662_v55  ;;  %1417 = vmatpush.msra.mxu1 %v3665_v60 }
 0x2a8   :  { %1437 = vmatpush.msra.mxu2 %v4230_v12  ;;  %1457 = vmatpush.msra.mxu3 %v4231_v1 }
 0x2a9   :  { %1398 = vmatpush.msra.mxu0 %v4232_v2  ;;  %1418 = vmatpush.msra.mxu1 %v4233_v3 }
 0x2aa   :  { %1438 = vmatpush.msra.mxu2 %v4234_v4  ;;  %1458 = vmatpush.msra.mxu3 %v4235_v6 }
 0x2ab   :  { %1399 = vmatpush.msra.mxu0 %v4236_v18  ;;  %1419 = vmatpush.msra.mxu1 %v4237_v25 }
 0x2ac   :  { %1439 = vmatpush.msra.mxu2 %v4238_v8  ;;  %1459 = vmatpush.msra.mxu3 %v4239_v28 }
 0x2ad   :  { %1400 = vmatpush.msra.mxu0 %v4240_v17  ;;  %1420 = vmatpush.msra.mxu1 %v4241_v14 }
 0x2ae   :  { %1440 = vmatpush.msra.mxu2 %v4242_v16  ;;  %1460 = vmatpush.msra.mxu3 %v4243_v19 }
 0x2af   :  { %1401 = vmatpush.msra.mxu0 %v4244_v21  ;;  %1421 = vmatpush.msra.mxu1 %v4245_v22 }
 0x2b0   :  { %1441 = vmatpush.msra.mxu2 %v4246_v10  ;;  %1461 = vmatpush.msra.mxu3 %v4247_v27  ;;  %v4256_v27 = vld [vmem:[#allocation68_spill] sm:$0xff]  ;;  %v4257_v10 = vld [vmem:[#allocation69_spill] sm:$0xff] }
 0x2b1   :  { %1402 = vmatpush.msra.mxu0 %v4248_v11  ;;  %1422 = vmatpush.msra.mxu1 %v4249_v20  ;;  %v3815_v20 = vld [vmem:[#allocation10 + $0x18] sm:$0xff] }
 0x2b2   :  { %1442 = vmatpush.msra.mxu2 %v3800_v23  ;;  %1462 = vmatpush.msra.mxu3 %v3803_v24  ;;  %4255 = vst [vmem:[#allocation59_spill] sm:$0xff] %v3815_v20 }
 0x2b3   :  { %1403 = vmatpush.msra.mxu0 %v3806_v7  ;;  %1423 = vmatpush.msra.mxu1 %v3809_v5  ;;  %v4258_v5 = vld [vmem:[#allocation71_spill] sm:$0xff] }
 0x2b4   :  { %1443 = vmatpush.msra.mxu2 %v3812_v15  ;;  %1463 = vmatpush.msra.mxu3 %v3815_v20 }
 0x310   :  { %v1085_v23 = vpop.f32.mrf.mxu0  ;;  %v1105_v11 = vpop.f32.mrf.mxu1 }
 0x311   :  { %v1148_v24 = vadd.f32 %v1085_v23, %v4256_v27  ;;  %v1149_v22 = vadd.f32 %v1105_v11, %v4257_v10  ;;  %v4259_v10 = vld [vmem:[#allocation70_spill] sm:$0xff] }
 0x313   :  { %v2362_v21 = vmul.f32 -1.442695, %v1148_v24  ;;  %v2363_v7 = vmul.f32 -1.442695, %v1149_v22 }
 0x315   :  { %2446 = vpow2.f32 %v2362_v21 }
 0x316   :  { %2448 = vpow2.f32 %v2363_v7 }
 0x317   :  { %v1145_v19 = vpop.f32.mrf.mxu3  ;;  %v1125_v20 = vpop.f32.mrf.mxu2 }
 0x318   :  { %v1151_v16 = vadd.f32 %v1145_v19, %v4258_v5  ;;  %v1150_v11 = vadd.f32 %v1125_v20, %v4259_v10 }
 0x31a   :  { %v2364_v14 = vmul.f32 -1.442695, %v1151_v16 }
 0x31b   :  { %v2447_v17 = vpop.eup %2446 }
 0x31c   :  { %v2449_v15 = vpop.eup %2448  ;;  %v1155_v28 = vadd.f32 1.0, %v2447_v17  ;;  %2450 = vpow2.f32 %v2364_v14 }
 0x31d   :  { %v1174_v8 = vadd.f32 1.0, %v2449_v15 }
 0x31e   :  { %2452 = vrcp.f32 %v1155_v28  ;;  %v1167_v16 = vand.u32 2147483648, %v1155_v28  ;;  %v1165_v14 = vand.u32 2147483647, %v1155_v28  ;;  %vm1161_vm6 = vweird.f32 %v1155_v28 }
 0x31f   :  { %2454 = vrcp.f32 %v1174_v8  ;;  %v1186_v5 = vand.u32 2147483648, %v1174_v8  ;;  %v1184_v18 = vand.u32 2147483647, %v1174_v8  ;;  %vm1180_vm7 = vweird.f32 %v1174_v8 }
 0x320   :  { %v1168_v20 = vor.u32 1.1754944e-38, %v1167_v16  ;;  %vm1166_vm10 = vcmp.eq.f32.partialorder %v1165_v14, 8.507059e+37 }
 0x321   :  { %vm1185_vm11 = vcmp.eq.f32.partialorder %v1184_v18, 8.507059e+37 }
 0x322   :  { %v2451_v25 = vpop.eup %2450 }
 0x323   :  { %v1194_v27 = vadd.f32 1.0, %v2451_v25 }
 0x324   :  { %v2453_v23 = vpop.eup %2452 }
 0x325   :  { %v2455_v22 = vpop.eup %2454  ;;  %v1157_v21 = vmul.f32 %v2453_v23, %v1155_v28  ;;  %2456 = vrcp.f32 %v1194_v27  ;;  %vm1162_vm4 = vweird.f32 %v2453_v23  ;;  %v1206_v16 = vand.u32 2147483648, %v1194_v27 }
 0x326   :  { %v1176_v24 = vmul.f32 %v2455_v22, %v1174_v8  ;;  %2458 = vtanh.f32 %v1150_v11  ;;  %vm1181_vm5 = vweird.f32 %v2455_v22  ;;  %vm1163_vm8 = vmor %vm1161_vm6, %vm1162_vm4  ;;  %vm1200_vm13 = vweird.f32 %v1194_v27 }
 0x327   :  { %v1158_v7 = vsub.f32 1.0, %v1157_v21  ;;  %vm1182_vm9 = vmor %vm1180_vm7, %vm1181_vm5  ;;  %v1187_v21 = vor.u32 1.1754944e-38, %v1186_v5  ;;  %v1207_v14 = vor.u32 1.1754944e-38, %v1206_v16  ;;  %v4278_v16 = vld [vmem:[#allocation52_spill] sm:$0xff] }
 0x328   :  { %v1177_v19 = vsub.f32 1.0, %v1176_v24 }
 0x329   :  { %v1159_v17 = vmul.f32 %v2453_v23, %v1158_v7 }
 0x32a   :  { %v1178_v15 = vmul.f32 %v2455_v22, %v1177_v19 }
 0x32b   :  { %v2457_v6 = vpop.eup %2456  ;;  %v1160_v25 = vadd.f32 %v2453_v23, %v1159_v17 }
 0x32c   :  { %v1179_v10 = vadd.f32 %v2455_v22, %v1178_v15  ;;  %v1196_v4 = vmul.f32 %v2457_v6, %v1194_v27  ;;  %v2459_v11 = vpop.eup %2458  ;;  %vm1201_vm12 = vweird.f32 %v2457_v6  ;;  %v4267_v15 = vld [vmem:[#allocation41_spill] sm:$0xff] }
 0x32d   :  { %v1164_v24 = vsel %vm1163_vm8, %v2453_v23, %v1160_v25  ;;  %v1204_v23 = vand.u32 2147483647, %v1194_v27  ;;  %vm1202_vm14 = vmor %vm1200_vm13, %vm1201_vm12  ;;  %v4266_v27 = vld [vmem:[#allocation40_spill] sm:$0xff]  ;;  %v4268_v25 = vld [vmem:[#allocation43_spill] sm:$0xff] }
 0x32e   :  { %v1169_v3 = vsel %vm1166_vm10, %v1168_v20, %v1164_v24  ;;  %v1183_v7 = vsel %vm1182_vm9, %v2455_v22, %v1179_v10  ;;  %v1197_v2 = vsub.f32 1.0, %v1196_v4  ;;  %v4269_v20 = vld [vmem:[#allocation42_spill] sm:$0xff]  ;;  %v4270_v10 = vld [vmem:[#allocation44_spill] sm:$0xff]  ;;  %v4272_v24 = vld [vmem:[#allocation47_spill] sm:$0xff] }
 0x32f   :  { %v1188_v19 = vsel %vm1185_vm11, %v1187_v21, %v1183_v7  ;;  %v1211_v1 = vmul.f32 %v2459_v11, %v1169_v3  ;;  %vm1205_vm15 = vcmp.eq.f32.partialorder %v1204_v23, 8.507059e+37  ;;  %v4264_v3 = vld [vmem:[#allocation39_spill] sm:$0xff]  ;;  %v4271_v21 = vld [vmem:[#allocation45_spill] sm:$0xff]  ;;  %v4273_v11 = vld [vmem:[#allocation46_spill] sm:$0xff] }
 0x330   :  { %v1210_v12 = vmul.f32 %v1188_v19, %v3739_v9  ;;  %v1198_v17 = vmul.f32 %v2457_v6, %v1197_v2  ;;  %v4260_v9 = vld [vmem:[#allocation35_spill] sm:$0xff]  ;;  %v4263_v2 = vld [vmem:[#allocation37_spill] sm:$0xff]  ;;  %v4274_v7 = vld [vmem:[#allocation48_spill] sm:$0xff] }
 0x331   :  { %v4275_v19 = vld [vmem:[#allocation49_spill] sm:$0xff] }
 0x332   :  { %v3823_v28 = vadd.f32 %v1211_v1, %v1210_v12  ;;  %v1199_v8 = vadd.f32 %v2457_v6, %v1198_v17  ;;  %v4261_v12 = vld [vmem:[#allocation34_spill] sm:$0xff]  ;;  %v4262_v1 = vld [vmem:[#allocation36_spill] sm:$0xff]  ;;  %v4276_v17 = vld [vmem:[#allocation51_spill] sm:$0xff] }
 0x333   :  { %v4279_v23 = vld [vmem:[#allocation53_spill] sm:$0xff] }
 0x334   :  { %2460 = vtanh.f32 %v3823_v28  ;;  %v1203_v5 = vsel %vm1202_vm14, %v2457_v6, %v1199_v8  ;;  %v4265_v6 = vld [vmem:[#allocation38_spill] sm:$0xff] }
 0x335   :  { %v1208_v4 = vsel %vm1205_vm15, %v1207_v14, %v1203_v5  ;;  %v4277_v8 = vld [vmem:[#allocation50_spill] sm:$0xff]  ;;  %v4281_v14 = vld [vmem:[#allocation55_spill] sm:$0xff] }
 0x336   :  { %v4280_v5 = vld [vmem:[#allocation54_spill] sm:$0xff] }
 0x33a   :  { %v2461_v18 = vpop.eup %2460 }
 0x33b   :  { %v1214_v22 = vmul.f32 %v2461_v18, %v1208_v4  ;;  %v4282_v18 = vld [vmem:[#allocation56_spill] sm:$0xff]  ;;  %v4283_v4 = vld [vmem:[#allocation57_spill] sm:$0xff] }
 0x33d   :  { %1244 = vmatmul.f32.vlgmr.msrb.gmra.mxu0 %v1214_v22  ;;  %1264 = vmatmul.f32.vlgmr.msrb.gmra.mxu1 %v1214_v22 }
 0x33e   :  { %1284 = vmatmul.f32.vlgmr.msrb.gmra.mxu2 %v1214_v22  ;;  %1304 = vmatmul.f32.vlgmr.msrb.gmra.mxu3 %v1214_v22  ;;  %v4284_v22 = vld [vmem:[#allocation58_spill] sm:$0xff] }
 0x33f   :  { %1548 = vmatpush.msrb.mxu0 %v3554_v53  ;;  %1568 = vmatpush.msrb.mxu1 %v3557_v29 }
 0x340   :  { %1588 = vmatpush.msrb.mxu2 %v3560_v30  ;;  %1608 = vmatpush.msrb.mxu3 %v3563_v31 }
 0x341   :  { %1549 = vmatpush.msrb.mxu0 %v3566_v32  ;;  %1569 = vmatpush.msrb.mxu1 %v3569_v33 }
 0x342   :  { %1589 = vmatpush.msrb.mxu2 %v3572_v34  ;;  %1609 = vmatpush.msrb.mxu3 %v3575_v35 }
 0x343   :  { %1550 = vmatpush.msrb.mxu0 %v3578_v36  ;;  %1570 = vmatpush.msrb.mxu1 %v3581_v37 }
 0x344   :  { %1590 = vmatpush.msrb.mxu2 %v3584_v38  ;;  %1610 = vmatpush.msrb.mxu3 %v3587_v40 }
 0x345   :  { %1551 = vmatpush.msrb.mxu0 %v3590_v41  ;;  %1571 = vmatpush.msrb.mxu1 %v3593_v42 }
 0x346   :  { %1591 = vmatpush.msrb.mxu2 %v3596_v43  ;;  %1611 = vmatpush.msrb.mxu3 %v3599_v47 }
 0x347   :  { %1552 = vmatpush.msrb.mxu0 %v3602_v0  ;;  %1572 = vmatpush.msrb.mxu1 %v3605_v46 }
 0x348   :  { %1592 = vmatpush.msrb.mxu2 %v3608_v13  ;;  %1612 = vmatpush.msrb.mxu3 %v3611_v61 }
 0x349   :  { %1553 = vmatpush.msrb.mxu0 %v3614_v39  ;;  %1573 = vmatpush.msrb.mxu1 %v3617_v50 }
 0x34a   :  { %1593 = vmatpush.msrb.mxu2 %v3620_v63  ;;  %1613 = vmatpush.msrb.mxu3 %v3623_v49 }
 0x34b   :  { %1554 = vmatpush.msrb.mxu0 %v3626_v44  ;;  %1574 = vmatpush.msrb.mxu1 %v3629_v52 }
 0x34c   :  { %1594 = vmatpush.msrb.mxu2 %v3632_v45  ;;  %1614 = vmatpush.msrb.mxu3 %v3635_v51 }
 0x34d   :  { %1555 = vmatpush.msrb.mxu0 %v3638_v56  ;;  %1575 = vmatpush.msrb.mxu1 %v3641_v26 }
 0x34e   :  { %1595 = vmatpush.msrb.mxu2 %v3644_v48  ;;  %1615 = vmatpush.msrb.mxu3 %v3647_v57 }
 0x34f   :  { %1556 = vmatpush.msrb.mxu0 %v3650_v58  ;;  %1576 = vmatpush.msrb.mxu1 %v3653_v54 }
 0x350   :  { %1596 = vmatpush.msrb.mxu2 %v3656_v59  ;;  %1616 = vmatpush.msrb.mxu3 %v3659_v62 }
 0x351   :  { %1557 = vmatpush.msrb.mxu0 %v3662_v55  ;;  %1577 = vmatpush.msrb.mxu1 %v3665_v60 }
 0x352   :  { %1597 = vmatpush.msrb.mxu2 %v4260_v9  ;;  %1617 = vmatpush.msrb.mxu3 %v4261_v12 }
 0x353   :  { %1558 = vmatpush.msrb.mxu0 %v4262_v1  ;;  %1578 = vmatpush.msrb.mxu1 %v4263_v2 }
 0x354   :  { %1598 = vmatpush.msrb.mxu2 %v4264_v3  ;;  %1618 = vmatpush.msrb.mxu3 %v4265_v6 }
 0x355   :  { %1559 = vmatpush.msrb.mxu0 %v4266_v27  ;;  %1579 = vmatpush.msrb.mxu1 %v4267_v15 }
 0x356   :  { %1599 = vmatpush.msrb.mxu2 %v4268_v25  ;;  %1619 = vmatpush.msrb.mxu3 %v4269_v20 }
 0x357   :  { %1560 = vmatpush.msrb.mxu0 %v4270_v10  ;;  %1580 = vmatpush.msrb.mxu1 %v4271_v21 }
 0x358   :  { %1600 = vmatpush.msrb.mxu2 %v4272_v24  ;;  %1620 = vmatpush.msrb.mxu3 %v4273_v11  ;;  %v4286_v24 = vld [vmem:[#allocation72_spill] sm:$0xff]  ;;  %v4287_v11 = vld [vmem:[#allocation73_spill] sm:$0xff] }
 0x359   :  { %1561 = vmatpush.msrb.mxu0 %v4274_v7  ;;  %1581 = vmatpush.msrb.mxu1 %v4275_v19  ;;  %v4285_v7 = vld [vmem:[#allocation59_spill] sm:$0xff] }
 0x35a   :  { %1601 = vmatpush.msrb.mxu2 %v4276_v17  ;;  %1621 = vmatpush.msrb.mxu3 %v4277_v8 }
 0x35b   :  { %1562 = vmatpush.msrb.mxu0 %v4278_v16  ;;  %1582 = vmatpush.msrb.mxu1 %v4279_v23 }
 0x35c   :  { %1602 = vmatpush.msrb.mxu2 %v4280_v5  ;;  %1622 = vmatpush.msrb.mxu3 %v4281_v14  ;;  %v4288_v14 = vld [vmem:[#allocation75_spill] sm:$0xff] }
 0x35d   :  { %1563 = vmatpush.msrb.mxu0 %v4282_v18  ;;  %1583 = vmatpush.msrb.mxu1 %v4283_v4 }
 0x35e   :  { %1603 = vmatpush.msrb.mxu2 %v4284_v22  ;;  %1623 = vmatpush.msrb.mxu3 %v4285_v7 }
 0x3ba   :  { %v1245_v19 = vpop.f32.mrf.mxu0  ;;  %v1265_v17 = vpop.f32.mrf.mxu1 }
 0x3bb   :  { %v1308_v8 = vadd.f32 %v1245_v19, %v4286_v24  ;;  %v1309_v16 = vadd.f32 %v1265_v17, %v4287_v11  ;;  %v4289_v11 = vld [vmem:[#allocation74_spill] sm:$0xff] }
 0x3bd   :  { %v2365_v21 = vmul.f32 -1.442695, %v1308_v8  ;;  %v2366_v23 = vmul.f32 -1.442695, %v1309_v16 }
 0x3bf   :  { %2462 = vpow2.f32 %v2365_v21 }
 0x3c0   :  { %2464 = vpow2.f32 %v2366_v23 }
 0x3c1   :  { %v1305_v5 = vpop.f32.mrf.mxu3  ;;  %v1285_v7 = vpop.f32.mrf.mxu2 }
 0x3c2   :  { %v1311_v10 = vadd.f32 %v1305_v5, %v4288_v14  ;;  %v1310_v17 = vadd.f32 %v1285_v7, %v4289_v11 }
 0x3c4   :  { %v2367_v18 = vmul.f32 -1.442695, %v1311_v10 }
 0x3c5   :  { %v2463_v25 = vpop.eup %2462 }
 0x3c6   :  { %v2465_v4 = vpop.eup %2464  ;;  %v1315_v20 = vadd.f32 1.0, %v2463_v25  ;;  %2466 = vpow2.f32 %v2367_v18 }
 0x3c7   :  { %v1334_v22 = vadd.f32 1.0, %v2465_v4 }
 0x3c8   :  { %2468 = vrcp.f32 %v1315_v20  ;;  %v1327_v10 = vand.u32 2147483648, %v1315_v20  ;;  %v1325_v18 = vand.u32 2147483647, %v1315_v20  ;;  %vm1321_vm2 = vweird.f32 %v1315_v20 }
 0x3c9   :  { %2470 = vrcp.f32 %v1334_v22  ;;  %v1346_v14 = vand.u32 2147483648, %v1334_v22  ;;  %v1344_v27 = vand.u32 2147483647, %v1334_v22  ;;  %vm1340_vm3 = vweird.f32 %v1334_v22 }
 0x3ca   :  { %v1328_v7 = vor.u32 1.1754944e-38, %v1327_v10  ;;  %vm1326_vm6 = vcmp.eq.f32.partialorder %v1325_v18, 8.507059e+37 }
 0x3cb   :  { %vm1345_vm7 = vcmp.eq.f32.partialorder %v1344_v27, 8.507059e+37 }
 0x3cc   :  { %v2467_v15 = vpop.eup %2466 }
 0x3cd   :  { %v1354_v24 = vadd.f32 1.0, %v2467_v15 }
 0x3ce   :  { %v2469_v19 = vpop.eup %2468 }
 0x3cf   :  { %v2471_v8 = vpop.eup %2470  ;;  %v1317_v21 = vmul.f32 %v2469_v19, %v1315_v20  ;;  %2472 = vrcp.f32 %v1354_v24  ;;  %vm1322_vm0 = vweird.f32 %v2469_v19  ;;  %v1366_v10 = vand.u32 2147483648, %v1354_v24 }
 0x3d0   :  { %v1336_v16 = vmul.f32 %v2471_v8, %v1334_v22  ;;  %2474 = vtanh.f32 %v1310_v17  ;;  %vm1341_vm1 = vweird.f32 %v2471_v8  ;;  %vm1323_vm4 = vmor %vm1321_vm2, %vm1322_vm0  ;;  %vm1360_vm9 = vweird.f32 %v1354_v24 }
 0x3d1   :  { %v1318_v23 = vsub.f32 1.0, %v1317_v21  ;;  %vm1342_vm5 = vmor %vm1340_vm3, %vm1341_vm1  ;;  %v1347_v21 = vor.u32 1.1754944e-38, %v1346_v14  ;;  %v1367_v18 = vor.u32 1.1754944e-38, %v1366_v10 }
 0x3d2   :  { %v1337_v5 = vsub.f32 1.0, %v1336_v16 }
 0x3d3   :  { %v1319_v25 = vmul.f32 %v2469_v19, %v1318_v23 }
 0x3d4   :  { %v1338_v4 = vmul.f32 %v2471_v8, %v1337_v5 }
 0x3d5   :  { %v2473_v3 = vpop.eup %2472  ;;  %v1320_v15 = vadd.f32 %v2469_v19, %v1319_v25 }
 0x3d6   :  { %v1339_v11 = vadd.f32 %v2471_v8, %v1338_v4  ;;  %v1356_v6 = vmul.f32 %v2473_v3, %v1354_v24  ;;  %v2475_v17 = vpop.eup %2474  ;;  %vm1361_vm8 = vweird.f32 %v2473_v3 }
 0x3d7   :  { %v1324_v16 = vsel %vm1323_vm4, %v2469_v19, %v1320_v15  ;;  %v1364_v19 = vand.u32 2147483647, %v1354_v24  ;;  %vm1362_vm10 = vmor %vm1360_vm9, %vm1361_vm8  ;;  %v4319_v15 = vld [vmem:[#allocation78_spill] sm:$0xff] }
 0x3d8   :  { %v1329_v2 = vsel %vm1326_vm6, %v1328_v7, %v1324_v16  ;;  %v1343_v23 = vsel %vm1342_vm5, %v2471_v8, %v1339_v11  ;;  %v1357_v1 = vsub.f32 1.0, %v1356_v6 }
 0x3d9   :  { %v1348_v5 = vsel %vm1345_vm7, %v1347_v21, %v1343_v23  ;;  %v1371_v9 = vmul.f32 %v2475_v17, %v1329_v2  ;;  %vm1365_vm11 = vcmp.eq.f32.partialorder %v1364_v19, 8.507059e+37 }
 0x3da   :  { %v1370_v12 = vmul.f32 %v1348_v5, %v3823_v28  ;;  %v1358_v25 = vmul.f32 %v2473_v3, %v1357_v1 }
 0x3dc   :  { %v3895_v20 = vadd.f32 %v1371_v9, %v1370_v12  ;;  %v1359_v22 = vadd.f32 %v2473_v3, %v1358_v25 }
 0x3de   :  { %2476 = vtanh.f32 %v3895_v20  ;;  %v1363_v14 = vsel %vm1362_vm10, %v2473_v3, %v1359_v22 }
 0x3df   :  { %v1368_v6 = vsel %vm1365_vm11, %v1367_v18, %v1363_v14 }
 0x3e4   :  { %v2477_v27 = vpop.eup %2476 }
 0x3e5   :  { %v1374_v8 = vmul.f32 %v2477_v27, %v1368_v6 }
 0x3e7   :  { %1404 = vmatmul.f32.vlgmr.msra.gmra.mxu0 %v1374_v8  ;;  %1424 = vmatmul.f32.vlgmr.msra.gmra.mxu1 %v1374_v8 }
 0x3e8   :  { %1444 = vmatmul.f32.vlgmr.msra.gmra.mxu2 %v1374_v8  ;;  %1464 = vmatmul.f32.vlgmr.msra.gmra.mxu3 %v1374_v8 }
 0x3e9   :  { %1708 = vmatpush.msra.mxu0 %v3554_v53  ;;  %1728 = vmatpush.msra.mxu1 %v3557_v29  ;;  %v4290_v53 = vld [vmem:[#allocation34_spill] sm:$0xff]  ;;  %v4291_v29 = vld [vmem:[#allocation35_spill] sm:$0xff] }
 0x3ea   :  { %1768 = vmatpush.msra.mxu3 %v3563_v31  ;;  %1748 = vmatpush.msra.mxu2 %v3560_v30  ;;  %v4292_v30 = vld [vmem:[#allocation36_spill] sm:$0xff]  ;;  %v4293_v31 = vld [vmem:[#allocation37_spill] sm:$0xff] }
 0x3eb   :  { %1709 = vmatpush.msra.mxu0 %v3566_v32  ;;  %1729 = vmatpush.msra.mxu1 %v3569_v33  ;;  %v4294_v32 = vld [vmem:[#allocation38_spill] sm:$0xff]  ;;  %v4295_v33 = vld [vmem:[#allocation39_spill] sm:$0xff] }
 0x3ec   :  { %1769 = vmatpush.msra.mxu3 %v3575_v35  ;;  %1749 = vmatpush.msra.mxu2 %v3572_v34  ;;  %v4296_v34 = vld [vmem:[#allocation40_spill] sm:$0xff]  ;;  %v4297_v35 = vld [vmem:[#allocation41_spill] sm:$0xff] }
 0x3ed   :  { %1710 = vmatpush.msra.mxu0 %v3578_v36  ;;  %1730 = vmatpush.msra.mxu1 %v3581_v37  ;;  %v4298_v36 = vld [vmem:[#allocation42_spill] sm:$0xff]  ;;  %v4299_v37 = vld [vmem:[#allocation43_spill] sm:$0xff] }
 0x3ee   :  { %1770 = vmatpush.msra.mxu3 %v3587_v40  ;;  %1750 = vmatpush.msra.mxu2 %v3584_v38  ;;  %v4300_v38 = vld [vmem:[#allocation44_spill] sm:$0xff]  ;;  %v4301_v40 = vld [vmem:[#allocation45_spill] sm:$0xff] }
 0x3ef   :  { %1711 = vmatpush.msra.mxu0 %v3590_v41  ;;  %1731 = vmatpush.msra.mxu1 %v3593_v42  ;;  %v4302_v41 = vld [vmem:[#allocation46_spill] sm:$0xff]  ;;  %v4303_v42 = vld [vmem:[#allocation47_spill] sm:$0xff] }
 0x3f0   :  { %1771 = vmatpush.msra.mxu3 %v3599_v47  ;;  %1751 = vmatpush.msra.mxu2 %v3596_v43  ;;  %v4304_v43 = vld [vmem:[#allocation48_spill] sm:$0xff]  ;;  %v4305_v47 = vld [vmem:[#allocation49_spill] sm:$0xff] }
 0x3f1   :  { %1712 = vmatpush.msra.mxu0 %v3602_v0  ;;  %1732 = vmatpush.msra.mxu1 %v3605_v46  ;;  %v4306_v0 = vld [vmem:[#allocation50_spill] sm:$0xff]  ;;  %v4307_v46 = vld [vmem:[#allocation51_spill] sm:$0xff] }
 0x3f2   :  { %1772 = vmatpush.msra.mxu3 %v3611_v61  ;;  %1752 = vmatpush.msra.mxu2 %v3608_v13  ;;  %v4308_v13 = vld [vmem:[#allocation52_spill] sm:$0xff]  ;;  %v4309_v61 = vld [vmem:[#allocation53_spill] sm:$0xff] }
 0x3f3   :  { %1713 = vmatpush.msra.mxu0 %v3614_v39  ;;  %1733 = vmatpush.msra.mxu1 %v3617_v50  ;;  %v4310_v39 = vld [vmem:[#allocation55_spill] sm:$0xff]  ;;  %v4311_v50 = vld [vmem:[#allocation54_spill] sm:$0xff] }
 0x3f4   :  { %1773 = vmatpush.msra.mxu3 %v3623_v49  ;;  %1753 = vmatpush.msra.mxu2 %v3620_v63  ;;  %v4312_v63 = vld [vmem:[#allocation56_spill] sm:$0xff]  ;;  %v4313_v49 = vld [vmem:[#allocation57_spill] sm:$0xff] }
 0x3f5   :  { %1714 = vmatpush.msra.mxu0 %v3626_v44  ;;  %1734 = vmatpush.msra.mxu1 %v3629_v52  ;;  %v4314_v44 = vld [vmem:[#allocation59_spill] sm:$0xff]  ;;  %v4315_v52 = vld [vmem:[#allocation58_spill] sm:$0xff] }
 0x3f6   :  { %1774 = vmatpush.msra.mxu3 %v3635_v51  ;;  %1754 = vmatpush.msra.mxu2 %v3632_v45 }
 0x3f7   :  { %1715 = vmatpush.msra.mxu0 %v3638_v56  ;;  %1735 = vmatpush.msra.mxu1 %v3641_v26  ;;  %v4316_v56 = vld [vmem:[#allocation76_spill] sm:$0xff] }
 0x3f8   :  { %1775 = vmatpush.msra.mxu3 %v3647_v57  ;;  %1755 = vmatpush.msra.mxu2 %v3644_v48  ;;  %v4317_v48 = vld [vmem:[#allocation77_spill] sm:$0xff] }
 0x3f9   :  { %1716 = vmatpush.msra.mxu0 %v3650_v58  ;;  %1736 = vmatpush.msra.mxu1 %v3653_v54 }
 0x3fa   :  { %1776 = vmatpush.msra.mxu3 %v3659_v62  ;;  %1756 = vmatpush.msra.mxu2 %v3656_v59  ;;  %v4318_v62 = vld [vmem:[#allocation79_spill] sm:$0xff] }
 0x3fb   :  { %1717 = vmatpush.msra.mxu0 %v3662_v55  ;;  %1737 = vmatpush.msra.mxu1 %v3665_v60 }
 0x3fc   :  { %1777 = vmatpush.msra.mxu3 %v4290_v53  ;;  %1757 = vmatpush.msra.mxu2 %v4291_v29 }
 0x3fd   :  { %1718 = vmatpush.msra.mxu0 %v4292_v30  ;;  %1738 = vmatpush.msra.mxu1 %v4293_v31 }
 0x3fe   :  { %1778 = vmatpush.msra.mxu3 %v4294_v32  ;;  %1758 = vmatpush.msra.mxu2 %v4295_v33 }
 0x3ff   :  { %1719 = vmatpush.msra.mxu0 %v4296_v34  ;;  %1739 = vmatpush.msra.mxu1 %v4297_v35 }
 0x400   :  { %1779 = vmatpush.msra.mxu3 %v4298_v36  ;;  %1759 = vmatpush.msra.mxu2 %v4299_v37 }
 0x401   :  { %1720 = vmatpush.msra.mxu0 %v4300_v38  ;;  %1740 = vmatpush.msra.mxu1 %v4301_v40 }
 0x402   :  { %1780 = vmatpush.msra.mxu3 %v4302_v41  ;;  %1760 = vmatpush.msra.mxu2 %v4303_v42 }
 0x403   :  { %1721 = vmatpush.msra.mxu0 %v4304_v43  ;;  %1741 = vmatpush.msra.mxu1 %v4305_v47 }
 0x404   :  { %1781 = vmatpush.msra.mxu3 %v4306_v0  ;;  %1761 = vmatpush.msra.mxu2 %v4307_v46 }
 0x405   :  { %1722 = vmatpush.msra.mxu0 %v4308_v13  ;;  %1742 = vmatpush.msra.mxu1 %v4309_v61 }
 0x406   :  { %1782 = vmatpush.msra.mxu3 %v4310_v39  ;;  %1762 = vmatpush.msra.mxu2 %v4311_v50  ;;  %v1993_v39 = vld [vmem:[#allocation14 + $0x1e8] sm:$0xff]  ;;  %v1995_v50 = vld [vmem:[#allocation14 + $0x1f8] sm:$0xff] }
 0x407   :  { %1723 = vmatpush.msra.mxu0 %v4312_v63  ;;  %1743 = vmatpush.msra.mxu1 %v4313_v49  ;;  %v1988_v63 = vld [vmem:[#allocation14 + $0x1c0] sm:$0xff]  ;;  %v1989_v49 = vld [vmem:[#allocation14 + $0x1c8] sm:$0xff] }
 0x408   :  { %1783 = vmatpush.msra.mxu3 %v4314_v44  ;;  %1763 = vmatpush.msra.mxu2 %v4315_v52  ;;  %v1991_v44 = vld [vmem:[#allocation14 + $0x1d8] sm:$0xff]  ;;  %v1984_v52 = vld [vmem:[#allocation14 + $0x1a0] sm:$0xff] }
 0x464   :  { %v1405_v45 = vpop.f32.mrf.mxu0  ;;  %v1425_v51 = vpop.f32.mrf.mxu1 }
 0x465   :  { %v1468_v26 = vadd.f32 %v1405_v45, %v4316_v56  ;;  %v1469_v57 = vadd.f32 %v1425_v51, %v4317_v48  ;;  %v1985_v45 = vld [vmem:[#allocation14 + $0x1a8] sm:$0xff]  ;;  %v1987_v51 = vld [vmem:[#allocation14 + $0x1b8] sm:$0xff]  ;;  %v1980_v56 = vld [vmem:[#allocation14 + $0x180] sm:$0xff] }
 0x466   :  { %v1983_v48 = vld [vmem:[#allocation14 + $0x198] sm:$0xff] }
 0x467   :  { %v2368_v58 = vmul.f32 -1.442695, %v1468_v26  ;;  %v2369_v54 = vmul.f32 -1.442695, %v1469_v57  ;;  %v1981_v26 = vld [vmem:[#allocation14 + $0x188] sm:$0xff]  ;;  %v1994_v57 = vld [vmem:[#allocation14 + $0x1f0] sm:$0xff] }
 0x469   :  { %2478 = vpow2.f32 %v2368_v58  ;;  %v1976_v58 = vld [vmem:[#allocation14 + $0x160] sm:$0xff] }
 0x46a   :  { %2480 = vpow2.f32 %v2369_v54  ;;  %v1977_v54 = vld [vmem:[#allocation14 + $0x168] sm:$0xff] }
 0x46b   :  { %v1465_v59 = vpop.f32.mrf.mxu3  ;;  %v1445_v2 = vpop.f32.mrf.mxu2 }
 0x46c   :  { %v1471_v55 = vadd.f32 %v1465_v59, %v4318_v62  ;;  %v1470_v7 = vadd.f32 %v1445_v2, %v4319_v15  ;;  %v1979_v59 = vld [vmem:[#allocation14 + $0x178] sm:$0xff]  ;;  %v1990_v62 = vld [vmem:[#allocation14 + $0x1d0] sm:$0xff] }
 0x46d   :  { %v1971_v2 = vld [vmem:[#allocation14 + $0x138] sm:$0xff] }
 0x46e   :  { %v2370_v60 = vmul.f32 -1.442695, %v1471_v55  ;;  %v1972_v55 = vld [vmem:[#allocation14 + $0x140] sm:$0xff]  ;;  %v1967_v15 = vld [vmem:[#allocation14 + $0x118] sm:$0xff] }
 0x46f   :  { %v2479_v28 = vpop.eup %2478 }
 0x470   :  { %v2481_v9 = vpop.eup %2480  ;;  %v1475_v12 = vadd.f32 1.0, %v2479_v28  ;;  %2482 = vpow2.f32 %v2370_v60  ;;  %v1973_v60 = vld [vmem:[#allocation14 + $0x148] sm:$0xff]  ;;  %v1975_v28 = vld [vmem:[#allocation14 + $0x158] sm:$0xff] }
 0x471   :  { %v1494_v1 = vadd.f32 1.0, %v2481_v9  ;;  %v1986_v9 = vld [vmem:[#allocation14 + $0x1b0] sm:$0xff] }
 0x472   :  { %2484 = vrcp.f32 %v1475_v12  ;;  %v1487_v5 = vand.u32 2147483648, %v1475_v12  ;;  %v1485_v10 = vand.u32 2147483647, %v1475_v12  ;;  %vm1481_vm14 = vweird.f32 %v1475_v12 }
 0x473   :  { %2486 = vrcp.f32 %v1494_v1  ;;  %v1506_v25 = vand.u32 2147483648, %v1494_v1  ;;  %v1504_v14 = vand.u32 2147483647, %v1494_v1  ;;  %vm1500_vm15 = vweird.f32 %v1494_v1 }
 0x474   :  { %v1488_v6 = vor.u32 1.1754944e-38, %v1487_v5  ;;  %vm1486_vm2 = vcmp.eq.f32.partialorder %v1485_v10, 8.507059e+37  ;;  %v1957_v5 = vld [vmem:[#allocation14 + $0xc8] sm:$0xff] }
 0x475   :  { %v1507_v29 = vor.u32 1.1754944e-38, %v1506_v25  ;;  %vm1505_vm3 = vcmp.eq.f32.partialorder %v1504_v14, 8.507059e+37  ;;  %v1959_v25 = vld [vmem:[#allocation14 + $0xd8] sm:$0xff] }
 0x476   :  { %v2483_v3 = vpop.eup %2482  ;;  %v4320_v14 = vld [vmem:[#allocation80_spill] sm:$0xff] }
 0x477   :  { %v1514_v24 = vadd.f32 1.0, %v2483_v3  ;;  %v1982_v3 = vld [vmem:[#allocation14 + $0x190] sm:$0xff] }
 0x478   :  { %v2485_v4 = vpop.eup %2484 }
 0x479   :  { %v2487_v11 = vpop.eup %2486  ;;  %v1477_v21 = vmul.f32 %v2485_v4, %v1475_v12  ;;  %2488 = vrcp.f32 %v1514_v24  ;;  %vm1482_vm12 = vweird.f32 %v2485_v4  ;;  %v1526_v42 = vand.u32 2147483648, %v1514_v24  ;;  %v1968_v12 = vld [vmem:[#allocation14 + $0x120] sm:$0xff] }
 0x47a   :  { %v1496_v16 = vmul.f32 %v2487_v11, %v1494_v1  ;;  %2490 = vtanh.f32 %v1470_v7  ;;  %vm1501_vm13 = vweird.f32 %v2487_v11  ;;  %vm1483_vm0 = vmor %vm1481_vm14, %vm1482_vm12  ;;  %vm1520_vm5 = vweird.f32 %v1514_v24  ;;  %v1969_v1 = vld [vmem:[#allocation14 + $0x128] sm:$0xff]  ;;  %v1978_v7 = vld [vmem:[#allocation14 + $0x170] sm:$0xff] }
 0x47b   :  { %v1478_v17 = vsub.f32 1.0, %v1477_v21  ;;  %vm1502_vm1 = vmor %vm1500_vm15, %vm1501_vm13  ;;  %v1524_v43 = vand.u32 2147483647, %v1514_v24  ;;  %v1527_v0 = vor.u32 1.1754944e-38, %v1526_v42  ;;  %v1961_v21 = vld [vmem:[#allocation14 + $0xe8] sm:$0xff]  ;;  %v1958_v42 = vld [vmem:[#allocation14 + $0xd0] sm:$0xff] }
 0x47c   :  { %v1497_v23 = vsub.f32 1.0, %v1496_v16  ;;  %v1963_v16 = vld [vmem:[#allocation14 + $0xf8] sm:$0xff] }
 0x47d   :  { %v1479_v22 = vmul.f32 %v2485_v4, %v1478_v17  ;;  %vm1525_vm7 = vcmp.eq.f32.partialorder %v1524_v43, 8.507059e+37  ;;  %v1974_v17 = vld [vmem:[#allocation14 + $0x150] sm:$0xff]  ;;  %v1940_v43 = vld [vmem:[#allocation14 + $0x40] sm:$0xff] }
 0x47e   :  { %v1498_v19 = vmul.f32 %v2487_v11, %v1497_v23  ;;  %v1956_v23 = vld [vmem:[#allocation14 + $0xc0] sm:$0xff] }
 0x47f   :  { %v2489_v18 = vpop.eup %2488  ;;  %v1480_v27 = vadd.f32 %v2485_v4, %v1479_v22 }
 0x480   :  { %v1499_v8 = vadd.f32 %v2487_v11, %v1498_v19  ;;  %v1516_v53 = vmul.f32 %v2489_v18, %v1514_v24  ;;  %v2491_v31 = vpop.eup %2490  ;;  %vm1521_vm4 = vweird.f32 %v2489_v18  ;;  %v1964_v24 = vld [vmem:[#allocation14 + $0x100] sm:$0xff]  ;;  %v1970_v19 = vld [vmem:[#allocation14 + $0x130] sm:$0xff] }
 0x481   :  { %v1484_v30 = vsel %vm1483_vm0, %v2485_v4, %v1480_v27  ;;  %vm1522_vm6 = vmor %vm1520_vm5, %vm1521_vm4  ;;  %v1965_v4 = vld [vmem:[#allocation14 + $0x108] sm:$0xff]  ;;  %v4321_v27 = vld [vmem:[#allocation81_spill] sm:$0xff] }
 0x482   :  { %v1489_v32 = vsel %vm1486_vm2, %v1488_v6, %v1484_v30  ;;  %v1503_v33 = vsel %vm1502_vm1, %v2487_v11, %v1499_v8  ;;  %v1517_v34 = vsub.f32 1.0, %v1516_v53  ;;  %v1960_v11 = vld [vmem:[#allocation14 + $0xe0] sm:$0xff]  ;;  %v1953_v53 = vld [vmem:[#allocation14 + $0xa8] sm:$0xff]  ;;  %v1966_v30 = vld [vmem:[#allocation14 + $0x110] sm:$0xff] }
 0x483   :  { %v1508_v35 = vsel %vm1505_vm3, %v1507_v29, %v1503_v33  ;;  %v1531_v36 = vmul.f32 %v2491_v31, %v1489_v32  ;;  %v1952_v8 = vld [vmem:[#allocation14 + $0xa0] sm:$0xff]  ;;  %v1955_v29 = vld [vmem:[#allocation14 + $0xb8] sm:$0xff] }
 0x484   :  { %v1530_v37 = vmul.f32 %v1508_v35, %v3895_v20  ;;  %v1518_v38 = vmul.f32 %v2489_v18, %v1517_v34  ;;  %v1992_v20 = vld [vmem:[#allocation14 + $0x1e0] sm:$0xff]  ;;  %v1949_v34 = vld [vmem:[#allocation14 + $0x88] sm:$0xff]  ;;  %v1951_v35 = vld [vmem:[#allocation14 + $0x98] sm:$0xff] }
 0x485   :  { %v1948_v33 = vld [vmem:[#allocation14 + $0x80] sm:$0xff] }
 0x486   :  { %v3967_v40 = vadd.f32 %v1531_v36, %v1530_v37  ;;  %v1519_v41 = vadd.f32 %v2489_v18, %v1518_v38  ;;  %v1962_v36 = vld [vmem:[#allocation14 + $0xf0] sm:$0xff]  ;;  %v1944_v37 = vld [vmem:[#allocation14 + $0x60] sm:$0xff]  ;;  %v1945_v38 = vld [vmem:[#allocation14 + $0x68] sm:$0xff] }
 0x488   :  { %2492 = vtanh.f32 %v3967_v40  ;;  %v1523_v47 = vsel %vm1522_vm6, %v2489_v18, %v1519_v41  ;;  %v1947_v41 = vld [vmem:[#allocation14 + $0x78] sm:$0xff] }
 0x489   :  { %v1528_v13 = vsel %vm1525_vm7, %v1527_v0, %v1523_v47  ;;  %v1941_v47 = vld [vmem:[#allocation14 + $0x48] sm:$0xff]  ;;  %v1943_v0 = vld [vmem:[#allocation14 + $0x58] sm:$0xff] }
 0x48e   :  { %v2493_v46 = vpop.eup %2492 }
 0x48f   :  { %v1534_v61 = vmul.f32 %v2493_v46, %v1528_v13  ;;  %v1954_v13 = vld [vmem:[#allocation14 + $0xb0] sm:$0xff] }
 0x491   :  { %1564 = vmatmul.f32.vlgmr.msrb.gmra.mxu0 %v1534_v61  ;;  %1584 = vmatmul.f32.vlgmr.msrb.gmra.mxu1 %v1534_v61 }
 0x492   :  { %1604 = vmatmul.f32.vlgmr.msrb.gmra.mxu2 %v1534_v61  ;;  %1624 = vmatmul.f32.vlgmr.msrb.gmra.mxu3 %v1534_v61  ;;  %v1936_v61 = vld [vmem:[#allocation14 + $0x20] sm:$0xff] }
 0x493   :  { %1996 = vmatpush.msrb.mxu0 %v1992_v20  ;;  %2016 = vmatpush.msrb.mxu1 %v1993_v39  ;;  %v1937_v20 = vld [vmem:[#allocation14 + $0x28] sm:$0xff] }
 0x494   :  { %2056 = vmatpush.msrb.mxu3 %v1995_v50  ;;  %2036 = vmatpush.msrb.mxu2 %v1994_v57  ;;  %v4322_v39 = vld [vmem:[#allocation83_spill] sm:$0xff] }
 0x495   :  { %1997 = vmatpush.msrb.mxu0 %v1988_v63  ;;  %2017 = vmatpush.msrb.mxu1 %v1989_v49  ;;  %v1939_v63 = vld [vmem:[#allocation14 + $0x38] sm:$0xff]  ;;  %v1950_v49 = vld [vmem:[#allocation14 + $0x90] sm:$0xff] }
 0x496   :  { %2057 = vmatpush.msrb.mxu3 %v1991_v44  ;;  %2037 = vmatpush.msrb.mxu2 %v1990_v62  ;;  %v1932_v44 = vld [vmem:[#allocation14] sm:$0xff] }
 0x497   :  { %1998 = vmatpush.msrb.mxu0 %v1984_v52  ;;  %2018 = vmatpush.msrb.mxu1 %v1985_v45  ;;  %v1933_v52 = vld [vmem:[#allocation14 + $0x8] sm:$0xff] }
 0x498   :  { %2058 = vmatpush.msrb.mxu3 %v1987_v51  ;;  %2038 = vmatpush.msrb.mxu2 %v1986_v9  ;;  %v1935_v51 = vld [vmem:[#allocation14 + $0x18] sm:$0xff]  ;;  %v4323_v9 = vld [vmem:[#allocation82_spill] sm:$0xff] }
 0x499   :  { %1999 = vmatpush.msrb.mxu0 %v1980_v56  ;;  %2019 = vmatpush.msrb.mxu1 %v1981_v26 }
 0x49a   :  { %2059 = vmatpush.msrb.mxu3 %v1983_v48  ;;  %2039 = vmatpush.msrb.mxu2 %v1982_v3 }
 0x49b   :  { %2000 = vmatpush.msrb.mxu0 %v1976_v58  ;;  %2020 = vmatpush.msrb.mxu1 %v1977_v54  ;;  %v1946_v58 = vld [vmem:[#allocation14 + $0x70] sm:$0xff] }
 0x49c   :  { %2060 = vmatpush.msrb.mxu3 %v1979_v59  ;;  %2040 = vmatpush.msrb.mxu2 %v1978_v7  ;;  %v1942_v54 = vld [vmem:[#allocation14 + $0x50] sm:$0xff] }
 0x49d   :  { %2001 = vmatpush.msrb.mxu0 %v1972_v55  ;;  %2021 = vmatpush.msrb.mxu1 %v1973_v60  ;;  %v1938_v55 = vld [vmem:[#allocation14 + $0x30] sm:$0xff] }
 0x49e   :  { %2061 = vmatpush.msrb.mxu3 %v1975_v28  ;;  %2041 = vmatpush.msrb.mxu2 %v1974_v17 }
 0x49f   :  { %2002 = vmatpush.msrb.mxu0 %v1968_v12  ;;  %2022 = vmatpush.msrb.mxu1 %v1969_v1  ;;  %v1934_v1 = vld [vmem:[#allocation14 + $0x10] sm:$0xff] }
 0x4a0   :  { %2062 = vmatpush.msrb.mxu3 %v1971_v2  ;;  %2042 = vmatpush.msrb.mxu2 %v1970_v19 }
 0x4a1   :  { %2003 = vmatpush.msrb.mxu0 %v1964_v24  ;;  %2023 = vmatpush.msrb.mxu1 %v1965_v4 }
 0x4a2   :  { %2063 = vmatpush.msrb.mxu3 %v1967_v15  ;;  %2043 = vmatpush.msrb.mxu2 %v1966_v30 }
 0x4a3   :  { %2004 = vmatpush.msrb.mxu0 %v1960_v11  ;;  %2024 = vmatpush.msrb.mxu1 %v1961_v21 }
 0x4a4   :  { %2064 = vmatpush.msrb.mxu3 %v1963_v16  ;;  %2044 = vmatpush.msrb.mxu2 %v1962_v36 }
 0x4a5   :  { %2005 = vmatpush.msrb.mxu0 %v1956_v23  ;;  %2025 = vmatpush.msrb.mxu1 %v1957_v5 }
 0x4a6   :  { %2065 = vmatpush.msrb.mxu3 %v1959_v25  ;;  %2045 = vmatpush.msrb.mxu2 %v1958_v42 }
 0x4a7   :  { %2006 = vmatpush.msrb.mxu0 %v1952_v8  ;;  %2026 = vmatpush.msrb.mxu1 %v1953_v53 }
 0x4a8   :  { %2066 = vmatpush.msrb.mxu3 %v1955_v29  ;;  %2046 = vmatpush.msrb.mxu2 %v1954_v13  ;;  %v1923_v13 = vld [vmem:[#allocation13 + $0x1c0] sm:$0xff] }
 0x4a9   :  { %2007 = vmatpush.msrb.mxu0 %v1948_v33  ;;  %2027 = vmatpush.msrb.mxu1 %v1949_v34 }
 0x4aa   :  { %2067 = vmatpush.msrb.mxu3 %v1951_v35  ;;  %2047 = vmatpush.msrb.mxu2 %v1950_v49  ;;  %v1922_v49 = vld [vmem:[#allocation13 + $0x1b8] sm:$0xff] }
 0x4ab   :  { %2008 = vmatpush.msrb.mxu0 %v1944_v37  ;;  %2028 = vmatpush.msrb.mxu1 %v1945_v38 }
 0x4ac   :  { %2068 = vmatpush.msrb.mxu3 %v1947_v41  ;;  %2048 = vmatpush.msrb.mxu2 %v1946_v58  ;;  %v1913_v58 = vld [vmem:[#allocation13 + $0x170] sm:$0xff] }
 0x4ad   :  { %2009 = vmatpush.msrb.mxu0 %v1940_v43  ;;  %2029 = vmatpush.msrb.mxu1 %v1941_v47  ;;  %v1927_v47 = vld [vmem:[#allocation13 + $0x1e0] sm:$0xff] }
 0x4ae   :  { %2069 = vmatpush.msrb.mxu3 %v1943_v0  ;;  %2049 = vmatpush.msrb.mxu2 %v1942_v54  ;;  %v1928_v0 = vld [vmem:[#allocation13 + $0x1e8] sm:$0xff]  ;;  %v1907_v54 = vld [vmem:[#allocation13 + $0x140] sm:$0xff] }
 0x4af   :  { %2010 = vmatpush.msrb.mxu0 %v1936_v61  ;;  %2030 = vmatpush.msrb.mxu1 %v1937_v20  ;;  %v1924_v61 = vld [vmem:[#allocation13 + $0x1c8] sm:$0xff]  ;;  %v1926_v20 = vld [vmem:[#allocation13 + $0x1d8] sm:$0xff] }
 0x4b0   :  { %2070 = vmatpush.msrb.mxu3 %v1939_v63  ;;  %2050 = vmatpush.msrb.mxu2 %v1938_v55  ;;  %v1920_v63 = vld [vmem:[#allocation13 + $0x1a8] sm:$0xff]  ;;  %v1909_v55 = vld [vmem:[#allocation13 + $0x150] sm:$0xff] }
 0x4b1   :  { %2011 = vmatpush.msrb.mxu0 %v1932_v44  ;;  %2031 = vmatpush.msrb.mxu1 %v1933_v52  ;;  %v1921_v44 = vld [vmem:[#allocation13 + $0x1b0] sm:$0xff]  ;;  %v1915_v52 = vld [vmem:[#allocation13 + $0x180] sm:$0xff] }
 0x4b2   :  { %2071 = vmatpush.msrb.mxu3 %v1935_v51  ;;  %2051 = vmatpush.msrb.mxu2 %v1934_v1  ;;  %v1918_v51 = vld [vmem:[#allocation13 + $0x198] sm:$0xff]  ;;  %v1899_v1 = vld [vmem:[#allocation13 + $0x100] sm:$0xff] }
 0x50e   :  { %v1565_v22 = vpop.f32.mrf.mxu0  ;;  %v1585_v10 = vpop.f32.mrf.mxu1 }
 0x50f   :  { %v1628_v18 = vadd.f32 %v1565_v22, %v4320_v14  ;;  %v1629_v6 = vadd.f32 %v1585_v10, %v4321_v27 }
 0x511   :  { %v2371_v31 = vmul.f32 -1.442695, %v1628_v18  ;;  %v2372_v32 = vmul.f32 -1.442695, %v1629_v6 }
 0x513   :  { %2494 = vpow2.f32 %v2371_v31 }
 0x514   :  { %2496 = vpow2.f32 %v2372_v32 }
 0x515   :  { %v1625_v46 = vpop.f32.mrf.mxu3  ;;  %v1605_v59 = vpop.f32.mrf.mxu2 }
 0x516   :  { %v1631_v50 = vadd.f32 %v1625_v46, %v4322_v39  ;;  %v1630_v12 = vadd.f32 %v1605_v59, %v4323_v9  ;;  %v1929_v46 = vld [vmem:[#allocation13 + $0x1f0] sm:$0xff]  ;;  %v1908_v59 = vld [vmem:[#allocation13 + $0x148] sm:$0xff]  ;;  %v1906_v9 = vld [vmem:[#allocation13 + $0x138] sm:$0xff] }
 0x517   :  { %v1925_v39 = vld [vmem:[#allocation13 + $0x1d0] sm:$0xff] }
 0x518   :  { %v2373_v45 = vmul.f32 -1.442695, %v1631_v50  ;;  %v1919_v50 = vld [vmem:[#allocation13 + $0x1a0] sm:$0xff] }
 0x519   :  { %v2495_v56 = vpop.eup %2494 }
 0x51a   :  { %v2497_v26 = vpop.eup %2496  ;;  %v1635_v48 = vadd.f32 1.0, %v2495_v56  ;;  %2498 = vpow2.f32 %v2373_v45  ;;  %v1916_v45 = vld [vmem:[#allocation13 + $0x188] sm:$0xff]  ;;  %v1917_v56 = vld [vmem:[#allocation13 + $0x190] sm:$0xff] }
 0x51b   :  { %v1654_v57 = vadd.f32 1.0, %v2497_v26  ;;  %v1911_v26 = vld [vmem:[#allocation13 + $0x160] sm:$0xff] }
 0x51c   :  { %2500 = vrcp.f32 %v1635_v48  ;;  %v1647_v7 = vand.u32 2147483648, %v1635_v48  ;;  %v1645_v16 = vand.u32 2147483647, %v1635_v48  ;;  %vm1641_vm10 = vweird.f32 %v1635_v48 }
 0x51d   :  { %2502 = vrcp.f32 %v1654_v57  ;;  %v1666_v11 = vand.u32 2147483648, %v1654_v57  ;;  %v1664_v23 = vand.u32 2147483647, %v1654_v57  ;;  %vm1660_vm11 = vweird.f32 %v1654_v57 }
 0x51e   :  { %v1648_v22 = vor.u32 1.1754944e-38, %v1647_v7  ;;  %vm1646_vm14 = vcmp.eq.f32.partialorder %v1645_v16, 8.507059e+37  ;;  %v1898_v7 = vld [vmem:[#allocation13 + $0xf8] sm:$0xff]  ;;  %v1892_v16 = vld [vmem:[#allocation13 + $0xc8] sm:$0xff] }
 0x51f   :  { %v1667_v14 = vor.u32 1.1754944e-38, %v1666_v11  ;;  %vm1665_vm15 = vcmp.eq.f32.partialorder %v1664_v23, 8.507059e+37  ;;  %v1931_v11 = vld [vmem:[%s4027_s9] sm:$0xff] }
 0x520   :  { %v2499_v62 = vpop.eup %2498  ;;  %v1887_v23 = vld [vmem:[#allocation13 + $0xa0] sm:$0xff] }
 0x521   :  { %v1674_v60 = vadd.f32 1.0, %v2499_v62  ;;  %v1910_v62 = vld [vmem:[#allocation13 + $0x158] sm:$0xff] }
 0x522   :  { %v2501_v28 = vpop.eup %2500 }
 0x523   :  { %v2503_v2 = vpop.eup %2502  ;;  %v1637_v3 = vmul.f32 %v2501_v28, %v1635_v48  ;;  %2504 = vrcp.f32 %v1674_v60  ;;  %vm1642_vm8 = vweird.f32 %v2501_v28  ;;  %v1686_v35 = vand.u32 2147483648, %v1674_v60  ;;  %v1912_v48 = vld [vmem:[#allocation13 + $0x168] sm:$0xff] }
 0x524   :  { %v1656_v24 = vmul.f32 %v2503_v2, %v1654_v57  ;;  %2506 = vtanh.f32 %v1630_v12  ;;  %vm1661_vm9 = vweird.f32 %v2503_v2  ;;  %vm1643_vm12 = vmor %vm1641_vm10, %vm1642_vm8  ;;  %vm1680_vm1 = vweird.f32 %v1674_v60  ;;  %v1914_v57 = vld [vmem:[#allocation13 + $0x178] sm:$0xff]  ;;  %v1905_v12 = vld [vmem:[#allocation13 + $0x130] sm:$0xff] }
 0x525   :  { %v1638_v4 = vsub.f32 1.0, %v1637_v3  ;;  %vm1662_vm13 = vmor %vm1660_vm11, %vm1661_vm9  ;;  %v1684_v36 = vand.u32 2147483647, %v1674_v60  ;;  %v1687_v38 = vor.u32 1.1754944e-38, %v1686_v35  ;;  %v1902_v3 = vld [vmem:[#allocation13 + $0x118] sm:$0xff]  ;;  %v1872_v35 = vld [vmem:[#allocation13 + $0x28] sm:$0xff] }
 0x526   :  { %v1657_v15 = vsub.f32 1.0, %v1656_v24  ;;  %v1901_v24 = vld [vmem:[#allocation13 + $0x110] sm:$0xff] }
 0x527   :  { %v1639_v21 = vmul.f32 %v2501_v28, %v1638_v4  ;;  %vm1685_vm3 = vcmp.eq.f32.partialorder %v1684_v36, 8.507059e+37  ;;  %v1895_v4 = vld [vmem:[#allocation13 + $0xe0] sm:$0xff]  ;;  %v1874_v36 = vld [vmem:[#allocation13 + $0x38] sm:$0xff] }
 0x528   :  { %v1658_v17 = vmul.f32 %v2503_v2, %v1657_v15  ;;  %v1896_v15 = vld [vmem:[#allocation13 + $0xe8] sm:$0xff] }
 0x529   :  { %v2505_v5 = vpop.eup %2504  ;;  %v1640_v25 = vadd.f32 %v2501_v28, %v1639_v21  ;;  %v1891_v21 = vld [vmem:[#allocation13 + $0xc0] sm:$0xff] }
 0x52a   :  { %v1659_v10 = vadd.f32 %v2503_v2, %v1658_v17  ;;  %v1676_v19 = vmul.f32 %v2505_v5, %v1674_v60  ;;  %v2507_v27 = vpop.eup %2506  ;;  %vm1681_vm0 = vweird.f32 %v2505_v5  ;;  %v1903_v60 = vld [vmem:[#allocation13 + $0x120] sm:$0xff]  ;;  %v1894_v17 = vld [vmem:[#allocation13 + $0xd8] sm:$0xff] }
 0x52b   :  { %v1644_v18 = vsel %vm1643_vm12, %v2501_v28, %v1640_v25  ;;  %vm1682_vm2 = vmor %vm1680_vm1, %vm1681_vm0  ;;  %v1904_v28 = vld [vmem:[#allocation13 + $0x128] sm:$0xff]  ;;  %v1890_v25 = vld [vmem:[#allocation13 + $0xb8] sm:$0xff] }
 0x52c   :  { %v1649_v6 = vsel %vm1646_vm14, %v1648_v22, %v1644_v18  ;;  %v1663_v8 = vsel %vm1662_vm13, %v2503_v2, %v1659_v10  ;;  %v1677_v53 = vsub.f32 1.0, %v1676_v19  ;;  %v1900_v2 = vld [vmem:[#allocation13 + $0x108] sm:$0xff]  ;;  %v1897_v22 = vld [vmem:[#allocation13 + $0xf0] sm:$0xff]  ;;  %v1883_v10 = vld [vmem:[#allocation13 + $0x80] sm:$0xff] }
 0x52d   :  { %v1668_v29 = vsel %vm1665_vm15, %v1667_v14, %v1663_v8  ;;  %v1691_v30 = vmul.f32 %v2507_v27, %v1649_v6  ;;  %v1884_v19 = vld [vmem:[#allocation13 + $0x88] sm:$0xff]  ;;  %v1886_v14 = vld [vmem:[#allocation13 + $0x98] sm:$0xff]  ;;  %v1893_v18 = vld [vmem:[#allocation13 + $0xd0] sm:$0xff] }
 0x52e   :  { %v1690_v31 = vmul.f32 %v1668_v29, %v3967_v40  ;;  %v1678_v32 = vmul.f32 %v2505_v5, %v1677_v53  ;;  %v1930_v40 = vld [vmem:[#allocation13 + $0x1f8] sm:$0xff]  ;;  %v1879_v27 = vld [vmem:[#allocation13 + $0x60] sm:$0xff]  ;;  %v1880_v6 = vld [vmem:[#allocation13 + $0x68] sm:$0xff] }
 0x52f   :  { %v1882_v8 = vld [vmem:[#allocation13 + $0x78] sm:$0xff]  ;;  %v1875_v53 = vld [vmem:[#allocation13 + $0x40] sm:$0xff]  ;;  %v1889_v29 = vld [vmem:[#allocation13 + $0xb0] sm:$0xff] }
 0x530   :  { %v3975_v33 = vadd.f32 %v1691_v30, %v1690_v31  ;;  %v1679_v34 = vadd.f32 %v2505_v5, %v1678_v32  ;;  %v1876_v30 = vld [vmem:[#allocation13 + $0x48] sm:$0xff]  ;;  %v1878_v31 = vld [vmem:[#allocation13 + $0x58] sm:$0xff]  ;;  %v1871_v32 = vld [vmem:[#allocation13 + $0x20] sm:$0xff] }
 0x532   :  { %2508 = vtanh.f32 %v3975_v33  ;;  %v1683_v37 = vsel %vm1682_vm2, %v2505_v5, %v1679_v34  ;;  %v1888_v5 = vld [vmem:[#allocation13 + $0xa8] sm:$0xff]  ;;  %v1885_v34 = vld [vmem:[#allocation13 + $0x90] sm:$0xff] }
 0x533   :  { %v1688_v42 = vsel %vm1685_vm3, %v1687_v38, %v1683_v37  ;;  %v1867_v37 = vld [vmem:[#allocation13] sm:$0xff]  ;;  %v1868_v38 = vld [vmem:[#allocation13 + $0x8] sm:$0xff] }
 0x538   :  { %v2509_v41 = vpop.eup %2508 }
 0x539   :  { %v1694_v43 = vmul.f32 %v2509_v41, %v1688_v42  ;;  %v1870_v41 = vld [vmem:[#allocation13 + $0x18] sm:$0xff] }
 0x53a   :  { %v1866_v42 = vld [vmem:[#allocation5 + $0x38] sm:$0xff] }
 0x53b   :  { %1724 = vmatmul.f32.vlgmr.msra.gmra.mxu0 %v1694_v43  ;;  %1744 = vmatmul.f32.vlgmr.msra.gmra.mxu1 %v1694_v43 }
 0x53c   :  { %1764 = vmatmul.f32.vlgmr.msra.gmra.mxu2 %v1694_v43  ;;  %1784 = vmatmul.f32.vlgmr.msra.gmra.mxu3 %v1694_v43  ;;  %v1881_v43 = vld [vmem:[#allocation13 + $0x70] sm:$0xff] }
 0x53d   :  { %2076 = vmatpush.msra.mxu0 %v1927_v47  ;;  %2096 = vmatpush.msra.mxu1 %v1928_v0  ;;  %v1877_v47 = vld [vmem:[#allocation13 + $0x50] sm:$0xff] }
 0x53e   :  { %2136 = vmatpush.msra.mxu3 %v1930_v40  ;;  %2116 = vmatpush.msra.mxu2 %v1929_v46  ;;  %v1873_v0 = vld [vmem:[#allocation13 + $0x30] sm:$0xff] }
 0x53f   :  { %2077 = vmatpush.msra.mxu0 %v1923_v13  ;;  %2097 = vmatpush.msra.mxu1 %v1924_v61  ;;  %v1869_v40 = vld [vmem:[#allocation13 + $0x10] sm:$0xff]  ;;  %v2247_v61 = vld [vmem:[#allocation22 + $0x68] sm:$0xff] }
 0x540   :  { %2137 = vmatpush.msra.mxu3 %v1926_v20  ;;  %2117 = vmatpush.msra.mxu2 %v1925_v39  ;;  %v2249_v46 = vld [vmem:[#allocation22 + $0x78] sm:$0xff]  ;;  %v2248_v13 = vld [vmem:[#allocation22 + $0x70] sm:$0xff]  ;;  %v2246_v20 = vld [vmem:[#allocation22 + $0x60] sm:$0xff] }
 0x541   :  { %2078 = vmatpush.msra.mxu0 %v1919_v50  ;;  %2098 = vmatpush.msra.mxu1 %v1920_v63  ;;  %v2245_v39 = vld [vmem:[#allocation22 + $0x58] sm:$0xff]  ;;  %v2244_v50 = vld [vmem:[#allocation22 + $0x50] sm:$0xff]  ;;  %v2243_v63 = vld [vmem:[#allocation22 + $0x48] sm:$0xff] }
 0x542   :  { %2138 = vmatpush.msra.mxu3 %v1922_v49  ;;  %2118 = vmatpush.msra.mxu2 %v1921_v44  ;;  %v2242_v49 = vld [vmem:[#allocation22 + $0x40] sm:$0xff] }
 0x543   :  { %2079 = vmatpush.msra.mxu0 %v1915_v52  ;;  %2099 = vmatpush.msra.mxu1 %v1916_v45  ;;  %v2241_v45 = vld [vmem:[#allocation22 + $0x38] sm:$0xff] }
 0x544   :  { %2139 = vmatpush.msra.mxu3 %v1918_v51  ;;  %2119 = vmatpush.msra.mxu2 %v1917_v56  ;;  %v4324_v51 = vld [vmem:[#allocation84_spill] sm:$0xff] }
 0x545   :  { %2080 = vmatpush.msra.mxu0 %v1911_v26  ;;  %2100 = vmatpush.msra.mxu1 %v1912_v48  ;;  %v4325_v26 = vld [vmem:[#allocation85_spill] sm:$0xff] }
 0x546   :  { %2140 = vmatpush.msra.mxu3 %v1914_v57  ;;  %2120 = vmatpush.msra.mxu2 %v1913_v58  ;;  %v2240_v57 = vld [vmem:[#allocation22 + $0x30] sm:$0xff] }
 0x547   :  { %2081 = vmatpush.msra.mxu0 %v1907_v54  ;;  %2101 = vmatpush.msra.mxu1 %v1908_v59  ;;  %v2239_v59 = vld [vmem:[#allocation22 + $0x28] sm:$0xff] }
 0x548   :  { %2141 = vmatpush.msra.mxu3 %v1910_v62  ;;  %2121 = vmatpush.msra.mxu2 %v1909_v55  ;;  %v2238_v62 = vld [vmem:[#allocation22 + $0x20] sm:$0xff] }
 0x549   :  { %2082 = vmatpush.msra.mxu0 %v1903_v60  ;;  %2102 = vmatpush.msra.mxu1 %v1904_v28  ;;  %v4326_v60 = vld [vmem:[#allocation87_spill] sm:$0xff] }
 0x54a   :  { %2142 = vmatpush.msra.mxu3 %v1906_v9  ;;  %2122 = vmatpush.msra.mxu2 %v1905_v12  ;;  %v2237_v9 = vld [vmem:[#allocation22 + $0x18] sm:$0xff] }
 0x54b   :  { %2083 = vmatpush.msra.mxu0 %v1899_v1  ;;  %2103 = vmatpush.msra.mxu1 %v1900_v2  ;;  %v2236_v1 = vld [vmem:[#allocation22 + $0x10] sm:$0xff] }
 0x54c   :  { %2143 = vmatpush.msra.mxu3 %v1902_v3  ;;  %2123 = vmatpush.msra.mxu2 %v1901_v24 }
 0x54d   :  { %2084 = vmatpush.msra.mxu0 %v1895_v4  ;;  %2104 = vmatpush.msra.mxu1 %v1896_v15  ;;  %v2235_v4 = vld [vmem:[#allocation22 + $0x8] sm:$0xff] }
 0x54e   :  { %2144 = vmatpush.msra.mxu3 %v1898_v7  ;;  %2012 = vmatmul.f32.vlgmr.msrb.gmra.mxu0 %v1931_v11  ;;  %v2234_v7 = vld [vmem:[#allocation22] sm:$0xff] }
 0x54f   :  { %2085 = vmatpush.msra.mxu0 %v1891_v21  ;;  %2105 = vmatpush.msra.mxu1 %v1892_v16  ;;  %v2265_v16 = vld [vmem:[#allocation23 + $0x78] sm:$0xff] }
 0x550   :  { %2145 = vmatpush.msra.mxu3 %v1894_v17  ;;  %2032 = vmatmul.f32.vlgmr.msrb.gmra.mxu1 %v1931_v11 }
 0x551   :  { %2086 = vmatpush.msra.mxu0 %v1887_v23  ;;  %2106 = vmatpush.msra.mxu1 %v1888_v5  ;;  %v4327_v5 = vld [vmem:[#allocation86_spill] sm:$0xff] }
 0x552   :  { %2146 = vmatpush.msra.mxu3 %v1890_v25  ;;  %2124 = vmatpush.msra.mxu2 %v1897_v22  ;;  %v2264_v22 = vld [vmem:[#allocation23 + $0x70] sm:$0xff] }
 0x553   :  { %2087 = vmatpush.msra.mxu0 %v1883_v10  ;;  %2107 = vmatpush.msra.mxu1 %v1884_v19 }
 0x554   :  { %2147 = vmatpush.msra.mxu3 %v1886_v14  ;;  %2125 = vmatpush.msra.mxu2 %v1893_v18  ;;  %v2263_v18 = vld [vmem:[#allocation23 + $0x68] sm:$0xff] }
 0x555   :  { %2072 = vmatmul.f32.vlgmr.msrb.gmra.mxu3 %v1931_v11  ;;  %2088 = vmatpush.msra.mxu0 %v1879_v27 }
 0x556   :  { %2108 = vmatpush.msra.mxu1 %v1880_v6  ;;  %2148 = vmatpush.msra.mxu3 %v1882_v8 }
 0x557   :  { %2089 = vmatpush.msra.mxu0 %v1875_v53  ;;  %2126 = vmatpush.msra.mxu2 %v1889_v29 }
 0x558   :  { %2109 = vmatpush.msra.mxu1 %v1876_v30  ;;  %2149 = vmatpush.msra.mxu3 %v1878_v31  ;;  %v2262_v30 = vld [vmem:[#allocation23 + $0x60] sm:$0xff] }
 0x559   :  { %2090 = vmatpush.msra.mxu0 %v1871_v32  ;;  %2127 = vmatpush.msra.mxu2 %v1885_v34 }
 0x55a   :  { %2110 = vmatpush.msra.mxu1 %v1872_v35  ;;  %2150 = vmatpush.msra.mxu3 %v1874_v36 }
 0x55b   :  { %2052 = vmatmul.f32.vlgmr.msrb.gmra.mxu2 %v1931_v11  ;;  %2091 = vmatpush.msra.mxu0 %v1867_v37  ;;  %v2261_v37 = vld [vmem:[#allocation23 + $0x58] sm:$0xff] }
 0x55c   :  { %2111 = vmatpush.msra.mxu1 %v1868_v38  ;;  %2151 = vmatpush.msra.mxu3 %v1870_v41 }
 0x55d   :  { %2092 = vmatmul.f32.vlgmr.msra.gmra.mxu0 %v1866_v42  ;;  %2112 = vmatmul.f32.vlgmr.msra.gmra.mxu1 %v1866_v42 }
 0x55e   :  { %2128 = vmatpush.msra.mxu2 %v1881_v43  ;;  %2152 = vmatmul.f32.vlgmr.msra.gmra.mxu3 %v1866_v42 }
 0x55f   :  { %2286 = vmatpush.msrb.mxu1 %v2249_v46  ;;  %2266 = vmatpush.msrb.mxu0 %v2265_v16  ;;  %v2254_v16 = vld [vmem:[#allocation23 + $0x20] sm:$0xff] }
 0x560   :  { %2129 = vmatpush.msra.mxu2 %v1877_v47 }
 0x561   :  { %2287 = vmatpush.msrb.mxu1 %v2248_v13  ;;  %2267 = vmatpush.msrb.mxu0 %v2264_v22 }
 0x562   :  { %2130 = vmatpush.msra.mxu2 %v1873_v0  ;;  %v2260_v0 = vld [vmem:[#allocation23 + $0x50] sm:$0xff] }
 0x563   :  { %2288 = vmatpush.msrb.mxu1 %v2247_v61  ;;  %2268 = vmatpush.msrb.mxu0 %v2263_v18  ;;  %v2251_v18 = vld [vmem:[#allocation23 + $0x8] sm:$0xff] }
 0x564   :  { %2131 = vmatpush.msra.mxu2 %v1869_v40 }
 0x565   :  { %2132 = vmatmul.f32.vlgmr.msra.gmra.mxu2 %v1866_v42  ;;  %2289 = vmatpush.msrb.mxu1 %v2246_v20 }
 0x566   :  { %2269 = vmatpush.msrb.mxu0 %v2262_v30 }
 0x567   :  { %2290 = vmatpush.msrb.mxu1 %v2245_v39 }
 0x568   :  { %2270 = vmatpush.msrb.mxu0 %v2261_v37 }
 0x569   :  { %2291 = vmatpush.msrb.mxu1 %v2244_v50  ;;  %v3992_v50 = vld [vmem:[#allocation16] sm:$0xf] }
 0x56a   :  { %2271 = vmatpush.msrb.mxu0 %v2260_v0 }
 0x56b   :  { %2292 = vmatpush.msrb.mxu1 %v2243_v63  ;;  %v2259_v63 = vld [vmem:[#allocation23 + $0x48] sm:$0xff] }
 0x56c   :  { %2272 = vmatpush.msrb.mxu0 %v2259_v63 }
 0x56d   :  { %2293 = vmatpush.msrb.mxu1 %v2242_v49 }
 0x56f   :  { %2294 = vmatpush.msrb.mxu1 %v2241_v45 }
 0x571   :  { %2295 = vmatpush.msrb.mxu1 %v2240_v57 }
 0x573   :  { %2296 = vmatpush.msrb.mxu1 %v2239_v59  ;;  %v2257_v59 = vld [vmem:[#allocation23 + $0x38] sm:$0xff] }
 0x575   :  { %2297 = vmatpush.msrb.mxu1 %v2238_v62 }
 0x577   :  { %2298 = vmatpush.msrb.mxu1 %v2237_v9 }
 0x579   :  { %2299 = vmatpush.msrb.mxu1 %v2236_v1 }
 0x57b   :  { %2300 = vmatpush.msrb.mxu1 %v2235_v4 }
 0x57d   :  { %2301 = vmatpush.msrb.mxu1 %v2234_v7 }
 0x5b8   :  { %v1725_v44 = vpop.f32.mrf.mxu0  ;;  %v1745_v52 = vpop.f32.mrf.mxu1 }
 0x5b9   :  { %v1788_v56 = vadd.f32 %v1725_v44, %v4324_v51  ;;  %v1789_v48 = vadd.f32 %v1745_v52, %v4325_v26  ;;  %v2158_v26 = vperm.slane %v3992_v50, 0 }
 0x5bb   :  { %v2374_v58 = vmul.f32 -1.442695, %v1788_v56  ;;  %v2375_v54 = vmul.f32 -1.442695, %v1789_v48  ;;  %v2258_v56 = vld [vmem:[#allocation23 + $0x40] sm:$0xff]  ;;  %v2159_v48 = vperm.slane %v3992_v50, 1 }
 0x5bc   :  { %2273 = vmatpush.msrb.mxu0 %v2258_v56  ;;  %v2228_v56 = vld [vmem:[#allocation20] sm:$0xff] }
 0x5bd   :  { %2510 = vpow2.f32 %v2374_v58 }
 0x5be   :  { %2512 = vpow2.f32 %v2375_v54  ;;  %2274 = vmatpush.msrb.mxu0 %v2257_v59 }
 0x5bf   :  { %v1785_v55 = vpop.f32.mrf.mxu3  ;;  %v1765_v11 = vpop.f32.mrf.mxu2 }
 0x5c0   :  { %v1791_v28 = vadd.f32 %v1785_v55, %v4326_v60  ;;  %v1790_v25 = vadd.f32 %v1765_v11, %v4327_v5  ;;  %v2161_v11 = vperm.slane %v3992_v50, 3 }
 0x5c2   :  { %v2376_v12 = vmul.f32 -1.442695, %v1791_v28  ;;  %v2256_v28 = vld [vmem:[#allocation23 + $0x30] sm:$0xff] }
 0x5c3   :  { %v2511_v2 = vpop.eup %2510  ;;  %2275 = vmatpush.msrb.mxu0 %v2256_v28 }
 0x5c4   :  { %v2513_v3 = vpop.eup %2512  ;;  %v1795_v24 = vadd.f32 1.0, %v2511_v2  ;;  %2514 = vpow2.f32 %v2376_v12 }
 0x5c5   :  { %v1814_v15 = vadd.f32 1.0, %v2513_v3  ;;  %v2255_v3 = vld [vmem:[#allocation23 + $0x28] sm:$0xff] }
 0x5c6   :  { %2516 = vrcp.f32 %v1795_v24  ;;  %v1807_v8 = vand.u32 2147483648, %v1795_v24  ;;  %v1805_v34 = vand.u32 2147483647, %v1795_v24  ;;  %vm1801_vm6 = vweird.f32 %v1795_v24  ;;  %2276 = vmatpush.msrb.mxu0 %v2255_v3 }
 0x5c7   :  { %2518 = vrcp.f32 %v1814_v15  ;;  %v1826_v31 = vand.u32 2147483648, %v1814_v15  ;;  %v1824_v36 = vand.u32 2147483647, %v1814_v15  ;;  %vm1820_vm7 = vweird.f32 %v1814_v15 }
 0x5c8   :  { %v1808_v42 = vor.u32 1.1754944e-38, %v1807_v8  ;;  %vm1806_vm10 = vcmp.eq.f32.partialorder %v1805_v34, 8.507059e+37  ;;  %2277 = vmatpush.msrb.mxu0 %v2254_v16  ;;  %v2160_v34 = vperm.slane %v3992_v50, 2 }
 0x5c9   :  { %v1827_v40 = vor.u32 1.1754944e-38, %v1826_v31  ;;  %vm1825_vm11 = vcmp.eq.f32.partialorder %v1824_v36, 8.507059e+37 }
 0x5ca   :  { %v2515_v21 = vpop.eup %2514 }
 0x5cb   :  { %v3984_v17 = vadd.f32 1.0, %v2515_v21  ;;  %v2013_v53 = vpop.f32.mrf.mxu0 }
 0x5cc   :  { %v2517_v23 = vpop.eup %2516 }
 0x5cd   :  { %v2519_v10 = vpop.eup %2518  ;;  %v1797_v19 = vmul.f32 %v2517_v23, %v1795_v24  ;;  %2520 = vrcp.f32 %v3984_v17  ;;  %v2033_v29 = vpop.f32.mrf.mxu1  ;;  %vm1802_vm4 = vweird.f32 %v2517_v23  ;;  %vm1840_vm13 = vweird.f32 %v3984_v17 }
 0x5ce   :  { %v1816_v14 = vmul.f32 %v2519_v10, %v1814_v15  ;;  %2522 = vtanh.f32 %v1790_v25  ;;  %vm1821_vm5 = vweird.f32 %v2519_v10  ;;  %vm1803_vm8 = vmor %vm1801_vm6, %vm1802_vm4  ;;  %v1844_v1 = vand.u32 2147483647, %v3984_v17 }
 0x5cf   :  { %v1798_v27 = vsub.f32 1.0, %v1797_v19  ;;  %vm1822_vm9 = vmor %vm1820_vm7, %vm1821_vm5 }
 0x5d0   :  { %v1817_v6 = vsub.f32 1.0, %v1816_v14  ;;  %vm1845_vm15 = vcmp.eq.f32.partialorder %v1844_v1, 8.507059e+37 }
 0x5d1   :  { %v1799_v32 = vmul.f32 %v2517_v23, %v1798_v27 }
 0x5d2   :  { %v1818_v35 = vmul.f32 %v2519_v10, %v1817_v6  ;;  %v2250_v6 = vld [vmem:[#allocation23] sm:$0xff] }
 0x5d3   :  { %v3988_v38 = vpop.eup %2520  ;;  %v1800_v41 = vadd.f32 %v2517_v23, %v1799_v32 }
 0x5d4   :  { %v1819_v43 = vadd.f32 %v2519_v10, %v1818_v35  ;;  %v1836_v47 = vmul.f32 %v3988_v38, %v3984_v17  ;;  %v2523_v13 = vpop.eup %2522  ;;  %vm1841_vm12 = vweird.f32 %v3988_v38 }
 0x5d5   :  { %v1804_v46 = vsel %vm1803_vm8, %v2517_v23, %v1800_v41  ;;  %vm4003_vm14 = vmor %vm1840_vm13, %vm1841_vm12  ;;  %v2253_v23 = vld [vmem:[#allocation23 + $0x18] sm:$0xff] }
 0x5d6   :  { %v1809_v61 = vsel %vm1806_vm10, %v1808_v42, %v1804_v46  ;;  %v1823_v20 = vsel %vm1822_vm9, %v2519_v10, %v1819_v43  ;;  %v1837_v39 = vsub.f32 1.0, %v1836_v47  ;;  %v2252_v10 = vld [vmem:[#allocation23 + $0x10] sm:$0xff]  ;;  %2278 = vmatpush.msrb.mxu0 %v2253_v23 }
 0x5d7   :  { %v1828_v49 = vsel %vm1825_vm11, %v1827_v40, %v1823_v20  ;;  %v1851_v44 = vmul.f32 %v2523_v13, %v1809_v61 }
 0x5d8   :  { %v1850_v52 = vmul.f32 %v1828_v49, %v3975_v33  ;;  %v2073_v45 = vpop.f32.mrf.mxu3  ;;  %v1838_v51 = vmul.f32 %v3988_v38, %v1837_v39  ;;  %v1846_v33 = vand.u32 2147483648, %v3984_v17  ;;  %2279 = vmatpush.msrb.mxu0 %v2252_v10 }
 0x5da   :  { %v1852_v57 = vadd.f32 %v1851_v44, %v1850_v52  ;;  %v2093_v58 = vpop.f32.mrf.mxu0  ;;  %v2113_v54 = vpop.f32.mrf.mxu1  ;;  %v1839_v60 = vadd.f32 %v3988_v38, %v1838_v51  ;;  %v1847_v21 = vor.u32 1.1754944e-38, %v1846_v33  ;;  %2280 = vmatpush.msrb.mxu0 %v2251_v18 }
 0x5db   :  { %v2094_v62 = vadd.f32 %v2093_v58, %v2013_v53  ;;  %v2114_v55 = vadd.f32 %v2113_v54, %v2033_v29 }
 0x5dc   :  { %2524 = vtanh.f32 %v1852_v57  ;;  %v1843_v7 = vsel %vm4003_vm14, %v3988_v38, %v1839_v60  ;;  %2281 = vmatpush.msrb.mxu0 %v2250_v6 }
 0x5dd   :  { %v2166_v9 = vadd.f32 %v2158_v26, %v2094_v62  ;;  %v2167_v12 = vadd.f32 %v2159_v48, %v2114_v55  ;;  %v1848_v22 = vsel %vm1845_vm15, %v1847_v21, %v1843_v7 }
 0x5de   :  { %v2053_v15 = vpop.f32.mrf.mxu2 }
 0x5df   :  { %v2377_v24 = vmul.f32 -1.442695, %v2166_v9  ;;  %v2378_v4 = vmul.f32 -1.442695, %v2167_v12 }
 0x5e1   :  { %2526 = vpow2.f32 %v2377_v24  ;;  %v2153_v17 = vpop.f32.mrf.mxu3 }
 0x5e2   :  { %v2525_v5 = vpop.eup %2524  ;;  %2528 = vpow2.f32 %v2378_v4  ;;  %v2154_v25 = vadd.f32 %v2153_v17, %v2073_v45  ;;  %v2397_v4 = vld [vmem:[%s4031_s13] ss:$0 sm:$0xff]  ;;  %s2330_s13 = sshll.u32 %s4032_s14, 4  ;;  %s2331_s13 = int_to_ptr.hbm [resolvable:$true] %s2330_s13 }
 0x5e3   :  { %v1854_v19 = vmul.f32 %v2525_v5, %v1848_v22 }
 0x5e4   :  { %v2169_v14 = vadd.f32 %v2161_v11, %v2154_v25 }
 0x5e5   :  { %2302 = vmatmul.f32.vlgmr.msrb.gmra.mxu1 %v1854_v19 }
 0x5e6   :  { %v2379_v27 = vmul.f32 -1.442695, %v2169_v14 }
 0x5e7   :  { %v2527_v8 = vpop.eup %2526 }
 0x5e8   :  { %v2529_v53 = vpop.eup %2528  ;;  %v2173_v29 = vadd.f32 1.0, %v2527_v8  ;;  %2530 = vpow2.f32 %v2379_v27  ;;  %v2133_v31 = vpop.f32.mrf.mxu2 }
 0x5e9   :  { %v2192_v30 = vadd.f32 1.0, %v2529_v53  ;;  %v2134_v32 = vadd.f32 %v2133_v31, %v2053_v15 }
 0x5ea   :  { %2532 = vrcp.f32 %v2173_v29  ;;  %v2185_v40 = vand.u32 2147483648, %v2173_v29  ;;  %v2183_v61 = vand.u32 2147483647, %v2173_v29  ;;  %vm2179_vm2 = vweird.f32 %v2173_v29 }
 0x5eb   :  { %2534 = vrcp.f32 %v2192_v30  ;;  %v2168_v38 = vadd.f32 %v2160_v34, %v2134_v32  ;;  %v2204_v46 = vand.u32 2147483648, %v2192_v30  ;;  %v2202_v39 = vand.u32 2147483647, %v2192_v30 }
 0x5ec   :  { %vm2198_vm3 = vweird.f32 %v2192_v30  ;;  %v2186_v44 = vor.u32 1.1754944e-38, %v2185_v40  ;;  %vm2184_vm6 = vcmp.eq.f32.partialorder %v2183_v61, 8.507059e+37 }
 0x5ed   :  { %v2205_v45 = vor.u32 1.1754944e-38, %v2204_v46  ;;  %vm2203_vm7 = vcmp.eq.f32.partialorder %v2202_v39, 8.507059e+37 }
 0x5ee   :  { %v2531_v35 = vpop.eup %2530 }
 0x5ef   :  { %v2212_v36 = vadd.f32 1.0, %v2531_v35 }
 0x5f0   :  { %v2533_v37 = vpop.eup %2532 }
 0x5f1   :  { %v2535_v41 = vpop.eup %2534  ;;  %v2175_v42 = vmul.f32 %v2533_v37, %v2173_v29  ;;  %2536 = vrcp.f32 %v2212_v36  ;;  %vm2180_vm0 = vweird.f32 %v2533_v37  ;;  %v2224_v28 = vand.u32 2147483648, %v2212_v36 }
 0x5f2   :  { %v2194_v43 = vmul.f32 %v2535_v41, %v2192_v30  ;;  %2538 = vtanh.f32 %v2168_v38  ;;  %vm2199_vm1 = vweird.f32 %v2535_v41  ;;  %vm2181_vm4 = vmor %vm2179_vm2, %vm2180_vm0  ;;  %vm2218_vm9 = vweird.f32 %v2212_v36 }
 0x5f3   :  { %v2176_v47 = vsub.f32 1.0, %v2175_v42  ;;  %vm2200_vm5 = vmor %vm2198_vm3, %vm2199_vm1  ;;  %v2222_v9 = vand.u32 2147483647, %v2212_v36  ;;  %v2225_v1 = vor.u32 1.1754944e-38, %v2224_v28 }
 0x5f4   :  { %v2195_v0 = vsub.f32 1.0, %v2194_v43 }
 0x5f5   :  { %v2177_v13 = vmul.f32 %v2533_v37, %v2176_v47  ;;  %vm2223_vm11 = vcmp.eq.f32.partialorder %v2222_v9, 8.507059e+37 }
 0x5f6   :  { %v2196_v20 = vmul.f32 %v2535_v41, %v2195_v0 }
 0x5f7   :  { %v2537_v50 = vpop.eup %2536  ;;  %v2178_v63 = vadd.f32 %v2533_v37, %v2177_v13 }
 0x5f8   :  { %v2214_v49 = vmul.f32 %v2537_v50, %v2212_v36  ;;  %v2197_v52 = vadd.f32 %v2535_v41, %v2196_v20  ;;  %v2539_v26 = vpop.eup %2538  ;;  %vm2219_vm8 = vweird.f32 %v2537_v50 }
 0x5f9   :  { %v2182_v51 = vsel %vm2181_vm4, %v2533_v37, %v2178_v63  ;;  %vm2220_vm10 = vmor %vm2218_vm9, %vm2219_vm8 }
 0x5fa   :  { %v2215_v48 = vsub.f32 1.0, %v2214_v49  ;;  %v2187_v57 = vsel %vm2184_vm6, %v2186_v44, %v2182_v51  ;;  %v2201_v58 = vsel %vm2200_vm5, %v2535_v41, %v2197_v52 }
 0x5fb   :  { %v2206_v54 = vsel %vm2203_vm7, %v2205_v45, %v2201_v58  ;;  %v2230_v59 = vmul.f32 %v2539_v26, %v2187_v57 }
 0x5fc   :  { %v2229_v62 = vmul.f32 %v2228_v56, %v2206_v54  ;;  %v2216_v55 = vmul.f32 %v2537_v50, %v2215_v48 }
 0x5fe   :  { %v2231_v60 = vadd.f32 %v2230_v59, %v2229_v62  ;;  %v2217_v33 = vadd.f32 %v2537_v50, %v2216_v55 }
 0x600   :  { %2540 = vtanh.f32 %v2231_v60  ;;  %v2221_v12 = vsel %vm2220_vm10, %v2537_v50, %v2217_v33 }
 0x601   :  { %v2226_v3 = vsel %vm2223_vm11, %v2225_v1, %v2221_v12 }
 0x606   :  { %v2541_v2 = vpop.eup %2540 }
 0x607   :  { %v2233_v24 = vmul.f32 %v2541_v2, %v2226_v3 }
 0x609   :  { %2282 = vmatmul.f32.vlgmr.msrb.gmra.mxu0 %v2233_v24 }
 0x662   :  { %v2303_v15 = vpop.f32.mrf.mxu1 }
 0x686   :  { %v2283_v7 = vpop.f32.mrf.mxu0 }
 0x687   :  { %v2304_v11 = vadd.f32 %v2303_v15, %v2283_v7 }
 0x689   :  { %v2310_v21 = vadd.f32 %v2397_v4, %v2304_v11 }
 0x68b   :  { %2311 = vmax.xlane.f32.xlu0 %v2310_v21 }
 0x6fe   :  { %v2312_v16 = vpop.xlane.xlu0 %2311 }
 0x6ff   :  { %v2313_v23 = vsub.f32 %v2310_v21, %v2312_v16 }
 0x701   :  { %v2314_v17 = vmul.f32 1.442695, %v2313_v23 }
 0x703   :  { %2542 = vpow2.f32 %v2314_v17 }
 0x709   :  { %v2543_v5 = vpop.eup %2542 }
 0x70a   :  { %2316 = vadd.xlane.f32.xlu0 %v2543_v5 }
 0x77d   :  { %v2317_v25 = vpop.xlane.xlu0 %2316 }
 0x77e   :  { %2544 = vlog2.f32 %v2317_v25 }
 0x784   :  { %v2545_v22 = vpop.eup %2544 }
 0x785   :  { %v2319_v10 = vmul.f32 0.6931472, %v2545_v22 }
 0x787   :  { %v2320_v19 = vadd.f32 %v2319_v10, %v2312_v16 }
 0x789   :  { %v2321_v14 = vsub.f32 %v2310_v21, %v2320_v19 }
 0x78b   :  { %2322 = vst [vmem:[#allocation25] sm:$0xff] %v2321_v14 }
 0x78c   :  { %2333 = dma.vmem_to_hbm [thread:$0]  %s2329_s15, 128, %s2331_s13, [#allocation7]  }
 0x78d   :  { %2936 = dma.done.wait [#allocation7], 128  }
 0x78e   :  { %2937 = vsyncadd [#allocation7], 4294967168 }
 0x78f   :  { %2338 = vsyncpa [#allocation6], 1 }
 0x790   :  { %2339 = vsyncpa [#allocation9], 1 }
 0x791   :  { %2340 = vsyncpa [#allocation12], 1 }
 0x792   :  { %2341 = vsyncpa [#allocation15], 1 }
 0x793   :  { %2342 = vsyncpa [#allocation18], 1 }
 0x794   :  { %2343 = vsyncpa [#allocation21], 1 }
 0x795   :  { %2344 = vsyncpa [#allocation24], 1 }
 0x796   :  { %2345 = vsyncpa [#allocation7], 1 }

</bundles_post_ra>
